<compile_context>
chip_gen: v7x
topology: tpu7x:2x2x1
jax: 0.10.0
libtpu: 0.0.40
codegen_flags: <defaults>
</compile_context>

<pallas_src>
import functools

import numpy as np
import jax
import jax.numpy as jnp
from jax.experimental import pallas as pl
from jax.experimental.pallas import tpu as pltpu

BN_EPS = 1e-5
LANE = 128
PAD = 128          # lane padding on each side of the activation scratch (>= Wp+1)


def _round_up(x, m):
    return (x + m - 1) // m * m


# -----------------------------------------------------------------------------
# Static (numpy -> jaxpr constants) helpers.
# -----------------------------------------------------------------------------
def _interp_matrix_padded(in_size, out_size):
    """(out_size + 2, in_size) bilinear align_corners=True interpolation matrix,
    with an all-zero first/last row (the conv zero-padding row folded in)."""
    A = np.zeros((out_size + 2, in_size), np.float32)
    scale = (in_size - 1) / (out_size - 1) if out_size > 1 else 0.0
    for i in range(out_size):
        src = i * scale
        i0 = min(int(np.floor(src)), in_size - 1)
        i1 = min(i0 + 1, in_size - 1)
        f = src - i0
        A[i + 1, i0] += 1.0 - f
        A[i + 1, i1] += f
    return A


def _interior_mask_flat(n, hp, wp, hi, wi, mp):
    m = np.zeros((hp, wp), np.float32)
    m[1:1 + hi, 1:1 + wi] = 1.0
    flat = np.tile(m.reshape(-1), n)
    out = np.zeros((1, mp), np.float32)
    out[0, :flat.size] = flat
    return out


# -----------------------------------------------------------------------------
# Fused kernel: 1x1 ConvLayer + 3x3 ConvLayer + 3x3 ConvLayer, all in VMEM.
# Activations are (C, Mp): channels on sublanes, flat padded pixels on lanes.
# -----------------------------------------------------------------------------
def _up_fused_kernel(x_ref, mask_ref,
                     w1_ref, p1_ref, w2_ref, p2_ref, w3_ref, p3_ref,
                     out_ref, hpad_ref, stack_ref,
                     *, wp, c2, c3, inv_count, eps):
    mp = out_ref.shape[1]
    mask = mask_ref[...]                        # (1, Mp), 1.0 at interior pixels

    # Scratch init: the PAD bands of hpad must be exact zeros (they are read by the
    # shifted im2col loads); unused stack rows must at least be finite (x0 weights).
    hpad_ref[...] = jnp.zeros_like(hpad_ref)
    stack_ref[...] = jnp.zeros_like(stack_ref)

    def bn_prelu(y, prm_ref, apply_mask):
        # Training-mode BatchNorm over interior pixels (masked, two-pass variance),
        # then PReLU, then (optionally) re-zero the padding columns so the next
        # 3x3 conv sees zero padding.
        prm = prm_ref[...]                      # (Cout, 3) = [gamma, beta, alpha]
        gamma, beta, alpha = prm[:, 0:1], prm[:, 1:2], prm[:, 2:3]
        mean = jnp.sum(y * mask, axis=1, keepdims=True) * inv_count
        d = y - mean
        dm = d * mask
        var = jnp.maximum(jnp.sum(dm * dm, axis=1, keepdims=True) * inv_count, 0.0)
        scale = gamma * jax.lax.rsqrt(var + eps)
        z = d * scale + beta
        z = jnp.where(z >= 0.0, z, alpha * z)
        return z * mask if apply_mask else z

    def conv3x3(cin, w_ref):
        # im2col: 9 statically shifted (unaligned lane-slice) views of the
        # lane-padded activation, stacked on sublanes, then ONE matmul.
        g = _round_up(cin, 8)                   # sublane-aligned group stride
        for kh in range(3):
            for kw in range(3):
                k = kh * 3 + kw
                s = (kh - 1) * wp + (kw - 1)    # flat offset of this tap
                stack_ref[k * g:k * g + cin, :] = hpad_ref[:cin, PAD + s:PAD + s + mp]
        return jnp.dot(w_ref[...], stack_ref[:9 * g, :],
                       preferred_element_type=jnp.float32)

    # Layer 1: 1x1 conv (up[1]):            C1 -> C2
    h = bn_prelu(jnp.dot(w1_ref[...], x_ref[...], preferred_element_type=jnp.float32),
                 p1_ref, True)
    hpad_ref[:c2, PAD:PAD + mp] = h
    # Layer 2: 3x3 conv (doubleconv[0]):    C2 -> C3
    h = bn_prelu(conv3x3(c2, w2_ref), p2_ref, True)
    hpad_ref[:c3, PAD:PAD + mp] = h
    # Layer 3: 3x3 conv (doubleconv[1]):    C3 -> C3  (no re-zero: wrapper slices)
    out_ref[...] = bn_prelu(conv3x3(c3, w3_ref), p3_ref, False)


# -----------------------------------------------------------------------------
# Plain-JAX glue: NCHW-native concat + separable upsample, layout prep, kernel call.
# -----------------------------------------------------------------------------
def up_forward(x0, x1, x2, params):
    """Up.forward: inputs/outputs NCHW (PyTorch convention)."""
    return _up_forward_jit(x0, x1, x2, params)


@jax.jit
def _up_forward_jit(x0, x1, x2, params):
    N, C, H, W = x0.shape
    C1, C2, C3 = 3 * C, (3 * C) // 2, C // 2
    Hi, Wi = 2 * H, 2 * W
    Hp, Wp = Hi + 2, Wi + 2
    m_valid = N * Hp * Wp
    Mp = _round_up(m_valid, LANE)
    g2, g3 = _round_up(C2, 8), _round_up(C3, 8)

    # concat + separable bilinear 2x upsample (align_corners=True), NCHW native.
    # Zero-padding is folded into the static interpolation matrices; the only
    # transpose is the leading-axis one on the small pre-upsample tensor.
    ah = jnp.asarray(_interp_matrix_padded(H, Hi))           # (Hp, H)
    awt = jnp.asarray(_interp_matrix_padded(W, Wi).T)        # (W, Wp)
    x = jnp.concatenate([x0, x1, x2], axis=1)                # (N, C1, H, W)
    x = jnp.transpose(x, (1, 0, 2, 3))                       # (C1, N, H, W)
    x = jnp.einsum('ph,cnhw->cnpw', ah, x)                   # (C1, N, Hp, W)
    x = jnp.einsum('cnpw,wq->cnpq', x, awt)                  # (C1, N, Hp, Wp)
    xf = jnp.pad(x.reshape(C1, m_valid), ((0, 0), (0, Mp - m_valid)))

    mask = jnp.asarray(_interior_mask_flat(N, Hp, Wp, Hi, Wi, Mp))   # (1, Mp)

    # weights: 1x1 conv as (C2, C1); 3x3 convs as (Cout, 9*ceil8(Cin)) matching the
    # sublane-aligned im2col stack.  Conv bias is dropped (cancels under train BN).
    def tap_weights(w, g):
        cout, cin = w.shape[0], w.shape[1]
        t = jnp.transpose(w, (0, 2, 3, 1)).reshape(cout, 9, cin)
        t = jnp.pad(t, ((0, 0), (0, 0), (0, g - cin)))
        return t.reshape(cout, 9 * g)

    def pack_bn_prelu(p, cout):                               # -> (cout, 3)
        gamma = jnp.asarray(p["gamma"], jnp.float32).reshape(cout)
        beta = jnp.asarray(p["beta"], jnp.float32).reshape(cout)
        alpha = jnp.broadcast_to(jnp.asarray(p["alpha"], jnp.float32).reshape(-1),
                                 (cout,))
        return jnp.stack([gamma, beta, alpha], axis=1)

    p1, p2, p3 = params["up_conv"], params["dc1"], params["dc2"]
    w1 = p1["w"].reshape(C2, C1)
    w2 = tap_weights(p2["w"], g2)
    w3 = tap_weights(p3["w"], g3)

    kernel = functools.partial(_up_fused_kernel, wp=Wp, c2=C2, c3=C3,
                               inv_count=1.0 / float(N * Hi * Wi), eps=BN_EPS)

    def full(shape):
        return pl.BlockSpec(shape, lambda i, _s=shape: (0,) * len(_s))

    out_flat = pl.pallas_call(
        kernel,
        out_shape=jax.ShapeDtypeStruct((C3, Mp), jnp.float32),
        grid_spec=pltpu.PrefetchScalarGridSpec(
            num_scalar_prefetch=0,
            grid=(1,),
            in_specs=[
                full((C1, Mp)), full((1, Mp)),
                full((C2, C1)), full((C2, 3)),
                full((C3, 9 * g2)), full((C3, 3)),
                full((C3, 9 * g3)), full((C3, 3)),
            ],
            out_specs=full((C3, Mp)),
            scratch_shapes=[
                pltpu.VMEM((C2, Mp + 2 * PAD), jnp.float32),  # lane-padded activation
                pltpu.VMEM((9 * g2, Mp), jnp.float32),        # im2col tap stack
            ],
        ),
        compiler_params=pltpu.CompilerParams(dimension_semantics=("arbitrary",)),
    )(xf, mask,
      w1, pack_bn_prelu(p1, C2),
      w2, pack_bn_prelu(p2, C3),
      w3, pack_bn_prelu(p3, C3))

    out = out_flat[:, :m_valid].reshape(C3, N, Hp, Wp)[:, :, 1:1 + Hi, 1:1 + Wi]
    return jnp.transpose(out, (1, 0, 2, 3))                   # -> NCHW


# -----------------------------------------------------------------------------
# Deterministic parameter initialization (shapes per Up.__init__).
# -----------------------------------------------------------------------------
def _conv_layer_params(key, cin, cout, k):
    k1, k2, k3, k4 = jax.random.split(key, 4)
    fan_in = cin * k * k
    return dict(
        w=jax.random.normal(k1, (cout, cin, k, k), jnp.float32) / jnp.sqrt(float(fan_in)),
        b=0.1 * jax.random.normal(k2, (cout,), jnp.float32),  # cancels under train BN
        gamma=1.0 + 0.1 * jax.random.normal(k3, (cout,), jnp.float32),
        beta=0.1 * jax.random.normal(k4, (cout,), jnp.float32),
        alpha=jnp.float32(0.25),                              # nn.PReLU() default slope
    )


def init_up_params(key, in_channels):
    c3 = 3 * in_channels
    k1, k2, k3 = jax.random.split(key, 3)
    return dict(
        up_conv=_conv_layer_params(k1, c3, c3 // 2, 1),
        dc1=_conv_layer_params(k2, c3 // 2, in_channels // 2, 3),
        dc2=_conv_layer_params(k3, in_channels // 2, in_channels // 2, 3),
    )


# -----------------------------------------------------------------------------
# Pure-JAX reference (independent gather-based upsample + lax.conv) for checking.
# -----------------------------------------------------------------------------
def _ref_upsample_2x_align_corners_nchw(x):
    N, C, H, W = x.shape
    Ho, Wo = 2 * H, 2 * W

    def coords(in_size, out_size):
        src = jnp.arange(out_size, dtype=jnp.float32) * (in_size - 1) / (out_size - 1)
        i0 = jnp.clip(jnp.floor(src).astype(jnp.int32), 0, in_size - 1)
        i1 = jnp.clip(i0 + 1, 0, in_size - 1)
        return i0, i1, src - i0.astype(jnp.float32)

    h0, h1, hf = coords(H, Ho)
    w0, w1, wf = coords(W, Wo)
    xh = (x[:, :, h0, :] * (1.0 - hf)[None, None, :, None]
          + x[:, :, h1, :] * hf[None, None, :, None])
    return (xh[:, :, :, w0] * (1.0 - wf)[None, None, None, :]
            + xh[:, :, :, w1] * wf[None, None, None, :])


def _ref_convlayer(x, p, padding):
    y = jax.lax.conv_general_dilated(
        x, p["w"], window_strides=(1, 1), padding=[(padding, padding)] * 2,
        dimension_numbers=("NCHW", "OIHW", "NCHW"))
    y = y + p["b"][None, :, None, None]
    mean = jnp.mean(y, axis=(0, 2, 3), keepdims=True)
    var = jnp.mean(jnp.square(y - mean), axis=(0, 2, 3), keepdims=True)
    y = (y - mean) * jax.lax.rsqrt(var + BN_EPS)
    y = y * p["gamma"][None, :, None, None] + p["beta"][None, :, None, None]
    return jnp.where(y >= 0, y, p["alpha"] * y)


def up_forward_reference(x0, x1, x2, params):
    x = jnp.concatenate([x0, x1, x2], axis=1)
    x = _ref_upsample_2x_align_corners_nchw(x)
    x = _ref_convlayer(x, params["up_conv"], 0)
    x = _ref_convlayer(x, params["dc1"], 1)
    x = _ref_convlayer(x, params["dc2"], 1)
    return x


if __name__ == "__main__":
    key = jax.random.PRNGKey(0)
    kp, kx0, kx1, kx2 = jax.random.split(key, 4)

    N, C, H, W = 2, 4, 16, 16                                 # in_channels = 4
    params = init_up_params(kp, C)
    x0 = jax.random.normal(kx0, (N, C, H, W), jnp.float32)
    x1 = jax.random.normal(kx1, (N, C, H, W), jnp.float32)
    x2 = jax.random.normal(kx2, (N, C, H, W), jnp.float32)

    out = up_forward(x0, x1, x2, params)                      # expected (2, 2, 32, 32)
    jax.block_until_ready(out)
    assert out.shape == (N, C // 2, 2 * H, 2 * W), out.shape

    ref = up_forward_reference(x0, x1, x2, params)
    err = float(jnp.max(jnp.abs(out - ref)))
    assert err < 2e-2, f"kernel/reference mismatch: max abs err = {err}"

    print("KERNEL_OK")
</pallas_src>

<mosaic_0001>
module attributes {stable_mosaic.version = 11 : i64} {
  func.func @_up_fused_kernel(%arg0: i32, %arg1: memref<12x2432xf32, #tpu.memory_space<vmem>>, %arg2: memref<1x2432xf32, #tpu.memory_space<vmem>>, %arg3: memref<6x12xf32, #tpu.memory_space<vmem>>, %arg4: memref<6x3xf32, #tpu.memory_space<vmem>>, %arg5: memref<2x72xf32, #tpu.memory_space<vmem>>, %arg6: memref<2x3xf32, #tpu.memory_space<vmem>>, %arg7: memref<2x72xf32, #tpu.memory_space<vmem>>, %arg8: memref<2x3xf32, #tpu.memory_space<vmem>>, %arg9: memref<2x2432xf32, #tpu.memory_space<vmem>>, %arg10: memref<6x2688xf32, #tpu.memory_space<vmem>>, %arg11: memref<72x2432xf32, #tpu.memory_space<vmem>>) attributes {dimension_semantics = [#tpu.dimension_semantics<arbitrary>], iteration_bounds = array<i64: 1>, scalar_prefetch = 0 : i64, scratch_operands = 2 : i64, tpu.core_type = #tpu.core_type<tc>, window_params = [{pipeline_mode = #tpu.pipeline_mode<synchronous>, transform_indices = @transform_0, window_bounds = array<i64: 12, 2432>}, {pipeline_mode = #tpu.pipeline_mode<synchronous>, transform_indices = @transform_1, window_bounds = array<i64: 1, 2432>}, {pipeline_mode = #tpu.pipeline_mode<synchronous>, transform_indices = @transform_2, window_bounds = array<i64: 6, 12>}, {pipeline_mode = #tpu.pipeline_mode<synchronous>, transform_indices = @transform_3, window_bounds = array<i64: 6, 3>}, {pipeline_mode = #tpu.pipeline_mode<synchronous>, transform_indices = @transform_4, window_bounds = array<i64: 2, 72>}, {pipeline_mode = #tpu.pipeline_mode<synchronous>, transform_indices = @transform_5, window_bounds = array<i64: 2, 3>}, {pipeline_mode = #tpu.pipeline_mode<synchronous>, transform_indices = @transform_6, window_bounds = array<i64: 2, 72>}, {pipeline_mode = #tpu.pipeline_mode<synchronous>, transform_indices = @transform_7, window_bounds = array<i64: 2, 3>}, {pipeline_mode = #tpu.pipeline_mode<synchronous>, transform_indices = @transform_8, window_bounds = array<i64: 2, 2432>}]} {
    %c0 = arith.constant 0 : index
    %c0_0 = arith.constant 0 : index
    %0 = vector.load %arg2[%c0, %c0_0] : memref<1x2432xf32, #tpu.memory_space<vmem>>, vector<1x2432xf32>
    %cst = arith.constant 0.000000e+00 : f32
    %1 = vector.broadcast %cst : f32 to vector<6x2688xf32>
    %c0_1 = arith.constant 0 : index
    %c0_2 = arith.constant 0 : index
    %2 = vector.load %arg10[%c0_1, %c0_2] : memref<6x2688xf32, #tpu.memory_space<vmem>>, vector<6x2688xf32>
    tpu.vector_store %arg10[%c0_1, %c0_2], %1 {strides = array<i32>} : memref<6x2688xf32, #tpu.memory_space<vmem>>, vector<6x2688xf32>,
    %cst_3 = arith.constant 0.000000e+00 : f32
    %3 = vector.broadcast %cst_3 : f32 to vector<72x2432xf32>
    %c0_4 = arith.constant 0 : index
    %c0_5 = arith.constant 0 : index
    %4 = vector.load %arg11[%c0_4, %c0_5] : memref<72x2432xf32, #tpu.memory_space<vmem>>, vector<72x2432xf32>
    tpu.vector_store %arg11[%c0_4, %c0_5], %3 {strides = array<i32>} : memref<72x2432xf32, #tpu.memory_space<vmem>>, vector<72x2432xf32>,
    %c0_6 = arith.constant 0 : index
    %c0_7 = arith.constant 0 : index
    %5 = vector.load %arg3[%c0_6, %c0_7] : memref<6x12xf32, #tpu.memory_space<vmem>>, vector<6x12xf32>
    %c0_8 = arith.constant 0 : index
    %c0_9 = arith.constant 0 : index
    %6 = vector.load %arg1[%c0_8, %c0_9] : memref<12x2432xf32, #tpu.memory_space<vmem>>, vector<12x2432xf32>
    %cst_10 = arith.constant dense<0.000000e+00> : vector<6x2432xf32>
    %7 = tpu.matmul %5, %6, %cst_10 {dimension_numbers = #tpu.dot_dimension_numbers<[1], [0], [0], [1], [0, 0, 1, 1], [], []>} : vector<6x12xf32>, vector<12x2432xf32>, vector<6x2432xf32> -> vector<6x2432xf32>
    %c0_11 = arith.constant 0 : index
    %c0_12 = arith.constant 0 : index
    %8 = vector.load %arg4[%c0_11, %c0_12] : memref<6x3xf32, #tpu.memory_space<vmem>>, vector<6x3xf32>
    %9 = vector.extract_strided_slice %8 {offsets = [0, 0], sizes = [6, 1], strides = [1, 1]} : vector<6x3xf32> to vector<6x1xf32>
    %10 = vector.extract_strided_slice %8 {offsets = [0, 1], sizes = [6, 1], strides = [1, 1]} : vector<6x3xf32> to vector<6x1xf32>
    %11 = vector.extract_strided_slice %8 {offsets = [0, 2], sizes = [6, 1], strides = [1, 1]} : vector<6x3xf32> to vector<6x1xf32>
    %12 = vector.broadcast %0 : vector<1x2432xf32> to vector<6x2432xf32>
    %13 = arith.mulf %7, %12 : vector<6x2432xf32>
    %cst_13 = arith.constant dense<0.000000e+00> : vector<6xf32>
    %14 = vector.multi_reduction <add>, %13, %cst_13 [1] : vector<6x2432xf32> to vector<6xf32>
    %15 = vector.shape_cast %14 : vector<6xf32> to vector<6x1xf32>
    %cst_14 = arith.constant 4.8828125E-4 : f32
    %16 = vector.broadcast %cst_14 : f32 to vector<6x1xf32>
    %17 = arith.mulf %15, %16 : vector<6x1xf32>
    %18 = vector.broadcast %17 : vector<6x1xf32> to vector<6x2432xf32>
    %19 = arith.subf %7, %18 : vector<6x2432xf32>
    %20 = vector.broadcast %0 : vector<1x2432xf32> to vector<6x2432xf32>
    %21 = arith.mulf %19, %20 : vector<6x2432xf32>
    %22 = arith.mulf %21, %21 : vector<6x2432xf32>
    %cst_15 = arith.constant dense<0.000000e+00> : vector<6xf32>
    %23 = vector.multi_reduction <add>, %22, %cst_15 [1] : vector<6x2432xf32> to vector<6xf32>
    %24 = vector.shape_cast %23 : vector<6xf32> to vector<6x1xf32>
    %cst_16 = arith.constant 4.8828125E-4 : f32
    %25 = vector.broadcast %cst_16 : f32 to vector<6x1xf32>
    %26 = arith.mulf %24, %25 : vector<6x1xf32>
    %cst_17 = arith.constant 0.000000e+00 : f32
    %27 = vector.broadcast %cst_17 : f32 to vector<6x1xf32>
    %28 = arith.maximumf %26, %27 : vector<6x1xf32>
    %cst_18 = arith.constant 9.99999974E-6 : f32
    %29 = vector.broadcast %cst_18 : f32 to vector<6x1xf32>
    %30 = arith.addf %28, %29 : vector<6x1xf32>
    %31 = math.rsqrt %30 : vector<6x1xf32>
    %32 = arith.mulf %9, %31 : vector<6x1xf32>
    %33 = vector.broadcast %32 : vector<6x1xf32> to vector<6x2432xf32>
    %34 = arith.mulf %19, %33 : vector<6x2432xf32>
    %35 = vector.broadcast %10 : vector<6x1xf32> to vector<6x2432xf32>
    %36 = arith.addf %34, %35 : vector<6x2432xf32>
    %cst_19 = arith.constant 0.000000e+00 : f32
    %37 = vector.broadcast %cst_19 : f32 to vector<6x2432xf32>
    %38 = arith.cmpf oge, %36, %37 : vector<6x2432xf32>
    %39 = vector.broadcast %11 : vector<6x1xf32> to vector<6x2432xf32>
    %40 = arith.mulf %39, %36 : vector<6x2432xf32>
    %41 = arith.select %38, %36, %40 : vector<6x2432xi1>, vector<6x2432xf32>
    %42 = vector.broadcast %0 : vector<1x2432xf32> to vector<6x2432xf32>
    %43 = arith.mulf %41, %42 : vector<6x2432xf32>
    %c0_20 = arith.constant 0 : index
    %c128 = arith.constant 128 : index
    %44 = vector.load %arg10[%c0_20, %c128] : memref<6x2688xf32, #tpu.memory_space<vmem>>, vector<6x2432xf32>
    tpu.vector_store %arg10[%c0_20, %c128], %43 {strides = array<i32>} : memref<6x2688xf32, #tpu.memory_space<vmem>>, vector<6x2432xf32>,
    %c0_21 = arith.constant 0 : index
    %c93 = arith.constant 93 : index
    %45 = vector.load %arg10[%c0_21, %c93] : memref<6x2688xf32, #tpu.memory_space<vmem>>, vector<6x2432xf32>
    %c0_22 = arith.constant 0 : index
    %c0_23 = arith.constant 0 : index
    %46 = vector.load %arg11[%c0_22, %c0_23] : memref<72x2432xf32, #tpu.memory_space<vmem>>, vector<6x2432xf32>
    tpu.vector_store %arg11[%c0_22, %c0_23], %45 {strides = array<i32>} : memref<72x2432xf32, #tpu.memory_space<vmem>>, vector<6x2432xf32>,
    %c0_24 = arith.constant 0 : index
    %c94 = arith.constant 94 : index
    %47 = vector.load %arg10[%c0_24, %c94] : memref<6x2688xf32, #tpu.memory_space<vmem>>, vector<6x2432xf32>
    %c8 = arith.constant 8 : index
    %c0_25 = arith.constant 0 : index
    %48 = vector.load %arg11[%c8, %c0_25] : memref<72x2432xf32, #tpu.memory_space<vmem>>, vector<6x2432xf32>
    tpu.vector_store %arg11[%c8, %c0_25], %47 {strides = array<i32>} : memref<72x2432xf32, #tpu.memory_space<vmem>>, vector<6x2432xf32>,
    %c0_26 = arith.constant 0 : index
    %c95 = arith.constant 95 : index
    %49 = vector.load %arg10[%c0_26, %c95] : memref<6x2688xf32, #tpu.memory_space<vmem>>, vector<6x2432xf32>
    %c16 = arith.constant 16 : index
    %c0_27 = arith.constant 0 : index
    %50 = vector.load %arg11[%c16, %c0_27] : memref<72x2432xf32, #tpu.memory_space<vmem>>, vector<6x2432xf32>
    tpu.vector_store %arg11[%c16, %c0_27], %49 {strides = array<i32>} : memref<72x2432xf32, #tpu.memory_space<vmem>>, vector<6x2432xf32>,
    %c0_28 = arith.constant 0 : index
    %c127 = arith.constant 127 : index
    %51 = vector.load %arg10[%c0_28, %c127] : memref<6x2688xf32, #tpu.memory_space<vmem>>, vector<6x2432xf32>
    %c24 = arith.constant 24 : index
    %c0_29 = arith.constant 0 : index
    %52 = vector.load %arg11[%c24, %c0_29] : memref<72x2432xf32, #tpu.memory_space<vmem>>, vector<6x2432xf32>
    tpu.vector_store %arg11[%c24, %c0_29], %51 {strides = array<i32>} : memref<72x2432xf32, #tpu.memory_space<vmem>>, vector<6x2432xf32>,
    %c0_30 = arith.constant 0 : index
    %c128_31 = arith.constant 128 : index
    %53 = vector.load %arg10[%c0_30, %c128_31] : memref<6x2688xf32, #tpu.memory_space<vmem>>, vector<6x2432xf32>
    %c32 = arith.constant 32 : index
    %c0_32 = arith.constant 0 : index
    %54 = vector.load %arg11[%c32, %c0_32] : memref<72x2432xf32, #tpu.memory_space<vmem>>, vector<6x2432xf32>
    tpu.vector_store %arg11[%c32, %c0_32], %53 {strides = array<i32>} : memref<72x2432xf32, #tpu.memory_space<vmem>>, vector<6x2432xf32>,
    %c0_33 = arith.constant 0 : index
    %c129 = arith.constant 129 : index
    %55 = vector.load %arg10[%c0_33, %c129] : memref<6x2688xf32, #tpu.memory_space<vmem>>, vector<6x2432xf32>
    %c40 = arith.constant 40 : index
    %c0_34 = arith.constant 0 : index
    %56 = vector.load %arg11[%c40, %c0_34] : memref<72x2432xf32, #tpu.memory_space<vmem>>, vector<6x2432xf32>
    tpu.vector_store %arg11[%c40, %c0_34], %55 {strides = array<i32>} : memref<72x2432xf32, #tpu.memory_space<vmem>>, vector<6x2432xf32>,
    %c0_35 = arith.constant 0 : index
    %c161 = arith.constant 161 : index
    %57 = vector.load %arg10[%c0_35, %c161] : memref<6x2688xf32, #tpu.memory_space<vmem>>, vector<6x2432xf32>
    %c48 = arith.constant 48 : index
    %c0_36 = arith.constant 0 : index
    %58 = vector.load %arg11[%c48, %c0_36] : memref<72x2432xf32, #tpu.memory_space<vmem>>, vector<6x2432xf32>
    tpu.vector_store %arg11[%c48, %c0_36], %57 {strides = array<i32>} : memref<72x2432xf32, #tpu.memory_space<vmem>>, vector<6x2432xf32>,
    %c0_37 = arith.constant 0 : index
    %c162 = arith.constant 162 : index
    %59 = vector.load %arg10[%c0_37, %c162] : memref<6x2688xf32, #tpu.memory_space<vmem>>, vector<6x2432xf32>
    %c56 = arith.constant 56 : index
    %c0_38 = arith.constant 0 : index
    %60 = vector.load %arg11[%c56, %c0_38] : memref<72x2432xf32, #tpu.memory_space<vmem>>, vector<6x2432xf32>
    tpu.vector_store %arg11[%c56, %c0_38], %59 {strides = array<i32>} : memref<72x2432xf32, #tpu.memory_space<vmem>>, vector<6x2432xf32>,
    %c0_39 = arith.constant 0 : index
    %c163 = arith.constant 163 : index
    %61 = vector.load %arg10[%c0_39, %c163] : memref<6x2688xf32, #tpu.memory_space<vmem>>, vector<6x2432xf32>
    %c64 = arith.constant 64 : index
    %c0_40 = arith.constant 0 : index
    %62 = vector.load %arg11[%c64, %c0_40] : memref<72x2432xf32, #tpu.memory_space<vmem>>, vector<6x2432xf32>
    tpu.vector_store %arg11[%c64, %c0_40], %61 {strides = array<i32>} : memref<72x2432xf32, #tpu.memory_space<vmem>>, vector<6x2432xf32>,
    %c0_41 = arith.constant 0 : index
    %c0_42 = arith.constant 0 : index
    %63 = vector.load %arg5[%c0_41, %c0_42] : memref<2x72xf32, #tpu.memory_space<vmem>>, vector<2x72xf32>
    %c0_43 = arith.constant 0 : index
    %c0_44 = arith.constant 0 : index
    %64 = vector.load %arg11[%c0_43, %c0_44] : memref<72x2432xf32, #tpu.memory_space<vmem>>, vector<72x2432xf32>
    %cst_45 = arith.constant dense<0.000000e+00> : vector<2x2432xf32>
    %65 = tpu.matmul %63, %64, %cst_45 {dimension_numbers = #tpu.dot_dimension_numbers<[1], [0], [0], [1], [0, 0, 1, 1], [], []>} : vector<2x72xf32>, vector<72x2432xf32>, vector<2x2432xf32> -> vector<2x2432xf32>
    %c0_46 = arith.constant 0 : index
    %c0_47 = arith.constant 0 : index
    %66 = vector.load %arg6[%c0_46, %c0_47] : memref<2x3xf32, #tpu.memory_space<vmem>>, vector<2x3xf32>
    %67 = vector.extract_strided_slice %66 {offsets = [0, 0], sizes = [2, 1], strides = [1, 1]} : vector<2x3xf32> to vector<2x1xf32>
    %68 = vector.extract_strided_slice %66 {offsets = [0, 1], sizes = [2, 1], strides = [1, 1]} : vector<2x3xf32> to vector<2x1xf32>
    %69 = vector.extract_strided_slice %66 {offsets = [0, 2], sizes = [2, 1], strides = [1, 1]} : vector<2x3xf32> to vector<2x1xf32>
    %70 = vector.broadcast %0 : vector<1x2432xf32> to vector<2x2432xf32>
    %71 = arith.mulf %65, %70 : vector<2x2432xf32>
    %cst_48 = arith.constant dense<0.000000e+00> : vector<2xf32>
    %72 = vector.multi_reduction <add>, %71, %cst_48 [1] : vector<2x2432xf32> to vector<2xf32>
    %73 = vector.shape_cast %72 : vector<2xf32> to vector<2x1xf32>
    %cst_49 = arith.constant 4.8828125E-4 : f32
    %74 = vector.broadcast %cst_49 : f32 to vector<2x1xf32>
    %75 = arith.mulf %73, %74 : vector<2x1xf32>
    %76 = vector.broadcast %75 : vector<2x1xf32> to vector<2x2432xf32>
    %77 = arith.subf %65, %76 : vector<2x2432xf32>
    %78 = vector.broadcast %0 : vector<1x2432xf32> to vector<2x2432xf32>
    %79 = arith.mulf %77, %78 : vector<2x2432xf32>
    %80 = arith.mulf %79, %79 : vector<2x2432xf32>
    %cst_50 = arith.constant dense<0.000000e+00> : vector<2xf32>
    %81 = vector.multi_reduction <add>, %80, %cst_50 [1] : vector<2x2432xf32> to vector<2xf32>
    %82 = vector.shape_cast %81 : vector<2xf32> to vector<2x1xf32>
    %cst_51 = arith.constant 4.8828125E-4 : f32
    %83 = vector.broadcast %cst_51 : f32 to vector<2x1xf32>
    %84 = arith.mulf %82, %83 : vector<2x1xf32>
    %cst_52 = arith.constant 0.000000e+00 : f32
    %85 = vector.broadcast %cst_52 : f32 to vector<2x1xf32>
    %86 = arith.maximumf %84, %85 : vector<2x1xf32>
    %cst_53 = arith.constant 9.99999974E-6 : f32
    %87 = vector.broadcast %cst_53 : f32 to vector<2x1xf32>
    %88 = arith.addf %86, %87 : vector<2x1xf32>
    %89 = math.rsqrt %88 : vector<2x1xf32>
    %90 = arith.mulf %67, %89 : vector<2x1xf32>
    %91 = vector.broadcast %90 : vector<2x1xf32> to vector<2x2432xf32>
    %92 = arith.mulf %77, %91 : vector<2x2432xf32>
    %93 = vector.broadcast %68 : vector<2x1xf32> to vector<2x2432xf32>
    %94 = arith.addf %92, %93 : vector<2x2432xf32>
    %cst_54 = arith.constant 0.000000e+00 : f32
    %95 = vector.broadcast %cst_54 : f32 to vector<2x2432xf32>
    %96 = arith.cmpf oge, %94, %95 : vector<2x2432xf32>
    %97 = vector.broadcast %69 : vector<2x1xf32> to vector<2x2432xf32>
    %98 = arith.mulf %97, %94 : vector<2x2432xf32>
    %99 = arith.select %96, %94, %98 : vector<2x2432xi1>, vector<2x2432xf32>
    %100 = vector.broadcast %0 : vector<1x2432xf32> to vector<2x2432xf32>
    %101 = arith.mulf %99, %100 : vector<2x2432xf32>
    %c0_55 = arith.constant 0 : index
    %c128_56 = arith.constant 128 : index
    %102 = vector.load %arg10[%c0_55, %c128_56] : memref<6x2688xf32, #tpu.memory_space<vmem>>, vector<2x2432xf32>
    tpu.vector_store %arg10[%c0_55, %c128_56], %101 {strides = array<i32>} : memref<6x2688xf32, #tpu.memory_space<vmem>>, vector<2x2432xf32>,
    %c0_57 = arith.constant 0 : index
    %c93_58 = arith.constant 93 : index
    %103 = vector.load %arg10[%c0_57, %c93_58] : memref<6x2688xf32, #tpu.memory_space<vmem>>, vector<2x2432xf32>
    %c0_59 = arith.constant 0 : index
    %c0_60 = arith.constant 0 : index
    %104 = vector.load %arg11[%c0_59, %c0_60] : memref<72x2432xf32, #tpu.memory_space<vmem>>, vector<2x2432xf32>
    tpu.vector_store %arg11[%c0_59, %c0_60], %103 {strides = array<i32>} : memref<72x2432xf32, #tpu.memory_space<vmem>>, vector<2x2432xf32>,
    %c0_61 = arith.constant 0 : index
    %c94_62 = arith.constant 94 : index
    %105 = vector.load %arg10[%c0_61, %c94_62] : memref<6x2688xf32, #tpu.memory_space<vmem>>, vector<2x2432xf32>
    %c8_63 = arith.constant 8 : index
    %c0_64 = arith.constant 0 : index
    %106 = vector.load %arg11[%c8_63, %c0_64] : memref<72x2432xf32, #tpu.memory_space<vmem>>, vector<2x2432xf32>
    tpu.vector_store %arg11[%c8_63, %c0_64], %105 {strides = array<i32>} : memref<72x2432xf32, #tpu.memory_space<vmem>>, vector<2x2432xf32>,
    %c0_65 = arith.constant 0 : index
    %c95_66 = arith.constant 95 : index
    %107 = vector.load %arg10[%c0_65, %c95_66] : memref<6x2688xf32, #tpu.memory_space<vmem>>, vector<2x2432xf32>
    %c16_67 = arith.constant 16 : index
    %c0_68 = arith.constant 0 : index
    %108 = vector.load %arg11[%c16_67, %c0_68] : memref<72x2432xf32, #tpu.memory_space<vmem>>, vector<2x2432xf32>
    tpu.vector_store %arg11[%c16_67, %c0_68], %107 {strides = array<i32>} : memref<72x2432xf32, #tpu.memory_space<vmem>>, vector<2x2432xf32>,
    %c0_69 = arith.constant 0 : index
    %c127_70 = arith.constant 127 : index
    %109 = vector.load %arg10[%c0_69, %c127_70] : memref<6x2688xf32, #tpu.memory_space<vmem>>, vector<2x2432xf32>
    %c24_71 = arith.constant 24 : index
    %c0_72 = arith.constant 0 : index
    %110 = vector.load %arg11[%c24_71, %c0_72] : memref<72x2432xf32, #tpu.memory_space<vmem>>, vector<2x2432xf32>
    tpu.vector_store %arg11[%c24_71, %c0_72], %109 {strides = array<i32>} : memref<72x2432xf32, #tpu.memory_space<vmem>>, vector<2x2432xf32>,
    %c0_73 = arith.constant 0 : index
    %c128_74 = arith.constant 128 : index
    %111 = vector.load %arg10[%c0_73, %c128_74] : memref<6x2688xf32, #tpu.memory_space<vmem>>, vector<2x2432xf32>
    %c32_75 = arith.constant 32 : index
    %c0_76 = arith.constant 0 : index
    %112 = vector.load %arg11[%c32_75, %c0_76] : memref<72x2432xf32, #tpu.memory_space<vmem>>, vector<2x2432xf32>
    tpu.vector_store %arg11[%c32_75, %c0_76], %111 {strides = array<i32>} : memref<72x2432xf32, #tpu.memory_space<vmem>>, vector<2x2432xf32>,
    %c0_77 = arith.constant 0 : index
    %c129_78 = arith.constant 129 : index
    %113 = vector.load %arg10[%c0_77, %c129_78] : memref<6x2688xf32, #tpu.memory_space<vmem>>, vector<2x2432xf32>
    %c40_79 = arith.constant 40 : index
    %c0_80 = arith.constant 0 : index
    %114 = vector.load %arg11[%c40_79, %c0_80] : memref<72x2432xf32, #tpu.memory_space<vmem>>, vector<2x2432xf32>
    tpu.vector_store %arg11[%c40_79, %c0_80], %113 {strides = array<i32>} : memref<72x2432xf32, #tpu.memory_space<vmem>>, vector<2x2432xf32>,
    %c0_81 = arith.constant 0 : index
    %c161_82 = arith.constant 161 : index
    %115 = vector.load %arg10[%c0_81, %c161_82] : memref<6x2688xf32, #tpu.memory_space<vmem>>, vector<2x2432xf32>
    %c48_83 = arith.constant 48 : index
    %c0_84 = arith.constant 0 : index
    %116 = vector.load %arg11[%c48_83, %c0_84] : memref<72x2432xf32, #tpu.memory_space<vmem>>, vector<2x2432xf32>
    tpu.vector_store %arg11[%c48_83, %c0_84], %115 {strides = array<i32>} : memref<72x2432xf32, #tpu.memory_space<vmem>>, vector<2x2432xf32>,
    %c0_85 = arith.constant 0 : index
    %c162_86 = arith.constant 162 : index
    %117 = vector.load %arg10[%c0_85, %c162_86] : memref<6x2688xf32, #tpu.memory_space<vmem>>, vector<2x2432xf32>
    %c56_87 = arith.constant 56 : index
    %c0_88 = arith.constant 0 : index
    %118 = vector.load %arg11[%c56_87, %c0_88] : memref<72x2432xf32, #tpu.memory_space<vmem>>, vector<2x2432xf32>
    tpu.vector_store %arg11[%c56_87, %c0_88], %117 {strides = array<i32>} : memref<72x2432xf32, #tpu.memory_space<vmem>>, vector<2x2432xf32>,
    %c0_89 = arith.constant 0 : index
    %c163_90 = arith.constant 163 : index
    %119 = vector.load %arg10[%c0_89, %c163_90] : memref<6x2688xf32, #tpu.memory_space<vmem>>, vector<2x2432xf32>
    %c64_91 = arith.constant 64 : index
    %c0_92 = arith.constant 0 : index
    %120 = vector.load %arg11[%c64_91, %c0_92] : memref<72x2432xf32, #tpu.memory_space<vmem>>, vector<2x2432xf32>
    tpu.vector_store %arg11[%c64_91, %c0_92], %119 {strides = array<i32>} : memref<72x2432xf32, #tpu.memory_space<vmem>>, vector<2x2432xf32>,
    %c0_93 = arith.constant 0 : index
    %c0_94 = arith.constant 0 : index
    %121 = vector.load %arg7[%c0_93, %c0_94] : memref<2x72xf32, #tpu.memory_space<vmem>>, vector<2x72xf32>
    %c0_95 = arith.constant 0 : index
    %c0_96 = arith.constant 0 : index
    %122 = vector.load %arg11[%c0_95, %c0_96] : memref<72x2432xf32, #tpu.memory_space<vmem>>, vector<72x2432xf32>
    %cst_97 = arith.constant dense<0.000000e+00> : vector<2x2432xf32>
    %123 = tpu.matmul %121, %122, %cst_97 {dimension_numbers = #tpu.dot_dimension_numbers<[1], [0], [0], [1], [0, 0, 1, 1], [], []>} : vector<2x72xf32>, vector<72x2432xf32>, vector<2x2432xf32> -> vector<2x2432xf32>
    %c0_98 = arith.constant 0 : index
    %c0_99 = arith.constant 0 : index
    %124 = vector.load %arg8[%c0_98, %c0_99] : memref<2x3xf32, #tpu.memory_space<vmem>>, vector<2x3xf32>
    %125 = vector.extract_strided_slice %124 {offsets = [0, 0], sizes = [2, 1], strides = [1, 1]} : vector<2x3xf32> to vector<2x1xf32>
    %126 = vector.extract_strided_slice %124 {offsets = [0, 1], sizes = [2, 1], strides = [1, 1]} : vector<2x3xf32> to vector<2x1xf32>
    %127 = vector.extract_strided_slice %124 {offsets = [0, 2], sizes = [2, 1], strides = [1, 1]} : vector<2x3xf32> to vector<2x1xf32>
    %128 = vector.broadcast %0 : vector<1x2432xf32> to vector<2x2432xf32>
    %129 = arith.mulf %123, %128 : vector<2x2432xf32>
    %cst_100 = arith.constant dense<0.000000e+00> : vector<2xf32>
    %130 = vector.multi_reduction <add>, %129, %cst_100 [1] : vector<2x2432xf32> to vector<2xf32>
    %131 = vector.shape_cast %130 : vector<2xf32> to vector<2x1xf32>
    %cst_101 = arith.constant 4.8828125E-4 : f32
    %132 = vector.broadcast %cst_101 : f32 to vector<2x1xf32>
    %133 = arith.mulf %131, %132 : vector<2x1xf32>
    %134 = vector.broadcast %133 : vector<2x1xf32> to vector<2x2432xf32>
    %135 = arith.subf %123, %134 : vector<2x2432xf32>
    %136 = vector.broadcast %0 : vector<1x2432xf32> to vector<2x2432xf32>
    %137 = arith.mulf %135, %136 : vector<2x2432xf32>
    %138 = arith.mulf %137, %137 : vector<2x2432xf32>
    %cst_102 = arith.constant dense<0.000000e+00> : vector<2xf32>
    %139 = vector.multi_reduction <add>, %138, %cst_102 [1] : vector<2x2432xf32> to vector<2xf32>
    %140 = vector.shape_cast %139 : vector<2xf32> to vector<2x1xf32>
    %cst_103 = arith.constant 4.8828125E-4 : f32
    %141 = vector.broadcast %cst_103 : f32 to vector<2x1xf32>
    %142 = arith.mulf %140, %141 : vector<2x1xf32>
    %cst_104 = arith.constant 0.000000e+00 : f32
    %143 = vector.broadcast %cst_104 : f32 to vector<2x1xf32>
    %144 = arith.maximumf %142, %143 : vector<2x1xf32>
    %cst_105 = arith.constant 9.99999974E-6 : f32
    %145 = vector.broadcast %cst_105 : f32 to vector<2x1xf32>
    %146 = arith.addf %144, %145 : vector<2x1xf32>
    %147 = math.rsqrt %146 : vector<2x1xf32>
    %148 = arith.mulf %125, %147 : vector<2x1xf32>
    %149 = vector.broadcast %148 : vector<2x1xf32> to vector<2x2432xf32>
    %150 = arith.mulf %135, %149 : vector<2x2432xf32>
    %151 = vector.broadcast %126 : vector<2x1xf32> to vector<2x2432xf32>
    %152 = arith.addf %150, %151 : vector<2x2432xf32>
    %cst_106 = arith.constant 0.000000e+00 : f32
    %153 = vector.broadcast %cst_106 : f32 to vector<2x2432xf32>
    %154 = arith.cmpf oge, %152, %153 : vector<2x2432xf32>
    %155 = vector.broadcast %127 : vector<2x1xf32> to vector<2x2432xf32>
    %156 = arith.mulf %155, %152 : vector<2x2432xf32>
    %157 = arith.select %154, %152, %156 : vector<2x2432xi1>, vector<2x2432xf32>
    %c0_107 = arith.constant 0 : index
    %c0_108 = arith.constant 0 : index
    %158 = vector.load %arg9[%c0_107, %c0_108] : memref<2x2432xf32, #tpu.memory_space<vmem>>, vector<2x2432xf32>
    tpu.vector_store %arg9[%c0_107, %c0_108], %157 {strides = array<i32>} : memref<2x2432xf32, #tpu.memory_space<vmem>>, vector<2x2432xf32>,
    return
  }
  func.func @transform_0(%arg0: i32) -> (i32, i32) {
    %c0_i32 = arith.constant 0 : i32
    %c0_i32_0 = arith.constant 0 : i32
    %c0_i32_1 = arith.constant 0 : i32
    return %c0_i32, %c0_i32_0 : i32, i32
  }
  func.func @transform_1(%arg0: i32) -> (i32, i32) {
    %c0_i32 = arith.constant 0 : i32
    %c0_i32_0 = arith.constant 0 : i32
    %c0_i32_1 = arith.constant 0 : i32
    return %c0_i32, %c0_i32_0 : i32, i32
  }
  func.func @transform_2(%arg0: i32) -> (i32, i32) {
    %c0_i32 = arith.constant 0 : i32
    %c0_i32_0 = arith.constant 0 : i32
    %c0_i32_1 = arith.constant 0 : i32
    return %c0_i32, %c0_i32_0 : i32, i32
  }
  func.func @transform_3(%arg0: i32) -> (i32, i32) {
    %c0_i32 = arith.constant 0 : i32
    %c0_i32_0 = arith.constant 0 : i32
    %c0_i32_1 = arith.constant 0 : i32
    return %c0_i32, %c0_i32_0 : i32, i32
  }
  func.func @transform_4(%arg0: i32) -> (i32, i32) {
    %c0_i32 = arith.constant 0 : i32
    %c0_i32_0 = arith.constant 0 : i32
    %c0_i32_1 = arith.constant 0 : i32
    return %c0_i32, %c0_i32_0 : i32, i32
  }
  func.func @transform_5(%arg0: i32) -> (i32, i32) {
    %c0_i32 = arith.constant 0 : i32
    %c0_i32_0 = arith.constant 0 : i32
    %c0_i32_1 = arith.constant 0 : i32
    return %c0_i32, %c0_i32_0 : i32, i32
  }
  func.func @transform_6(%arg0: i32) -> (i32, i32) {
    %c0_i32 = arith.constant 0 : i32
    %c0_i32_0 = arith.constant 0 : i32
    %c0_i32_1 = arith.constant 0 : i32
    return %c0_i32, %c0_i32_0 : i32, i32
  }
  func.func @transform_7(%arg0: i32) -> (i32, i32) {
    %c0_i32 = arith.constant 0 : i32
    %c0_i32_0 = arith.constant 0 : i32
    %c0_i32_1 = arith.constant 0 : i32
    return %c0_i32, %c0_i32_0 : i32, i32
  }
  func.func @transform_8(%arg0: i32) -> (i32, i32) {
    %c0_i32 = arith.constant 0 : i32
    %c0_i32_0 = arith.constant 0 : i32
    %c0_i32_1 = arith.constant 0 : i32
    return %c0_i32, %c0_i32_0 : i32, i32
  }
}

</mosaic_0001>

<bundles_post_ra>
// kernel: _up_forward_jit.1
= control target key start
LH: loop header
LB: loop body
LE: loop exit
PB: predicated region body
PF: predicated region fallthrough
CT: control target
= control target key end

     0   :  { %vm267_vm0 = vcmask 1043456   ;;  %vm6707_vm1 = vmmov 1   ;;  %v6708_v3 = vmov 0.0   ;;  %vm263_vm3 = vcmask 97280   ;;  %s6712_s20 = smov 1   ;;  %s6716_s21 = smov 34   ;;  %s9442_s0 = inlined_call_operand.vmem [shape: f32[12,2432], index: 0, kind: input, shape index: {}]   ;;  %s9443_s2 = inlined_call_operand.vmem [shape: f32[6,12], index: 2, kind: input, shape index: {}]   ;;  %s9444_s1 = inlined_call_operand.vmem [shape: f32[1,2432], index: 1, kind: input, shape index: {}]   ;;  %s9445_s3 = inlined_call_operand.vmem [shape: f32[6,3], index: 3, kind: input, shape index: {}]   ;;  %s9446_s4 = inlined_call_operand.vmem [shape: f32[2,72], index: 4, kind: input, shape index: {}]   ;;  %s9447_s5 = inlined_call_operand.vmem [shape: f32[2,3], index: 5, kind: input, shape index: {}]   ;;  %s9448_s6 = inlined_call_operand.vmem [shape: f32[2,72], index: 6, kind: input, shape index: {}]   ;;  %s9449_s7 = inlined_call_operand.vmem [shape: f32[2,3], index: 7, kind: input, shape index: {}]   ;;  %s9450_s8 = inlined_call_operand.vmem [shape: f32[2,2432], index: 8, kind: output, shape index: {}]  }
   0x1   :  { %v6771_v0 = vld [vmem:[%s9442_s0 + $0x8] sm:$0xff]  ;;  %v6776_v1 = vld [vmem:[%s9442_s0 + $0xa0] sm:$0xf]  ;;  %vm6778_vm2 = vmpackc.low %vm267_vm0, %vm6707_vm1  ;;  %389 = vmatprep.mubr.f32.mxu0 %v6708_v3  ;;  %32 = vst [vmem:[#allocation2] sm:$0x3f] %v6708_v3  ;;  %460 = vmatprep.mubr.f32.mxu1 %v6708_v3  ;;  %v6709_v60 = vmov 0.0|0.0   ;;  %v1038_v62 = vlaneseq }
   0x2   :  { %33 = vst [vmem:[#allocation2 + $0x8] sm:$0x3f] %v6708_v3  ;;  %34 = vst [vmem:[#allocation2 + $0x10] sm:$0x3f] %v6708_v3  ;;  %v6303_v4 = vpack.c.bf16 %v6776_v1, %v6771_v0  ;;  %v225_v5 = vld [vmem:[%s9442_s0] sm:$0xff]  ;;  %v228_v7 = vld [vmem:[%s9442_s0 + $0x18] sm:$0xff] }
   0x3   :  { %35 = vst [vmem:[#allocation2 + $0x18] sm:$0x3f] %v6708_v3  ;;  %36 = vst [vmem:[#allocation2 + $0x20] sm:$0x3f] %v6708_v3  ;;  %v244_v6 = vld [vmem:[%s9442_s0 + $0x98] sm:$0xf] }
   0x4   :  { %37 = vst [vmem:[#allocation2 + $0x28] sm:$0x3f] %v6708_v3  ;;  %38 = vst [vmem:[#allocation2 + $0x30] sm:$0x3f] %v6708_v3  ;;  %v6306_v8 = vpack.c.bf16 %v244_v6, %v225_v5  ;;  %v247_v9 = vld [vmem:[%s9442_s0 + $0xb0] sm:$0xf]  ;;  %6305 = vmatprep.subr.msk.bf16.mxu0 %vm6778_vm2, %v6303_v4 }
   0x5   :  { %39 = vst [vmem:[#allocation2 + $0x38] sm:$0x3f] %v6708_v3  ;;  %40 = vst [vmem:[#allocation2 + $0x40] sm:$0x3f] %v6708_v3  ;;  %v227_v10 = vld [vmem:[%s9442_s0 + $0x10] sm:$0xff]  ;;  %v6309_v12 = vpack.c.bf16 %v247_v9, %v228_v7  ;;  %v230_v15 = vld [vmem:[%s9442_s0 + $0x28] sm:$0xff] }
   0x6   :  { %41 = vst [vmem:[#allocation2 + $0x48] sm:$0x3f] %v6708_v3  ;;  %42 = vst [vmem:[#allocation2 + $0x50] sm:$0x3f] %v6708_v3  ;;  %v246_v11 = vld [vmem:[%s9442_s0 + $0xa8] sm:$0xf]  ;;  %6308 = vmatpush1.bf16.msk.msra.mxu0 %vm6778_vm2, %v6306_v8 }
   0x7   :  { %43 = vst [vmem:[#allocation2 + $0x58] sm:$0x3f] %v6708_v3  ;;  %44 = vst [vmem:[#allocation2 + $0x60] sm:$0x3f] %v6708_v3  ;;  %v6312_v13 = vpack.c.bf16 %v246_v11, %v227_v10  ;;  %v7001_v14 = vld [vmem:[%s9443_s2] sm:$0x3f]  ;;  %6311 = vmatprep.subr.msk.bf16.mxu1 %vm6778_vm2, %v6309_v12 }
   0x8   :  { %45 = vst [vmem:[#allocation2 + $0x68] sm:$0x3f] %v6708_v3  ;;  %46 = vst [vmem:[#allocation2 + $0x70] sm:$0x3f] %v6708_v3  ;;  %v249_v16 = vld [vmem:[%s9442_s0 + $0xc0] sm:$0xf] }
   0x9   :  { %47 = vst [vmem:[#allocation2 + $0x78] sm:$0x3f] %v6708_v3  ;;  %48 = vst [vmem:[#allocation2 + $0x80] sm:$0x3f] %v6708_v3  ;;  %v6315_v17 = vpack.c.bf16 %v249_v16, %v230_v15  ;;  %v229_v18 = vld [vmem:[%s9442_s0 + $0x20] sm:$0xff]  ;;  %v232_v20 = vld [vmem:[%s9442_s0 + $0x38] sm:$0xff]  ;;  %6314 = vmatpush1.bf16.msk.msra.mxu1 %vm6778_vm2, %v6312_v13  ;;  %6184 = vmatmul.mubr.msk.f32.vlgmr.msra.gmra.mrb[0].mxu0 %vm263_vm3, %v7001_v14 }
   0xa   :  { %49 = vst [vmem:[#allocation2 + $0x88] sm:$0x3f] %v6708_v3  ;;  %50 = vst [vmem:[#allocation2 + $0x90] sm:$0x3f] %v6708_v3  ;;  %v248_v19 = vld [vmem:[%s9442_s0 + $0xb8] sm:$0xf]  ;;  %531 = vmatprep.mubr.f32.mxu0 %v6708_v3 }
   0xb   :  { %51 = vst [vmem:[#allocation2 + $0x98] sm:$0x3f] %v6708_v3  ;;  %52 = vst [vmem:[#allocation2 + $0xa0] sm:$0x3f] %v6708_v3  ;;  %v6318_v21 = vpack.c.bf16 %v248_v19, %v229_v18  ;;  %v251_v22 = vld [vmem:[%s9442_s0 + $0xd0] sm:$0xf]  ;;  %6317 = vmatprep.subr.msk.bf16.mxu0 %vm6778_vm2, %v6315_v17 }
   0xc   :  { %53 = vst [vmem:[#allocation3] sm:$0xff] %v6708_v3  ;;  %54 = vst [vmem:[#allocation3 + $0x8] sm:$0xff] %v6708_v3  ;;  %v231_v23 = vld [vmem:[%s9442_s0 + $0x30] sm:$0xff]  ;;  %v250_v24 = vld [vmem:[%s9442_s0 + $0xc8] sm:$0xf]  ;;  %v6321_v25 = vpack.c.bf16 %v251_v22, %v232_v20  ;;  %6187 = vmatmul.mubr.msk.f32.vlgmr.msra.gmra.mrb[0].mxu1 %vm263_vm3, %v7001_v14  ;;  %vm6710_vm4 = vmmov 0  }
   0xd   :  { %55 = vst [vmem:[#allocation3 + $0x10] sm:$0xff] %v6708_v3  ;;  %56 = vst [vmem:[#allocation3 + $0x18] sm:$0xff] %v6708_v3  ;;  %v6324_v26 = vpack.c.bf16 %v250_v24, %v231_v23  ;;  %v234_v27 = vld [vmem:[%s9442_s0 + $0x48] sm:$0xff]  ;;  %v253_v28 = vld [vmem:[%s9442_s0 + $0xe0] sm:$0xf]  ;;  %6320 = vmatpush1.bf16.msk.msra.mxu0 %vm6778_vm2, %v6318_v21  ;;  %602 = vmatprep.mubr.f32.mxu1 %v6708_v3  ;;  %v6711_v61 = vmov 2  }
   0xe   :  { %57 = vst [vmem:[#allocation3 + $0x20] sm:$0xff] %v6708_v3  ;;  %58 = vst [vmem:[#allocation3 + $0x28] sm:$0xff] %v6708_v3  ;;  %v233_v29 = vld [vmem:[%s9442_s0 + $0x40] sm:$0xff]  ;;  %v6327_v30 = vpack.c.bf16 %v253_v28, %v234_v27  ;;  %v252_v31 = vld [vmem:[%s9442_s0 + $0xd8] sm:$0xf]  ;;  %6323 = vmatprep.subr.msk.bf16.mxu1 %vm6778_vm2, %v6321_v25  ;;  %6690 = vset.pattern.permute.xlu0 %v6711_v61  ;;  %v7162_v63 = vshrl.u32 %v1038_v62, 7 }
   0xf   :  { %59 = vst [vmem:[#allocation3 + $0x30] sm:$0xff] %v6708_v3  ;;  %60 = vst [vmem:[#allocation3 + $0x38] sm:$0xff] %v6708_v3  ;;  %v236_v32 = vld [vmem:[%s9442_s0 + $0x58] sm:$0xff]  ;;  %v255_v33 = vld [vmem:[%s9442_s0 + $0xf0] sm:$0xf]  ;;  %v6330_v34 = vpack.c.bf16 %v252_v31, %v233_v29  ;;  %6326 = vmatpush1.bf16.msk.msra.mxu1 %vm6778_vm2, %v6324_v26  ;;  %vm1152_vm5 = vcmask 1045504  }
  0x10   :  { %61 = vst [vmem:[#allocation3 + $0x40] sm:$0xff] %v6708_v3  ;;  %62 = vst [vmem:[#allocation3 + $0x48] sm:$0xff] %v6708_v3  ;;  %v235_v35 = vld [vmem:[%s9442_s0 + $0x50] sm:$0xff]  ;;  %v254_v36 = vld [vmem:[%s9442_s0 + $0xe8] sm:$0xf]  ;;  %v6333_v38 = vpack.c.bf16 %v255_v33, %v236_v32  ;;  %6190 = vmatmul.mubr.msk.f32.vlgmr.msra.gmra.mrb[2].mxu0 %vm263_vm3, %v7001_v14  ;;  %6329 = vmatprep.subr.msk.bf16.mxu0 %vm6778_vm2, %v6327_v30  ;;  %v7165_v0 = vsub.s32 0, %v7162_v63 }
  0x11   :  { %63 = vst [vmem:[#allocation3 + $0x50] sm:$0xff] %v6708_v3  ;;  %64 = vst [vmem:[#allocation3 + $0x58] sm:$0xff] %v6708_v3  ;;  %v238_v37 = vld [vmem:[%s9442_s0 + $0x68] sm:$0xff]  ;;  %v257_v39 = vld [vmem:[%s9442_s0 + $0x100] sm:$0xf]  ;;  %v6336_v42 = vpack.c.bf16 %v254_v36, %v235_v35  ;;  %6332 = vmatpush1.bf16.msk.msra.mxu0 %vm6778_vm2, %v6330_v34  ;;  %673 = vmatprep.mubr.f32.mxu0 %v6708_v3  ;;  %v7171_v2 = vsub.s32 1, %v7162_v63 }
  0x12   :  { %65 = vst [vmem:[#allocation3 + $0x60] sm:$0xff] %v6708_v3  ;;  %66 = vst [vmem:[#allocation3 + $0x68] sm:$0xff] %v6708_v3  ;;  %v237_v40 = vld [vmem:[%s9442_s0 + $0x60] sm:$0xff]  ;;  %v256_v41 = vld [vmem:[%s9442_s0 + $0xf8] sm:$0xf]  ;;  %v6339_v45 = vpack.c.bf16 %v257_v39, %v238_v37  ;;  %6193 = vmatmul.mubr.msk.f32.vlgmr.msra.gmra.mrb[2].mxu1 %vm263_vm3, %v7001_v14  ;;  %6335 = vmatprep.subr.msk.bf16.mxu1 %vm6778_vm2, %v6333_v38  ;;  %v7174_v4 = vsub.s32 2, %v7162_v63 }
  0x13   :  { %67 = vst [vmem:[#allocation3 + $0x70] sm:$0xff] %v6708_v3  ;;  %68 = vst [vmem:[#allocation3 + $0x78] sm:$0xff] %v6708_v3  ;;  %v240_v43 = vld [vmem:[%s9442_s0 + $0x78] sm:$0xff]  ;;  %v259_v44 = vld [vmem:[%s9442_s0 + $0x110] sm:$0xf]  ;;  %v6342_v48 = vpack.c.bf16 %v256_v41, %v237_v40  ;;  %6338 = vmatpush1.bf16.msk.msra.mxu1 %vm6778_vm2, %v6336_v42  ;;  %744 = vmatprep.mubr.f32.mxu1 %v6708_v3  ;;  %v1056_v6 = vsub.s32 4, %v7162_v63 }
  0x14   :  { %69 = vst [vmem:[#allocation3 + $0x80] sm:$0xff] %v6708_v3  ;;  %70 = vst [vmem:[#allocation3 + $0x88] sm:$0xff] %v6708_v3  ;;  %v239_v46 = vld [vmem:[%s9442_s0 + $0x70] sm:$0xff]  ;;  %v258_v47 = vld [vmem:[%s9442_s0 + $0x108] sm:$0xf]  ;;  %v6345_v51 = vpack.c.bf16 %v259_v44, %v240_v43  ;;  %6196 = vmatmul.mubr.msk.f32.vlgmr.msra.gmra.mrb[4].mxu0 %vm263_vm3, %v7001_v14  ;;  %6341 = vmatprep.subr.msk.bf16.mxu0 %vm6778_vm2, %v6339_v45  ;;  %v1060_v11 = vsub.s32 5, %v7162_v63 }
  0x15   :  { %71 = vst [vmem:[#allocation3 + $0x90] sm:$0xff] %v6708_v3  ;;  %72 = vst [vmem:[#allocation3 + $0x98] sm:$0xff] %v6708_v3  ;;  %v242_v49 = vld [vmem:[%s9442_s0 + $0x88] sm:$0xff]  ;;  %v261_v50 = vld [vmem:[%s9442_s0 + $0x120] sm:$0xf]  ;;  %v6348_v54 = vpack.c.bf16 %v258_v47, %v239_v46  ;;  %6344 = vmatpush1.bf16.msk.msra.mxu0 %vm6778_vm2, %v6342_v48  ;;  %815 = vmatprep.mubr.f32.mxu0 %v6708_v3  ;;  %v1064_v12 = vsub.s32 6, %v7162_v63 }
  0x16   :  { %73 = vst [vmem:[#allocation3 + $0xa0] sm:$0xff] %v6708_v3  ;;  %74 = vst [vmem:[#allocation3 + $0xa8] sm:$0xff] %v6708_v3  ;;  %v241_v52 = vld [vmem:[%s9442_s0 + $0x80] sm:$0xff]  ;;  %v260_v53 = vld [vmem:[%s9442_s0 + $0x118] sm:$0xf]  ;;  %v6351_v55 = vpack.c.bf16 %v261_v50, %v242_v49  ;;  %6199 = vmatmul.mubr.msk.f32.vlgmr.msra.gmra.mrb[4].mxu1 %vm263_vm3, %v7001_v14  ;;  %6347 = vmatprep.subr.msk.bf16.mxu1 %vm6778_vm2, %v6345_v51  ;;  %v1068_v21 = vsub.s32 7, %v7162_v63 }
  0x17   :  { %75 = vst [vmem:[#allocation3 + $0xb0] sm:$0xff] %v6708_v3  ;;  %76 = vst [vmem:[#allocation3 + $0xb8] sm:$0xff] %v6708_v3  ;;  %v243_v56 = vld [vmem:[%s9442_s0 + $0x90] sm:$0xff]  ;;  %v262_v57 = vld [vmem:[%s9442_s0 + $0x128] sm:$0xf]  ;;  %v6354_v58 = vpack.c.bf16 %v260_v53, %v241_v52  ;;  %6350 = vmatpush1.bf16.msk.msra.mxu1 %vm6778_vm2, %v6348_v54  ;;  %886 = vmatprep.mubr.f32.mxu1 %v6708_v3  ;;  %s6717_s22 = smov 33  }
  0x18   :  { %77 = vst [vmem:[#allocation3 + $0xc0] sm:$0xff] %v6708_v3  ;;  %78 = vst [vmem:[#allocation3 + $0xc8] sm:$0xff] %v6708_v3  ;;  %v6358_v59 = vpack.c.bf16 %v262_v57, %v243_v56  ;;  %6202 = vmatmul.mubr.msk.f32.vlgmr.msra.gmra.mrb[6].mxu0 %vm263_vm3, %v7001_v14  ;;  %6353 = vmatprep.subr.msk.bf16.mxu0 %vm6778_vm2, %v6351_v55  ;;  %v29_v1 = vld [vmem:[%s9444_s1] sm:$0xff]  ;;  %v30_v27 = vld [vmem:[%s9444_s1 + $0x8] sm:$0xff]  ;;  %s6718_s23 = smov 127   ;;  %s6719_s24 = smov 95  }
  0x19   :  { %79 = vst [vmem:[#allocation3 + $0xd0] sm:$0xff] %v6708_v3  ;;  %80 = vst [vmem:[#allocation3 + $0xd8] sm:$0xff] %v6708_v3  ;;  %6356 = vmatpush1.bf16.msk.msra.mxu0 %vm6778_vm2, %v6354_v58  ;;  %957 = vmatprep.mubr.f32.mxu0 %v6708_v3  ;;  %v7178_v5 = vrot.slane %v29_v1, %v7165_v0  ;;  %v7182_v7 = vrot.slane %v29_v1, %v7171_v2  ;;  %s6720_s25 = smov 94   ;;  %s6721_s26 = smov 93  }
  0x1a   :  { %81 = vst [vmem:[#allocation3 + $0xe0] sm:$0xff] %v6708_v3  ;;  %82 = vst [vmem:[#allocation3 + $0xe8] sm:$0xff] %v6708_v3  ;;  %6205 = vmatmul.mubr.msk.f32.vlgmr.msra.gmra.mrb[6].mxu1 %vm263_vm3, %v7001_v14  ;;  %6357 = vmatprep.subr.bf16.mxu1 %v6709_v60  ;;  %v7185_v8 = vrot.slane %v29_v1, %v7174_v4  ;;  %v7197_v15 = vrot.slane %v29_v1, %v1056_v6 }
  0x1b   :  { %83 = vst [vmem:[#allocation3 + $0xf0] sm:$0xff] %v6708_v3  ;;  %84 = vst [vmem:[#allocation3 + $0xf8] sm:$0xff] %v6708_v3  ;;  %6360 = vmatpush3.bf16.msk.msra.mxu1 %vm6778_vm2, %v6358_v59  ;;  %6258 = vmatprep.mubr.msk.f32.mxu1 %vm6710_vm4, %v6708_v3  ;;  %v7214_v25 = vrot.slane %v29_v1, %v1060_v11  ;;  %v7216_v26 = vrot.slane %v29_v1, %v1064_v12 }
  0x1c   :  { %85 = vst [vmem:[#allocation3 + $0x100] sm:$0xff] %v6708_v3  ;;  %86 = vst [vmem:[#allocation3 + $0x108] sm:$0xff] %v6708_v3  ;;  %6208 = vmatmul.mubr.msk.f32.vlgmr.msra.gmra.mrb[8].mxu0 %vm263_vm3, %v7001_v14  ;;  %v7230_v35 = vrot.slane %v29_v1, %v1068_v21  ;;  %v7233_v36 = vrot.slane %v30_v27, %v7165_v0  ;;  %v7248_v46 = vrot.slane %v30_v27, %v7171_v2 }
  0x1d   :  { %87 = vst [vmem:[#allocation3 + $0x110] sm:$0xff] %v6708_v3  ;;  %88 = vst [vmem:[#allocation3 + $0x118] sm:$0xff] %v6708_v3  ;;  %2823 = vmatprep.mubr.f32.mxu0 %v6708_v3  ;;  %v7251_v47 = vrot.slane %v30_v27, %v7174_v4  ;;  %v7269_v59 = vrot.slane %v30_v27, %v1056_v6 }
  0x1e   :  { %89 = vst [vmem:[#allocation3 + $0x120] sm:$0xff] %v6708_v3  ;;  %90 = vst [vmem:[#allocation3 + $0x128] sm:$0xff] %v6708_v3  ;;  %6259 = vmatmul.mubr.msk.f32.vlgmr.msra.gmra.mrb[8].mxu1 %vm263_vm3, %v7001_v14 }
  0x1f   :  { %91 = vst [vmem:[#allocation3 + $0x130] sm:$0xff] %v6708_v3  ;;  %92 = vst [vmem:[#allocation3 + $0x138] sm:$0xff] %v6708_v3  ;;  %2894 = vmatprep.mubr.f32.mxu1 %v6708_v3 }
  0x20   :  { %93 = vst [vmem:[#allocation3 + $0x140] sm:$0xff] %v6708_v3  ;;  %94 = vst [vmem:[#allocation3 + $0x148] sm:$0xff] %v6708_v3 }
  0x21   :  { %95 = vst [vmem:[#allocation3 + $0x150] sm:$0xff] %v6708_v3  ;;  %96 = vst [vmem:[#allocation3 + $0x158] sm:$0xff] %v6708_v3 }
  0x22   :  { %97 = vst [vmem:[#allocation3 + $0x160] sm:$0xff] %v6708_v3  ;;  %98 = vst [vmem:[#allocation3 + $0x168] sm:$0xff] %v6708_v3 }
  0x23   :  { %99 = vst [vmem:[#allocation3 + $0x170] sm:$0xff] %v6708_v3  ;;  %100 = vst [vmem:[#allocation3 + $0x178] sm:$0xff] %v6708_v3 }
  0x24   :  { %101 = vst [vmem:[#allocation3 + $0x180] sm:$0xff] %v6708_v3  ;;  %102 = vst [vmem:[#allocation3 + $0x188] sm:$0xff] %v6708_v3 }
  0x25   :  { %103 = vst [vmem:[#allocation3 + $0x190] sm:$0xff] %v6708_v3  ;;  %104 = vst [vmem:[#allocation3 + $0x198] sm:$0xff] %v6708_v3 }
  0x26   :  { %105 = vst [vmem:[#allocation3 + $0x1a0] sm:$0xff] %v6708_v3  ;;  %106 = vst [vmem:[#allocation3 + $0x1a8] sm:$0xff] %v6708_v3 }
  0x27   :  { %107 = vst [vmem:[#allocation3 + $0x1b0] sm:$0xff] %v6708_v3  ;;  %108 = vst [vmem:[#allocation3 + $0x1b8] sm:$0xff] %v6708_v3 }
  0x28   :  { %109 = vst [vmem:[#allocation3 + $0x1c0] sm:$0xff] %v6708_v3  ;;  %110 = vst [vmem:[#allocation3 + $0x1c8] sm:$0xff] %v6708_v3 }
  0x29   :  { %111 = vst [vmem:[#allocation3 + $0x1d0] sm:$0xff] %v6708_v3  ;;  %112 = vst [vmem:[#allocation3 + $0x1d8] sm:$0xff] %v6708_v3 }
  0x2a   :  { %113 = vst [vmem:[#allocation3 + $0x1e0] sm:$0xff] %v6708_v3  ;;  %114 = vst [vmem:[#allocation3 + $0x1e8] sm:$0xff] %v6708_v3 }
  0x2b   :  { %115 = vst [vmem:[#allocation3 + $0x1f0] sm:$0xff] %v6708_v3  ;;  %116 = vst [vmem:[#allocation3 + $0x1f8] sm:$0xff] %v6708_v3 }
  0x2c   :  { %117 = vst [vmem:[#allocation3 + $0x200] sm:$0xff] %v6708_v3  ;;  %118 = vst [vmem:[#allocation3 + $0x208] sm:$0xff] %v6708_v3 }
  0x2d   :  { %119 = vst [vmem:[#allocation3 + $0x210] sm:$0xff] %v6708_v3  ;;  %120 = vst [vmem:[#allocation3 + $0x218] sm:$0xff] %v6708_v3 }
  0x2e   :  { %121 = vst [vmem:[#allocation3 + $0x220] sm:$0xff] %v6708_v3  ;;  %122 = vst [vmem:[#allocation3 + $0x228] sm:$0xff] %v6708_v3 }
  0x2f   :  { %123 = vst [vmem:[#allocation3 + $0x230] sm:$0xff] %v6708_v3  ;;  %124 = vst [vmem:[#allocation3 + $0x238] sm:$0xff] %v6708_v3 }
  0x30   :  { %125 = vst [vmem:[#allocation3 + $0x240] sm:$0xff] %v6708_v3  ;;  %126 = vst [vmem:[#allocation3 + $0x248] sm:$0xff] %v6708_v3 }
  0x31   :  { %127 = vst [vmem:[#allocation3 + $0x250] sm:$0xff] %v6708_v3  ;;  %128 = vst [vmem:[#allocation3 + $0x258] sm:$0xff] %v6708_v3 }
  0x32   :  { %129 = vst [vmem:[#allocation3 + $0x260] sm:$0xff] %v6708_v3  ;;  %130 = vst [vmem:[#allocation3 + $0x268] sm:$0xff] %v6708_v3 }
  0x33   :  { %131 = vst [vmem:[#allocation3 + $0x270] sm:$0xff] %v6708_v3  ;;  %132 = vst [vmem:[#allocation3 + $0x278] sm:$0xff] %v6708_v3 }
  0x34   :  { %133 = vst [vmem:[#allocation3 + $0x280] sm:$0xff] %v6708_v3  ;;  %134 = vst [vmem:[#allocation3 + $0x288] sm:$0xff] %v6708_v3 }
  0x35   :  { %135 = vst [vmem:[#allocation3 + $0x290] sm:$0xff] %v6708_v3  ;;  %136 = vst [vmem:[#allocation3 + $0x298] sm:$0xff] %v6708_v3 }
  0x36   :  { %137 = vst [vmem:[#allocation3 + $0x2a0] sm:$0xff] %v6708_v3  ;;  %138 = vst [vmem:[#allocation3 + $0x2a8] sm:$0xff] %v6708_v3 }
  0x37   :  { %139 = vst [vmem:[#allocation3 + $0x2b0] sm:$0xff] %v6708_v3  ;;  %140 = vst [vmem:[#allocation3 + $0x2b8] sm:$0xff] %v6708_v3 }
  0x38   :  { %141 = vst [vmem:[#allocation3 + $0x2c0] sm:$0xff] %v6708_v3  ;;  %142 = vst [vmem:[#allocation3 + $0x2c8] sm:$0xff] %v6708_v3 }
  0x39   :  { %143 = vst [vmem:[#allocation3 + $0x2d0] sm:$0xff] %v6708_v3  ;;  %144 = vst [vmem:[#allocation3 + $0x2d8] sm:$0xff] %v6708_v3 }
  0x3a   :  { %145 = vst [vmem:[#allocation3 + $0x2e0] sm:$0xff] %v6708_v3  ;;  %146 = vst [vmem:[#allocation3 + $0x2e8] sm:$0xff] %v6708_v3 }
  0x3b   :  { %147 = vst [vmem:[#allocation3 + $0x2f0] sm:$0xff] %v6708_v3  ;;  %148 = vst [vmem:[#allocation3 + $0x2f8] sm:$0xff] %v6708_v3 }
  0x3c   :  { %149 = vst [vmem:[#allocation3 + $0x300] sm:$0xff] %v6708_v3  ;;  %150 = vst [vmem:[#allocation3 + $0x308] sm:$0xff] %v6708_v3 }
  0x3d   :  { %151 = vst [vmem:[#allocation3 + $0x310] sm:$0xff] %v6708_v3  ;;  %152 = vst [vmem:[#allocation3 + $0x318] sm:$0xff] %v6708_v3 }
  0x3e   :  { %153 = vst [vmem:[#allocation3 + $0x320] sm:$0xff] %v6708_v3  ;;  %154 = vst [vmem:[#allocation3 + $0x328] sm:$0xff] %v6708_v3 }
  0x3f   :  { %155 = vst [vmem:[#allocation3 + $0x330] sm:$0xff] %v6708_v3  ;;  %156 = vst [vmem:[#allocation3 + $0x338] sm:$0xff] %v6708_v3 }
  0x40   :  { %157 = vst [vmem:[#allocation3 + $0x340] sm:$0xff] %v6708_v3  ;;  %158 = vst [vmem:[#allocation3 + $0x348] sm:$0xff] %v6708_v3 }
  0x41   :  { %159 = vst [vmem:[#allocation3 + $0x350] sm:$0xff] %v6708_v3  ;;  %160 = vst [vmem:[#allocation3 + $0x358] sm:$0xff] %v6708_v3 }
  0x42   :  { %161 = vst [vmem:[#allocation3 + $0x360] sm:$0xff] %v6708_v3  ;;  %162 = vst [vmem:[#allocation3 + $0x368] sm:$0xff] %v6708_v3 }
  0x43   :  { %163 = vst [vmem:[#allocation3 + $0x370] sm:$0xff] %v6708_v3  ;;  %164 = vst [vmem:[#allocation3 + $0x378] sm:$0xff] %v6708_v3 }
  0x44   :  { %165 = vst [vmem:[#allocation3 + $0x380] sm:$0xff] %v6708_v3  ;;  %166 = vst [vmem:[#allocation3 + $0x388] sm:$0xff] %v6708_v3 }
  0x45   :  { %167 = vst [vmem:[#allocation3 + $0x390] sm:$0xff] %v6708_v3  ;;  %168 = vst [vmem:[#allocation3 + $0x398] sm:$0xff] %v6708_v3 }
  0x46   :  { %169 = vst [vmem:[#allocation3 + $0x3a0] sm:$0xff] %v6708_v3  ;;  %170 = vst [vmem:[#allocation3 + $0x3a8] sm:$0xff] %v6708_v3 }
  0x47   :  { %171 = vst [vmem:[#allocation3 + $0x3b0] sm:$0xff] %v6708_v3  ;;  %172 = vst [vmem:[#allocation3 + $0x3b8] sm:$0xff] %v6708_v3 }
  0x48   :  { %173 = vst [vmem:[#allocation3 + $0x3c0] sm:$0xff] %v6708_v3  ;;  %174 = vst [vmem:[#allocation3 + $0x3c8] sm:$0xff] %v6708_v3 }
  0x49   :  { %175 = vst [vmem:[#allocation3 + $0x3d0] sm:$0xff] %v6708_v3  ;;  %176 = vst [vmem:[#allocation3 + $0x3d8] sm:$0xff] %v6708_v3 }
  0x4a   :  { %177 = vst [vmem:[#allocation3 + $0x3e0] sm:$0xff] %v6708_v3  ;;  %178 = vst [vmem:[#allocation3 + $0x3e8] sm:$0xff] %v6708_v3 }
  0x4b   :  { %179 = vst [vmem:[#allocation3 + $0x3f0] sm:$0xff] %v6708_v3  ;;  %180 = vst [vmem:[#allocation3 + $0x3f8] sm:$0xff] %v6708_v3 }
  0x4c   :  { %181 = vst [vmem:[#allocation3 + $0x400] sm:$0xff] %v6708_v3  ;;  %182 = vst [vmem:[#allocation3 + $0x408] sm:$0xff] %v6708_v3 }
  0x4d   :  { %183 = vst [vmem:[#allocation3 + $0x410] sm:$0xff] %v6708_v3  ;;  %184 = vst [vmem:[#allocation3 + $0x418] sm:$0xff] %v6708_v3 }
  0x4e   :  { %185 = vst [vmem:[#allocation3 + $0x420] sm:$0xff] %v6708_v3  ;;  %186 = vst [vmem:[#allocation3 + $0x428] sm:$0xff] %v6708_v3 }
  0x4f   :  { %187 = vst [vmem:[#allocation3 + $0x430] sm:$0xff] %v6708_v3  ;;  %188 = vst [vmem:[#allocation3 + $0x438] sm:$0xff] %v6708_v3 }
  0x50   :  { %189 = vst [vmem:[#allocation3 + $0x440] sm:$0xff] %v6708_v3  ;;  %190 = vst [vmem:[#allocation3 + $0x448] sm:$0xff] %v6708_v3 }
  0x51   :  { %191 = vst [vmem:[#allocation3 + $0x450] sm:$0xff] %v6708_v3  ;;  %192 = vst [vmem:[#allocation3 + $0x458] sm:$0xff] %v6708_v3 }
  0x52   :  { %193 = vst [vmem:[#allocation3 + $0x460] sm:$0xff] %v6708_v3  ;;  %194 = vst [vmem:[#allocation3 + $0x468] sm:$0xff] %v6708_v3 }
  0x53   :  { %195 = vst [vmem:[#allocation3 + $0x470] sm:$0xff] %v6708_v3  ;;  %196 = vst [vmem:[#allocation3 + $0x478] sm:$0xff] %v6708_v3 }
  0x54   :  { %197 = vst [vmem:[#allocation3 + $0x480] sm:$0xff] %v6708_v3  ;;  %198 = vst [vmem:[#allocation3 + $0x488] sm:$0xff] %v6708_v3 }
  0x55   :  { %199 = vst [vmem:[#allocation3 + $0x490] sm:$0xff] %v6708_v3  ;;  %200 = vst [vmem:[#allocation3 + $0x498] sm:$0xff] %v6708_v3 }
  0x56   :  { %201 = vst [vmem:[#allocation3 + $0x4a0] sm:$0xff] %v6708_v3  ;;  %202 = vst [vmem:[#allocation3 + $0x4a8] sm:$0xff] %v6708_v3 }
  0x57   :  { %203 = vst [vmem:[#allocation3 + $0x4b0] sm:$0xff] %v6708_v3  ;;  %204 = vst [vmem:[#allocation3 + $0x4b8] sm:$0xff] %v6708_v3 }
  0x58   :  { %205 = vst [vmem:[#allocation3 + $0x4c0] sm:$0xff] %v6708_v3  ;;  %206 = vst [vmem:[#allocation3 + $0x4c8] sm:$0xff] %v6708_v3 }
  0x59   :  { %207 = vst [vmem:[#allocation3 + $0x4d0] sm:$0xff] %v6708_v3  ;;  %208 = vst [vmem:[#allocation3 + $0x4d8] sm:$0xff] %v6708_v3 }
  0x5a   :  { %209 = vst [vmem:[#allocation3 + $0x4e0] sm:$0xff] %v6708_v3  ;;  %210 = vst [vmem:[#allocation3 + $0x4e8] sm:$0xff] %v6708_v3 }
  0x5b   :  { %211 = vst [vmem:[#allocation3 + $0x4f0] sm:$0xff] %v6708_v3  ;;  %212 = vst [vmem:[#allocation3 + $0x4f8] sm:$0xff] %v6708_v3 }
  0x5c   :  { %213 = vst [vmem:[#allocation3 + $0x500] sm:$0xff] %v6708_v3  ;;  %214 = vst [vmem:[#allocation3 + $0x508] sm:$0xff] %v6708_v3 }
  0x5d   :  { %215 = vst [vmem:[#allocation3 + $0x510] sm:$0xff] %v6708_v3  ;;  %216 = vst [vmem:[#allocation3 + $0x518] sm:$0xff] %v6708_v3 }
  0x5e   :  { %217 = vst [vmem:[#allocation3 + $0x520] sm:$0xff] %v6708_v3  ;;  %218 = vst [vmem:[#allocation3 + $0x528] sm:$0xff] %v6708_v3 }
  0x5f   :  { %219 = vst [vmem:[#allocation3 + $0x530] sm:$0xff] %v6708_v3  ;;  %220 = vst [vmem:[#allocation3 + $0x538] sm:$0xff] %v6708_v3 }
  0x60   :  { %221 = vst [vmem:[#allocation3 + $0x540] sm:$0xff] %v6708_v3  ;;  %222 = vst [vmem:[#allocation3 + $0x548] sm:$0xff] %v6708_v3 }
  0x61   :  { %223 = vst [vmem:[#allocation3 + $0x550] sm:$0xff] %v6708_v3  ;;  %v1052_v3 = vsub.s32 3, %v7162_v63 }
  0x63   :  { %v7189_v10 = vrot.slane %v29_v1, %v1052_v3  ;;  %v7267_v58 = vrot.slane %v30_v27, %v1052_v3 }
  0xdc   :  { %v7187_v9 = vpop.f32.mrb[0].mxu0 }
  0xdd   :  { %v1133_v13 = vmul.f32 %v7178_v5, %v7187_v9  ;;  %v7195_v14 = vpop.f32.mrb[1].mxu0 }
  0xde   :  { %v1134_v16 = vmul.f32 %v7182_v7, %v7195_v14 }
  0xdf   :  { %v7201_v17 = vpop.f32.mrb[0].mxu1  ;;  %v1153_v18 = vsel %vm1152_vm5, %v1133_v13, 0.0 }
  0xe0   :  { %v1135_v19 = vmul.f32 %v7185_v8, %v7201_v17  ;;  %v7206_v20 = vpop.f32.mrb[1].mxu1  ;;  %v1154_v22 = vsel %vm1152_vm5, %v1134_v16, 0.0 }
  0xe1   :  { %v1136_v23 = vmul.f32 %v7189_v10, %v7206_v20  ;;  %v1155_v28 = vadd.f32 %v1154_v22, %v1153_v18 }
  0xe2   :  { %v1156_v29 = vsel %vm1152_vm5, %v1135_v19, 0.0 }
  0xe3   :  { %v7212_v24 = vpop.f32.mrb[2].mxu0  ;;  %v1157_v33 = vadd.f32 %v1156_v29, %v1155_v28  ;;  %v1158_v37 = vsel %vm1152_vm5, %v1136_v23, 0.0  ;;  %v7285_v28 = vrot.slane %v30_v27, %v1060_v11  ;;  %v7287_v29 = vrot.slane %v30_v27, %v1064_v12 }
  0xe4   :  { %v1137_v30 = vmul.f32 %v7197_v15, %v7212_v24  ;;  %v7224_v31 = vpop.f32.mrb[3].mxu0 }
  0xe5   :  { %v7226_v32 = vpop.f32.mrb[2].mxu1  ;;  %v1138_v39 = vmul.f32 %v7214_v25, %v7224_v31  ;;  %v1159_v42 = vadd.f32 %v1158_v37, %v1157_v33 }
  0xe6   :  { %v7228_v34 = vpop.f32.mrb[3].mxu1  ;;  %v1160_v38 = vsel %vm1152_vm5, %v1137_v30, 0.0  ;;  %v1139_v40 = vmul.f32 %v7216_v26, %v7226_v32 }
  0xe7   :  { %v7241_v41 = vpop.f32.mrb[4].mxu0  ;;  %v1161_v45 = vadd.f32 %v1160_v38, %v1159_v42  ;;  %v1162_v49 = vsel %vm1152_vm5, %v1138_v39, 0.0  ;;  %v1140_v51 = vmul.f32 %v7230_v35, %v7228_v34 }
  0xe8   :  { %v7243_v43 = vpop.f32.mrb[5].mxu0  ;;  %v1164_v50 = vsel %vm1152_vm5, %v1139_v40, 0.0  ;;  %v1141_v52 = vmul.f32 %v7233_v36, %v7241_v41  ;;  %v31_v40 = vld [vmem:[%s9444_s1 + $0x10] sm:$0x7] }
  0xe9   :  { %v7245_v44 = vpop.f32.mrb[4].mxu1  ;;  %v1163_v54 = vadd.f32 %v1162_v49, %v1161_v45  ;;  %v1166_v1 = vsel %vm1152_vm5, %v1140_v51, 0.0  ;;  %v1142_v16 = vmul.f32 %v7248_v46, %v7243_v43  ;;  %v7298_v45 = vrot.slane %v30_v27, %v1068_v21 }
  0xea   :  { %v7253_v48 = vpop.f32.mrb[5].mxu1  ;;  %v1168_v13 = vsel %vm1152_vm5, %v1141_v52, 0.0  ;;  %v1143_v18 = vmul.f32 %v7251_v47, %v7245_v44  ;;  %v7301_v12 = vrot.slane %v31_v40, %v7165_v0  ;;  %v7313_v21 = vrot.slane %v31_v40, %v7174_v4 }
  0xeb   :  { %v7261_v53 = vpop.f32.mrb[6].mxu0  ;;  %v1165_v57 = vadd.f32 %v1164_v50, %v1163_v54  ;;  %v1170_v33 = vsel %vm1152_vm5, %v1142_v16, 0.0  ;;  %v1144_v38 = vmul.f32 %v7267_v58, %v7253_v48 }
  0xec   :  { %v7263_v55 = vpop.f32.mrb[7].mxu0  ;;  %v1172_v37 = vsel %vm1152_vm5, %v1143_v18, 0.0  ;;  %v1145_v39 = vmul.f32 %v7269_v59, %v7261_v53 }
  0xed   :  { %v7265_v56 = vpop.f32.mrb[6].mxu1  ;;  %v1167_v22 = vadd.f32 %v1166_v1, %v1165_v57  ;;  %v1174_v49 = vsel %vm1152_vm5, %v1144_v38, 0.0  ;;  %v1146_v51 = vmul.f32 %v7285_v28, %v7263_v55  ;;  %v7310_v1 = vrot.slane %v31_v40, %v7171_v2 }
  0xee   :  { %v7271_v62 = vpop.f32.mrb[7].mxu1  ;;  %v1176_v50 = vsel %vm1152_vm5, %v1145_v39, 0.0  ;;  %v1147_v52 = vmul.f32 %v7287_v29, %v7265_v56 }
  0xef   :  { %v7279_v19 = vpop.f32.mrb[8].mxu0  ;;  %v1169_v6 = vadd.f32 %v1168_v13, %v1167_v22  ;;  %v1178_v0 = vsel %vm1152_vm5, %v1146_v51, 0.0  ;;  %v1148_v13 = vmul.f32 %v7298_v45, %v7271_v62 }
  0xf0   :  { %v7281_v23 = vpop.f32.mrb[9].mxu0  ;;  %v1180_v27 = vsel %vm1152_vm5, %v1147_v52, 0.0  ;;  %v1149_v16 = vmul.f32 %v7301_v12, %v7279_v19 }
  0xf1   :  { %v7283_v3 = vpop.f32.mrb[8].mxu1  ;;  %v1171_v42 = vadd.f32 %v1170_v33, %v1169_v6  ;;  %v1182_v6 = vsel %vm1152_vm5, %v1148_v13, 0.0  ;;  %v1150_v4 = vmul.f32 %v7310_v1, %v7281_v23 }
  0xf2   :  { %v6260_v30 = vpop.f32.mrb[9].mxu1  ;;  %v1184_v2 = vsel %vm1152_vm5, %v1149_v16, 0.0 }
  0xf3   :  { %v1173_v11 = vadd.f32 %v1172_v37, %v1171_v42  ;;  %v1151_v30 = vmul.f32 %v7313_v21, %v7283_v3  ;;  %v1186_v38 = vsel %vm1152_vm5, %v1150_v4, 0.0 }
  0xf5   :  { %v1175_v54 = vadd.f32 %v1174_v49, %v1173_v11  ;;  %v1188_v39 = vsel %vm1152_vm5, %v1151_v30, 0.0  ;;  %v7332_v11 = vld [vmem:[%s9445_s3] sm:$0x3f]  ;;  %s6714_s3 = smov 35  }
  0xf6   :  { %v1855_v49 = vld [vmem:[#allocation2] sm:$0x3f] }
  0xf7   :  { %v1177_v57 = vadd.f32 %v1176_v50, %v1175_v54  ;;  %v6713_v50 = vmov 1  }
  0xf8   :  { %6689 = vset.pattern.permute.xlu1 %v6713_v50 }
  0xf9   :  { %v1179_v18 = vadd.f32 %v1178_v0, %v1177_v57  ;;  %1320 = vperm.xlu1 %6689, %v7332_v11  }
  0xfb   :  { %v1181_v22 = vadd.f32 %v1180_v27, %v1179_v18 }
  0xfd   :  { %v1183_v33 = vadd.f32 %v1182_v6, %v1181_v22 }
  0xff   :  { %v1185_v37 = vadd.f32 %v1184_v2, %v1183_v33 }
 0x101   :  { %v1187_v40 = vadd.f32 %v1186_v38, %v1185_v37 }
 0x103   :  { %v1189_v42 = vadd.f32 %v1188_v39, %v1187_v40 }
 0x105   :  { %1190 = vadd.xlane.f32.xlu0 %v1189_v42 }
 0x11b   :  { %1362 = vperm.xlu0 %6690, %v7332_v11  }
 0x11f   :  { %1895 = vrot.lane.b32.xlu0 %v1855_v49, %s6712_s20 }
 0x192   :  { %v1191_v51 = vpop.xlane.xlu0 %1190 }
 0x193   :  { %v7338_v52 = vmul.f32 0.00048828125, %v1191_v51 }
 0x195   :  { %v7342_v54 = vsub.f32 %v7187_v9, %v7338_v52  ;;  %v7346_v57 = vsub.f32 %v7195_v14, %v7338_v52  ;;  %v7350_v0 = vsub.f32 %v7201_v17, %v7338_v52  ;;  %v7354_v27 = vsub.f32 %v7206_v20, %v7338_v52 }
 0x196   :  { %v7362_v9 = vsub.f32 %v7212_v24, %v7338_v52  ;;  %v7368_v17 = vsub.f32 %v7224_v31, %v7338_v52  ;;  %v7374_v6 = vsub.f32 %v7226_v32, %v7338_v52  ;;  %v7380_v4 = vsub.f32 %v7228_v34, %v7338_v52 }
 0x197   :  { %v1212_v13 = vmul.f32 %v7342_v54, %v7178_v5  ;;  %v1213_v16 = vmul.f32 %v7346_v57, %v7182_v7  ;;  %v1214_v14 = vmul.f32 %v7350_v0, %v7185_v8  ;;  %v1215_v20 = vmul.f32 %v7354_v27, %v7189_v10 }
 0x198   :  { %v1216_v24 = vmul.f32 %v7362_v9, %v7197_v15  ;;  %v1217_v31 = vmul.f32 %v7368_v17, %v7214_v25  ;;  %v7388_v32 = vsub.f32 %v7241_v41, %v7338_v52  ;;  %v1218_v39 = vmul.f32 %v7374_v6, %v7216_v26 }
 0x199   :  { %v1231_v18 = vmul.f32 %v1212_v13, %v1212_v13  ;;  %v1232_v22 = vmul.f32 %v1213_v16, %v1213_v16  ;;  %v1233_v2 = vmul.f32 %v1214_v14, %v1214_v14  ;;  %v1234_v30 = vmul.f32 %v1215_v20, %v1215_v20 }
 0x19a   :  { %v1235_v40 = vmul.f32 %v1216_v24, %v1216_v24  ;;  %v7395_v49 = vsub.f32 %v7243_v43, %v7338_v52  ;;  %v1219_v51 = vmul.f32 %v7380_v4, %v7230_v35  ;;  %v1236_v13 = vmul.f32 %v1217_v31, %v1217_v31 }
 0x19b   :  { %v1250_v33 = vsel %vm1152_vm5, %v1231_v18, 0.0  ;;  %v1251_v37 = vsel %vm1152_vm5, %v1232_v22, 0.0  ;;  %v1253_v34 = vsel %vm1152_vm5, %v1233_v2, 0.0  ;;  %v1255_v16 = vsel %vm1152_vm5, %v1234_v30, 0.0 }
 0x19c   :  { %v1252_v38 = vadd.f32 %v1251_v37, %v1250_v33  ;;  %v7402_v41 = vsub.f32 %v7245_v44, %v7338_v52  ;;  %v1220_v20 = vmul.f32 %v7388_v32, %v7233_v36  ;;  %v1237_v18 = vmul.f32 %v1218_v39, %v1218_v39 }
 0x19d   :  { %v1257_v22 = vsel %vm1152_vm5, %v1235_v40, 0.0  ;;  %v7409_v43 = vsub.f32 %v7253_v48, %v7338_v52  ;;  %v1221_v2 = vmul.f32 %v7395_v49, %v7248_v46  ;;  %v1238_v31 = vmul.f32 %v1219_v51, %v1219_v51 }
 0x19e   :  { %v1254_v42 = vadd.f32 %v1253_v34, %v1252_v38  ;;  %v1259_v30 = vsel %vm1152_vm5, %v1236_v13, 0.0  ;;  %v7416_v44 = vsub.f32 %v7261_v53, %v7338_v52  ;;  %v1222_v37 = vmul.f32 %v7402_v41, %v7251_v47 }
 0x19f   :  { %v1239_v38 = vmul.f32 %v1220_v20, %v1220_v20  ;;  %v1261_v39 = vsel %vm1152_vm5, %v1237_v18, 0.0  ;;  %v7423_v48 = vsub.f32 %v7263_v55, %v7338_v52  ;;  %v1223_v34 = vmul.f32 %v7409_v43, %v7267_v58 }
 0x1a0   :  { %v1256_v14 = vadd.f32 %v1255_v16, %v1254_v42  ;;  %v1240_v42 = vmul.f32 %v1221_v2, %v1221_v2  ;;  %v1263_v51 = vsel %vm1152_vm5, %v1238_v31, 0.0  ;;  %v7430_v53 = vsub.f32 %v7265_v56, %v7338_v52 }
 0x1a1   :  { %v1224_v16 = vmul.f32 %v7416_v44, %v7269_v59  ;;  %v1265_v20 = vsel %vm1152_vm5, %v1239_v38, 0.0  ;;  %v7437_v55 = vsub.f32 %v7271_v62, %v7338_v52  ;;  %v7444_v56 = vsub.f32 %v7279_v19, %v7338_v52 }
 0x1a2   :  { %v1258_v24 = vadd.f32 %v1257_v22, %v1256_v14  ;;  %v1241_v14 = vmul.f32 %v1222_v37, %v1222_v37  ;;  %v1225_v22 = vmul.f32 %v7423_v48, %v7285_v28  ;;  %v1267_v2 = vsel %vm1152_vm5, %v1240_v42, 0.0 }
 0x1a3   :  { %v7451_v62 = vsub.f32 %v7281_v23, %v7338_v52  ;;  %v7458_v19 = vsub.f32 %v7283_v3, %v7338_v52 }
 0x1a4   :  { %v1260_v33 = vadd.f32 %v1259_v30, %v1258_v24  ;;  %v1242_v24 = vmul.f32 %v1223_v34, %v1223_v34  ;;  %v1226_v30 = vmul.f32 %v7430_v53, %v7287_v29  ;;  %v1269_v37 = vsel %vm1152_vm5, %v1241_v14, 0.0 }
 0x1a5   :  { %v1229_v23 = vmul.f32 %v7451_v62, %v7310_v1 }
 0x1a6   :  { %v1262_v40 = vadd.f32 %v1261_v39, %v1260_v33  ;;  %v1243_v33 = vmul.f32 %v1224_v16, %v1224_v16  ;;  %v1227_v39 = vmul.f32 %v7437_v55, %v7298_v45  ;;  %v1271_v34 = vsel %vm1152_vm5, %v1242_v24, 0.0 }
 0x1a7   :  { %v1230_v24 = vmul.f32 %v7458_v19, %v7313_v21 }
 0x1a8   :  { %v1264_v13 = vadd.f32 %v1263_v51, %v1262_v40  ;;  %v1244_v40 = vmul.f32 %v1225_v22, %v1225_v22  ;;  %v1228_v51 = vmul.f32 %v7444_v56, %v7301_v12  ;;  %v1273_v16 = vsel %vm1152_vm5, %v1243_v33, 0.0 }
 0x1a9   :  { %v1249_v33 = vmul.f32 %v1230_v24, %v1230_v24 }
 0x1aa   :  { %v1266_v18 = vadd.f32 %v1265_v20, %v1264_v13  ;;  %v1245_v13 = vmul.f32 %v1226_v30, %v1226_v30  ;;  %v1246_v20 = vmul.f32 %v1227_v39, %v1227_v39 }
 0x1ac   :  { %v1268_v31 = vadd.f32 %v1267_v2, %v1266_v18  ;;  %v1275_v18 = vsel %vm1152_vm5, %v1244_v40, 0.0  ;;  %v1247_v2 = vmul.f32 %v1228_v51, %v1228_v51  ;;  %v1277_v3 = vsel %vm1152_vm5, %v1245_v13, 0.0  ;;  %v1579_v51 = vld [vmem:[#allocation2] sm:$0x3f] }
 0x1ad   :  { %v1279_v30 = vsel %vm1152_vm5, %v1246_v20, 0.0  ;;  %v1285_v40 = vsel %vm1152_vm5, %v1249_v33, 0.0  ;;  %v6715_v13 = vmov 0   ;;  %v2050_v20 = vld [vmem:[#allocation2 + $0xa0] sm:$0x3f] }
 0x1ae   :  { %v1270_v38 = vadd.f32 %v1269_v37, %v1268_v31  ;;  %v1248_v31 = vmul.f32 %v1229_v23, %v1229_v23  ;;  %6691 = vset.pattern.permute.xlu1 %v6715_v13  ;;  %6694 = vset.pattern.permute.xlu0 %v6715_v13  ;;  %v1717_v23 = vld [vmem:[#allocation2] sm:$0x3f] }
 0x1b0   :  { %v1272_v42 = vadd.f32 %v1271_v34, %v1270_v38  ;;  %v1281_v38 = vsel %vm1152_vm5, %v1247_v2, 0.0  ;;  %v1283_v39 = vsel %vm1152_vm5, %v1248_v31, 0.0 }
 0x1b2   :  { %v1274_v14 = vadd.f32 %v1273_v16, %v1272_v42 }
 0x1b4   :  { %v1276_v22 = vadd.f32 %v1275_v18, %v1274_v14  ;;  %v1441_v14 = vld [vmem:[#allocation2] sm:$0x3f]  ;;  %v7477_v18 = vpop.permute.xlu0 %1362 }
 0x1b5   :  { %1481 = vrot.lane.b32.xlu1 %v1441_v14, %s6714_s3 }
 0x1b6   :  { %v1278_v52 = vadd.f32 %v1277_v3, %v1276_v22 }
 0x1b8   :  { %v1280_v37 = vadd.f32 %v1279_v30, %v1278_v52  ;;  %v7479_v22 = vpop.permute.xlu0 %1895 }
 0x1b9   :  { %1619 = vrot.lane.b32.xlu1 %v1579_v51, %s6716_s21 }
 0x1ba   :  { %v1282_v34 = vadd.f32 %v1281_v38, %v1280_v37  ;;  %v7483_v37 = vpop.permute.xlu1 %1320 }
 0x1bc   :  { %v1284_v42 = vadd.f32 %v1283_v39, %v1282_v34 }
 0x1bd   :  { %1757 = vrot.lane.b32.xlu1 %v1717_v23, %s6717_s22 }
 0x1be   :  { %v1286_v16 = vadd.f32 %v1285_v40, %v1284_v42 }
 0x1c0   :  { %1287 = vadd.xlane.f32.xlu0 %v1286_v16 }
 0x1c1   :  { %2109 = vrot.lane.b32.xlu1 %v2050_v20, %s6718_s23 }
 0x227   :  { %v7485_v33 = vpop.permute.xlu1 %1481 }
 0x22b   :  { %v7487_v38 = vpop.permute.xlu1 %1619 }
 0x22f   :  { %v7489_v34 = vpop.permute.xlu1 %1757 }
 0x233   :  { %v7491_v39 = vpop.permute.xlu1 %2109 }
 0x24d   :  { %v1288_v24 = vpop.xlane.xlu0 %1287 }
 0x24e   :  { %v1289_v2 = vmul.f32 0.00048828125, %v1288_v24 }
 0x250   :  { %v1290_v3 = vmax.f32 %v1289_v2, 0.0 }
 0x252   :  { %v1291_v52 = vadd.f32 1e-05, %v1290_v3 }
 0x254   :  { %6697 = vrsqrt.f32 %v1291_v52 }
 0x25e   :  { %v6698_v31 = vpop.eup %6697 }
 0x25f   :  { %v1293_v30 = vmul.f32 %v6698_v31, %v7332_v11 }
 0x261   :  { %1296 = vperm.xlu1 %6691, %v1293_v30  }
 0x265   :  { %6692 = vset.pattern.permute.xlu1 %v6713_v50 }
 0x2e0   :  { %v7493_v42 = vpop.permute.xlu1 %1296 }
 0x2e1   :  { %v1300_v40 = vmul.f32 %v7493_v42, %v7346_v57  ;;  %v1299_v11 = vmul.f32 %v7493_v42, %v7342_v54  ;;  %v1302_v16 = vmul.f32 %v7493_v42, %v7354_v27  ;;  %v1301_v14 = vmul.f32 %v7493_v42, %v7350_v0 }
 0x2e2   :  { %v1303_v51 = vmul.f32 %v7493_v42, %v7362_v9  ;;  %v1306_v13 = vmul.f32 %v7493_v42, %v7380_v4  ;;  %v1304_v23 = vmul.f32 %v7493_v42, %v7368_v17  ;;  %v1305_v57 = vmul.f32 %v7493_v42, %v7374_v6 }
 0x2e3   :  { %v1324_v54 = vadd.f32 %v7483_v37, %v1300_v40  ;;  %v1323_v20 = vadd.f32 %v7483_v37, %v1299_v11  ;;  %v1326_v27 = vadd.f32 %v7483_v37, %v1302_v16  ;;  %v1325_v0 = vadd.f32 %v7483_v37, %v1301_v14 }
 0x2e4   :  { %v1327_v24 = vadd.f32 %v7483_v37, %v1303_v51  ;;  %v1330_v9 = vadd.f32 %v7483_v37, %v1306_v13  ;;  %v1328_v4 = vadd.f32 %v7483_v37, %v1304_v23  ;;  %v1329_v2 = vadd.f32 %v7483_v37, %v1305_v57 }
 0x2e5   :  { %vm1343_vm6 = vcmp.ge.f32.partialorder %v1324_v54, 0.0  ;;  %v1366_v17 = vmul.f32 %v7477_v18, %v1324_v54  ;;  %vm1342_vm7 = vcmp.ge.f32.partialorder %v1323_v20, 0.0  ;;  %v1365_v6 = vmul.f32 %v7477_v18, %v1323_v20 }
 0x2e6   :  { %vm1345_vm8 = vcmp.ge.f32.partialorder %v1326_v27, 0.0  ;;  %v1368_v3 = vmul.f32 %v7477_v18, %v1326_v27  ;;  %vm1344_vm9 = vcmp.ge.f32.partialorder %v1325_v0, 0.0  ;;  %v1367_v52 = vmul.f32 %v7477_v18, %v1325_v0 }
 0x2e7   :  { %v1385_v31 = vsel %vm1343_vm6, %v1324_v54, %v1366_v17  ;;  %v1384_v30 = vsel %vm1342_vm7, %v1323_v20, %v1365_v6  ;;  %vm1346_vm10 = vcmp.ge.f32.partialorder %v1327_v24, 0.0  ;;  %v1369_v40 = vmul.f32 %v7477_v18, %v1327_v24 }
 0x2e8   :  { %v1404_v11 = vmul.f32 %v1385_v31, %v7182_v7  ;;  %v1403_v16 = vmul.f32 %v1384_v30, %v7178_v5  ;;  %v1387_v14 = vsel %vm1345_vm8, %v1326_v27, %v1368_v3  ;;  %v1386_v51 = vsel %vm1344_vm9, %v1325_v0, %v1367_v52 }
 0x2e9   :  { %v1406_v13 = vmul.f32 %v1387_v14, %v7189_v10  ;;  %v1405_v23 = vmul.f32 %v1386_v51, %v7185_v8  ;;  %v1388_v57 = vsel %vm1346_vm10, %v1327_v24, %v1369_v40  ;;  %vm1349_vm11 = vcmp.ge.f32.partialorder %v1330_v9, 0.0 }
 0x2ea   :  { %1423 = vst [vmem:[#allocation2 + $0x10] sm:$0x3f] %v1404_v11  ;;  %1422 = vst [vmem:[#allocation2 + $0x8] sm:$0x3f] %v1403_v16  ;;  %v1407_v54 = vmul.f32 %v1388_v57, %v7197_v15  ;;  %v1372_v20 = vmul.f32 %v7477_v18, %v1330_v9  ;;  %vm1347_vm12 = vcmp.ge.f32.partialorder %v1328_v4, 0.0  ;;  %v1370_v17 = vmul.f32 %v7477_v18, %v1328_v4 }
 0x2eb   :  { %1425 = vst [vmem:[#allocation2 + $0x20] sm:$0x3f] %v1406_v13  ;;  %1424 = vst [vmem:[#allocation2 + $0x18] sm:$0x3f] %v1405_v23  ;;  %vm1348_vm13 = vcmp.ge.f32.partialorder %v1329_v2, 0.0  ;;  %v1371_v27 = vmul.f32 %v7477_v18, %v1329_v2  ;;  %v1307_v0 = vmul.f32 %v7493_v42, %v7388_v32  ;;  %v1308_v24 = vmul.f32 %v7493_v42, %v7395_v49 }
 0x2ec   :  { %1426 = vst [vmem:[#allocation2 + $0x28] sm:$0x3f] %v1407_v54  ;;  %v1391_v6 = vsel %vm1349_vm11, %v1330_v9, %v1372_v20  ;;  %v1389_v3 = vsel %vm1347_vm12, %v1328_v4, %v1370_v17  ;;  %v1310_v17 = vmul.f32 %v7493_v42, %v7409_v43  ;;  %v1314_v43 = vmul.f32 %v7493_v42, %v7437_v55 }
 0x2ed   :  { %v1410_v52 = vmul.f32 %v1391_v6, %v7230_v35  ;;  %v1408_v31 = vmul.f32 %v1389_v3, %v7214_v25  ;;  %v1390_v30 = vsel %vm1348_vm13, %v1329_v2, %v1371_v27  ;;  %v1331_v40 = vadd.f32 %v7483_v37, %v1307_v0 }
 0x2ee   :  { %v1409_v11 = vmul.f32 %v1390_v30, %v7216_v26  ;;  %v1332_v16 = vadd.f32 %v7483_v37, %v1308_v24  ;;  %v1334_v24 = vadd.f32 %v7483_v37, %v1310_v17  ;;  %v1309_v6 = vmul.f32 %v7493_v42, %v7402_v41 }
 0x2ef   :  { %1429 = vst [vmem:[#allocation2 + $0x40] sm:$0x3f] %v1410_v52  ;;  %1427 = vst [vmem:[#allocation2 + $0x30] sm:$0x3f] %v1408_v31  ;;  %vm1350_vm14 = vcmp.ge.f32.partialorder %v1331_v40, 0.0  ;;  %v1373_v32 = vmul.f32 %v7477_v18, %v1331_v40  ;;  %v1311_v3 = vmul.f32 %v7493_v42, %v7416_v44  ;;  %v1312_v52 = vmul.f32 %v7493_v42, %v7423_v48 }
 0x2f0   :  { %1428 = vst [vmem:[#allocation2 + $0x38] sm:$0x3f] %v1409_v11  ;;  %vm1351_vm15 = vcmp.ge.f32.partialorder %v1332_v16, 0.0  ;;  %v1374_v49 = vmul.f32 %v7477_v18, %v1332_v16  ;;  %v1376_v41 = vmul.f32 %v7477_v18, %v1334_v24  ;;  %v1333_v11 = vadd.f32 %v7483_v37, %v1309_v6 }
 0x2f1   :  { %v1719_v9 = vld [vmem:[#allocation2 + $0x10] sm:$0x3f]  ;;  %v1442_v4 = vld [vmem:[#allocation2 + $0x8] sm:$0x3f]  ;;  %v1392_v14 = vsel %vm1350_vm14, %v1331_v40, %v1373_v32  ;;  %v1313_v40 = vmul.f32 %v7493_v42, %v7430_v53  ;;  %v1315_v44 = vmul.f32 %v7493_v42, %v7444_v56  ;;  %v1335_v48 = vadd.f32 %v7483_v37, %v1311_v3 }
 0x2f2   :  { %1761 = vrot.lane.b32.xlu0 %v1719_v9, %s6717_s22  ;;  %1483 = vrot.lane.b32.xlu1 %v1442_v4, %s6714_s3  ;;  %v1411_v2 = vmul.f32 %v1392_v14, %v7233_v36  ;;  %v1393_v51 = vsel %vm1351_vm15, %v1332_v16, %v1374_v49  ;;  %v1857_v23 = vld [vmem:[#allocation2 + $0x10] sm:$0x3f]  ;;  %v1721_v54 = vld [vmem:[#allocation2 + $0x20] sm:$0x3f]  ;;  %v1580_v20 = vld [vmem:[#allocation2 + $0x8] sm:$0x3f]  ;;  %v1336_v16 = vadd.f32 %v7483_v37, %v1312_v52 }
 0x2f3   :  { %v1412_v13 = vmul.f32 %v1393_v51, %v7248_v46  ;;  %v1443_v57 = vld [vmem:[#allocation2 + $0x10] sm:$0x3f]  ;;  %v1859_v27 = vld [vmem:[#allocation2 + $0x20] sm:$0x3f]  ;;  %v2033_v31 = vld [vmem:[#allocation2 + $0x18] sm:$0x3f]  ;;  %v1316_v55 = vmul.f32 %v7493_v42, %v7451_v62  ;;  %v1338_v49 = vadd.f32 %v7483_v37, %v1314_v43  ;;  %v1337_v9 = vadd.f32 %v7483_v37, %v1313_v40 }
 0x2f4   :  { %1430 = vst [vmem:[#allocation2 + $0x48] sm:$0x3f] %v1411_v2  ;;  %v1581_v0 = vld [vmem:[#allocation2 + $0x10] sm:$0x3f]  ;;  %v1444_v30 = vld [vmem:[#allocation2 + $0x18] sm:$0x3f]  ;;  %v1375_v56 = vmul.f32 %v7477_v18, %v1333_v11  ;;  %v1339_v14 = vadd.f32 %v7483_v37, %v1315_v44  ;;  %v1377_v62 = vmul.f32 %v7477_v18, %v1335_v48  ;;  %v1378_v51 = vmul.f32 %v7477_v18, %v1336_v16 }
 0x2f5   :  { %1431 = vst [vmem:[#allocation2 + $0x50] sm:$0x3f] %v1412_v13  ;;  %v2034_v32 = vld [vmem:[#allocation2 + $0x20] sm:$0x3f]  ;;  %vm1353_vm0 = vcmp.ge.f32.partialorder %v1334_v24, 0.0  ;;  %v1340_v13 = vadd.f32 %v7483_v37, %v1316_v55  ;;  %vm1352_vm1 = vcmp.ge.f32.partialorder %v1333_v11, 0.0  ;;  %v1379_v17 = vmul.f32 %v7477_v18, %v1337_v9 }
 0x2f6   :  { %1899 = vrot.lane.b32.xlu0 %v1857_v23, %s6712_s20  ;;  %1485 = vrot.lane.b32.xlu1 %v1443_v57, %s6714_s3  ;;  %v1445_v53 = vld [vmem:[#allocation2 + $0x20] sm:$0x3f]  ;;  %v1395_v4 = vsel %vm1353_vm0, %v1334_v24, %v1376_v41  ;;  %v1317_v23 = vmul.f32 %v7493_v42, %v7458_v19  ;;  %v2170_v57 = vld [vmem:[#allocation2 + $0x10] sm:$0x3f]  ;;  %vm1354_vm2 = vcmp.ge.f32.partialorder %v1335_v48, 0.0  ;;  %vm1355_vm3 = vcmp.ge.f32.partialorder %v1336_v16, 0.0 }
 0x2f7   :  { %v1414_v2 = vmul.f32 %v1395_v4, %v7267_v58  ;;  %v1396_v42 = vsel %vm1354_vm2, %v1335_v48, %v1377_v62  ;;  %v1994_v24 = vld [vmem:[#allocation2 + $0x10] sm:$0x3f]  ;;  %v1397_v6 = vsel %vm1355_vm3, %v1336_v16, %v1378_v51  ;;  %v1382_v3 = vmul.f32 %v7477_v18, %v1340_v13  ;;  %v1996_v43 = vld [vmem:[#allocation2 + $0x20] sm:$0x3f]  ;;  %v1995_v40 = vld [vmem:[#allocation2 + $0x18] sm:$0x3f] }
 0x2f8   :  { %v1415_v52 = vmul.f32 %v1396_v42, %v7269_v59  ;;  %2013 = vst [vmem:[#allocation3 + $0x268] sm:$0x3f] %v1994_v24  ;;  %v1341_v41 = vadd.f32 %v7483_v37, %v1317_v23  ;;  %v1583_v44 = vld [vmem:[#allocation2 + $0x20] sm:$0x3f]  ;;  %2015 = vst [vmem:[#allocation3 + $0x278] sm:$0x3f] %v1996_v43 }
 0x2f9   :  { %1433 = vst [vmem:[#allocation2 + $0x60] sm:$0x3f] %v1414_v2  ;;  %2014 = vst [vmem:[#allocation3 + $0x270] sm:$0x3f] %v1995_v40  ;;  %vm1357_vm5 = vcmp.ge.f32.partialorder %v1338_v49, 0.0  ;;  %vm1356_vm6 = vcmp.ge.f32.partialorder %v1337_v9, 0.0 }
 0x2fa   :  { %1765 = vrot.lane.b32.xlu0 %v1721_v54, %s6717_s22  ;;  %1621 = vrot.lane.b32.xlu1 %v1580_v20, %s6716_s21  ;;  %v1582_v54 = vld [vmem:[#allocation2 + $0x18] sm:$0x3f]  ;;  %v1380_v20 = vmul.f32 %v7477_v18, %v1338_v49  ;;  %1434 = vst [vmem:[#allocation2 + $0x68] sm:$0x3f] %v1415_v52  ;;  %v1398_v16 = vsel %vm1356_vm6, %v1337_v9, %v1379_v17  ;;  %vm1358_vm7 = vcmp.ge.f32.partialorder %v1339_v14, 0.0  ;;  %vm1359_vm8 = vcmp.ge.f32.partialorder %v1340_v13, 0.0 }
 0x2fb   :  { %v1417_v55 = vmul.f32 %v1398_v16, %v7287_v29  ;;  %v1998_v4 = vld [vmem:[#allocation2 + $0x30] sm:$0x3f]  ;;  %v2000_v2 = vld [vmem:[#allocation2 + $0x40] sm:$0x3f]  ;;  %v2169_v9 = vld [vmem:[#allocation2 + $0x8] sm:$0x3f] }
 0x2fc   :  { %v1399_v48 = vsel %vm1357_vm5, %v1338_v49, %v1380_v20  ;;  %2017 = vst [vmem:[#allocation3 + $0x288] sm:$0x3f] %v1998_v4  ;;  %2019 = vst [vmem:[#allocation3 + $0x298] sm:$0x3f] %v2000_v2  ;;  %v1383_v49 = vmul.f32 %v7477_v18, %v1341_v41  ;;  %v1718_v23 = vld [vmem:[#allocation2 + $0x8] sm:$0x3f] }
 0x2fd   :  { %v1418_v37 = vmul.f32 %v1399_v48, %v7298_v45  ;;  %1436 = vst [vmem:[#allocation2 + $0x78] sm:$0x3f] %v1417_v55  ;;  %vm1360_vm9 = vcmp.ge.f32.partialorder %v1341_v41, 0.0  ;;  %v2172_v20 = vld [vmem:[#allocation2 + $0x20] sm:$0x3f]  ;;  %vm1521_vm10 = vcmask 285696  }
 0x2fe   :  { %1903 = vrot.lane.b32.xlu0 %v1859_v27, %s6712_s20  ;;  %1623 = vrot.lane.b32.xlu1 %v1581_v0, %s6716_s21  ;;  %v1394_v27 = vsel %vm1352_vm1, %v1333_v11, %v1375_v56  ;;  %v1381_v0 = vmul.f32 %v7477_v18, %v1339_v14  ;;  %v2308_v11 = vld [vmem:[#allocation2 + $0x10] sm:$0x3f]  ;;  %v1997_v56 = vld [vmem:[#allocation2 + $0x28] sm:$0x3f]  ;;  %v1858_v42 = vld [vmem:[#allocation2 + $0x18] sm:$0x3f] }
 0x2ff   :  { %v1413_v19 = vmul.f32 %v1394_v27, %v7251_v47  ;;  %2016 = vst [vmem:[#allocation3 + $0x280] sm:$0x3f] %v1997_v56  ;;  %1437 = vst [vmem:[#allocation2 + $0x80] sm:$0x3f] %v1418_v37  ;;  %v1856_v18 = vld [vmem:[#allocation2 + $0x8] sm:$0x3f] }
 0x300   :  { %v2310_v27 = vld [vmem:[#allocation2 + $0x20] sm:$0x3f]  ;;  %v1584_v24 = vld [vmem:[#allocation2 + $0x28] sm:$0x3f]  ;;  %v2171_v40 = vld [vmem:[#allocation2 + $0x18] sm:$0x3f] }
 0x301   :  { %1432 = vst [vmem:[#allocation2 + $0x58] sm:$0x3f] %v1413_v19  ;;  %v1446_v19 = vld [vmem:[#allocation2 + $0x28] sm:$0x3f]  ;;  %v1449_v43 = vld [vmem:[#allocation2 + $0x40] sm:$0x3f] }
 0x302   :  { %2075 = vrot.lane.b32.xlu0 %v2033_v31, %s6718_s23  ;;  %1487 = vrot.lane.b32.xlu1 %v1444_v30, %s6714_s3  ;;  %v1416_v31 = vmul.f32 %v1397_v6, %v7285_v28  ;;  %v1993_v30 = vld [vmem:[#allocation2 + $0x8] sm:$0x3f]  ;;  %v2032_v6 = vld [vmem:[#allocation2 + $0x10] sm:$0x3f]  ;;  %v1587_v4 = vld [vmem:[#allocation2 + $0x40] sm:$0x3f] }
 0x303   :  { %2012 = vst [vmem:[#allocation3 + $0x260] sm:$0x3f] %v1993_v30  ;;  %v2031_v52 = vld [vmem:[#allocation2 + $0x8] sm:$0x3f]  ;;  %v2309_v56 = vld [vmem:[#allocation2 + $0x18] sm:$0x3f] }
 0x304   :  { %1435 = vst [vmem:[#allocation2 + $0x70] sm:$0x3f] %v1416_v31  ;;  %v2445_v31 = vld [vmem:[#allocation2 + $0x8] sm:$0x3f]  ;;  %v2007_v37 = vld [vmem:[#allocation2 + $0x78] sm:$0x3f] }
 0x305   :  { %v2035_v30 = vld [vmem:[#allocation2 + $0x28] sm:$0x3f]  ;;  %2026 = vst [vmem:[#allocation3 + $0x2d0] sm:$0x3f] %v2007_v37  ;;  %v1723_v2 = vld [vmem:[#allocation2 + $0x30] sm:$0x3f] }
 0x306   :  { %2077 = vrot.lane.b32.xlu0 %v2034_v32, %s6718_s23  ;;  %1489 = vrot.lane.b32.xlu1 %v1445_v53, %s6714_s3  ;;  %v1400_v32 = vsel %vm1358_vm7, %v1339_v14, %v1381_v0  ;;  %v1401_v53 = vsel %vm1359_vm8, %v1340_v13, %v1382_v3  ;;  %v1999_v14 = vld [vmem:[#allocation2 + $0x38] sm:$0x3f]  ;;  %v2002_v13 = vld [vmem:[#allocation2 + $0x50] sm:$0x3f]  ;;  %v2005_v48 = vld [vmem:[#allocation2 + $0x68] sm:$0x3f] }
 0x307   :  { %v1419_v62 = vmul.f32 %v1400_v32, %v7301_v12  ;;  %v1420_v51 = vmul.f32 %v1401_v53, %v7310_v1  ;;  %2018 = vst [vmem:[#allocation3 + $0x290] sm:$0x3f] %v1999_v14  ;;  %2021 = vst [vmem:[#allocation3 + $0x2a8] sm:$0x3f] %v2002_v13  ;;  %v1720_v0 = vld [vmem:[#allocation2 + $0x18] sm:$0x3f] }
 0x308   :  { %v2446_v3 = vld [vmem:[#allocation2 + $0x10] sm:$0x3f]  ;;  %v2008_v16 = vld [vmem:[#allocation2 + $0x80] sm:$0x3f]  ;;  %2024 = vst [vmem:[#allocation3 + $0x2c0] sm:$0x3f] %v2005_v48 }
 0x309   :  { %1438 = vst [vmem:[#allocation2 + $0x88] sm:$0x3f] %v1419_v62  ;;  %1439 = vst [vmem:[#allocation2 + $0x90] sm:$0x3f] %v1420_v51  ;;  %v2307_v62 = vld [vmem:[#allocation2 + $0x8] sm:$0x3f] }
 0x30a   :  { %2211 = vrot.lane.b32.xlu0 %v2170_v57, %s6719_s24  ;;  %1625 = vrot.lane.b32.xlu1 %v1582_v54, %s6716_s21  ;;  %v2001_v57 = vld [vmem:[#allocation2 + $0x48] sm:$0x3f]  ;;  %v1402_v54 = vsel %vm1360_vm9, %v1341_v41, %v1383_v49  ;;  %v2004_v41 = vld [vmem:[#allocation2 + $0x60] sm:$0x3f]  ;;  %2027 = vst [vmem:[#allocation3 + $0x2d8] sm:$0x3f] %v2008_v16 }
 0x30b   :  { %2020 = vst [vmem:[#allocation3 + $0x2a0] sm:$0x3f] %v2001_v57  ;;  %v1421_v17 = vmul.f32 %v1402_v54, %v7313_v21  ;;  %2023 = vst [vmem:[#allocation3 + $0x2b8] sm:$0x3f] %v2004_v41  ;;  %v1861_v51 = vld [vmem:[#allocation2 + $0x30] sm:$0x3f] }
 0x30c   :  { %v2173_v49 = vld [vmem:[#allocation2 + $0x28] sm:$0x3f]  ;;  %v1725_v14 = vld [vmem:[#allocation2 + $0x40] sm:$0x3f]  ;;  %v1447_v13 = vld [vmem:[#allocation2 + $0x30] sm:$0x3f] }
 0x30d   :  { %1440 = vst [vmem:[#allocation2 + $0x98] sm:$0x3f] %v1421_v17  ;;  %v1863_v57 = vld [vmem:[#allocation2 + $0x40] sm:$0x3f]  ;;  %v1585_v54 = vld [vmem:[#allocation2 + $0x30] sm:$0x3f] }
 0x30e   :  { %2349 = vrot.lane.b32.xlu0 %v2308_v11, %s6720_s25  ;;  %1627 = vrot.lane.b32.xlu1 %v1583_v44, %s6716_s21  ;;  %v2003_v11 = vld [vmem:[#allocation2 + $0x58] sm:$0x3f]  ;;  %v2006_v44 = vld [vmem:[#allocation2 + $0x70] sm:$0x3f]  ;;  %v2039_v17 = vld [vmem:[#allocation2 + $0x48] sm:$0x3f] }
 0x30f   :  { %2022 = vst [vmem:[#allocation3 + $0x2b0] sm:$0x3f] %v2003_v11  ;;  %2025 = vst [vmem:[#allocation3 + $0x2c8] sm:$0x3f] %v2006_v44  ;;  %v1589_v44 = vld [vmem:[#allocation2 + $0x50] sm:$0x3f] }
 0x310   :  { %v2010_v55 = vld [vmem:[#allocation2 + $0x90] sm:$0x3f]  ;;  %v2009_v32 = vld [vmem:[#allocation2 + $0x88] sm:$0x3f]  ;;  %v1862_v48 = vld [vmem:[#allocation2 + $0x38] sm:$0x3f] }
 0x311   :  { %2029 = vst [vmem:[#allocation3 + $0x2e8] sm:$0x3f] %v2010_v55  ;;  %2028 = vst [vmem:[#allocation3 + $0x2e0] sm:$0x3f] %v2009_v32  ;;  %v2451_v32 = vld [vmem:[#allocation2 + $0x38] sm:$0x3f] }
 0x312   :  { %2209 = vrot.lane.b32.xlu0 %v2169_v9, %s6719_s24  ;;  %1759 = vrot.lane.b32.xlu1 %v1718_v23, %s6717_s22  ;;  %v2449_v9 = vld [vmem:[#allocation2 + $0x28] sm:$0x3f]  ;;  %vm1659_vm11 = vcmask 277504   ;;  %vm2111_vm12 = vcmask 1039360   ;;  %vm2249_vm13 = vcmask 777216   ;;  %vm1797_vm14 = vcmask 269312  }
 0x313   :  { %v2311_v23 = vld [vmem:[#allocation2 + $0x28] sm:$0x3f]  ;;  %vm1935_vm15 = vcmask 7168   ;;  %vm2525_vm0 = vcmask 760832   ;;  %vm2387_vm1 = vcmask 769024   ;;  %vm2755_vm2 = vcmask 588800  }
 0x314   :  { %v2011_v53 = vld [vmem:[#allocation2 + $0x98] sm:$0x3f]  ;;  %vm9451_vm3 = vcmask 1041408  }
 0x315   :  { %2030 = vst [vmem:[#allocation3 + $0x2f0] sm:$0x3f] %v2011_v53  ;;  %v2036_v53 = vld [vmem:[#allocation2 + $0x30] sm:$0x3f] }
 0x316   :  { %2215 = vrot.lane.b32.xlu0 %v2172_v20, %s6719_s24  ;;  %1897 = vrot.lane.b32.xlu1 %v1856_v18, %s6712_s20  ;;  %v2037_v20 = vld [vmem:[#allocation2 + $0x38] sm:$0x3f] }
 0x317   :  { %v2447_v18 = vld [vmem:[#allocation2 + $0x18] sm:$0x3f] }
 0x31a   :  { %2353 = vrot.lane.b32.xlu0 %v2310_v27, %s6720_s25  ;;  %1763 = vrot.lane.b32.xlu1 %v1720_v0, %s6717_s22  ;;  %v1448_v27 = vld [vmem:[#allocation2 + $0x38] sm:$0x3f] }
 0x31b   :  { %v2175_v0 = vld [vmem:[#allocation2 + $0x38] sm:$0x3f] }
 0x31e   :  { %1491 = vrot.lane.b32.xlu0 %v1446_v19, %s6714_s3  ;;  %1901 = vrot.lane.b32.xlu1 %v1858_v42, %s6712_s20  ;;  %v1586_v19 = vld [vmem:[#allocation2 + $0x38] sm:$0x3f] }
 0x31f   :  { %v2313_v42 = vld [vmem:[#allocation2 + $0x38] sm:$0x3f] }
 0x322   :  { %1629 = vrot.lane.b32.xlu0 %v1584_v24, %s6716_s21  ;;  %2073 = vrot.lane.b32.xlu1 %v2032_v6, %s6718_s23  ;;  %v1722_v24 = vld [vmem:[#allocation2 + $0x28] sm:$0x3f] }
 0x323   :  { %v2177_v6 = vld [vmem:[#allocation2 + $0x48] sm:$0x3f] }
 0x326   :  { %2487 = vrot.lane.b32.xlu0 %v2446_v3, %s6721_s26  ;;  %2071 = vrot.lane.b32.xlu1 %v2031_v52, %s6718_s23  ;;  %v1860_v3 = vld [vmem:[#allocation2 + $0x28] sm:$0x3f] }
 0x327   :  { %v2315_v52 = vld [vmem:[#allocation2 + $0x48] sm:$0x3f] }
 0x32a   :  { %2485 = vrot.lane.b32.xlu0 %v2445_v31, %s6721_s26  ;;  %2079 = vrot.lane.b32.xlu1 %v2035_v30, %s6718_s23  ;;  %v2448_v31 = vld [vmem:[#allocation2 + $0x20] sm:$0x3f]  ;;  %v1451_v30 = vld [vmem:[#allocation2 + $0x50] sm:$0x3f] }
 0x32e   :  { %1497 = vrot.lane.b32.xlu0 %v1449_v43, %s6714_s3  ;;  %2213 = vrot.lane.b32.xlu1 %v2171_v40, %s6719_s24  ;;  %v1724_v43 = vld [vmem:[#allocation2 + $0x38] sm:$0x3f] }
 0x332   :  { %1635 = vrot.lane.b32.xlu0 %v1587_v4, %s6716_s21  ;;  %2351 = vrot.lane.b32.xlu1 %v2309_v56, %s6720_s25 }
 0x336   :  { %1769 = vrot.lane.b32.xlu0 %v1723_v2, %s6717_s22  ;;  %2347 = vrot.lane.b32.xlu1 %v2307_v62, %s6720_s25  ;;  %v1453_v2 = vld [vmem:[#allocation2 + $0x60] sm:$0x3f] }
 0x337   :  { %v2038_v62 = vld [vmem:[#allocation2 + $0x40] sm:$0x3f] }
 0x33a   :  { %1907 = vrot.lane.b32.xlu0 %v1861_v51, %s6712_s20  ;;  %2217 = vrot.lane.b32.xlu1 %v2173_v49, %s6719_s24 }
 0x33e   :  { %2493 = vrot.lane.b32.xlu0 %v2449_v9, %s6721_s26  ;;  %2355 = vrot.lane.b32.xlu1 %v2311_v23, %s6720_s25  ;;  %v1591_v23 = vld [vmem:[#allocation2 + $0x60] sm:$0x3f] }
 0x342   :  { %1773 = vrot.lane.b32.xlu0 %v1725_v14, %s6717_s22  ;;  %1493 = vrot.lane.b32.xlu1 %v1447_v13, %s6714_s3  ;;  %v2174_v14 = vld [vmem:[#allocation2 + $0x30] sm:$0x3f] }
 0x346   :  { %1911 = vrot.lane.b32.xlu0 %v1863_v57, %s6712_s20  ;;  %1631 = vrot.lane.b32.xlu1 %v1585_v54, %s6716_s21  ;;  %v1727_v54 = vld [vmem:[#allocation2 + $0x50] sm:$0x3f] }
 0x34a   :  { %2083 = vrot.lane.b32.xlu0 %v2037_v20, %s6718_s23  ;;  %2489 = vrot.lane.b32.xlu1 %v2447_v18, %s6721_s26  ;;  %v2312_v20 = vld [vmem:[#allocation2 + $0x30] sm:$0x3f] }
 0x34e   :  { %2087 = vrot.lane.b32.xlu0 %v2039_v17, %s6718_s23  ;;  %1495 = vrot.lane.b32.xlu1 %v1448_v27, %s6714_s3  ;;  %v1865_v27 = vld [vmem:[#allocation2 + $0x50] sm:$0x3f] }
 0x352   :  { %2221 = vrot.lane.b32.xlu0 %v2175_v0, %s6719_s24  ;;  %1633 = vrot.lane.b32.xlu1 %v1586_v19, %s6716_s21 }
 0x356   :  { %2359 = vrot.lane.b32.xlu0 %v2313_v42, %s6720_s25  ;;  %1767 = vrot.lane.b32.xlu1 %v1722_v24, %s6717_s22  ;;  %v2176_v24 = vld [vmem:[#allocation2 + $0x40] sm:$0x3f] }
 0x35a   :  { %2225 = vrot.lane.b32.xlu0 %v2177_v6, %s6719_s24  ;;  %1905 = vrot.lane.b32.xlu1 %v1860_v3, %s6712_s20 }
 0x35e   :  { %2363 = vrot.lane.b32.xlu0 %v2315_v52, %s6720_s25  ;;  %2491 = vrot.lane.b32.xlu1 %v2448_v31, %s6721_s26 }
 0x362   :  { %1501 = vrot.lane.b32.xlu0 %v1451_v30, %s6714_s3  ;;  %1771 = vrot.lane.b32.xlu1 %v1724_v43, %s6717_s22 }
 0x364   :  { %v7648_v40 = vpop.permute.xlu0 %1761  ;;  %v1484_v41 = vpop.permute.xlu1 %1483 }
 0x365   :  { %v1522_v11 = vsel %vm1521_vm10, %v7485_v33, %v1484_v41 }
 0x366   :  { %1560 = vst [vmem:[#allocation3] sm:$0x3f] %v1522_v11  ;;  %1639 = vrot.lane.b32.xlu0 %v1589_v44, %s6716_s21  ;;  %1909 = vrot.lane.b32.xlu1 %v1862_v48, %s6712_s20  ;;  %v2453_v44 = vld [vmem:[#allocation2 + $0x48] sm:$0x3f]  ;;  %v2314_v48 = vld [vmem:[#allocation2 + $0x40] sm:$0x3f] }
 0x368   :  { %v7654_v16 = vpop.permute.xlu0 %1899  ;;  %v1486_v37 = vpop.permute.xlu1 %1485 }
 0x369   :  { %v1523_v55 = vsel %vm1521_vm10, %v1484_v41, %v1486_v37 }
 0x36a   :  { %1561 = vst [vmem:[#allocation3 + $0x8] sm:$0x3f] %v1523_v55  ;;  %2497 = vrot.lane.b32.xlu0 %v2451_v32, %s6721_s26  ;;  %2081 = vrot.lane.b32.xlu1 %v2036_v53, %s6718_s23  ;;  %v1729_v53 = vld [vmem:[#allocation2 + $0x60] sm:$0x3f] }
 0x36c   :  { %v7659_v33 = vpop.permute.xlu0 %1765  ;;  %v1622_v4 = vpop.permute.xlu1 %1621 }
 0x36d   :  { %v1660_v56 = vsel %vm1659_vm11, %v7487_v38, %v1622_v4  ;;  %v2584_v31 = vld [vmem:[#allocation3] sm:$0xff] }
 0x36e   :  { %1698 = vst [vmem:[#allocation3 + $0x98] sm:$0x3f] %v1660_v56  ;;  %1505 = vrot.lane.b32.xlu0 %v1453_v2, %s6714_s3  ;;  %2085 = vrot.lane.b32.xlu1 %v2038_v62, %s6718_s23 }
 0x370   :  { %v7665_v51 = vpop.permute.xlu0 %1903  ;;  %v1624_v49 = vpop.permute.xlu1 %1623 }
 0x371   :  { %v1661_v9 = vsel %vm1659_vm11, %v1622_v4, %v1624_v49  ;;  %v2585_v6 = vld [vmem:[#allocation3 + $0x8] sm:$0xff]  ;;  %v1450_v4 = vld [vmem:[#allocation2 + $0x48] sm:$0x3f] }
 0x372   :  { %1699 = vst [vmem:[#allocation3 + $0xa0] sm:$0x3f] %v1661_v9  ;;  %1643 = vrot.lane.b32.xlu0 %v1591_v23, %s6716_s21  ;;  %2219 = vrot.lane.b32.xlu1 %v2174_v14, %s6719_s24  ;;  %v1867_v23 = vld [vmem:[#allocation2 + $0x60] sm:$0x3f]  ;;  %v1588_v14 = vld [vmem:[#allocation2 + $0x48] sm:$0x3f] }
 0x374   :  { %v7670_v38 = vpop.permute.xlu0 %2075  ;;  %v1488_v13 = vpop.permute.xlu1 %1487 }
 0x375   :  { %v1524_v57 = vsel %vm1521_vm10, %v1486_v37, %v1488_v13  ;;  %v2603_v0 = vld [vmem:[#allocation3 + $0x98] sm:$0xff] }
 0x376   :  { %1562 = vst [vmem:[#allocation3 + $0x10] sm:$0x3f] %v1524_v57  ;;  %1777 = vrot.lane.b32.xlu0 %v1727_v54, %s6717_s22  ;;  %2357 = vrot.lane.b32.xlu1 %v2312_v20, %s6720_s25  ;;  %v6363_v30 = vpack.c.bf16 %v2603_v0, %v2584_v31  ;;  %v2450_v54 = vld [vmem:[#allocation2 + $0x30] sm:$0x3f]  ;;  %v2041_v0 = vld [vmem:[#allocation2 + $0x58] sm:$0x3f] }
 0x378   :  { %v7675_v18 = vpop.permute.xlu0 %2077  ;;  %v7677_v17 = vpop.permute.xlu1 %1489 }
 0x379   :  { %v2114_v19 = vsel %vm2111_vm12, %v7670_v38, %v7675_v18  ;;  %v1525_v42 = vsel %vm1521_vm10, %v1488_v13, %v7677_v17  ;;  %v2604_v3 = vld [vmem:[#allocation3 + $0xa0] sm:$0xff] }
 0x37a   :  { %2152 = vst [vmem:[#allocation3 + $0x308] sm:$0x3f] %v2114_v19  ;;  %1563 = vst [vmem:[#allocation3 + $0x18] sm:$0x3f] %v1525_v42  ;;  %1915 = vrot.lane.b32.xlu0 %v1865_v27, %s6712_s20  ;;  %2223 = vrot.lane.b32.xlu1 %v2176_v24, %s6719_s24  ;;  %v6361_v52 = vpack.c.bf16 %v2604_v3, %v2585_v6 }
 0x37c   :  { %v7686_v43 = vpop.permute.xlu0 %2211  ;;  %6362 = vmatprep.subr.bf16.mxu0 %v6361_v52  ;;  %v1626_v41 = vpop.permute.xlu1 %1625 }
 0x37d   :  { %v1662_v11 = vsel %vm1659_vm11, %v1624_v49, %v1626_v41  ;;  %6364 = vmatpush1.bf16.msra.mxu0 %v6363_v30  ;;  %v2586_v6 = vld [vmem:[#allocation3 + $0x10] sm:$0xff] }
 0x37e   :  { %1700 = vst [vmem:[#allocation3 + $0xa8] sm:$0x3f] %v1662_v11  ;;  %2501 = vrot.lane.b32.xlu0 %v2453_v44, %s6721_s26  ;;  %2361 = vrot.lane.b32.xlu1 %v2314_v48, %s6720_s25  ;;  %v1452_v11 = vld [vmem:[#allocation2 + $0x58] sm:$0x3f] }
 0x380   :  { %v7691_v37 = vpop.permute.xlu0 %2349  ;;  %v7693_v55 = vpop.permute.xlu1 %1627 }
 0x381   :  { %v1663_v32 = vsel %vm1659_vm11, %v1626_v41, %v7693_v55  ;;  %v2587_v19 = vld [vmem:[#allocation3 + $0x18] sm:$0xff]  ;;  %v2043_v41 = vld [vmem:[#allocation2 + $0x68] sm:$0x3f] }
 0x382   :  { %1701 = vst [vmem:[#allocation3 + $0xb0] sm:$0x3f] %v1663_v32  ;;  %1781 = vrot.lane.b32.xlu0 %v1729_v53, %s6717_s22  ;;  %1499 = vrot.lane.b32.xlu1 %v1450_v4, %s6714_s3  ;;  %v2179_v32 = vld [vmem:[#allocation2 + $0x58] sm:$0x3f] }
 0x383   :  { %v1590_v53 = vld [vmem:[#allocation2 + $0x58] sm:$0x3f] }
 0x384   :  { %v2210_v56 = vpop.permute.xlu0 %2209  ;;  %v1760_v2 = vpop.permute.xlu1 %1759 }
 0x385   :  { %v2250_v62 = vsel %vm2249_vm13, %v2210_v56, %v7686_v43  ;;  %v1798_v49 = vsel %vm1797_vm14, %v7489_v34, %v1760_v2  ;;  %v1799_v9 = vsel %vm1797_vm14, %v1760_v2, %v7648_v40  ;;  %v2605_v20 = vld [vmem:[#allocation3 + $0xa8] sm:$0xff] }
 0x386   :  { %2288 = vst [vmem:[#allocation3 + $0x390] sm:$0x3f] %v2250_v62  ;;  %1836 = vst [vmem:[#allocation3 + $0x130] sm:$0x3f] %v1798_v49  ;;  %1919 = vrot.lane.b32.xlu0 %v1867_v23, %s6712_s20  ;;  %1637 = vrot.lane.b32.xlu1 %v1588_v14, %s6716_s21  ;;  %v6379_v3 = vpack.c.bf16 %v2605_v20, %v2586_v6  ;;  %v2317_v20 = vld [vmem:[#allocation2 + $0x58] sm:$0x3f] }
 0x387   :  { %1837 = vst [vmem:[#allocation3 + $0x138] sm:$0x3f] %v1799_v9 }
 0x388   :  { %v7707_v13 = vpop.permute.xlu0 %2215  ;;  %v1898_v57 = vpop.permute.xlu1 %1897 }
 0x389   :  { %v1936_v34 = vsel %vm1935_vm15, %v7479_v22, %v1898_v57  ;;  %v1937_v27 = vsel %vm1935_vm15, %v1898_v57, %v7654_v16  ;;  %v2606_v42 = vld [vmem:[#allocation3 + $0xb0] sm:$0xff] }
 0x38a   :  { %1974 = vst [vmem:[#allocation3 + $0x1c8] sm:$0x3f] %v1936_v34  ;;  %1975 = vst [vmem:[#allocation3 + $0x1d0] sm:$0x3f] %v1937_v27  ;;  %2091 = vrot.lane.b32.xlu0 %v2041_v0, %s6718_s23  ;;  %2495 = vrot.lane.b32.xlu1 %v2450_v54, %s6721_s26  ;;  %v6377_v24 = vpack.c.bf16 %v2606_v42, %v2587_v19  ;;  %v1726_v34 = vld [vmem:[#allocation2 + $0x48] sm:$0x3f] }
 0x38b   :  { %v2181_v19 = vld [vmem:[#allocation2 + $0x68] sm:$0x3f] }
 0x38c   :  { %v7715_v52 = vpop.permute.xlu0 %2353  ;;  %6378 = vmatprep.subr.bf16.mxu1 %v6377_v24  ;;  %v1764_v31 = vpop.permute.xlu1 %1763  ;;  %v1864_v42 = vld [vmem:[#allocation2 + $0x48] sm:$0x3f] }
 0x38d   :  { %v1800_v22 = vsel %vm1797_vm14, %v7648_v40, %v1764_v31  ;;  %v1801_v30 = vsel %vm1797_vm14, %v1764_v31, %v7659_v33  ;;  %6380 = vmatpush1.bf16.msra.mxu1 %v6379_v3  ;;  %v2622_v49 = vld [vmem:[#allocation3 + $0x130] sm:$0xff] }
 0x38e   :  { %1838 = vst [vmem:[#allocation3 + $0x140] sm:$0x3f] %v1800_v22  ;;  %1839 = vst [vmem:[#allocation3 + $0x148] sm:$0x3f] %v1801_v30  ;;  %2095 = vrot.lane.b32.xlu0 %v2043_v41, %s6718_s23  ;;  %1503 = vrot.lane.b32.xlu1 %v1452_v11, %s6714_s3  ;;  %v2623_v4 = vld [vmem:[#allocation3 + $0x138] sm:$0xff] }
 0x38f   :  { %v2452_v11 = vld [vmem:[#allocation2 + $0x40] sm:$0x3f] }
 0x390   :  { %v7723_v44 = vpop.permute.xlu0 %1491  ;;  %v1902_v48 = vpop.permute.xlu1 %1901 }
 0x391   :  { %v1526_v40 = vsel %vm1521_vm10, %v7677_v17, %v7723_v44  ;;  %v1938_v56 = vsel %vm1935_vm15, %v7654_v16, %v1902_v48  ;;  %v1939_v2 = vsel %vm1935_vm15, %v1902_v48, %v7665_v51  ;;  %v2642_v62 = vld [vmem:[#allocation3 + $0x1d0] sm:$0xff]  ;;  %v2641_v9 = vld [vmem:[#allocation3 + $0x1c8] sm:$0xff] }
 0x392   :  { %1564 = vst [vmem:[#allocation3 + $0x20] sm:$0x3f] %v1526_v40  ;;  %1976 = vst [vmem:[#allocation3 + $0x1d8] sm:$0x3f] %v1938_v56  ;;  %2229 = vrot.lane.b32.xlu0 %v2179_v32, %s6719_s24  ;;  %1641 = vrot.lane.b32.xlu1 %v1590_v53, %s6716_s21  ;;  %v6365_v23 = vpack.c.bf16 %v2642_v62, %v2623_v4  ;;  %v6367_v14 = vpack.c.bf16 %v2641_v9, %v2622_v49  ;;  %v2319_v53 = vld [vmem:[#allocation2 + $0x68] sm:$0x3f] }
 0x393   :  { %1977 = vst [vmem:[#allocation3 + $0x1e0] sm:$0x3f] %v1939_v2  ;;  %v2661_v4 = vld [vmem:[#allocation3 + $0x268] sm:$0xff] }
 0x394   :  { %v7734_v57 = vpop.permute.xlu0 %1629  ;;  %6366 = vmatprep.subr.bf16.mxu0 %v6365_v23  ;;  %v2074_v17 = vpop.permute.xlu1 %2073  ;;  %v1455_v49 = vld [vmem:[#allocation2 + $0x70] sm:$0x3f]  ;;  %v1728_v23 = vld [vmem:[#allocation2 + $0x58] sm:$0x3f] }
 0x395   :  { %v1664_v16 = vsel %vm1659_vm11, %v7693_v55, %v7734_v57  ;;  %v2113_v54 = vsel %vm2111_vm12, %v2074_v17, %v7670_v38  ;;  %6368 = vmatpush1.bf16.msra.mxu0 %v6367_v14  ;;  %v2625_v24 = vld [vmem:[#allocation3 + $0x148] sm:$0xff]  ;;  %v2624_v3 = vld [vmem:[#allocation3 + $0x140] sm:$0xff] }
 0x396   :  { %1702 = vst [vmem:[#allocation3 + $0xb8] sm:$0x3f] %v1664_v16  ;;  %2151 = vst [vmem:[#allocation3 + $0x300] sm:$0x3f] %v2113_v54  ;;  %2367 = vrot.lane.b32.xlu0 %v2317_v20, %s6720_s25  ;;  %1775 = vrot.lane.b32.xlu1 %v1726_v34, %s6717_s22  ;;  %v2660_v14 = vld [vmem:[#allocation3 + $0x260] sm:$0xff] }
 0x397   :  { %v1593_v34 = vld [vmem:[#allocation2 + $0x70] sm:$0x3f] }
 0x398   :  { %v7743_v27 = vpop.permute.xlu0 %2487  ;;  %v2072_v0 = vpop.permute.xlu1 %2071 }
 0x399   :  { %v2112_v55 = vsel %vm2111_vm12, %v2072_v0, %v2074_v17  ;;  %v2643_v38 = vld [vmem:[#allocation3 + $0x1d8] sm:$0xff] }
 0x39a   :  { %v2644_v6 = vld [vmem:[#allocation3 + $0x1e0] sm:$0xff]  ;;  %2150 = vst [vmem:[#allocation3 + $0x2f8] sm:$0x3f] %v2112_v55  ;;  %2233 = vrot.lane.b32.xlu0 %v2181_v19, %s6719_s24  ;;  %1913 = vrot.lane.b32.xlu1 %v1864_v42, %s6712_s20  ;;  %v6383_v22 = vpack.c.bf16 %v2643_v38, %v2624_v3  ;;  %v1866_v42 = vld [vmem:[#allocation2 + $0x58] sm:$0x3f] }
 0x39b   :  { %v6381_v31 = vpack.c.bf16 %v2644_v6, %v2625_v24  ;;  %v2663_v24 = vld [vmem:[#allocation3 + $0x278] sm:$0xff]  ;;  %v2662_v3 = vld [vmem:[#allocation3 + $0x270] sm:$0xff] }
 0x39c   :  { %v2486_v30 = vpop.permute.xlu0 %2485  ;;  %v7748_v41 = vpop.permute.xlu1 %2079 }
 0x39d   :  { %6382 = vmatprep.subr.bf16.mxu1 %v6381_v31  ;;  %v2526_v48 = vsel %vm2525_vm0, %v2486_v30, %v7743_v27  ;;  %v2115_v32 = vsel %vm2111_vm12, %v7675_v18, %v7748_v41  ;;  %v2680_v40 = vld [vmem:[#allocation3 + $0x300] sm:$0xff] }
 0x39e   :  { %6384 = vmatpush1.bf16.msra.mxu1 %v6383_v22  ;;  %2564 = vst [vmem:[#allocation3 + $0x4c0] sm:$0x3f] %v2526_v48  ;;  %2153 = vst [vmem:[#allocation3 + $0x310] sm:$0x3f] %v2115_v32  ;;  %2371 = vrot.lane.b32.xlu0 %v2319_v53, %s6720_s25  ;;  %v6369_v56 = vpack.c.bf16 %v2680_v40, %v2661_v4  ;;  %v2040_v48 = vld [vmem:[#allocation2 + $0x50] sm:$0x3f] }
 0x39f   :  { %2499 = vrot.lane.b32.xlu1 %v2452_v11, %s6721_s26  ;;  %v2455_v11 = vld [vmem:[#allocation2 + $0x58] sm:$0x3f]  ;;  %v2042_v4 = vld [vmem:[#allocation2 + $0x60] sm:$0x3f] }
 0x3a0   :  { %v7757_v2 = vpop.permute.xlu0 %1497  ;;  %6370 = vmatprep.subr.bf16.mxu0 %v6369_v56  ;;  %v2214_v62 = vpop.permute.xlu1 %2213  ;;  %v1457_v56 = vld [vmem:[#allocation2 + $0x80] sm:$0x3f] }
 0x3a1   :  { %v2251_v9 = vsel %vm2249_vm13, %v7686_v43, %v2214_v62  ;;  %v2252_v18 = vsel %vm2249_vm13, %v2214_v62, %v7707_v13  ;;  %v2679_v17 = vld [vmem:[#allocation3 + $0x2f8] sm:$0xff]  ;;  %v2681_v43 = vld [vmem:[#allocation3 + $0x308] sm:$0xff] }
 0x3a2   :  { %2289 = vst [vmem:[#allocation3 + $0x398] sm:$0x3f] %v2251_v9  ;;  %2290 = vst [vmem:[#allocation3 + $0x3a0] sm:$0x3f] %v2252_v18  ;;  %1509 = vrot.lane.b32.xlu0 %v1455_v49, %s6714_s3  ;;  %v6371_v16 = vpack.c.bf16 %v2679_v17, %v2660_v14  ;;  %v6387_v38 = vpack.c.bf16 %v2681_v43, %v2662_v3  ;;  %v2698_v17 = vld [vmem:[#allocation3 + $0x390] sm:$0xff] }
 0x3a3   :  { %1779 = vrot.lane.b32.xlu1 %v1728_v23, %s6717_s22  ;;  %v2178_v23 = vld [vmem:[#allocation2 + $0x50] sm:$0x3f] }
 0x3a4   :  { %v7765_v54 = vpop.permute.xlu0 %1635  ;;  %6372 = vmatpush1.bf16.msra.mxu0 %v6371_v16  ;;  %v2352_v20 = vpop.permute.xlu1 %2351 }
 0x3a5   :  { %v2389_v0 = vsel %vm2387_vm1, %v7691_v37, %v2352_v20  ;;  %v2390_v19 = vsel %vm2387_vm1, %v2352_v20, %v7715_v52  ;;  %v2682_v55 = vld [vmem:[#allocation3 + $0x310] sm:$0xff] }
 0x3a6   :  { %2427 = vst [vmem:[#allocation3 + $0x430] sm:$0x3f] %v2389_v0  ;;  %2428 = vst [vmem:[#allocation3 + $0x438] sm:$0x3f] %v2390_v19  ;;  %1647 = vrot.lane.b32.xlu0 %v1593_v34, %s6716_s21  ;;  %v6385_v6 = vpack.c.bf16 %v2682_v55, %v2663_v24  ;;  %v1731_v19 = vld [vmem:[#allocation2 + $0x70] sm:$0x3f] }
 0x3a7   :  { %1917 = vrot.lane.b32.xlu1 %v1866_v42, %s6712_s20  ;;  %v2316_v42 = vld [vmem:[#allocation2 + $0x50] sm:$0x3f]  ;;  %v2180_v55 = vld [vmem:[#allocation2 + $0x60] sm:$0x3f] }
 0x3a8   :  { %v7773_v31 = vpop.permute.xlu0 %1769  ;;  %6386 = vmatprep.subr.bf16.mxu1 %v6385_v6  ;;  %v2348_v22 = vpop.permute.xlu1 %2347 }
 0x3a9   :  { %v2388_v30 = vsel %vm2387_vm1, %v2348_v22, %v7691_v37  ;;  %6388 = vmatpush1.bf16.msra.mxu1 %v6387_v38  ;;  %v2699_v62 = vld [vmem:[#allocation3 + $0x398] sm:$0xff]  ;;  %v1869_v38 = vld [vmem:[#allocation2 + $0x70] sm:$0x3f] }
 0x3aa   :  { %2426 = vst [vmem:[#allocation3 + $0x428] sm:$0x3f] %v2388_v30  ;;  %2505 = vrot.lane.b32.xlu0 %v2455_v11, %s6721_s26  ;;  %v2700_v11 = vld [vmem:[#allocation3 + $0x3a0] sm:$0xff] }
 0x3ab   :  { %2089 = vrot.lane.b32.xlu1 %v2040_v48, %s6718_s23 }
 0x3ac   :  { %v7779_v32 = vpop.permute.xlu0 %1907  ;;  %v7781_v53 = vpop.permute.xlu1 %2217 }
 0x3ad   :  { %v2253_v40 = vsel %vm2249_vm13, %v7707_v13, %v7781_v53  ;;  %v2718_v37 = vld [vmem:[#allocation3 + $0x430] sm:$0xff]  ;;  %v1595_v13 = vld [vmem:[#allocation2 + $0x80] sm:$0x3f] }
 0x3ae   :  { %2291 = vst [vmem:[#allocation3 + $0x3a8] sm:$0x3f] %v2253_v40  ;;  %1513 = vrot.lane.b32.xlu0 %v1457_v56, %s6714_s3  ;;  %v6373_v49 = vpack.c.bf16 %v2718_v37, %v2699_v62  ;;  %v2719_v6 = vld [vmem:[#allocation3 + $0x438] sm:$0xff]  ;;  %v2457_v56 = vld [vmem:[#allocation2 + $0x68] sm:$0x3f] }
 0x3af   :  { %2093 = vrot.lane.b32.xlu1 %v2042_v4, %s6718_s23  ;;  %v6391_v48 = vpack.c.bf16 %v2719_v6, %v2700_v11  ;;  %v2318_v62 = vld [vmem:[#allocation2 + $0x60] sm:$0x3f] }
 0x3b0   :  { %v7788_v9 = vpop.permute.xlu0 %2493  ;;  %6374 = vmatprep.subr.bf16.mxu0 %v6373_v49  ;;  %v7790_v18 = vpop.permute.xlu1 %2355  ;;  %v2607_v6 = vld [vmem:[#allocation3 + $0xb8] sm:$0xff] }
 0x3b1   :  { %v2391_v14 = vsel %vm2387_vm1, %v7715_v52, %v7790_v18  ;;  %v2717_v16 = vld [vmem:[#allocation3 + $0x428] sm:$0xff] }
 0x3b2   :  { %2429 = vst [vmem:[#allocation3 + $0x440] sm:$0x3f] %v2391_v14  ;;  %1651 = vrot.lane.b32.xlu0 %v1595_v13, %s6716_s21  ;;  %v6375_v20 = vpack.c.bf16 %v2717_v16, %v2698_v17  ;;  %v1733_v13 = vld [vmem:[#allocation2 + $0x80] sm:$0x3f]  ;;  %v1454_v17 = vld [vmem:[#allocation2 + $0x68] sm:$0x3f] }
 0x3b3   :  { %2227 = vrot.lane.b32.xlu1 %v2178_v23, %s6719_s24 }
 0x3b4   :  { %v7797_v34 = vpop.permute.xlu0 %1773  ;;  %6376 = vmatpush1.bf16.msra.mxu0 %v6375_v20  ;;  %v1494_v43 = vpop.permute.xlu1 %1493  ;;  %v1871_v20 = vld [vmem:[#allocation2 + $0x80] sm:$0x3f] }
 0x3b5   :  { %v1527_v0 = vsel %vm1521_vm10, %v7723_v44, %v1494_v43  ;;  %v2701_v22 = vld [vmem:[#allocation3 + $0x3a8] sm:$0xff] }
 0x3b6   :  { %1565 = vst [vmem:[#allocation3 + $0x28] sm:$0x3f] %v1527_v0  ;;  %1785 = vrot.lane.b32.xlu0 %v1731_v19, %s6717_s22 }
 0x3b7   :  { %2365 = vrot.lane.b32.xlu1 %v2316_v42, %s6720_s25  ;;  %v1592_v42 = vld [vmem:[#allocation2 + $0x68] sm:$0x3f] }
 0x3b8   :  { %v7803_v52 = vpop.permute.xlu0 %1911  ;;  %v1632_v24 = vpop.permute.xlu1 %1631 }
 0x3b9   :  { %v1665_v3 = vsel %vm1659_vm11, %v7734_v57, %v1632_v24  ;;  %v2720_v30 = vld [vmem:[#allocation3 + $0x440] sm:$0xff] }
 0x3ba   :  { %1703 = vst [vmem:[#allocation3 + $0xc0] sm:$0x3f] %v1665_v3  ;;  %1923 = vrot.lane.b32.xlu0 %v1869_v38, %s6712_s20  ;;  %v6389_v44 = vpack.c.bf16 %v2720_v30, %v2701_v22  ;;  %v7835_v38 = vld [vmem:[%s9446_s4] sm:$0x3]  ;;  %v2588_v30 = vld [vmem:[#allocation3 + $0x20] sm:$0xff] }
 0x3bb   :  { %2231 = vrot.lane.b32.xlu1 %v2180_v55, %s6719_s24 }
 0x3bc   :  { %v7809_v4 = vpop.permute.xlu0 %2083  ;;  %6390 = vmatprep.subr.bf16.mxu1 %v6389_v44  ;;  %v7811_v40 = vpop.permute.xlu1 %2489 }
 0x3bd   :  { %v2527_v57 = vsel %vm2525_vm0, %v7743_v27, %v7811_v40  ;;  %6392 = vmatpush1.bf16.msra.mxu1 %v6391_v48  ;;  %v2589_v3 = vld [vmem:[#allocation3 + $0x28] sm:$0xff]  ;;  %v6395_v48 = vpack.c.bf16 %v2607_v6, %v2588_v30 }
 0x3be   :  { %2565 = vst [vmem:[#allocation3 + $0x4c8] sm:$0x3f] %v2527_v57  ;;  %2509 = vrot.lane.b32.xlu0 %v2457_v56, %s6721_s26 }
 0x3bf   :  { %2369 = vrot.lane.b32.xlu1 %v2318_v62, %s6720_s25  ;;  %v2045_v62 = vld [vmem:[#allocation2 + $0x78] sm:$0x3f] }
 0x3c0   :  { %v7818_v37 = vpop.permute.xlu0 %2087  ;;  %v1496_v49 = vpop.permute.xlu1 %1495 }
 0x3c1   :  { %v1528_v23 = vsel %vm1521_vm10, %v1494_v43, %v1496_v49  ;;  %v1529_v14 = vsel %vm1521_vm10, %v1496_v49, %v7757_v2  ;;  %v2608_v0 = vld [vmem:[#allocation3 + $0xc0] sm:$0xff]  ;;  %v2454_v49 = vld [vmem:[#allocation2 + $0x50] sm:$0x3f] }
 0x3c2   :  { %1566 = vst [vmem:[#allocation3 + $0x30] sm:$0x3f] %v1528_v23  ;;  %1567 = vst [vmem:[#allocation3 + $0x38] sm:$0x3f] %v1529_v14  ;;  %1789 = vrot.lane.b32.xlu0 %v1733_v13, %s6717_s22  ;;  %v6393_v22 = vpack.c.bf16 %v2608_v0, %v2589_v3  ;;  %v7847_v23 = vld [vmem:[#allocation3 + $0x40] sm:$0xff] }
 0x3c3   :  { %1507 = vrot.lane.b32.xlu1 %v1454_v17, %s6714_s3 }
 0x3c4   :  { %v7825_v27 = vpop.permute.xlu0 %2221  ;;  %v1634_v16 = vpop.permute.xlu1 %1633 }
 0x3c5   :  { %v1666_v19 = vsel %vm1659_vm11, %v1632_v24, %v1634_v16  ;;  %v1667_v43 = vsel %vm1659_vm11, %v1634_v16, %v7765_v54  ;;  %v2737_v55 = vld [vmem:[#allocation3 + $0x4c8] sm:$0xff]  ;;  %v2736_v24 = vld [vmem:[#allocation3 + $0x4c0] sm:$0xff] }
 0x3c6   :  { %1704 = vst [vmem:[#allocation3 + $0xc8] sm:$0x3f] %v1666_v19  ;;  %1705 = vst [vmem:[#allocation3 + $0xd0] sm:$0x3f] %v1667_v43  ;;  %1927 = vrot.lane.b32.xlu0 %v1871_v20, %s6712_s20  ;;  %2775 = vmatprep.subr.mxu0 %v2737_v55  ;;  %v2047_v16 = vld [vmem:[#allocation2 + $0x88] sm:$0x3f] }
 0x3c7   :  { %1645 = vrot.lane.b32.xlu1 %v1592_v42, %s6716_s21  ;;  %2776 = vmatpush1.msra.mxu0 %v2736_v24  ;;  %v1456_v20 = vld [vmem:[#allocation2 + $0x78] sm:$0x3f] }
 0x3c8   :  { %v7837_v44 = vpop.permute.xlu0 %2359  ;;  %v1768_v11 = vpop.permute.xlu1 %1767  ;;  %6394 = vmatprep.subr.bf16.mxu0 %v6393_v22  ;;  %6211 = vmatmul.mubr.msk.f32.vlgmr.msra.gmra.mrb[10].mxu0 %vm2755_vm2, %v7835_v38  ;;  %v2183_v42 = vld [vmem:[#allocation2 + $0x78] sm:$0x3f] }
 0x3c9   :  { %v1802_v57 = vsel %vm1797_vm14, %v7659_v33, %v1768_v11  ;;  %v1803_v56 = vsel %vm1797_vm14, %v1768_v11, %v7773_v31  ;;  %6396 = vmatpush1.bf16.msra.mxu0 %v6395_v48  ;;  %2965 = vmatprep.mubr.f32.mxu0 %v7847_v23  ;;  %v1594_v55 = vld [vmem:[#allocation2 + $0x78] sm:$0x3f] }
 0x3ca   :  { %1840 = vst [vmem:[#allocation3 + $0x150] sm:$0x3f] %v1802_v57  ;;  %1841 = vst [vmem:[#allocation3 + $0x158] sm:$0x3f] %v1803_v56  ;;  %2099 = vrot.lane.b32.xlu0 %v2045_v62, %s6718_s23  ;;  %v2321_v24 = vld [vmem:[#allocation2 + $0x78] sm:$0x3f] }
 0x3cb   :  { %2503 = vrot.lane.b32.xlu1 %v2454_v49, %s6721_s26  ;;  %v1730_v56 = vld [vmem:[#allocation2 + $0x68] sm:$0x3f] }
 0x3cc   :  { %v7850_v33 = vpop.permute.xlu0 %2225  ;;  %v1906_v14 = vpop.permute.xlu1 %1905 }
 0x3cd   :  { %v1940_v13 = vsel %vm1935_vm15, %v7665_v51, %v1906_v14  ;;  %v1941_v17 = vsel %vm1935_vm15, %v1906_v14, %v7779_v32  ;;  %v2610_v14 = vld [vmem:[#allocation3 + $0xd0] sm:$0xff] }
 0x3ce   :  { %1978 = vst [vmem:[#allocation3 + $0x1e8] sm:$0x3f] %v1940_v13  ;;  %1979 = vst [vmem:[#allocation3 + $0x1f0] sm:$0x3f] %v1941_v17  ;;  %2103 = vrot.lane.b32.xlu0 %v2047_v16, %s6718_s23  ;;  %v2185_v17 = vld [vmem:[#allocation2 + $0x88] sm:$0x3f] }
 0x3cf   :  { %1511 = vrot.lane.b32.xlu1 %v1456_v20, %s6714_s3  ;;  %v2609_v16 = vld [vmem:[#allocation3 + $0xc8] sm:$0xff] }
 0x3d0   :  { %v7858_v0 = vpop.permute.xlu0 %2363  ;;  %v2492_v19 = vpop.permute.xlu1 %2491 }
 0x3d1   :  { %v2528_v43 = vsel %vm2525_vm0, %v7811_v40, %v2492_v19  ;;  %v2529_v51 = vsel %vm2525_vm0, %v2492_v19, %v7788_v9  ;;  %v2627_v22 = vld [vmem:[#allocation3 + $0x158] sm:$0xff]  ;;  %v2626_v48 = vld [vmem:[#allocation3 + $0x150] sm:$0xff] }
 0x3d2   :  { %2566 = vst [vmem:[#allocation3 + $0x4d0] sm:$0x3f] %v2528_v43  ;;  %2567 = vst [vmem:[#allocation3 + $0x4d8] sm:$0x3f] %v2529_v51  ;;  %2237 = vrot.lane.b32.xlu0 %v2183_v42, %s6719_s24  ;;  %v2591_v42 = vld [vmem:[#allocation3 + $0x38] sm:$0xff] }
 0x3d3   :  { %1649 = vrot.lane.b32.xlu1 %v1594_v55, %s6716_s21  ;;  %v1868_v55 = vld [vmem:[#allocation2 + $0x68] sm:$0x3f] }
 0x3d4   :  { %v7866_v6 = vpop.permute.xlu0 %1501  ;;  %v1772_v3 = vpop.permute.xlu1 %1771 }
 0x3d5   :  { %v1804_v30 = vsel %vm1797_vm14, %v7773_v31, %v1772_v3  ;;  %v1805_v40 = vsel %vm1797_vm14, %v1772_v3, %v7797_v34  ;;  %v2646_v11 = vld [vmem:[#allocation3 + $0x1f0] sm:$0xff]  ;;  %v2645_v57 = vld [vmem:[#allocation3 + $0x1e8] sm:$0xff]  ;;  %v6409_v3 = vpack.c.bf16 %v2610_v14, %v2591_v42 }
 0x3d6   :  { %1842 = vst [vmem:[#allocation3 + $0x160] sm:$0x3f] %v1804_v30  ;;  %1843 = vst [vmem:[#allocation3 + $0x168] sm:$0x3f] %v1805_v40  ;;  %2375 = vrot.lane.b32.xlu0 %v2321_v24, %s6720_s25  ;;  %v6397_v62 = vpack.c.bf16 %v2646_v11, %v2627_v22  ;;  %v6399_v49 = vpack.c.bf16 %v2645_v57, %v2626_v48  ;;  %v2590_v24 = vld [vmem:[#allocation3 + $0x30] sm:$0xff] }
 0x3d7   :  { %1783 = vrot.lane.b32.xlu1 %v1730_v56, %s6717_s22  ;;  %v6411_v22 = vpack.c.bf16 %v2609_v16, %v2590_v24  ;;  %v2323_v48 = vld [vmem:[#allocation2 + $0x88] sm:$0x3f]  ;;  %v2456_v57 = vld [vmem:[#allocation2 + $0x60] sm:$0x3f] }
 0x3d8   :  { %v7874_v13 = vpop.permute.xlu0 %1639  ;;  %6398 = vmatprep.subr.bf16.mxu0 %v6397_v62  ;;  %v1910_v31 = vpop.permute.xlu1 %1909 }
 0x3d9   :  { %v1942_v20 = vsel %vm1935_vm15, %v7779_v32, %v1910_v31  ;;  %v1943_v19 = vsel %vm1935_vm15, %v1910_v31, %v7803_v52  ;;  %6400 = vmatpush1.bf16.msra.mxu0 %v6399_v49  ;;  %v2739_v43 = vld [vmem:[#allocation3 + $0x4d8] sm:$0xff]  ;;  %v2738_v51 = vld [vmem:[#allocation3 + $0x4d0] sm:$0xff]  ;;  %v1459_v49 = vld [vmem:[#allocation2 + $0x90] sm:$0x3f] }
 0x3da   :  { %1980 = vst [vmem:[#allocation3 + $0x1f8] sm:$0x3f] %v1942_v20  ;;  %1981 = vst [vmem:[#allocation3 + $0x200] sm:$0x3f] %v1943_v19  ;;  %2241 = vrot.lane.b32.xlu0 %v2185_v17, %s6719_s24  ;;  %2846 = vmatprep.subr.mxu1 %v2739_v43  ;;  %v1732_v19 = vld [vmem:[#allocation2 + $0x78] sm:$0x3f] }
 0x3db   :  { %1921 = vrot.lane.b32.xlu1 %v1868_v55, %s6712_s20  ;;  %2847 = vmatpush1.msra.mxu1 %v2738_v51 }
 0x3dc   :  { %v7882_v32 = vpop.permute.xlu0 %2497  ;;  %6410 = vmatprep.subr.bf16.mxu1 %v6409_v3  ;;  %v2082_v30 = vpop.permute.xlu1 %2081  ;;  %6212 = vmatmul.mubr.msk.f32.vlgmr.msra.gmra.mrb[10].mxu1 %vm2755_vm2, %v7835_v38  ;;  %v2665_v3 = vld [vmem:[#allocation3 + $0x288] sm:$0xff] }
 0x3dd   :  { %v2116_v40 = vsel %vm2111_vm12, %v7748_v41, %v2082_v30  ;;  %v2117_v11 = vsel %vm2111_vm12, %v2082_v30, %v7809_v4  ;;  %6412 = vmatpush1.bf16.msra.mxu1 %v6411_v22  ;;  %3036 = vmatprep.mubr.f32.mxu1 %v7847_v23  ;;  %v2629_v14 = vld [vmem:[#allocation3 + $0x168] sm:$0xff]  ;;  %v2628_v16 = vld [vmem:[#allocation3 + $0x160] sm:$0xff] }
 0x3de   :  { %2154 = vst [vmem:[#allocation3 + $0x318] sm:$0x3f] %v2116_v40  ;;  %2155 = vst [vmem:[#allocation3 + $0x320] sm:$0x3f] %v2117_v11  ;;  %2379 = vrot.lane.b32.xlu0 %v2323_v48, %s6720_s25  ;;  %v2664_v40 = vld [vmem:[#allocation3 + $0x280] sm:$0xff] }
 0x3df   :  { %2507 = vrot.lane.b32.xlu1 %v2456_v57, %s6721_s26  ;;  %v1870_v48 = vld [vmem:[#allocation2 + $0x78] sm:$0x3f] }
 0x3e0   :  { %v7893_v56 = vpop.permute.xlu0 %1505  ;;  %v2086_v62 = vpop.permute.xlu1 %2085 }
 0x3e1   :  { %v2118_v41 = vsel %vm2111_vm12, %v7809_v4, %v2086_v62  ;;  %v2119_v31 = vsel %vm2111_vm12, %v2086_v62, %v7818_v37  ;;  %v2648_v17 = vld [vmem:[#allocation3 + $0x200] sm:$0xff]  ;;  %v2647_v20 = vld [vmem:[#allocation3 + $0x1f8] sm:$0xff]  ;;  %v1597_v4 = vld [vmem:[#allocation2 + $0x90] sm:$0x3f] }
 0x3e2   :  { %2156 = vst [vmem:[#allocation3 + $0x328] sm:$0x3f] %v2118_v41  ;;  %2157 = vst [vmem:[#allocation3 + $0x330] sm:$0x3f] %v2119_v31  ;;  %1517 = vrot.lane.b32.xlu0 %v1459_v49, %s6714_s3  ;;  %v6413_v43 = vpack.c.bf16 %v2648_v17, %v2629_v14  ;;  %v6415_v51 = vpack.c.bf16 %v2647_v20, %v2628_v16  ;;  %v2459_v14 = vld [vmem:[#allocation2 + $0x78] sm:$0x3f] }
 0x3e3   :  { %1787 = vrot.lane.b32.xlu1 %v1732_v19, %s6717_s22  ;;  %v2667_v41 = vld [vmem:[#allocation3 + $0x298] sm:$0xff]  ;;  %v2666_v20 = vld [vmem:[#allocation3 + $0x290] sm:$0xff] }
 0x3e4   :  { %v7901_v42 = vpop.permute.xlu0 %1643  ;;  %6414 = vmatprep.subr.bf16.mxu1 %v6413_v43  ;;  %v2220_v55 = vpop.permute.xlu1 %2219  ;;  %v2044_v43 = vld [vmem:[#allocation2 + $0x70] sm:$0x3f] }
 0x3e5   :  { %v2254_v24 = vsel %vm2249_vm13, %v7781_v53, %v2220_v55  ;;  %v2255_v22 = vsel %vm2249_vm13, %v2220_v55, %v7825_v27  ;;  %6416 = vmatpush1.bf16.msra.mxu1 %v6415_v51  ;;  %v2684_v30 = vld [vmem:[#allocation3 + $0x320] sm:$0xff]  ;;  %v2683_v11 = vld [vmem:[#allocation3 + $0x318] sm:$0xff] }
 0x3e6   :  { %2292 = vst [vmem:[#allocation3 + $0x3b0] sm:$0x3f] %v2254_v24  ;;  %2293 = vst [vmem:[#allocation3 + $0x3b8] sm:$0x3f] %v2255_v22  ;;  %1655 = vrot.lane.b32.xlu0 %v1597_v4, %s6716_s21  ;;  %v6401_v57 = vpack.c.bf16 %v2684_v30, %v2665_v3  ;;  %v6403_v62 = vpack.c.bf16 %v2683_v11, %v2664_v40  ;;  %v1735_v22 = vld [vmem:[#allocation2 + $0x90] sm:$0x3f] }
 0x3e7   :  { %1925 = vrot.lane.b32.xlu1 %v1870_v48, %s6712_s20  ;;  %v2046_v30 = vld [vmem:[#allocation2 + $0x80] sm:$0x3f]  ;;  %v1873_v48 = vld [vmem:[#allocation2 + $0x90] sm:$0x3f] }
 0x3e8   :  { %v7909_v49 = vpop.permute.xlu0 %1777  ;;  %6402 = vmatprep.subr.bf16.mxu0 %v6401_v57  ;;  %v2358_v53 = vpop.permute.xlu1 %2357 }
 0x3e9   :  { %v2392_v31 = vsel %vm2387_vm1, %v7790_v18, %v2358_v53  ;;  %v2393_v17 = vsel %vm2387_vm1, %v2358_v53, %v7837_v44  ;;  %6404 = vmatpush1.bf16.msra.mxu0 %v6403_v62  ;;  %v2686_v16 = vld [vmem:[#allocation3 + $0x330] sm:$0xff]  ;;  %v2685_v19 = vld [vmem:[#allocation3 + $0x328] sm:$0xff] }
 0x3ea   :  { %2430 = vst [vmem:[#allocation3 + $0x448] sm:$0x3f] %v2392_v31  ;;  %2431 = vst [vmem:[#allocation3 + $0x450] sm:$0x3f] %v2393_v17  ;;  %2513 = vrot.lane.b32.xlu0 %v2459_v14, %s6721_s26  ;;  %v6417_v51 = vpack.c.bf16 %v2686_v16, %v2667_v41  ;;  %v6419_v55 = vpack.c.bf16 %v2685_v19, %v2666_v20  ;;  %v2182_v31 = vld [vmem:[#allocation2 + $0x70] sm:$0x3f] }
 0x3eb   :  { %2097 = vrot.lane.b32.xlu1 %v2044_v43, %s6718_s23 }
 0x3ec   :  { %v7917_v4 = vpop.permute.xlu0 %1915  ;;  %6418 = vmatprep.subr.bf16.mxu1 %v6417_v51  ;;  %v2224_v18 = vpop.permute.xlu1 %2223  ;;  %v2461_v51 = vld [vmem:[#allocation2 + $0x88] sm:$0x3f] }
 0x3ed   :  { %v2256_v3 = vsel %vm2249_vm13, %v7825_v27, %v2224_v18  ;;  %v2257_v24 = vsel %vm2249_vm13, %v2224_v18, %v7850_v33  ;;  %6420 = vmatpush1.bf16.msra.mxu1 %v6419_v55  ;;  %v2703_v57 = vld [vmem:[#allocation3 + $0x3b8] sm:$0xff]  ;;  %v2702_v14 = vld [vmem:[#allocation3 + $0x3b0] sm:$0xff]  ;;  %v2320_v55 = vld [vmem:[#allocation2 + $0x70] sm:$0x3f] }
 0x3ee   :  { %2294 = vst [vmem:[#allocation3 + $0x3c0] sm:$0x3f] %v2256_v3  ;;  %2295 = vst [vmem:[#allocation3 + $0x3c8] sm:$0x3f] %v2257_v24  ;;  %1793 = vrot.lane.b32.xlu0 %v1735_v22, %s6717_s22  ;;  %v1598_v24 = vld [vmem:[#allocation2 + $0x98] sm:$0x3f] }
 0x3ef   :  { %2101 = vrot.lane.b32.xlu1 %v2046_v30, %s6718_s23 }
 0x3f0   :  { %v7925_v40 = vpop.permute.xlu0 %2501  ;;  %v2362_v11 = vpop.permute.xlu1 %2361 }
 0x3f1   :  { %v2394_v27 = vsel %vm2387_vm1, %v7837_v44, %v2362_v11  ;;  %v2395_v62 = vsel %vm2387_vm1, %v2362_v11, %v7858_v0  ;;  %v2722_v53 = vld [vmem:[#allocation3 + $0x450] sm:$0xff]  ;;  %v2721_v41 = vld [vmem:[#allocation3 + $0x448] sm:$0xff] }
 0x3f2   :  { %2432 = vst [vmem:[#allocation3 + $0x458] sm:$0x3f] %v2394_v27  ;;  %2433 = vst [vmem:[#allocation3 + $0x460] sm:$0x3f] %v2395_v62  ;;  %1931 = vrot.lane.b32.xlu0 %v1873_v48, %s6712_s20  ;;  %v6405_v17 = vpack.c.bf16 %v2722_v53, %v2703_v57  ;;  %v6407_v16 = vpack.c.bf16 %v2721_v41, %v2702_v14  ;;  %v2184_v27 = vld [vmem:[#allocation2 + $0x80] sm:$0x3f] }
 0x3f3   :  { %2235 = vrot.lane.b32.xlu1 %v2182_v31, %s6719_s24 }
 0x3f4   :  { %v7933_v20 = vpop.permute.xlu0 %1781  ;;  %6406 = vmatprep.subr.bf16.mxu0 %v6405_v17  ;;  %v1500_v19 = vpop.permute.xlu1 %1499  ;;  %v2049_v17 = vld [vmem:[#allocation2 + $0x98] sm:$0x3f] }
 0x3f5   :  { %v1530_v44 = vsel %vm1521_vm10, %v7757_v2, %v1500_v19  ;;  %v1531_v43 = vsel %vm1521_vm10, %v1500_v19, %v7866_v6  ;;  %6408 = vmatpush1.bf16.msra.mxu0 %v6407_v16  ;;  %v2705_v22 = vld [vmem:[#allocation3 + $0x3c8] sm:$0xff]  ;;  %v2704_v48 = vld [vmem:[#allocation3 + $0x3c0] sm:$0xff]  ;;  %v2322_v16 = vld [vmem:[#allocation2 + $0x80] sm:$0x3f] }
 0x3f6   :  { %1568 = vst [vmem:[#allocation3 + $0x40] sm:$0x3f] %v1530_v44  ;;  %1569 = vst [vmem:[#allocation3 + $0x48] sm:$0x3f] %v1531_v43  ;;  %2517 = vrot.lane.b32.xlu0 %v2461_v51, %s6721_s26  ;;  %v1874_v51 = vld [vmem:[#allocation2 + $0x98] sm:$0x3f] }
 0x3f7   :  { %2373 = vrot.lane.b32.xlu1 %v2320_v55, %s6720_s25  ;;  %v1458_v55 = vld [vmem:[#allocation2 + $0x88] sm:$0x3f] }
 0x3f8   :  { %v7941_v18 = vpop.permute.xlu0 %1919  ;;  %v1638_v3 = vpop.permute.xlu1 %1637 }
 0x3f9   :  { %v1668_v2 = vsel %vm1659_vm11, %v7765_v54, %v1638_v3  ;;  %v1669_v30 = vsel %vm1659_vm11, %v1638_v3, %v7874_v13  ;;  %v2724_v11 = vld [vmem:[#allocation3 + $0x460] sm:$0xff]  ;;  %v2723_v57 = vld [vmem:[#allocation3 + $0x458] sm:$0xff] }
 0x3fa   :  { %1706 = vst [vmem:[#allocation3 + $0xd8] sm:$0x3f] %v1668_v2  ;;  %1707 = vst [vmem:[#allocation3 + $0xe0] sm:$0x3f] %v1669_v30  ;;  %1657 = vrot.lane.b32.xlu0 %v1598_v24, %s6716_s21  ;;  %v6421_v62 = vpack.c.bf16 %v2724_v11, %v2705_v22  ;;  %v6423_v53 = vpack.c.bf16 %v2723_v57, %v2704_v48  ;;  %v2187_v2 = vld [vmem:[#allocation2 + $0x98] sm:$0x3f] }
 0x3fb   :  { %2239 = vrot.lane.b32.xlu1 %v2184_v27, %s6719_s24 }
 0x3fc   :  { %v7949_v14 = vpop.permute.xlu0 %2091  ;;  %6422 = vmatprep.subr.bf16.mxu1 %v6421_v62  ;;  %v2496_v41 = vpop.permute.xlu1 %2495  ;;  %v1596_v62 = vld [vmem:[#allocation2 + $0x88] sm:$0x3f] }
 0x3fd   :  { %v2530_v54 = vsel %vm2525_vm0, %v7788_v9, %v2496_v41  ;;  %v2531_v31 = vsel %vm2525_vm0, %v2496_v41, %v7882_v32  ;;  %6424 = vmatpush1.bf16.msra.mxu1 %v6423_v53  ;;  %v2593_v27 = vld [vmem:[#allocation3 + $0x48] sm:$0xff]  ;;  %v2592_v41 = vld [vmem:[#allocation3 + $0x40] sm:$0xff] }
 0x3fe   :  { %2568 = vst [vmem:[#allocation3 + $0x4e0] sm:$0x3f] %v2530_v54  ;;  %2569 = vst [vmem:[#allocation3 + $0x4e8] sm:$0x3f] %v2531_v31  ;;  %2107 = vrot.lane.b32.xlu0 %v2049_v17, %s6718_s23 }
 0x3ff   :  { %2377 = vrot.lane.b32.xlu1 %v2322_v16, %s6720_s25 }
 0x400   :  { %v7957_v19 = vpop.permute.xlu0 %2095  ;;  %v1504_v44 = vpop.permute.xlu1 %1503 }
 0x401   :  { %v1532_v43 = vsel %vm1521_vm10, %v7866_v6, %v1504_v44  ;;  %v1533_v9 = vsel %vm1521_vm10, %v1504_v44, %v7893_v56  ;;  %v2612_v3 = vld [vmem:[#allocation3 + $0xe0] sm:$0xff]  ;;  %v2611_v30 = vld [vmem:[#allocation3 + $0xd8] sm:$0xff]  ;;  %v2325_v44 = vld [vmem:[#allocation2 + $0x98] sm:$0x3f] }
 0x402   :  { %1570 = vst [vmem:[#allocation3 + $0x50] sm:$0x3f] %v1532_v43  ;;  %1571 = vst [vmem:[#allocation3 + $0x58] sm:$0x3f] %v1533_v9  ;;  %1933 = vrot.lane.b32.xlu0 %v1874_v51, %s6712_s20  ;;  %v6425_v53 = vpack.c.bf16 %v2612_v3, %v2593_v27  ;;  %v6427_v54 = vpack.c.bf16 %v2611_v30, %v2592_v41  ;;  %v2458_v43 = vld [vmem:[#allocation2 + $0x70] sm:$0x3f] }
 0x403   :  { %1515 = vrot.lane.b32.xlu1 %v1458_v55, %s6714_s3  ;;  %v2188_v9 = vld [vmem:[#allocation2 + $0xa0] sm:$0x3f] }
 0x404   :  { %v7965_v24 = vpop.permute.xlu0 %2229  ;;  %v1642_v22 = vpop.permute.xlu1 %1641 }
 0x405   :  { %v1670_v6 = vsel %vm1659_vm11, %v7874_v13, %v1642_v22  ;;  %v1671_v11 = vsel %vm1659_vm11, %v1642_v22, %v7901_v42  ;;  %v2741_v48 = vld [vmem:[#allocation3 + $0x4e8] sm:$0xff]  ;;  %v2740_v57 = vld [vmem:[#allocation3 + $0x4e0] sm:$0xff] }
 0x406   :  { %1708 = vst [vmem:[#allocation3 + $0xe8] sm:$0x3f] %v1670_v6  ;;  %1709 = vst [vmem:[#allocation3 + $0xf0] sm:$0x3f] %v1671_v11  ;;  %2245 = vrot.lane.b32.xlu0 %v2187_v2, %s6719_s24  ;;  %2917 = vmatprep.subr.mxu0 %v2741_v48  ;;  %v1734_v22 = vld [vmem:[#allocation2 + $0x88] sm:$0x3f] }
 0x407   :  { %1653 = vrot.lane.b32.xlu1 %v1596_v62, %s6716_s21  ;;  %2918 = vmatpush1.msra.mxu0 %v2740_v57  ;;  %v1872_v48 = vld [vmem:[#allocation2 + $0x88] sm:$0x3f]  ;;  %v2464_v57 = vld [vmem:[#allocation2 + $0xa0] sm:$0x3f] }
 0x408   :  { %v7973_v31 = vpop.permute.xlu0 %2367  ;;  %6426 = vmatprep.subr.bf16.mxu0 %v6425_v53  ;;  %v1776_v13 = vpop.permute.xlu1 %1775  ;;  %6213 = vmatmul.mubr.msk.f32.vlgmr.msra.gmra.mrb[12].mxu0 %vm2755_vm2, %v7835_v38 }
 0x409   :  { %v1806_v17 = vsel %vm1797_vm14, %v7797_v34, %v1776_v13  ;;  %v1807_v16 = vsel %vm1797_vm14, %v1776_v13, %v7909_v49  ;;  %6428 = vmatpush1.bf16.msra.mxu0 %v6427_v54  ;;  %3107 = vmatprep.mubr.f32.mxu0 %v7847_v23 }
 0x40a   :  { %1844 = vst [vmem:[#allocation3 + $0x170] sm:$0x3f] %v1806_v17  ;;  %1845 = vst [vmem:[#allocation3 + $0x178] sm:$0x3f] %v1807_v16  ;;  %2383 = vrot.lane.b32.xlu0 %v2325_v44, %s6720_s25  ;;  %v2460_v16 = vld [vmem:[#allocation2 + $0x80] sm:$0x3f] }
 0x40b   :  { %2511 = vrot.lane.b32.xlu1 %v2458_v43, %s6721_s26 }
 0x40c   :  { %v7984_v51 = vpop.permute.xlu0 %2233  ;;  %v1914_v55 = vpop.permute.xlu1 %1913 }
 0x40d   :  { %v1944_v34 = vsel %vm1935_vm15, %v7803_v52, %v1914_v55  ;;  %v1945_v3 = vsel %vm1935_vm15, %v1914_v55, %v7917_v4  ;;  %v2462_v52 = vld [vmem:[#allocation2 + $0x90] sm:$0x3f] }
 0x40e   :  { %1982 = vst [vmem:[#allocation3 + $0x208] sm:$0x3f] %v1944_v34  ;;  %1983 = vst [vmem:[#allocation3 + $0x210] sm:$0x3f] %v1945_v3  ;;  %2247 = vrot.lane.b32.xlu0 %v2188_v9, %s6719_s24  ;;  %v2614_v9 = vld [vmem:[#allocation3 + $0xf0] sm:$0xff]  ;;  %v2613_v34 = vld [vmem:[#allocation3 + $0xe8] sm:$0xff] }
 0x40f   :  { %1791 = vrot.lane.b32.xlu1 %v1734_v22, %s6717_s22 }
 0x410   :  { %v7992_v2 = vpop.permute.xlu0 %2371 }
 0x411   :  { %v2500_v30 = vpop.permute.xlu1 %2499  ;;  %v2631_v53 = vld [vmem:[#allocation3 + $0x178] sm:$0xff]  ;;  %v2630_v13 = vld [vmem:[#allocation3 + $0x170] sm:$0xff] }
 0x412   :  { %v2532_v6 = vsel %vm2525_vm0, %v7882_v32, %v2500_v30  ;;  %v2533_v11 = vsel %vm2525_vm0, %v2500_v30, %v7925_v40  ;;  %2519 = vrot.lane.b32.xlu0 %v2462_v52, %s6721_s26  ;;  %v1460_v52 = vld [vmem:[#allocation2 + $0x98] sm:$0x3f] }
 0x413   :  { %2570 = vst [vmem:[#allocation3 + $0x4f0] sm:$0x3f] %v2532_v6  ;;  %2571 = vst [vmem:[#allocation3 + $0x4f8] sm:$0x3f] %v2533_v11  ;;  %1929 = vrot.lane.b32.xlu1 %v1872_v48, %s6712_s20  ;;  %v2595_v11 = vld [vmem:[#allocation3 + $0x58] sm:$0xff] }
 0x414   :  { %v8000_v27 = vpop.permute.xlu0 %1509  ;;  %v6441_v48 = vpack.c.bf16 %v2614_v9, %v2595_v11  ;;  %v2669_v11 = vld [vmem:[#allocation3 + $0x2a8] sm:$0xff] }
 0x415   :  { %v1780_v62 = vpop.permute.xlu1 %1779  ;;  %v2650_v54 = vld [vmem:[#allocation3 + $0x210] sm:$0xff]  ;;  %v2649_v17 = vld [vmem:[#allocation3 + $0x208] sm:$0xff] }
 0x416   :  { %v1808_v41 = vsel %vm1797_vm14, %v7909_v49, %v1780_v62  ;;  %v1809_v32 = vsel %vm1797_vm14, %v1780_v62, %v7933_v20  ;;  %v6429_v44 = vpack.c.bf16 %v2650_v54, %v2631_v53  ;;  %v6431_v43 = vpack.c.bf16 %v2649_v17, %v2630_v13  ;;  %2523 = vrot.lane.b32.xlu0 %v2464_v57, %s6721_s26  ;;  %v2594_v57 = vld [vmem:[#allocation3 + $0x50] sm:$0xff]  ;;  %v2048_v54 = vld [vmem:[#allocation2 + $0x90] sm:$0x3f] }
 0x417   :  { %1846 = vst [vmem:[#allocation3 + $0x180] sm:$0x3f] %v1808_v41  ;;  %1847 = vst [vmem:[#allocation3 + $0x188] sm:$0x3f] %v1809_v32  ;;  %2515 = vrot.lane.b32.xlu1 %v2460_v16, %s6721_s26  ;;  %v6443_v62 = vpack.c.bf16 %v2613_v34, %v2594_v57  ;;  %v1736_v34 = vld [vmem:[#allocation2 + $0x98] sm:$0x3f] }
 0x418   :  { %v8008_v55 = vpop.permute.xlu0 %1647  ;;  %6430 = vmatprep.subr.bf16.mxu0 %v6429_v44  ;;  %v2668_v57 = vld [vmem:[#allocation3 + $0x2a0] sm:$0xff] }
 0x419   :  { %v1918_v49 = vpop.permute.xlu1 %1917  ;;  %6432 = vmatpush1.bf16.msra.mxu0 %v6431_v43 }
 0x41a   :  { %v1946_v3 = vsel %vm1935_vm15, %v7917_v4, %v1918_v49  ;;  %v1947_v22 = vsel %vm1935_vm15, %v1918_v49, %v7941_v18  ;;  %v2743_v30 = vld [vmem:[#allocation3 + $0x4f8] sm:$0xff]  ;;  %v2742_v6 = vld [vmem:[#allocation3 + $0x4f0] sm:$0xff] }
 0x41b   :  { %1984 = vst [vmem:[#allocation3 + $0x218] sm:$0x3f] %v1946_v3  ;;  %1985 = vst [vmem:[#allocation3 + $0x220] sm:$0x3f] %v1947_v22  ;;  %2988 = vmatprep.subr.mxu1 %v2743_v30  ;;  %1519 = vrot.lane.b32.xlu1 %v1460_v52, %s6714_s3 }
 0x41c   :  { %2989 = vmatpush1.msra.mxu1 %v2742_v6  ;;  %v8015_v53 = vpop.permute.xlu0 %2505 }
 0x41d   :  { %6442 = vmatprep.subr.bf16.mxu1 %v6441_v48  ;;  %v2090_v4 = vpop.permute.xlu1 %2089  ;;  %6214 = vmatmul.mubr.msk.f32.vlgmr.msra.gmra.mrb[12].mxu1 %vm2755_vm2, %v7835_v38 }
 0x41e   :  { %v2120_v41 = vsel %vm2111_vm12, %v7818_v37, %v2090_v4  ;;  %v2121_v32 = vsel %vm2111_vm12, %v2090_v4, %v7949_v14  ;;  %6444 = vmatpush1.bf16.msra.mxu1 %v6443_v62  ;;  %3178 = vmatprep.mubr.f32.mxu1 %v7847_v23  ;;  %v2633_v16 = vld [vmem:[#allocation3 + $0x188] sm:$0xff]  ;;  %v2632_v9 = vld [vmem:[#allocation3 + $0x180] sm:$0xff] }
 0x41f   :  { %2158 = vst [vmem:[#allocation3 + $0x338] sm:$0x3f] %v2120_v41  ;;  %2159 = vst [vmem:[#allocation3 + $0x340] sm:$0x3f] %v2121_v32  ;;  %2105 = vrot.lane.b32.xlu1 %v2048_v54, %s6718_s23  ;;  %v2186_v4 = vld [vmem:[#allocation2 + $0x90] sm:$0x3f] }
 0x420   :  { %v8025_v13 = vpop.permute.xlu0 %1513 }
 0x421   :  { %v2094_v17 = vpop.permute.xlu1 %2093 }
 0x422   :  { %v2122_v44 = vsel %vm2111_vm12, %v7949_v14, %v2094_v17  ;;  %v2123_v37 = vsel %vm2111_vm12, %v2094_v17, %v7957_v19  ;;  %v2652_v43 = vld [vmem:[#allocation3 + $0x220] sm:$0xff]  ;;  %v2651_v49 = vld [vmem:[#allocation3 + $0x218] sm:$0xff] }
 0x423   :  { %2160 = vst [vmem:[#allocation3 + $0x348] sm:$0x3f] %v2122_v44  ;;  %2161 = vst [vmem:[#allocation3 + $0x350] sm:$0x3f] %v2123_v37  ;;  %v6445_v3 = vpack.c.bf16 %v2652_v43, %v2633_v16  ;;  %v6447_v22 = vpack.c.bf16 %v2651_v49, %v2632_v9  ;;  %1795 = vrot.lane.b32.xlu1 %v1736_v34, %s6717_s22  ;;  %v2671_v16 = vld [vmem:[#allocation3 + $0x2b8] sm:$0xff]  ;;  %v2670_v43 = vld [vmem:[#allocation3 + $0x2b0] sm:$0xff] }
 0x424   :  { %v8032_v30 = vpop.permute.xlu0 %1651  ;;  %v2324_v49 = vld [vmem:[#allocation2 + $0x90] sm:$0x3f] }
 0x425   :  { %6446 = vmatprep.subr.bf16.mxu1 %v6445_v3  ;;  %v2228_v6 = vpop.permute.xlu1 %2227 }
 0x426   :  { %v2258_v14 = vsel %vm2249_vm13, %v7850_v33, %v2228_v6  ;;  %v2259_v52 = vsel %vm2249_vm13, %v2228_v6, %v7965_v24  ;;  %6448 = vmatpush1.bf16.msra.mxu1 %v6447_v22  ;;  %v2688_v48 = vld [vmem:[#allocation3 + $0x340] sm:$0xff]  ;;  %v2687_v62 = vld [vmem:[#allocation3 + $0x338] sm:$0xff] }
 0x427   :  { %2296 = vst [vmem:[#allocation3 + $0x3d0] sm:$0x3f] %v2258_v14  ;;  %2297 = vst [vmem:[#allocation3 + $0x3d8] sm:$0x3f] %v2259_v52  ;;  %v6433_v41 = vpack.c.bf16 %v2688_v48, %v2669_v11  ;;  %v6435_v32 = vpack.c.bf16 %v2687_v62, %v2668_v57  ;;  %2243 = vrot.lane.b32.xlu1 %v2186_v4, %s6719_s24  ;;  %v2326_v11 = vld [vmem:[#allocation2 + $0xa0] sm:$0x3f] }
 0x428   :  { %v8039_v54 = vpop.permute.xlu0 %1785 }
 0x429   :  { %6434 = vmatprep.subr.bf16.mxu0 %v6433_v41  ;;  %v2366_v17 = vpop.permute.xlu1 %2365 }
 0x42a   :  { %v2396_v33 = vsel %vm2387_vm1, %v7858_v0, %v2366_v17  ;;  %v2397_v44 = vsel %vm2387_vm1, %v2366_v17, %v7973_v31  ;;  %6436 = vmatpush1.bf16.msra.mxu0 %v6435_v32  ;;  %v2690_v37 = vld [vmem:[#allocation3 + $0x350] sm:$0xff]  ;;  %v2689_v9 = vld [vmem:[#allocation3 + $0x348] sm:$0xff] }
 0x42b   :  { %2434 = vst [vmem:[#allocation3 + $0x468] sm:$0x3f] %v2396_v33  ;;  %2435 = vst [vmem:[#allocation3 + $0x470] sm:$0x3f] %v2397_v44  ;;  %v6449_v34 = vpack.c.bf16 %v2690_v37, %v2671_v16  ;;  %v6451_v3 = vpack.c.bf16 %v2689_v9, %v2670_v43  ;;  %2381 = vrot.lane.b32.xlu1 %v2324_v49, %s6720_s25  ;;  %v2463_v17 = vld [vmem:[#allocation2 + $0x98] sm:$0x3f] }
 0x42c   :  { %v8046_v22 = vpop.permute.xlu0 %1923 }
 0x42d   :  { %6450 = vmatprep.subr.bf16.mxu1 %v6449_v34  ;;  %v2232_v6 = vpop.permute.xlu1 %2231 }
 0x42e   :  { %v2260_v0 = vsel %vm2249_vm13, %v7965_v24, %v2232_v6  ;;  %v2261_v14 = vsel %vm2249_vm13, %v2232_v6, %v7984_v51  ;;  %6452 = vmatpush1.bf16.msra.mxu1 %v6451_v3  ;;  %v2707_v57 = vld [vmem:[#allocation3 + $0x3d8] sm:$0xff]  ;;  %v2706_v24 = vld [vmem:[#allocation3 + $0x3d0] sm:$0xff] }
 0x42f   :  { %2298 = vst [vmem:[#allocation3 + $0x3e0] sm:$0x3f] %v2260_v0  ;;  %2299 = vst [vmem:[#allocation3 + $0x3e8] sm:$0x3f] %v2261_v14  ;;  %2385 = vrot.lane.b32.xlu1 %v2326_v11, %s6720_s25 }
 0x430   :  { %v8053_v52 = vpop.permute.xlu0 %2509 }
 0x431   :  { %v2370_v48 = vpop.permute.xlu1 %2369 }
 0x432   :  { %v2398_v62 = vsel %vm2387_vm1, %v7973_v31, %v2370_v48  ;;  %v2399_v4 = vsel %vm2387_vm1, %v2370_v48, %v7992_v2  ;;  %v2726_v41 = vld [vmem:[#allocation3 + $0x470] sm:$0xff]  ;;  %v2725_v32 = vld [vmem:[#allocation3 + $0x468] sm:$0xff] }
 0x433   :  { %2436 = vst [vmem:[#allocation3 + $0x478] sm:$0x3f] %v2398_v62  ;;  %2437 = vst [vmem:[#allocation3 + $0x480] sm:$0x3f] %v2399_v4  ;;  %v6437_v16 = vpack.c.bf16 %v2726_v41, %v2707_v57  ;;  %v6439_v33 = vpack.c.bf16 %v2725_v32, %v2706_v24  ;;  %2521 = vrot.lane.b32.xlu1 %v2463_v17, %s6721_s26 }
 0x434   :  { %v8060_v44 = vpop.permute.xlu0 %1789 }
 0x435   :  { %6438 = vmatprep.subr.bf16.mxu0 %v6437_v16  ;;  %v1508_v37 = vpop.permute.xlu1 %1507 }
 0x436   :  { %v1534_v31 = vsel %vm1521_vm10, %v7893_v56, %v1508_v37  ;;  %v1535_v43 = vsel %vm1521_vm10, %v1508_v37, %v8000_v27  ;;  %6440 = vmatpush1.bf16.msra.mxu0 %v6439_v33  ;;  %v2709_v34 = vld [vmem:[#allocation3 + $0x3e8] sm:$0xff]  ;;  %v2708_v0 = vld [vmem:[#allocation3 + $0x3e0] sm:$0xff] }
 0x437   :  { %1572 = vst [vmem:[#allocation3 + $0x60] sm:$0x3f] %v1534_v31  ;;  %1573 = vst [vmem:[#allocation3 + $0x68] sm:$0x3f] %v1535_v43 }
 0x438   :  { %v8066_v9 = vpop.permute.xlu0 %1927 }
 0x439   :  { %v1646_v49 = vpop.permute.xlu1 %1645 }
 0x43a   :  { %v1672_v3 = vsel %vm1659_vm11, %v7901_v42, %v1646_v49  ;;  %v1673_v6 = vsel %vm1659_vm11, %v1646_v49, %v8008_v55  ;;  %v2728_v11 = vld [vmem:[#allocation3 + $0x480] sm:$0xff]  ;;  %v2727_v14 = vld [vmem:[#allocation3 + $0x478] sm:$0xff] }
 0x43b   :  { %1710 = vst [vmem:[#allocation3 + $0xf8] sm:$0x3f] %v1672_v3  ;;  %1711 = vst [vmem:[#allocation3 + $0x100] sm:$0x3f] %v1673_v6  ;;  %v6453_v56 = vpack.c.bf16 %v2728_v11, %v2709_v34  ;;  %v6455_v48 = vpack.c.bf16 %v2727_v14, %v2708_v0 }
 0x43c   :  { %v8072_v57 = vpop.permute.xlu0 %2099 }
 0x43d   :  { %6454 = vmatprep.subr.bf16.mxu1 %v6453_v56  ;;  %v2504_v62 = vpop.permute.xlu1 %2503 }
 0x43e   :  { %6456 = vmatpush1.bf16.msra.mxu1 %v6455_v48  ;;  %v2534_v4 = vsel %vm2525_vm0, %v7925_v40, %v2504_v62  ;;  %v2535_v42 = vsel %vm2525_vm0, %v2504_v62, %v8015_v53  ;;  %v2597_v3 = vld [vmem:[#allocation3 + $0x68] sm:$0xff]  ;;  %v2596_v6 = vld [vmem:[#allocation3 + $0x60] sm:$0xff] }
 0x43f   :  { %2572 = vst [vmem:[#allocation3 + $0x500] sm:$0x3f] %v2534_v4  ;;  %2573 = vst [vmem:[#allocation3 + $0x508] sm:$0x3f] %v2535_v42 }
 0x440   :  { %v8078_v41 = vpop.permute.xlu0 %2103 }
 0x441   :  { %v1512_v24 = vpop.permute.xlu1 %1511 }
 0x442   :  { %v1536_v32 = vsel %vm1521_vm10, %v8000_v27, %v1512_v24  ;;  %v1537_v17 = vsel %vm1521_vm10, %v1512_v24, %v8025_v13  ;;  %v2616_v33 = vld [vmem:[#allocation3 + $0x100] sm:$0xff]  ;;  %v2615_v37 = vld [vmem:[#allocation3 + $0xf8] sm:$0xff] }
 0x443   :  { %1574 = vst [vmem:[#allocation3 + $0x70] sm:$0x3f] %v1536_v32  ;;  %1575 = vst [vmem:[#allocation3 + $0x78] sm:$0x3f] %v1537_v17  ;;  %v6457_v27 = vpack.c.bf16 %v2616_v33, %v2597_v3  ;;  %v6459_v0 = vpack.c.bf16 %v2615_v37, %v2596_v6 }
 0x444   :  { %v8084_v16 = vpop.permute.xlu0 %2237 }
 0x445   :  { %v1650_v40 = vpop.permute.xlu1 %1649 }
 0x446   :  { %v1674_v31 = vsel %vm1659_vm11, %v8008_v55, %v1650_v40  ;;  %v1675_v43 = vsel %vm1659_vm11, %v1650_v40, %v8032_v30  ;;  %v2745_v49 = vld [vmem:[#allocation3 + $0x508] sm:$0xff]  ;;  %v2744_v34 = vld [vmem:[#allocation3 + $0x500] sm:$0xff] }
 0x447   :  { %1712 = vst [vmem:[#allocation3 + $0x108] sm:$0x3f] %v1674_v31  ;;  %1713 = vst [vmem:[#allocation3 + $0x110] sm:$0x3f] %v1675_v43  ;;  %3059 = vmatprep.subr.mxu0 %v2745_v49 }
 0x448   :  { %3060 = vmatpush1.msra.mxu0 %v2744_v34  ;;  %v8090_v11 = vpop.permute.xlu0 %2375 }
 0x449   :  { %6458 = vmatprep.subr.bf16.mxu0 %v6457_v27  ;;  %v1784_v14 = vpop.permute.xlu1 %1783  ;;  %6215 = vmatmul.mubr.msk.f32.vlgmr.msra.gmra.mrb[14].mxu0 %vm2755_vm2, %v7835_v38 }
 0x44a   :  { %v1810_v55 = vsel %vm1797_vm14, %v7933_v20, %v1784_v14  ;;  %v1811_v56 = vsel %vm1797_vm14, %v1784_v14, %v8039_v54  ;;  %6460 = vmatpush1.bf16.msra.mxu0 %v6459_v0  ;;  %3249 = vmatprep.mubr.f32.mxu0 %v7847_v23 }
 0x44b   :  { %1848 = vst [vmem:[#allocation3 + $0x190] sm:$0x3f] %v1810_v55  ;;  %1849 = vst [vmem:[#allocation3 + $0x198] sm:$0x3f] %v1811_v56 }
 0x44c   :  { %v8099_v48 = vpop.permute.xlu0 %2241 }
 0x44d   :  { %v1922_v62 = vpop.permute.xlu1 %1921 }
 0x44e   :  { %v1948_v4 = vsel %vm1935_vm15, %v7941_v18, %v1922_v62  ;;  %v1949_v42 = vsel %vm1935_vm15, %v1922_v62, %v8046_v22  ;;  %v2618_v6 = vld [vmem:[#allocation3 + $0x110] sm:$0xff]  ;;  %v2617_v14 = vld [vmem:[#allocation3 + $0x108] sm:$0xff] }
 0x44f   :  { %1986 = vst [vmem:[#allocation3 + $0x228] sm:$0x3f] %v1948_v4  ;;  %1987 = vst [vmem:[#allocation3 + $0x230] sm:$0x3f] %v1949_v42  ;;  %v2599_v4 = vld [vmem:[#allocation3 + $0x78] sm:$0xff] }
 0x450   :  { %v8105_v20 = vpop.permute.xlu0 %2379  ;;  %v6473_v42 = vpack.c.bf16 %v2618_v6, %v2599_v4 }
 0x451   :  { %v2508_v24 = vpop.permute.xlu1 %2507 }
 0x452   :  { %v2536_v32 = vsel %vm2525_vm0, %v8015_v53, %v2508_v24  ;;  %v2537_v17 = vsel %vm2525_vm0, %v2508_v24, %v8053_v52  ;;  %v2635_v18 = vld [vmem:[#allocation3 + $0x198] sm:$0xff]  ;;  %v2634_v49 = vld [vmem:[#allocation3 + $0x190] sm:$0xff] }
 0x453   :  { %2574 = vst [vmem:[#allocation3 + $0x510] sm:$0x3f] %v2536_v32  ;;  %2575 = vst [vmem:[#allocation3 + $0x518] sm:$0x3f] %v2537_v17  ;;  %v2598_v24 = vld [vmem:[#allocation3 + $0x70] sm:$0xff] }
 0x454   :  { %v8111_v33 = vpop.permute.xlu0 %1517  ;;  %v6475_v17 = vpack.c.bf16 %v2617_v14, %v2598_v24  ;;  %v2673_v14 = vld [vmem:[#allocation3 + $0x2c8] sm:$0xff] }
 0x455   :  { %v1788_v40 = vpop.permute.xlu1 %1787 }
 0x456   :  { %v1812_v37 = vsel %vm1797_vm14, %v8039_v54, %v1788_v40  ;;  %v1813_v31 = vsel %vm1797_vm14, %v1788_v40, %v8060_v44  ;;  %v2654_v43 = vld [vmem:[#allocation3 + $0x230] sm:$0xff]  ;;  %v2653_v34 = vld [vmem:[#allocation3 + $0x228] sm:$0xff] }
 0x457   :  { %1850 = vst [vmem:[#allocation3 + $0x1a0] sm:$0x3f] %v1812_v37  ;;  %1851 = vst [vmem:[#allocation3 + $0x1a8] sm:$0x3f] %v1813_v31  ;;  %v6461_v53 = vpack.c.bf16 %v2654_v43, %v2635_v18  ;;  %v6463_v3 = vpack.c.bf16 %v2653_v34, %v2634_v49 }
 0x458   :  { %v8117_v27 = vpop.permute.xlu0 %1655 }
 0x459   :  { %6462 = vmatprep.subr.bf16.mxu0 %v6461_v53  ;;  %v1926_v0 = vpop.permute.xlu1 %1925 }
 0x45a   :  { %v1950_v55 = vsel %vm1935_vm15, %v8046_v22, %v1926_v0  ;;  %v1951_v54 = vsel %vm1935_vm15, %v1926_v0, %v8066_v9  ;;  %6464 = vmatpush1.bf16.msra.mxu0 %v6463_v3  ;;  %v2747_v56 = vld [vmem:[#allocation3 + $0x518] sm:$0xff]  ;;  %v2746_v62 = vld [vmem:[#allocation3 + $0x510] sm:$0xff] }
 0x45b   :  { %1988 = vst [vmem:[#allocation3 + $0x238] sm:$0x3f] %v1950_v55  ;;  %1989 = vst [vmem:[#allocation3 + $0x240] sm:$0x3f] %v1951_v54  ;;  %3130 = vmatprep.subr.mxu1 %v2747_v56  ;;  %v2672_v56 = vld [vmem:[#allocation3 + $0x2c0] sm:$0xff] }
 0x45c   :  { %3131 = vmatpush1.msra.mxu1 %v2746_v62  ;;  %v8123_v32 = vpop.permute.xlu0 %2513 }
 0x45d   :  { %6474 = vmatprep.subr.bf16.mxu1 %v6473_v42  ;;  %v2098_v40 = vpop.permute.xlu1 %2097  ;;  %6216 = vmatmul.mubr.msk.f32.vlgmr.msra.gmra.mrb[14].mxu1 %vm2755_vm2, %v7835_v38 }
 0x45e   :  { %v2124_v22 = vsel %vm2111_vm12, %v7957_v19, %v2098_v40  ;;  %v2125_v18 = vsel %vm2111_vm12, %v2098_v40, %v8072_v57  ;;  %6476 = vmatpush1.bf16.msra.mxu1 %v6475_v17  ;;  %3320 = vmatprep.mubr.f32.mxu1 %v7847_v23  ;;  %v2637_v43 = vld [vmem:[#allocation3 + $0x1a8] sm:$0xff]  ;;  %v2636_v19 = vld [vmem:[#allocation3 + $0x1a0] sm:$0xff]  ;;  %v2675_v40 = vld [vmem:[#allocation3 + $0x2d8] sm:$0xff] }
 0x45f   :  { %2162 = vst [vmem:[#allocation3 + $0x358] sm:$0x3f] %v2124_v22  ;;  %2163 = vst [vmem:[#allocation3 + $0x360] sm:$0x3f] %v2125_v18 }
 0x460   :  { %v8132_v37 = vpop.permute.xlu0 %1793 }
 0x461   :  { %v2102_v31 = vpop.permute.xlu1 %2101 }
 0x462   :  { %v2126_v49 = vsel %vm2111_vm12, %v8072_v57, %v2102_v31  ;;  %v2127_v38 = vsel %vm2111_vm12, %v2102_v31, %v8078_v41  ;;  %v2656_v34 = vld [vmem:[#allocation3 + $0x240] sm:$0xff]  ;;  %v2655_v53 = vld [vmem:[#allocation3 + $0x238] sm:$0xff]  ;;  %v2674_v31 = vld [vmem:[#allocation3 + $0x2d0] sm:$0xff] }
 0x463   :  { %2164 = vst [vmem:[#allocation3 + $0x368] sm:$0x3f] %v2126_v49  ;;  %2165 = vst [vmem:[#allocation3 + $0x370] sm:$0x3f] %v2127_v38  ;;  %v6477_v3 = vpack.c.bf16 %v2656_v34, %v2637_v43  ;;  %v6479_v6 = vpack.c.bf16 %v2655_v53, %v2636_v19 }
 0x464   :  { %v8138_v23 = vpop.permute.xlu0 %1931 }
 0x465   :  { %6478 = vmatprep.subr.bf16.mxu1 %v6477_v3  ;;  %v2236_v0 = vpop.permute.xlu1 %2235 }
 0x466   :  { %v2262_v55 = vsel %vm2249_vm13, %v7984_v51, %v2236_v0  ;;  %v2263_v57 = vsel %vm2249_vm13, %v2236_v0, %v8084_v16  ;;  %6480 = vmatpush1.bf16.msra.mxu1 %v6479_v6  ;;  %v2692_v54 = vld [vmem:[#allocation3 + $0x360] sm:$0xff]  ;;  %v2691_v62 = vld [vmem:[#allocation3 + $0x358] sm:$0xff] }
 0x467   :  { %2300 = vst [vmem:[#allocation3 + $0x3f0] sm:$0x3f] %v2262_v55  ;;  %2301 = vst [vmem:[#allocation3 + $0x3f8] sm:$0x3f] %v2263_v57  ;;  %v6465_v4 = vpack.c.bf16 %v2692_v54, %v2673_v14  ;;  %v6467_v42 = vpack.c.bf16 %v2691_v62, %v2672_v56 }
 0x468   :  { %v8144_v24 = vpop.permute.xlu0 %2517 }
 0x469   :  { %6466 = vmatprep.subr.bf16.mxu0 %v6465_v4  ;;  %v2374_v17 = vpop.permute.xlu1 %2373 }
 0x46a   :  { %v2400_v22 = vsel %vm2387_vm1, %v7992_v2, %v2374_v17  ;;  %v2401_v51 = vsel %vm2387_vm1, %v2374_v17, %v8090_v11  ;;  %6468 = vmatpush1.bf16.msra.mxu0 %v6467_v42  ;;  %v2694_v18 = vld [vmem:[#allocation3 + $0x370] sm:$0xff]  ;;  %v2693_v43 = vld [vmem:[#allocation3 + $0x368] sm:$0xff] }
 0x46b   :  { %2438 = vst [vmem:[#allocation3 + $0x488] sm:$0x3f] %v2400_v22  ;;  %2439 = vst [vmem:[#allocation3 + $0x490] sm:$0x3f] %v2401_v51  ;;  %v6481_v49 = vpack.c.bf16 %v2694_v18, %v2675_v40  ;;  %v6483_v38 = vpack.c.bf16 %v2693_v43, %v2674_v31 }
 0x46c   :  { %v1658_v34 = vpop.permute.xlu0 %1657 }
 0x46d   :  { %v1678_v19 = vsel %vm1659_vm11, %v8117_v27, %v1658_v34  ;;  %6482 = vmatprep.subr.bf16.mxu1 %v6481_v49  ;;  %v2240_v53 = vpop.permute.xlu1 %2239 }
 0x46e   :  { %1716 = vst [vmem:[#allocation3 + $0x128] sm:$0x3f] %v1678_v19  ;;  %v2264_v2 = vsel %vm2249_vm13, %v8084_v16, %v2240_v53  ;;  %v2265_v3 = vsel %vm2249_vm13, %v2240_v53, %v8099_v48  ;;  %6484 = vmatpush1.bf16.msra.mxu1 %v6483_v38  ;;  %v2711_v55 = vld [vmem:[#allocation3 + $0x3f8] sm:$0xff]  ;;  %v2710_v56 = vld [vmem:[#allocation3 + $0x3f0] sm:$0xff] }
 0x46f   :  { %2302 = vst [vmem:[#allocation3 + $0x400] sm:$0x3f] %v2264_v2  ;;  %2303 = vst [vmem:[#allocation3 + $0x408] sm:$0x3f] %v2265_v3 }
 0x470   :  { %v8156_v6 = vpop.permute.xlu0 %2107 }
 0x471   :  { %v2130_v0 = vsel %vm2111_vm12, %v8156_v6, %v7491_v39  ;;  %v2378_v14 = vpop.permute.xlu1 %2377 }
 0x472   :  { %2168 = vst [vmem:[#allocation3 + $0x388] sm:$0x3f] %v2130_v0  ;;  %v2402_v57 = vsel %vm2387_vm1, %v8090_v11, %v2378_v14  ;;  %v2403_v16 = vsel %vm2387_vm1, %v2378_v14, %v8105_v20  ;;  %v2730_v54 = vld [vmem:[#allocation3 + $0x490] sm:$0xff]  ;;  %v2729_v62 = vld [vmem:[#allocation3 + $0x488] sm:$0xff] }
 0x473   :  { %2440 = vst [vmem:[#allocation3 + $0x498] sm:$0x3f] %v2402_v57  ;;  %2441 = vst [vmem:[#allocation3 + $0x4a0] sm:$0x3f] %v2403_v16  ;;  %v6469_v4 = vpack.c.bf16 %v2730_v54, %v2711_v55  ;;  %v6471_v42 = vpack.c.bf16 %v2729_v62, %v2710_v56 }
 0x474   :  { %v1934_v17 = vpop.permute.xlu0 %1933 }
 0x475   :  { %v1954_v39 = vsel %vm1935_vm15, %v8138_v23, %v1934_v17  ;;  %6470 = vmatprep.subr.bf16.mxu0 %v6469_v4  ;;  %v1516_v40 = vpop.permute.xlu1 %1515 }
 0x476   :  { %1992 = vst [vmem:[#allocation3 + $0x258] sm:$0x3f] %v1954_v39  ;;  %v1538_v11 = vsel %vm1521_vm10, %v8025_v13, %v1516_v40  ;;  %v1539_v22 = vsel %vm1521_vm10, %v1516_v40, %v8111_v33  ;;  %6472 = vmatpush1.bf16.msra.mxu0 %v6471_v42  ;;  %v2713_v31 = vld [vmem:[#allocation3 + $0x408] sm:$0xff]  ;;  %v2712_v34 = vld [vmem:[#allocation3 + $0x400] sm:$0xff] }
 0x477   :  { %1576 = vst [vmem:[#allocation3 + $0x80] sm:$0x3f] %v1538_v11  ;;  %1577 = vst [vmem:[#allocation3 + $0x88] sm:$0x3f] %v1539_v22 }
 0x478   :  { %v8171_v51 = vpop.permute.xlu0 %2245 }
 0x479   :  { %v1654_v18 = vpop.permute.xlu1 %1653 }
 0x47a   :  { %v1676_v43 = vsel %vm1659_vm11, %v8032_v30, %v1654_v18  ;;  %v1677_v49 = vsel %vm1659_vm11, %v1654_v18, %v8117_v27  ;;  %v2732_v38 = vld [vmem:[#allocation3 + $0x4a0] sm:$0xff]  ;;  %v2731_v19 = vld [vmem:[#allocation3 + $0x498] sm:$0xff] }
 0x47b   :  { %1714 = vst [vmem:[#allocation3 + $0x118] sm:$0x3f] %v1676_v43  ;;  %1715 = vst [vmem:[#allocation3 + $0x120] sm:$0x3f] %v1677_v49  ;;  %v6485_v13 = vpack.c.bf16 %v2732_v38, %v2713_v31  ;;  %v6487_v53 = vpack.c.bf16 %v2731_v19, %v2712_v34  ;;  %v8201_v31 = vld [vmem:[%s9446_s4] sm:$0x3] }
 0x47c   :  { %v8177_v2 = vpop.permute.xlu0 %2383  ;;  %v8209_v49 = vld [vmem:[#allocation3 + $0x90] sm:$0xff] }
 0x47d   :  { %6486 = vmatprep.subr.bf16.mxu1 %v6485_v13  ;;  %v2512_v3 = vpop.permute.xlu1 %2511 }
 0x47e   :  { %v2538_v0 = vsel %vm2525_vm0, %v8053_v52, %v2512_v3  ;;  %v2539_v30 = vsel %vm2525_vm0, %v2512_v3, %v8123_v32  ;;  %6488 = vmatpush1.bf16.msra.mxu1 %v6487_v53  ;;  %v2601_v40 = vld [vmem:[#allocation3 + $0x88] sm:$0xff]  ;;  %v2600_v22 = vld [vmem:[#allocation3 + $0x80] sm:$0xff] }
 0x47f   :  { %2576 = vst [vmem:[#allocation3 + $0x520] sm:$0x3f] %v2538_v0  ;;  %2577 = vst [vmem:[#allocation3 + $0x528] sm:$0x3f] %v2539_v30 }
 0x480   :  { %v2248_v27 = vpop.permute.xlu0 %2247 }
 0x481   :  { %v2268_v14 = vsel %vm2249_vm13, %v8171_v51, %v2248_v27  ;;  %v1792_v55 = vpop.permute.xlu1 %1791 }
 0x482   :  { %2306 = vst [vmem:[#allocation3 + $0x420] sm:$0x3f] %v2268_v14  ;;  %v1814_v57 = vsel %vm1797_vm14, %v8060_v44, %v1792_v55  ;;  %v1815_v16 = vsel %vm1797_vm14, %v1792_v55, %v8132_v37  ;;  %v2620_v54 = vld [vmem:[#allocation3 + $0x120] sm:$0xff]  ;;  %v2619_v4 = vld [vmem:[#allocation3 + $0x118] sm:$0xff] }
 0x483   :  { %1852 = vst [vmem:[#allocation3 + $0x1b0] sm:$0x3f] %v1814_v57  ;;  %1853 = vst [vmem:[#allocation3 + $0x1b8] sm:$0x3f] %v1815_v16  ;;  %v6489_v11 = vpack.c.bf16 %v2620_v54, %v2601_v40  ;;  %v6491_v18 = vpack.c.bf16 %v2619_v4, %v2600_v22  ;;  %v2621_v16 = vld [vmem:[#allocation3 + $0x128] sm:$0xff] }
 0x484   :  { %v8189_v52 = vpop.permute.xlu0 %2519 }
 0x485   :  { %v2542_v56 = vsel %vm2525_vm0, %v8144_v24, %v8189_v52  ;;  %v1930_v62 = vpop.permute.xlu1 %1929 }
 0x486   :  { %2580 = vst [vmem:[#allocation3 + $0x540] sm:$0x3f] %v2542_v56  ;;  %v1952_v42 = vsel %vm1935_vm15, %v8066_v9, %v1930_v62  ;;  %v1953_v44 = vsel %vm1935_vm15, %v1930_v62, %v8138_v23  ;;  %v2749_v17 = vld [vmem:[#allocation3 + $0x528] sm:$0xff]  ;;  %v2748_v39 = vld [vmem:[#allocation3 + $0x520] sm:$0xff] }
 0x487   :  { %1990 = vst [vmem:[#allocation3 + $0x248] sm:$0x3f] %v1952_v42  ;;  %1991 = vst [vmem:[#allocation3 + $0x250] sm:$0x3f] %v1953_v44  ;;  %3201 = vmatprep.subr.mxu0 %v2749_v17  ;;  %v2677_v56 = vld [vmem:[#allocation3 + $0x2e8] sm:$0xff]  ;;  %v2676_v44 = vld [vmem:[#allocation3 + $0x2e0] sm:$0xff] }
 0x488   :  { %3202 = vmatpush1.msra.mxu0 %v2748_v39 }
 0x489   :  { %6217 = vmatmul.mubr.msk.f32.vlgmr.msra.gmra.mrb[16].mxu0 %vm2755_vm2, %v8201_v31  ;;  %6490 = vmatprep.subr.bf16.mxu0 %v6489_v11  ;;  %v2516_v9 = vpop.permute.xlu1 %2515 }
 0x48a   :  { %v2540_v23 = vsel %vm2525_vm0, %v8123_v32, %v2516_v9  ;;  %v2541_v43 = vsel %vm2525_vm0, %v2516_v9, %v8144_v24  ;;  %6492 = vmatpush1.bf16.msra.mxu0 %v6491_v18  ;;  %3391 = vmatprep.mubr.f32.mxu0 %v8209_v49  ;;  %v2639_v34 = vld [vmem:[#allocation3 + $0x1b8] sm:$0xff]  ;;  %v2638_v53 = vld [vmem:[#allocation3 + $0x1b0] sm:$0xff] }
 0x48b   :  { %2578 = vst [vmem:[#allocation3 + $0x530] sm:$0x3f] %v2540_v23  ;;  %2579 = vst [vmem:[#allocation3 + $0x538] sm:$0x3f] %v2541_v43  ;;  %v2659_v23 = vld [vmem:[#allocation3 + $0x258] sm:$0xff] }
 0x48d   :  { %v1520_v38 = vpop.permute.xlu1 %1519 }
 0x48e   :  { %v1540_v19 = vsel %vm1521_vm10, %v8111_v33, %v1520_v38  ;;  %v2658_v13 = vld [vmem:[#allocation3 + $0x250] sm:$0xff]  ;;  %v2657_v3 = vld [vmem:[#allocation3 + $0x248] sm:$0xff] }
 0x48f   :  { %1578 = vst [vmem:[#allocation3 + $0x90] sm:$0x3f] %v1540_v19  ;;  %v6493_v32 = vpack.c.bf16 %v2658_v13, %v2639_v34  ;;  %v6495_v0 = vpack.c.bf16 %v2657_v3, %v2638_v53  ;;  %v2697_v19 = vld [vmem:[#allocation3 + $0x388] sm:$0xff] }
 0x491   :  { %6494 = vmatprep.subr.bf16.mxu0 %v6493_v32  ;;  %v2106_v24 = vpop.permute.xlu1 %2105  ;;  %v2678_v32 = vld [vmem:[#allocation3 + $0x2f0] sm:$0xff] }
 0x492   :  { %v2128_v30 = vsel %vm2111_vm12, %v8078_v41, %v2106_v24  ;;  %v2129_v27 = vsel %vm2111_vm12, %v2106_v24, %v8156_v6  ;;  %6496 = vmatpush1.bf16.msra.mxu0 %v6495_v0  ;;  %v2751_v14 = vld [vmem:[#allocation3 + $0x538] sm:$0xff]  ;;  %v2750_v55 = vld [vmem:[#allocation3 + $0x530] sm:$0xff]  ;;  %v2524_v0 = vpop.permute.xlu0 %2523  ;;  %v6512_v24 = vpack.c.bf16 %v2697_v19, %v2678_v32 }
 0x493   :  { %2166 = vst [vmem:[#allocation3 + $0x378] sm:$0x3f] %v2128_v30  ;;  %2167 = vst [vmem:[#allocation3 + $0x380] sm:$0x3f] %v2129_v27  ;;  %3272 = vmatprep.subr.mxu1 %v2751_v14 }
 0x494   :  { %3273 = vmatpush1.msra.mxu1 %v2750_v55 }
 0x495   :  { %6218 = vmatmul.mubr.msk.f32.vlgmr.msra.gmra.mrb[16].mxu1 %vm2755_vm2, %v8201_v31  ;;  %v1796_v33 = vpop.permute.xlu1 %1795  ;;  %6505 = vmatprep.subr.bf16.mxu1 %v6709_v60 }
 0x496   :  { %v1816_v57 = vsel %vm1797_vm14, %v8132_v37, %v1796_v33  ;;  %v2602_v41 = vld [vmem:[#allocation3 + $0x90] sm:$0xff]  ;;  %6279 = vmatprep.mubr.msk.f32.mxu1 %vm6710_vm4, %v8209_v49 }
 0x497   :  { %1854 = vst [vmem:[#allocation3 + $0x1c0] sm:$0x3f] %v1816_v57  ;;  %v6506_v6 = vpack.c.bf16 %v2621_v16, %v2602_v41 }
 0x499   :  { %6507 = vmatpush3.bf16.msra.mxu1 %v6506_v6  ;;  %v2244_v54 = vpop.permute.xlu1 %2243  ;;  %v2716_v6 = vld [vmem:[#allocation3 + $0x420] sm:$0xff] }
 0x49a   :  { %v2266_v62 = vsel %vm2249_vm13, %v8099_v48, %v2244_v54  ;;  %v2267_v4 = vsel %vm2249_vm13, %v2244_v54, %v8171_v51  ;;  %v2696_v42 = vld [vmem:[#allocation3 + $0x380] sm:$0xff]  ;;  %v2695_v17 = vld [vmem:[#allocation3 + $0x378] sm:$0xff]  ;;  %6508 = vmatprep.subr.bf16.mxu1 %v6709_v60 }
 0x49b   :  { %2304 = vst [vmem:[#allocation3 + $0x410] sm:$0x3f] %v2266_v62  ;;  %2305 = vst [vmem:[#allocation3 + $0x418] sm:$0x3f] %v2267_v4  ;;  %v6497_v37 = vpack.c.bf16 %v2696_v42, %v2677_v56  ;;  %v6499_v39 = vpack.c.bf16 %v2695_v17, %v2676_v44  ;;  %v8230_v40 = vpop.f32.mrb[10].mxu0 }
 0x49c   :  { %v3469_v48 = vmul.f32 %v8230_v40, %v7178_v5  ;;  %v8234_v22 = vpop.f32.mrb[11].mxu0 }
 0x49d   :  { %6498 = vmatprep.subr.bf16.mxu0 %v6497_v37  ;;  %v2382_v11 = vpop.permute.xlu1 %2381  ;;  %v3470_v43 = vmul.f32 %v8234_v22, %v7182_v7 }
 0x49e   :  { %v2404_v51 = vsel %vm2387_vm1, %v8105_v20, %v2382_v11  ;;  %v2405_v18 = vsel %vm2387_vm1, %v2382_v11, %v8177_v2  ;;  %6500 = vmatpush1.bf16.msra.mxu0 %v6499_v39  ;;  %v2640_v9 = vld [vmem:[#allocation3 + $0x1c0] sm:$0xff]  ;;  %v3489_v34 = vsel %vm9451_vm3, %v3469_v48, 0.0 }
 0x49f   :  { %2442 = vst [vmem:[#allocation3 + $0x4a8] sm:$0x3f] %v2404_v51  ;;  %2443 = vst [vmem:[#allocation3 + $0x4b0] sm:$0x3f] %v2405_v18  ;;  %v6509_v38 = vpack.c.bf16 %v2659_v23, %v2640_v9  ;;  %v3490_v13 = vsel %vm9451_vm3, %v3470_v43, 0.0 }
 0x4a0   :  { %v3491_v20 = vadd.f32 %v3490_v13, %v3489_v34 }
 0x4a1   :  { %6510 = vmatpush3.bf16.msra.mxu1 %v6509_v38  ;;  %v2386_v53 = vpop.permute.xlu1 %2385 }
 0x4a2   :  { %v2406_v3 = vsel %vm2387_vm1, %v8177_v2, %v2386_v53  ;;  %6511 = vmatprep.subr.bf16.mxu1 %v6709_v60  ;;  %v2715_v27 = vld [vmem:[#allocation3 + $0x418] sm:$0xff]  ;;  %v2714_v57 = vld [vmem:[#allocation3 + $0x410] sm:$0xff] }
 0x4a3   :  { %2444 = vst [vmem:[#allocation3 + $0x4b8] sm:$0x3f] %v2406_v3 }
 0x4a5   :  { %6513 = vmatpush3.bf16.msra.mxu1 %v6512_v24  ;;  %v2522_v30 = vpop.permute.xlu1 %2521 }
 0x4a6   :  { %v2543_v14 = vsel %vm2525_vm0, %v8189_v52, %v2522_v30  ;;  %v2544_v55 = vsel %vm2525_vm0, %v2522_v30, %v2524_v0  ;;  %v2734_v33 = vld [vmem:[#allocation3 + $0x4b0] sm:$0xff]  ;;  %v2733_v41 = vld [vmem:[#allocation3 + $0x4a8] sm:$0xff]  ;;  %6514 = vmatprep.subr.bf16.mxu1 %v6709_v60  ;;  %v2752_v52 = vld [vmem:[#allocation3 + $0x540] sm:$0xff] }
 0x4a7   :  { %2581 = vst [vmem:[#allocation3 + $0x548] sm:$0x3f] %v2543_v14  ;;  %2582 = vst [vmem:[#allocation3 + $0x550] sm:$0x3f] %v2544_v55  ;;  %v6501_v2 = vpack.c.bf16 %v2734_v33, %v2715_v27  ;;  %v6503_v16 = vpack.c.bf16 %v2733_v41, %v2714_v57 }
 0x4a9   :  { %6502 = vmatprep.subr.bf16.mxu0 %v6501_v2 }
 0x4aa   :  { %6504 = vmatpush1.bf16.msra.mxu0 %v6503_v16  ;;  %v2735_v54 = vld [vmem:[#allocation3 + $0x4b8] sm:$0xff] }
 0x4ab   :  { %v6515_v56 = vpack.c.bf16 %v2735_v54, %v2716_v6 }
 0x4ad   :  { %6516 = vmatpush3.bf16.msra.mxu1 %v6515_v56 }
 0x4ae   :  { %v2753_v62 = vld [vmem:[#allocation3 + $0x548] sm:$0xff]  ;;  %6277 = vmatprep.subr.mxu1 %v8209_v49  ;;  %v2754_v42 = vld [vmem:[#allocation3 + $0x550] sm:$0xff] }
 0x4af   :  { %3343 = vmatprep.subr.mxu0 %v2753_v62  ;;  %v8252_v4 = vpop.f32.mrb[10].mxu1 }
 0x4b0   :  { %3344 = vmatpush1.msra.mxu0 %v2752_v52  ;;  %v3471_v44 = vmul.f32 %v8252_v4, %v7185_v8  ;;  %v8256_v17 = vpop.f32.mrb[11].mxu1 }
 0x4b1   :  { %6219 = vmatmul.mubr.msk.f32.vlgmr.msra.gmra.mrb[18].mxu0 %vm2755_vm2, %v8201_v31  ;;  %6278 = vmatpush3.msra.mxu1 %v2754_v42  ;;  %v3472_v37 = vmul.f32 %v8256_v17, %v7189_v10 }
 0x4b2   :  { %6280 = vmatmul.mubr.msk.f32.vlgmr.msra.gmra.mrb[18].mxu1 %vm2755_vm2, %v8201_v31  ;;  %v3492_v39 = vsel %vm9451_vm3, %v3471_v44, 0.0  ;;  %5150 = vmatprep.mubr.f32.mxu0 %v8209_v49 }
 0x4b3   :  { %v3493_v11 = vadd.f32 %v3492_v39, %v3491_v20  ;;  %v3494_v48 = vsel %vm9451_vm3, %v3472_v37, 0.0  ;;  %5221 = vmatprep.mubr.f32.mxu1 %v8209_v49 }
 0x4b5   :  { %v3495_v51 = vadd.f32 %v3494_v48, %v3493_v11 }
 0x4db   :  { %v8268_v18 = vpop.f32.mrb[12].mxu0 }
 0x4dc   :  { %v3473_v9 = vmul.f32 %v8268_v18, %v7197_v15  ;;  %v8272_v23 = vpop.f32.mrb[13].mxu0 }
 0x4dd   :  { %v3474_v31 = vmul.f32 %v8272_v23, %v7214_v25 }
 0x4de   :  { %v3496_v43 = vsel %vm9451_vm3, %v3473_v9, 0.0 }
 0x4df   :  { %v3497_v38 = vadd.f32 %v3496_v43, %v3495_v51  ;;  %v3498_v34 = vsel %vm9451_vm3, %v3474_v31, 0.0 }
 0x4e1   :  { %v3499_v19 = vadd.f32 %v3498_v34, %v3497_v38 }
 0x4f0   :  { %v8278_v13 = vpop.f32.mrb[12].mxu1 }
 0x4f1   :  { %v3475_v53 = vmul.f32 %v8278_v13, %v7216_v26  ;;  %v8282_v20 = vpop.f32.mrb[13].mxu1 }
 0x4f2   :  { %v3476_v3 = vmul.f32 %v8282_v20, %v7230_v35 }
 0x4f3   :  { %v3500_v32 = vsel %vm9451_vm3, %v3475_v53, 0.0 }
 0x4f4   :  { %v3501_v0 = vadd.f32 %v3500_v32, %v3499_v19  ;;  %v3502_v24 = vsel %vm9451_vm3, %v3476_v3, 0.0 }
 0x4f6   :  { %v3503_v30 = vadd.f32 %v3502_v24, %v3501_v0 }
 0x51c   :  { %v8288_v27 = vpop.f32.mrb[14].mxu0 }
 0x51d   :  { %v3477_v14 = vmul.f32 %v8288_v27, %v7233_v36  ;;  %v8292_v55 = vpop.f32.mrb[15].mxu0 }
 0x51e   :  { %v3478_v33 = vmul.f32 %v8292_v55, %v7248_v46 }
 0x51f   :  { %v3504_v57 = vsel %vm9451_vm3, %v3477_v14, 0.0 }
 0x520   :  { %v3505_v41 = vadd.f32 %v3504_v57, %v3503_v30  ;;  %v3506_v2 = vsel %vm9451_vm3, %v3478_v33, 0.0 }
 0x522   :  { %v3507_v16 = vadd.f32 %v3506_v2, %v3505_v41 }
 0x530   :  { %v8298_v6 = vpop.f32.mrb[14].mxu1 }
 0x531   :  { %v3479_v54 = vmul.f32 %v8298_v6, %v7251_v47  ;;  %v8302_v56 = vpop.f32.mrb[15].mxu1 }
 0x532   :  { %v3480_v62 = vmul.f32 %v8302_v56, %v7267_v58 }
 0x533   :  { %v3508_v52 = vsel %vm9451_vm3, %v3479_v54, 0.0 }
 0x534   :  { %v3509_v42 = vadd.f32 %v3508_v52, %v3507_v16  ;;  %v3510_v44 = vsel %vm9451_vm3, %v3480_v62, 0.0 }
 0x536   :  { %v3511_v37 = vadd.f32 %v3510_v44, %v3509_v42 }
 0x55c   :  { %v8308_v39 = vpop.f32.mrb[16].mxu0 }
 0x55d   :  { %v3481_v11 = vmul.f32 %v8308_v39, %v7269_v59  ;;  %v8312_v48 = vpop.f32.mrb[17].mxu0 }
 0x55e   :  { %v3482_v51 = vmul.f32 %v8312_v48, %v7285_v28 }
 0x55f   :  { %v3512_v9 = vsel %vm9451_vm3, %v3481_v11, 0.0 }
 0x560   :  { %v3513_v31 = vadd.f32 %v3512_v9, %v3511_v37  ;;  %v3514_v43 = vsel %vm9451_vm3, %v3482_v51, 0.0  ;;  %v4051_v51 = vld [vmem:[#allocation2] sm:$0x3] }
 0x561   :  { %4091 = vrot.lane.b32.xlu0 %v4051_v51, %s6717_s22  ;;  %v4382_v9 = vld [vmem:[#allocation2 + $0xa0] sm:$0x3] }
 0x562   :  { %v3515_v38 = vadd.f32 %v3514_v43, %v3513_v31 }
 0x565   :  { %4441 = vrot.lane.b32.xlu0 %v4382_v9, %s6718_s23 }
 0x568   :  { %v8318_v34 = vpop.f32.mrb[16].mxu1 }
 0x569   :  { %v3483_v19 = vmul.f32 %v8318_v34, %v7287_v29  ;;  %v8322_v53 = vpop.f32.mrb[17].mxu1 }
 0x56a   :  { %v3484_v3 = vmul.f32 %v8322_v53, %v7298_v45 }
 0x56b   :  { %v3516_v32 = vsel %vm9451_vm3, %v3483_v19, 0.0 }
 0x56c   :  { %v3517_v0 = vadd.f32 %v3516_v32, %v3515_v38  ;;  %v3518_v24 = vsel %vm9451_vm3, %v3484_v3, 0.0 }
 0x56e   :  { %v3519_v30 = vadd.f32 %v3518_v24, %v3517_v0 }
 0x584   :  { %v8328_v14 = vpop.f32.mrb[18].mxu0 }
 0x585   :  { %v3485_v33 = vmul.f32 %v8328_v14, %v7301_v12  ;;  %v8332_v57 = vpop.f32.mrb[19].mxu0  ;;  %v8334_v41 = vpop.f32.mrb[18].mxu1 }
 0x586   :  { %v3486_v2 = vmul.f32 %v8332_v57, %v7310_v1  ;;  %v3487_v16 = vmul.f32 %v8334_v41, %v7313_v21  ;;  %v6281_v54 = vpop.f32.mrb[19].mxu1 }
 0x587   :  { %v3520_v62 = vsel %vm9451_vm3, %v3485_v33, 0.0 }
 0x588   :  { %v3521_v52 = vadd.f32 %v3520_v62, %v3519_v30  ;;  %v3522_v42 = vsel %vm9451_vm3, %v3486_v2, 0.0  ;;  %v3524_v44 = vsel %vm9451_vm3, %v3487_v16, 0.0 }
 0x58a   :  { %v3523_v37 = vadd.f32 %v3522_v42, %v3521_v52 }
 0x58c   :  { %v3525_v11 = vadd.f32 %v3524_v44, %v3523_v37 }
 0x58e   :  { %3526 = vadd.xlane.f32.xlu1 %v3525_v11 }
 0x61b   :  { %v3527_v31 = vpop.xlane.xlu1 %3526 }
 0x61c   :  { %v8345_v43 = vmul.f32 0.00048828125, %v3527_v31 }
 0x61e   :  { %v8349_v38 = vsub.f32 %v8230_v40, %v8345_v43  ;;  %v8353_v19 = vsub.f32 %v8234_v22, %v8345_v43  ;;  %v8357_v3 = vsub.f32 %v8252_v4, %v8345_v43  ;;  %v8361_v32 = vsub.f32 %v8256_v17, %v8345_v43 }
 0x61f   :  { %v8369_v40 = vsub.f32 %v8268_v18, %v8345_v43  ;;  %v8375_v4 = vsub.f32 %v8272_v23, %v8345_v43  ;;  %v8381_v2 = vsub.f32 %v8278_v13, %v8345_v43  ;;  %v8387_v54 = vsub.f32 %v8282_v20, %v8345_v43 }
 0x620   :  { %v3548_v0 = vmul.f32 %v8349_v38, %v7178_v5  ;;  %v3549_v24 = vmul.f32 %v8353_v19, %v7182_v7  ;;  %v3550_v22 = vmul.f32 %v8357_v3, %v7185_v8  ;;  %v3551_v17 = vmul.f32 %v8361_v32, %v7189_v10 }
 0x621   :  { %v3552_v18 = vmul.f32 %v8369_v40, %v7197_v15  ;;  %v3553_v23 = vmul.f32 %v8375_v4, %v7214_v25  ;;  %v8395_v13 = vsub.f32 %v8288_v27, %v8345_v43  ;;  %v3554_v37 = vmul.f32 %v8381_v2, %v7216_v26 }
 0x622   :  { %v3567_v30 = vmul.f32 %v3548_v0, %v3548_v0  ;;  %v3568_v33 = vmul.f32 %v3549_v24, %v3549_v24  ;;  %v3569_v16 = vmul.f32 %v3550_v22, %v3550_v22  ;;  %v3570_v62 = vmul.f32 %v3551_v17, %v3551_v17 }
 0x623   :  { %v3571_v11 = vmul.f32 %v3552_v18, %v3552_v18  ;;  %v8402_v9 = vsub.f32 %v8292_v55, %v8345_v43  ;;  %v3555_v31 = vmul.f32 %v8387_v54, %v7230_v35  ;;  %v3572_v0 = vmul.f32 %v3553_v23, %v3553_v23 }
 0x624   :  { %v3586_v52 = vsel %vm9451_vm3, %v3567_v30, 0.0  ;;  %v3587_v42 = vsel %vm9451_vm3, %v3568_v33, 0.0  ;;  %v3589_v20 = vsel %vm9451_vm3, %v3569_v16, 0.0  ;;  %v3591_v24 = vsel %vm9451_vm3, %v3570_v62, 0.0 }
 0x625   :  { %v3588_v44 = vadd.f32 %v3587_v42, %v3586_v52  ;;  %v8409_v27 = vsub.f32 %v8298_v6, %v8345_v43  ;;  %v3556_v17 = vmul.f32 %v8395_v13, %v7233_v36  ;;  %v3573_v30 = vmul.f32 %v3554_v37, %v3554_v37 }
 0x626   :  { %v3593_v33 = vsel %vm9451_vm3, %v3571_v11, 0.0  ;;  %v8416_v55 = vsub.f32 %v8302_v56, %v8345_v43  ;;  %v3557_v16 = vmul.f32 %v8402_v9, %v7248_v46  ;;  %v3574_v23 = vmul.f32 %v3555_v31, %v3555_v31 }
 0x627   :  { %v3590_v51 = vadd.f32 %v3589_v20, %v3588_v44  ;;  %v3595_v62 = vsel %vm9451_vm3, %v3572_v0, 0.0  ;;  %v8423_v6 = vsub.f32 %v8308_v39, %v8345_v43  ;;  %v3558_v42 = vmul.f32 %v8409_v27, %v7251_v47 }
 0x628   :  { %v3575_v44 = vmul.f32 %v3556_v17, %v3556_v17  ;;  %v3597_v37 = vsel %vm9451_vm3, %v3573_v30, 0.0  ;;  %v8430_v56 = vsub.f32 %v8312_v48, %v8345_v43  ;;  %v3559_v20 = vmul.f32 %v8416_v55, %v7267_v58 }
 0x629   :  { %v3592_v22 = vadd.f32 %v3591_v24, %v3590_v51  ;;  %v3576_v51 = vmul.f32 %v3557_v16, %v3557_v16  ;;  %v3599_v31 = vsel %vm9451_vm3, %v3574_v23, 0.0  ;;  %v8437_v39 = vsub.f32 %v8318_v34, %v8345_v43 }
 0x62a   :  { %v3560_v24 = vmul.f32 %v8423_v6, %v7269_v59  ;;  %v3601_v17 = vsel %vm9451_vm3, %v3575_v44, 0.0  ;;  %v8444_v48 = vsub.f32 %v8322_v53, %v8345_v43  ;;  %v8451_v34 = vsub.f32 %v8328_v14, %v8345_v43 }
 0x62b   :  { %v3594_v18 = vadd.f32 %v3593_v33, %v3592_v22  ;;  %v3577_v22 = vmul.f32 %v3558_v42, %v3558_v42  ;;  %v3561_v33 = vmul.f32 %v8430_v56, %v7285_v28  ;;  %v3603_v16 = vsel %vm9451_vm3, %v3576_v51, 0.0 }
 0x62c   :  { %v8458_v53 = vsub.f32 %v8332_v57, %v8345_v43  ;;  %v8465_v14 = vsub.f32 %v8334_v41, %v8345_v43 }
 0x62d   :  { %v3596_v52 = vadd.f32 %v3595_v62, %v3594_v18  ;;  %v3578_v18 = vmul.f32 %v3559_v20, %v3559_v20  ;;  %v3562_v62 = vmul.f32 %v8437_v39, %v7287_v29  ;;  %v3605_v42 = vsel %vm9451_vm3, %v3577_v22, 0.0 }
 0x62e   :  { %v3565_v57 = vmul.f32 %v8458_v53, %v7310_v1 }
 0x62f   :  { %v3598_v11 = vadd.f32 %v3597_v37, %v3596_v52  ;;  %v3579_v52 = vmul.f32 %v3560_v24, %v3560_v24  ;;  %v3563_v37 = vmul.f32 %v8444_v48, %v7298_v45  ;;  %v3607_v20 = vsel %vm9451_vm3, %v3578_v18, 0.0 }
 0x630   :  { %v3566_v18 = vmul.f32 %v8465_v14, %v7313_v21 }
 0x631   :  { %v3600_v0 = vadd.f32 %v3599_v31, %v3598_v11  ;;  %v3580_v11 = vmul.f32 %v3561_v33, %v3561_v33  ;;  %v3564_v31 = vmul.f32 %v8451_v34, %v7301_v12  ;;  %v3609_v24 = vsel %vm9451_vm3, %v3579_v52, 0.0 }
 0x632   :  { %v3585_v52 = vmul.f32 %v3566_v18, %v3566_v18 }
 0x633   :  { %v3602_v30 = vadd.f32 %v3601_v17, %v3600_v0  ;;  %v3581_v0 = vmul.f32 %v3562_v62, %v3562_v62  ;;  %v3582_v17 = vmul.f32 %v3563_v37, %v3563_v37 }
 0x635   :  { %v3604_v23 = vadd.f32 %v3603_v16, %v3602_v30  ;;  %v3611_v30 = vsel %vm9451_vm3, %v3580_v11, 0.0  ;;  %v3583_v16 = vmul.f32 %v3564_v31, %v3564_v31  ;;  %v3613_v41 = vsel %vm9451_vm3, %v3581_v0, 0.0  ;;  %v3468_v31 = vld [vmem:[%s9447_s5] sm:$0x3]  ;;  %v8485_v0 = vpop.permute.xlu0 %4091 }
 0x636   :  { %v3615_v62 = vsel %vm9451_vm3, %v3582_v17, 0.0  ;;  %v3621_v11 = vsel %vm9451_vm3, %v3585_v52, 0.0  ;;  %3656 = vperm.xlu1 %6692, %v3468_v31  }
 0x637   :  { %v3606_v44 = vadd.f32 %v3605_v42, %v3604_v23  ;;  %v3584_v23 = vmul.f32 %v3565_v57, %v3565_v57 }
 0x639   :  { %v3608_v51 = vadd.f32 %v3607_v20, %v3606_v44  ;;  %v3617_v44 = vsel %vm9451_vm3, %v3583_v16, 0.0  ;;  %v3619_v37 = vsel %vm9451_vm3, %v3584_v23, 0.0  ;;  %v4188_v23 = vld [vmem:[#allocation2] sm:$0x3] }
 0x63a   :  { %6693 = vset.pattern.permute.xlu1 %v6711_v61 }
 0x63b   :  { %v3610_v22 = vadd.f32 %v3609_v24, %v3608_v51  ;;  %3698 = vperm.xlu1 %6693, %v3468_v31  }
 0x63d   :  { %v3612_v33 = vadd.f32 %v3611_v30, %v3610_v22  ;;  %v8487_v22 = vpop.permute.xlu0 %4441 }
 0x63f   :  { %v3614_v43 = vadd.f32 %v3613_v41, %v3612_v33  ;;  %6695 = vset.pattern.permute.xlu1 %v6713_v50  ;;  %v3777_v41 = vld [vmem:[#allocation2] sm:$0x3] }
 0x640   :  { %3817 = vrot.lane.b32.xlu1 %v3777_v41, %s6714_s3 }
 0x641   :  { %v3616_v42 = vadd.f32 %v3615_v62, %v3614_v43  ;;  %v3914_v43 = vld [vmem:[#allocation2] sm:$0x3] }
 0x643   :  { %v3618_v20 = vadd.f32 %v3617_v44, %v3616_v42 }
 0x644   :  { %3954 = vrot.lane.b32.xlu1 %v3914_v43, %s6716_s21 }
 0x645   :  { %v3620_v51 = vadd.f32 %v3619_v37, %v3618_v20 }
 0x647   :  { %v3622_v24 = vadd.f32 %v3621_v11, %v3620_v51 }
 0x648   :  { %4228 = vrot.lane.b32.xlu1 %v4188_v23, %s6712_s20 }
 0x649   :  { %3623 = vadd.xlane.f32.xlu0 %v3622_v24 }
 0x6b5   :  { %v8492_v50 = vpop.permute.xlu1 %3656 }
 0x6ba   :  { %v8504_v37 = vpop.permute.xlu1 %3698 }
 0x6d6   :  { %v3624_v57 = vpop.xlane.xlu0 %3623 }
 0x6d7   :  { %v3625_v17 = vmul.f32 0.00048828125, %v3624_v57 }
 0x6d9   :  { %v3626_v30 = vmax.f32 %v3625_v17, 0.0 }
 0x6db   :  { %v3627_v33 = vadd.f32 1e-05, %v3626_v30 }
 0x6dd   :  { %6699 = vrsqrt.f32 %v3627_v33 }
 0x6e7   :  { %v6700_v18 = vpop.eup %6699 }
 0x6e8   :  { %v3629_v16 = vmul.f32 %v6700_v18, %v3468_v31 }
 0x6ea   :  { %3632 = vperm.xlu0 %6694, %v3629_v16  }
 0x769   :  { %v8494_v62 = vpop.permute.xlu0 %3632 }
 0x76a   :  { %v3637_v42 = vmul.f32 %v8494_v62, %v8357_v3  ;;  %v3635_v52 = vmul.f32 %v8494_v62, %v8349_v38  ;;  %v3636_v44 = vmul.f32 %v8494_v62, %v8353_v19  ;;  %v3638_v20 = vmul.f32 %v8494_v62, %v8361_v32 }
 0x76b   :  { %v3639_v51 = vmul.f32 %v8494_v62, %v8369_v40  ;;  %v3640_v11 = vmul.f32 %v8494_v62, %v8375_v4  ;;  %v3641_v3 = vmul.f32 %v8494_v62, %v8381_v2  ;;  %v3642_v38 = vmul.f32 %v8494_v62, %v8387_v54 }
 0x76c   :  { %v3661_v24 = vadd.f32 %v8492_v50, %v3637_v42  ;;  %v3659_v19 = vadd.f32 %v8492_v50, %v3635_v52  ;;  %v3660_v32 = vadd.f32 %v8492_v50, %v3636_v44  ;;  %v3662_v31 = vadd.f32 %v8492_v50, %v3638_v20 }
 0x76d   :  { %v3663_v57 = vadd.f32 %v8492_v50, %v3639_v51  ;;  %v3664_v40 = vadd.f32 %v8492_v50, %v3640_v11  ;;  %v3665_v4 = vadd.f32 %v8492_v50, %v3641_v3  ;;  %v3666_v17 = vadd.f32 %v8492_v50, %v3642_v38 }
 0x76e   :  { %vm3680_vm5 = vcmp.ge.f32.partialorder %v3661_v24, 0.0  ;;  %v3703_v2 = vmul.f32 %v8504_v37, %v3661_v24  ;;  %vm3678_vm6 = vcmp.ge.f32.partialorder %v3659_v19, 0.0  ;;  %v3701_v54 = vmul.f32 %v8504_v37, %v3659_v19 }
 0x76f   :  { %vm3679_vm7 = vcmp.ge.f32.partialorder %v3660_v32, 0.0  ;;  %v3702_v30 = vmul.f32 %v8504_v37, %v3660_v32  ;;  %vm3681_vm8 = vcmp.ge.f32.partialorder %v3662_v31, 0.0  ;;  %v3704_v33 = vmul.f32 %v8504_v37, %v3662_v31 }
 0x770   :  { %v3722_v18 = vsel %vm3680_vm5, %v3661_v24, %v3703_v2  ;;  %v3720_v16 = vsel %vm3678_vm6, %v3659_v19, %v3701_v54  ;;  %vm3682_vm9 = vcmp.ge.f32.partialorder %v3663_v57, 0.0  ;;  %v3705_v41 = vmul.f32 %v8504_v37, %v3663_v57 }
 0x771   :  { %v3741_v43 = vmul.f32 %v3722_v18, %v7185_v8  ;;  %v3739_v23 = vmul.f32 %v3720_v16, %v7178_v5  ;;  %v3721_v42 = vsel %vm3679_vm7, %v3660_v32, %v3702_v30  ;;  %v3723_v52 = vsel %vm3681_vm8, %v3662_v31, %v3704_v33 }
 0x772   :  { %v3740_v44 = vmul.f32 %v3721_v42, %v7182_v7  ;;  %v3742_v20 = vmul.f32 %v3723_v52, %v7189_v10  ;;  %v3724_v51 = vsel %vm3682_vm9, %v3663_v57, %v3705_v41  ;;  %vm3683_vm3 = vcmp.ge.f32.partialorder %v3664_v40, 0.0 }
 0x773   :  { %3760 = vst [vmem:[#allocation2 + $0x18] sm:$0x3] %v3741_v43  ;;  %3758 = vst [vmem:[#allocation2 + $0x8] sm:$0x3] %v3739_v23  ;;  %v3743_v11 = vmul.f32 %v3724_v51, %v7197_v15  ;;  %v3706_v3 = vmul.f32 %v8504_v37, %v3664_v40  ;;  %vm3684_vm5 = vcmp.ge.f32.partialorder %v3665_v4, 0.0  ;;  %v3707_v38 = vmul.f32 %v8504_v37, %v3665_v4 }
 0x774   :  { %3759 = vst [vmem:[#allocation2 + $0x10] sm:$0x3] %v3740_v44  ;;  %3761 = vst [vmem:[#allocation2 + $0x20] sm:$0x3] %v3742_v20  ;;  %vm3685_vm6 = vcmp.ge.f32.partialorder %v3666_v17, 0.0  ;;  %v3708_v24 = vmul.f32 %v8504_v37, %v3666_v17  ;;  %v3643_v19 = vmul.f32 %v8494_v62, %v8395_v13  ;;  %v3645_v32 = vmul.f32 %v8494_v62, %v8409_v27 }
 0x775   :  { %3762 = vst [vmem:[#allocation2 + $0x28] sm:$0x3] %v3743_v11  ;;  %v3725_v31 = vsel %vm3683_vm3, %v3664_v40, %v3706_v3  ;;  %v3726_v57 = vsel %vm3684_vm5, %v3665_v4, %v3707_v38  ;;  %v3644_v2 = vmul.f32 %v8494_v62, %v8402_v9 }
 0x776   :  { %v3744_v54 = vmul.f32 %v3725_v31, %v7214_v25  ;;  %v3745_v30 = vmul.f32 %v3726_v57, %v7216_v26  ;;  %v3727_v33 = vsel %vm3685_vm6, %v3666_v17, %v3708_v24  ;;  %v3667_v18 = vadd.f32 %v8492_v50, %v3643_v19 }
 0x777   :  { %v3746_v16 = vmul.f32 %v3727_v33, %v7230_v35  ;;  %v3669_v13 = vadd.f32 %v8492_v50, %v3645_v32  ;;  %v3668_v41 = vadd.f32 %v8492_v50, %v3644_v2  ;;  %v3646_v32 = vmul.f32 %v8494_v62, %v8416_v55 }
 0x778   :  { %3763 = vst [vmem:[#allocation2 + $0x30] sm:$0x3] %v3744_v54  ;;  %3764 = vst [vmem:[#allocation2 + $0x38] sm:$0x3] %v3745_v30  ;;  %vm3686_vm3 = vcmp.ge.f32.partialorder %v3667_v18, 0.0  ;;  %v3709_v27 = vmul.f32 %v8504_v37, %v3667_v18  ;;  %v3647_v31 = vmul.f32 %v8494_v62, %v8423_v6  ;;  %v3649_v33 = vmul.f32 %v8494_v62, %v8437_v39 }
 0x779   :  { %3765 = vst [vmem:[#allocation2 + $0x40] sm:$0x3] %v3746_v16  ;;  %vm3688_vm7 = vcmp.ge.f32.partialorder %v3669_v13, 0.0  ;;  %v3711_v9 = vmul.f32 %v8504_v37, %v3669_v13  ;;  %vm3687_vm8 = vcmp.ge.f32.partialorder %v3668_v41, 0.0  ;;  %v3710_v40 = vmul.f32 %v8504_v37, %v3668_v41 }
 0x77a   :  { %v3780_v4 = vld [vmem:[#allocation2 + $0x18] sm:$0x3]  ;;  %v3778_v17 = vld [vmem:[#allocation2 + $0x8] sm:$0x3]  ;;  %v3728_v43 = vsel %vm3686_vm3, %v3667_v18, %v3709_v27  ;;  %v3670_v54 = vadd.f32 %v8492_v50, %v3646_v32  ;;  %v3671_v30 = vadd.f32 %v8492_v50, %v3647_v31  ;;  %v3648_v18 = vmul.f32 %v8494_v62, %v8430_v56 }
 0x77b   :  { %3823 = vrot.lane.b32.xlu0 %v3780_v4, %s6714_s3  ;;  %3819 = vrot.lane.b32.xlu1 %v3778_v17, %s6714_s3  ;;  %v3747_v23 = vmul.f32 %v3728_v43, %v7233_v36  ;;  %v3730_v42 = vsel %vm3688_vm7, %v3669_v13, %v3711_v9  ;;  %v3729_v52 = vsel %vm3687_vm8, %v3668_v41, %v3710_v40  ;;  %v3917_v51 = vld [vmem:[#allocation2 + $0x18] sm:$0x3]  ;;  %v3779_v11 = vld [vmem:[#allocation2 + $0x10] sm:$0x3]  ;;  %v4052_v3 = vld [vmem:[#allocation2 + $0x8] sm:$0x3] }
 0x77c   :  { %v3749_v44 = vmul.f32 %v3730_v42, %v7251_v47  ;;  %v3748_v20 = vmul.f32 %v3729_v52, %v7248_v46  ;;  %v3915_v38 = vld [vmem:[#allocation2 + $0x8] sm:$0x3]  ;;  %v3916_v19 = vld [vmem:[#allocation2 + $0x10] sm:$0x3]  ;;  %v4054_v57 = vld [vmem:[#allocation2 + $0x18] sm:$0x3]  ;;  %v3650_v6 = vmul.f32 %v8494_v62, %v8444_v48  ;;  %v3651_v13 = vmul.f32 %v8494_v62, %v8451_v34 }
 0x77d   :  { %3766 = vst [vmem:[#allocation2 + $0x48] sm:$0x3] %v3747_v23  ;;  %v4189_v24 = vld [vmem:[#allocation2 + $0x8] sm:$0x3]  ;;  %v3781_v2 = vld [vmem:[#allocation2 + $0x20] sm:$0x3]  ;;  %v3712_v41 = vmul.f32 %v8504_v37, %v3670_v54  ;;  %v3713_v27 = vmul.f32 %v8504_v37, %v3671_v30  ;;  %v3652_v39 = vmul.f32 %v8494_v62, %v8458_v53  ;;  %v3653_v56 = vmul.f32 %v8494_v62, %v8465_v14 }
 0x77e   :  { %3768 = vst [vmem:[#allocation2 + $0x58] sm:$0x3] %v3749_v44  ;;  %3767 = vst [vmem:[#allocation2 + $0x50] sm:$0x3] %v3748_v20  ;;  %v4191_v55 = vld [vmem:[#allocation2 + $0x18] sm:$0x3]  ;;  %v3673_v9 = vadd.f32 %v8492_v50, %v3649_v33  ;;  %v3672_v48 = vadd.f32 %v8492_v50, %v3648_v18  ;;  %v3674_v4 = vadd.f32 %v8492_v50, %v3650_v6 }
 0x77f   :  { %3960 = vrot.lane.b32.xlu0 %v3917_v51, %s6716_s21  ;;  %3821 = vrot.lane.b32.xlu1 %v3779_v11, %s6714_s3  ;;  %v3918_v16 = vld [vmem:[#allocation2 + $0x20] sm:$0x3]  ;;  %v4364_v40 = vld [vmem:[#allocation2 + $0x10] sm:$0x3]  ;;  %v3675_v17 = vadd.f32 %v8492_v50, %v3651_v13  ;;  %vm3689_vm9 = vcmp.ge.f32.partialorder %v3670_v54, 0.0  ;;  %vm3690_vm5 = vcmp.ge.f32.partialorder %v3671_v30, 0.0  ;;  %v3676_v14 = vadd.f32 %v8492_v50, %v3652_v39 }
 0x780   :  { %v4053_v34 = vld [vmem:[#allocation2 + $0x10] sm:$0x3]  ;;  %v3731_v53 = vsel %vm3689_vm9, %v3670_v54, %v3712_v41  ;;  %v3732_v43 = vsel %vm3690_vm5, %v3671_v30, %v3713_v27  ;;  %v3677_v62 = vadd.f32 %v8492_v50, %v3653_v56  ;;  %v4363_v23 = vld [vmem:[#allocation2 + $0x8] sm:$0x3]  ;;  %v3715_v51 = vmul.f32 %v8504_v37, %v3673_v9  ;;  %v4332_v13 = vld [vmem:[#allocation2 + $0x40] sm:$0x3] }
 0x781   :  { %v3750_v42 = vmul.f32 %v3731_v53, %v7267_v58  ;;  %v4326_v52 = vld [vmem:[#allocation2 + $0x10] sm:$0x3]  ;;  %v4325_v44 = vld [vmem:[#allocation2 + $0x8] sm:$0x3]  ;;  %v3751_v20 = vmul.f32 %v3732_v43, %v7269_v59  ;;  %v3714_v11 = vmul.f32 %v8504_v37, %v3672_v48  ;;  %v3717_v50 = vmul.f32 %v8504_v37, %v3675_v17  ;;  %v4331_v41 = vld [vmem:[#allocation2 + $0x38] sm:$0x3] }
 0x782   :  { %4345 = vst [vmem:[#allocation3 + $0x268] sm:$0x3] %v4326_v52  ;;  %4344 = vst [vmem:[#allocation3 + $0x260] sm:$0x3] %v4325_v44  ;;  %v4367_v32 = vld [vmem:[#allocation2 + $0x28] sm:$0x3]  ;;  %v3718_v31 = vmul.f32 %v8504_v37, %v3676_v14 }
 0x783   :  { %4093 = vrot.lane.b32.xlu0 %v4052_v3, %s6717_s22  ;;  %3956 = vrot.lane.b32.xlu1 %v3915_v38, %s6716_s21  ;;  %v4190_v3 = vld [vmem:[#allocation2 + $0x10] sm:$0x3]  ;;  %v4328_v38 = vld [vmem:[#allocation2 + $0x20] sm:$0x3]  ;;  %3769 = vst [vmem:[#allocation2 + $0x60] sm:$0x3] %v3750_v42 }
 0x784   :  { %4347 = vst [vmem:[#allocation3 + $0x278] sm:$0x3] %v4328_v38  ;;  %3770 = vst [vmem:[#allocation2 + $0x68] sm:$0x3] %v3751_v20  ;;  %vm3692_vm6 = vcmp.ge.f32.partialorder %v3673_v9, 0.0  ;;  %vm3691_vm3 = vcmp.ge.f32.partialorder %v3672_v48, 0.0 }
 0x785   :  { %v3734_v54 = vsel %vm3692_vm6, %v3673_v9, %v3715_v51  ;;  %v3733_v30 = vsel %vm3691_vm3, %v3672_v48, %v3714_v11  ;;  %vm3693_vm7 = vcmp.ge.f32.partialorder %v3674_v4, 0.0  ;;  %v4330_v33 = vld [vmem:[#allocation2 + $0x30] sm:$0x3]  ;;  %vm3694_vm8 = vcmp.ge.f32.partialorder %v3675_v17, 0.0  ;;  %v4329_v6 = vld [vmem:[#allocation2 + $0x28] sm:$0x3] }
 0x786   :  { %v3753_v18 = vmul.f32 %v3734_v54, %v7287_v29  ;;  %4349 = vst [vmem:[#allocation3 + $0x288] sm:$0x3] %v4330_v33  ;;  %v3736_v27 = vsel %vm3694_vm8, %v3675_v17, %v3717_v50  ;;  %4348 = vst [vmem:[#allocation3 + $0x280] sm:$0x3] %v4329_v6  ;;  %vm3695_vm9 = vcmp.ge.f32.partialorder %v3676_v14, 0.0  ;;  %vm3696_vm5 = vcmp.ge.f32.partialorder %v3677_v62, 0.0 }
 0x787   :  { %4230 = vrot.lane.b32.xlu0 %v4189_v24, %s6712_s20  ;;  %3958 = vrot.lane.b32.xlu1 %v3916_v19, %s6716_s21  ;;  %v4327_v24 = vld [vmem:[#allocation2 + $0x18] sm:$0x3]  ;;  %v3716_v19 = vmul.f32 %v8504_v37, %v3674_v4  ;;  %4351 = vst [vmem:[#allocation3 + $0x298] sm:$0x3] %v4332_v13  ;;  %4350 = vst [vmem:[#allocation3 + $0x290] sm:$0x3] %v4331_v41  ;;  %v3755_v39 = vmul.f32 %v3736_v27, %v7301_v12 }
 0x788   :  { %4346 = vst [vmem:[#allocation3 + $0x270] sm:$0x3] %v4327_v24  ;;  %v4334_v56 = vld [vmem:[#allocation2 + $0x50] sm:$0x3]  ;;  %v4333_v9 = vld [vmem:[#allocation2 + $0x48] sm:$0x3]  ;;  %v3737_v48 = vsel %vm3695_vm9, %v3676_v14, %v3718_v31 }
 0x789   :  { %3772 = vst [vmem:[#allocation2 + $0x78] sm:$0x3] %v3753_v18  ;;  %4353 = vst [vmem:[#allocation3 + $0x2a8] sm:$0x3] %v4334_v56  ;;  %v4502_v53 = vld [vmem:[#allocation2 + $0x18] sm:$0x3] }
 0x78a   :  { %4352 = vst [vmem:[#allocation3 + $0x2a0] sm:$0x3] %v4333_v9  ;;  %3774 = vst [vmem:[#allocation2 + $0x88] sm:$0x3] %v3755_v39  ;;  %v4192_v43 = vld [vmem:[#allocation2 + $0x20] sm:$0x3] }
 0x78b   :  { %4097 = vrot.lane.b32.xlu0 %v4054_v57, %s6717_s22  ;;  %3825 = vrot.lane.b32.xlu1 %v3781_v2, %s6714_s3  ;;  %v3719_v57 = vmul.f32 %v8504_v37, %v3677_v62  ;;  %v4055_v2 = vld [vmem:[#allocation2 + $0x20] sm:$0x3]  ;;  %v4639_v14 = vld [vmem:[#allocation2 + $0x18] sm:$0x3]  ;;  %v4504_v52 = vld [vmem:[#allocation2 + $0x28] sm:$0x3] }
 0x78c   :  { %v4366_v42 = vld [vmem:[#allocation2 + $0x20] sm:$0x3]  ;;  %v4501_v44 = vld [vmem:[#allocation2 + $0x10] sm:$0x3]  ;;  %v4641_v20 = vld [vmem:[#allocation2 + $0x28] sm:$0x3] }
 0x78d   :  { %v4638_v51 = vld [vmem:[#allocation2 + $0x10] sm:$0x3]  ;;  %v4336_v38 = vld [vmem:[#allocation2 + $0x60] sm:$0x3]  ;;  %v4776_v33 = vld [vmem:[#allocation2 + $0x18] sm:$0x3] }
 0x78e   :  { %v3783_v11 = vld [vmem:[#allocation2 + $0x30] sm:$0x3]  ;;  %4355 = vst [vmem:[#allocation3 + $0x2b8] sm:$0x3] %v4336_v38  ;;  %v4640_v18 = vld [vmem:[#allocation2 + $0x20] sm:$0x3] }
 0x78f   :  { %4234 = vrot.lane.b32.xlu0 %v4191_v55, %s6712_s20  ;;  %3962 = vrot.lane.b32.xlu1 %v3918_v16, %s6716_s21  ;;  %v3752_v55 = vmul.f32 %v3733_v30, %v7285_v28  ;;  %v3735_v16 = vsel %vm3693_vm7, %v3674_v4, %v3716_v19  ;;  %v3756_v4 = vmul.f32 %v3737_v48, %v7310_v1  ;;  %v3920_v24 = vld [vmem:[#allocation2 + $0x30] sm:$0x3]  ;;  %v4503_v19 = vld [vmem:[#allocation2 + $0x20] sm:$0x3]  ;;  %v3921_v6 = vld [vmem:[#allocation2 + $0x38] sm:$0x3] }
 0x790   :  { %v3754_v37 = vmul.f32 %v3735_v16, %v7298_v45  ;;  %v3782_v16 = vld [vmem:[#allocation2 + $0x28] sm:$0x3]  ;;  %v4775_v27 = vld [vmem:[#allocation2 + $0x10] sm:$0x3]  ;;  %v4777_v56 = vld [vmem:[#allocation2 + $0x20] sm:$0x3] }
 0x791   :  { %3771 = vst [vmem:[#allocation2 + $0x70] sm:$0x3] %v3752_v55  ;;  %3775 = vst [vmem:[#allocation2 + $0x90] sm:$0x3] %v3756_v4  ;;  %v4341_v54 = vld [vmem:[#allocation2 + $0x88] sm:$0x3] }
 0x792   :  { %3773 = vst [vmem:[#allocation2 + $0x80] sm:$0x3] %v3754_v37  ;;  %4360 = vst [vmem:[#allocation3 + $0x2e0] sm:$0x3] %v4341_v54  ;;  %v3784_v55 = vld [vmem:[#allocation2 + $0x38] sm:$0x3] }
 0x793   :  { %4405 = vrot.lane.b32.xlu0 %v4364_v40, %s6718_s23  ;;  %4095 = vrot.lane.b32.xlu1 %v4053_v34, %s6717_s22  ;;  %v3738_v40 = vsel %vm3696_vm5, %v3677_v62, %v3719_v57  ;;  %v4335_v34 = vld [vmem:[#allocation2 + $0x58] sm:$0x3]  ;;  %v3919_v13 = vld [vmem:[#allocation2 + $0x28] sm:$0x3]  ;;  %v3785_v9 = vld [vmem:[#allocation2 + $0x40] sm:$0x3] }
 0x794   :  { %v3757_v17 = vmul.f32 %v3738_v40, %v7313_v21  ;;  %4354 = vst [vmem:[#allocation3 + $0x2b0] sm:$0x3] %v4335_v34  ;;  %v4365_v62 = vld [vmem:[#allocation2 + $0x18] sm:$0x3]  ;;  %v4056_v41 = vld [vmem:[#allocation2 + $0x28] sm:$0x3] }
 0x795   :  { %v4339_v57 = vld [vmem:[#allocation2 + $0x78] sm:$0x3]  ;;  %v4193_v37 = vld [vmem:[#allocation2 + $0x28] sm:$0x3]  ;;  %v3922_v40 = vld [vmem:[#allocation2 + $0x40] sm:$0x3] }
 0x796   :  { %3776 = vst [vmem:[#allocation2 + $0x98] sm:$0x3] %v3757_v17  ;;  %4358 = vst [vmem:[#allocation3 + $0x2d0] sm:$0x3] %v4339_v57  ;;  %v4774_v39 = vld [vmem:[#allocation2 + $0x8] sm:$0x3] }
 0x797   :  { %4403 = vrot.lane.b32.xlu0 %v4363_v23, %s6718_s23  ;;  %4232 = vrot.lane.b32.xlu1 %v4190_v3, %s6712_s20  ;;  %v4637_v23 = vld [vmem:[#allocation2 + $0x8] sm:$0x3]  ;;  %v4058_v48 = vld [vmem:[#allocation2 + $0x38] sm:$0x3]  ;;  %v4057_v4 = vld [vmem:[#allocation2 + $0x30] sm:$0x3] }
 0x798   :  { %v4500_v3 = vld [vmem:[#allocation2 + $0x8] sm:$0x3]  ;;  %v4338_v50 = vld [vmem:[#allocation2 + $0x70] sm:$0x3]  ;;  %v4195_v34 = vld [vmem:[#allocation2 + $0x38] sm:$0x3] }
 0x799   :  { %4357 = vst [vmem:[#allocation3 + $0x2c8] sm:$0x3] %v4338_v50  ;;  %v4340_v31 = vld [vmem:[#allocation2 + $0x80] sm:$0x3]  ;;  %v4368_v17 = vld [vmem:[#allocation2 + $0x30] sm:$0x3] }
 0x79a   :  { %4359 = vst [vmem:[#allocation3 + $0x2d8] sm:$0x3] %v4340_v31  ;;  %v4644_v50 = vld [vmem:[#allocation2 + $0x40] sm:$0x3] }
 0x79b   :  { %4411 = vrot.lane.b32.xlu0 %v4367_v32, %s6718_s23  ;;  %4099 = vrot.lane.b32.xlu1 %v4055_v2, %s6717_s22  ;;  %v4337_v32 = vld [vmem:[#allocation2 + $0x68] sm:$0x3]  ;;  %v4342_v2 = vld [vmem:[#allocation2 + $0x90] sm:$0x3] }
 0x79c   :  { %4356 = vst [vmem:[#allocation3 + $0x2c0] sm:$0x3] %v4337_v32  ;;  %4361 = vst [vmem:[#allocation3 + $0x2e8] sm:$0x3] %v4342_v2  ;;  %v4371_v32 = vld [vmem:[#allocation2 + $0x48] sm:$0x3] }
 0x79d   :  { %v4343_v30 = vld [vmem:[#allocation2 + $0x98] sm:$0x3] }
 0x79e   :  { %4362 = vst [vmem:[#allocation3 + $0x2f0] sm:$0x3] %v4343_v30  ;;  %v3786_v30 = vld [vmem:[#allocation2 + $0x48] sm:$0x3] }
 0x79f   :  { %4544 = vrot.lane.b32.xlu0 %v4502_v53, %s6719_s24  ;;  %4236 = vrot.lane.b32.xlu1 %v4192_v43, %s6712_s20  ;;  %v4194_v53 = vld [vmem:[#allocation2 + $0x30] sm:$0x3]  ;;  %v3818_v43 = vpop.permute.xlu1 %3817 }
 0x7a3   :  { %4681 = vrot.lane.b32.xlu0 %v4639_v14, %s6720_s25  ;;  %4407 = vrot.lane.b32.xlu1 %v4365_v62, %s6718_s23  ;;  %v4370_v14 = vld [vmem:[#allocation2 + $0x40] sm:$0x3]  ;;  %v4778_v62 = vld [vmem:[#allocation2 + $0x28] sm:$0x3] }
 0x7a7   :  { %4677 = vrot.lane.b32.xlu0 %v4637_v23, %s6720_s25  ;;  %4409 = vrot.lane.b32.xlu1 %v4366_v42, %s6718_s23  ;;  %v3955_v23 = vpop.permute.xlu1 %3954  ;;  %v4505_v42 = vld [vmem:[#allocation2 + $0x30] sm:$0x3] }
 0x7ab   :  { %4548 = vrot.lane.b32.xlu0 %v4504_v52, %s6719_s24  ;;  %4542 = vrot.lane.b32.xlu1 %v4501_v44, %s6719_s24  ;;  %v4059_v52 = vld [vmem:[#allocation2 + $0x40] sm:$0x3]  ;;  %v4642_v44 = vld [vmem:[#allocation2 + $0x30] sm:$0x3] }
 0x7af   :  { %4685 = vrot.lane.b32.xlu0 %v4641_v20, %s6720_s25  ;;  %4679 = vrot.lane.b32.xlu1 %v4638_v51, %s6720_s25  ;;  %v4196_v20 = vld [vmem:[#allocation2 + $0x40] sm:$0x3]  ;;  %v4229_v51 = vpop.permute.xlu1 %4228 }
 0x7b3   :  { %3829 = vrot.lane.b32.xlu0 %v3783_v11, %s6714_s3  ;;  %4540 = vrot.lane.b32.xlu1 %v4500_v3, %s6719_s24  ;;  %v4507_v11 = vld [vmem:[#allocation2 + $0x40] sm:$0x3]  ;;  %v4369_v3 = vld [vmem:[#allocation2 + $0x38] sm:$0x3] }
 0x7b7   :  { %3966 = vrot.lane.b32.xlu0 %v3920_v24, %s6716_s21  ;;  %4546 = vrot.lane.b32.xlu1 %v4503_v19, %s6719_s24 }
 0x7bb   :  { %4818 = vrot.lane.b32.xlu0 %v4776_v33, %s6721_s26  ;;  %4683 = vrot.lane.b32.xlu1 %v4640_v18, %s6720_s25  ;;  %v4506_v33 = vld [vmem:[#allocation2 + $0x38] sm:$0x3] }
 0x7bf   :  { %3831 = vrot.lane.b32.xlu0 %v3784_v55, %s6714_s3  ;;  %3827 = vrot.lane.b32.xlu1 %v3782_v16, %s6714_s3 }
 0x7c3   :  { %3968 = vrot.lane.b32.xlu0 %v3921_v6, %s6716_s21  ;;  %3964 = vrot.lane.b32.xlu1 %v3919_v13, %s6716_s21  ;;  %v3923_v13 = vld [vmem:[#allocation2 + $0x48] sm:$0x3] }
 0x7c7   :  { %4101 = vrot.lane.b32.xlu0 %v4056_v41, %s6717_s22  ;;  %4816 = vrot.lane.b32.xlu1 %v4775_v27, %s6721_s26  ;;  %v4643_v41 = vld [vmem:[#allocation2 + $0x38] sm:$0x3] }
 0x7cb   :  { %4238 = vrot.lane.b32.xlu0 %v4193_v37, %s6712_s20  ;;  %4814 = vrot.lane.b32.xlu1 %v4774_v39, %s6721_s26 }
 0x7cf   :  { %4820 = vrot.lane.b32.xlu0 %v4777_v56, %s6721_s26  ;;  %3833 = vrot.lane.b32.xlu1 %v3785_v9, %s6714_s3 }
 0x7d3   :  { %4105 = vrot.lane.b32.xlu0 %v4058_v48, %s6717_s22  ;;  %3970 = vrot.lane.b32.xlu1 %v3922_v40, %s6716_s21  ;;  %v4779_v48 = vld [vmem:[#allocation2 + $0x30] sm:$0x3] }
 0x7d7   :  { %4242 = vrot.lane.b32.xlu0 %v4195_v34, %s6712_s20  ;;  %4103 = vrot.lane.b32.xlu1 %v4057_v4, %s6717_s22 }
 0x7db   :  { %4413 = vrot.lane.b32.xlu0 %v4368_v17, %s6718_s23  ;;  %4240 = vrot.lane.b32.xlu1 %v4194_v53, %s6712_s20  ;;  %v3788_v17 = vld [vmem:[#allocation2 + $0x58] sm:$0x3]  ;;  %v4645_v53 = vld [vmem:[#allocation2 + $0x48] sm:$0x3] }
 0x7df   :  { %4417 = vrot.lane.b32.xlu0 %v4370_v14, %s6718_s23  ;;  %4822 = vrot.lane.b32.xlu1 %v4778_v62, %s6721_s26  ;;  %v3925_v62 = vld [vmem:[#allocation2 + $0x58] sm:$0x3] }
 0x7e3   :  { %4550 = vrot.lane.b32.xlu0 %v4505_v42, %s6719_s24  ;;  %4107 = vrot.lane.b32.xlu1 %v4059_v52, %s6717_s22  ;;  %v3787_v52 = vld [vmem:[#allocation2 + $0x50] sm:$0x3] }
 0x7e7   :  { %4687 = vrot.lane.b32.xlu0 %v4642_v44, %s6720_s25  ;;  %4244 = vrot.lane.b32.xlu1 %v4196_v20, %s6712_s20 }
 0x7eb   :  { %4554 = vrot.lane.b32.xlu0 %v4507_v11, %s6719_s24  ;;  %4415 = vrot.lane.b32.xlu1 %v4369_v3, %s6718_s23 }
 0x7ed   :  { %v3824_v38 = vpop.permute.xlu0 %3823  ;;  %v3820_v24 = vpop.permute.xlu1 %3819 }
 0x7ee   :  { %v3857_v19 = vsel %vm1521_vm10, %v3818_v43, %v3820_v24 }
 0x7ef   :  { %3895 = vst [vmem:[#allocation3] sm:$0x3] %v3857_v19  ;;  %4691 = vrot.lane.b32.xlu0 %v4644_v50, %s6720_s25  ;;  %4419 = vrot.lane.b32.xlu1 %v4371_v32, %s6718_s23  ;;  %v4060_v32 = vld [vmem:[#allocation2 + $0x48] sm:$0x3] }
 0x7f1   :  { %v3961_v31 = vpop.permute.xlu0 %3960  ;;  %v3822_v57 = vpop.permute.xlu1 %3821 }
 0x7f2   :  { %v3858_v2 = vsel %vm1521_vm10, %v3820_v24, %v3822_v57  ;;  %v3859_v54 = vsel %vm1521_vm10, %v3822_v57, %v3824_v38 }
 0x7f3   :  { %3896 = vst [vmem:[#allocation3 + $0x8] sm:$0x3] %v3858_v2  ;;  %3897 = vst [vmem:[#allocation3 + $0x10] sm:$0x3] %v3859_v54  ;;  %3835 = vrot.lane.b32.xlu0 %v3786_v30, %s6714_s3  ;;  %4552 = vrot.lane.b32.xlu1 %v4506_v33, %s6719_s24  ;;  %v4197_v54 = vld [vmem:[#allocation2 + $0x48] sm:$0x3] }
 0x7f5   :  { %v4094_v18 = vpop.permute.xlu0 %4093  ;;  %v3957_v55 = vpop.permute.xlu1 %3956 }
 0x7f6   :  { %v4131_v16 = vsel %vm1797_vm14, %v8485_v0, %v4094_v18  ;;  %v3994_v6 = vsel %vm1659_vm11, %v3955_v23, %v3957_v55  ;;  %v4508_v0 = vld [vmem:[#allocation2 + $0x48] sm:$0x3] }
 0x7f7   :  { %4169 = vst [vmem:[#allocation3 + $0x130] sm:$0x3] %v4131_v16  ;;  %4032 = vst [vmem:[#allocation3 + $0x98] sm:$0x3] %v3994_v6  ;;  %3972 = vrot.lane.b32.xlu0 %v3923_v13, %s6716_s21  ;;  %4689 = vrot.lane.b32.xlu1 %v4643_v41, %s6720_s25  ;;  %v4912_v11 = vld [vmem:[#allocation3] sm:$0xff] }
 0x7f8   :  { %v4780_v16 = vld [vmem:[#allocation2 + $0x38] sm:$0x3] }
 0x7f9   :  { %v4231_v27 = vpop.permute.xlu0 %4230  ;;  %v3959_v37 = vpop.permute.xlu1 %3958 }
 0x7fa   :  { %v4268_v39 = vsel %vm1935_vm15, %v4229_v51, %v4231_v27  ;;  %v3995_v56 = vsel %vm1659_vm11, %v3957_v55, %v3959_v37  ;;  %v3996_v9 = vsel %vm1659_vm11, %v3959_v37, %v3961_v31  ;;  %v4913_v44 = vld [vmem:[#allocation3 + $0x8] sm:$0xff]  ;;  %v4914_v37 = vld [vmem:[#allocation3 + $0x10] sm:$0xff] }
 0x7fb   :  { %4306 = vst [vmem:[#allocation3 + $0x1c8] sm:$0x3] %v4268_v39  ;;  %4033 = vst [vmem:[#allocation3 + $0xa0] sm:$0x3] %v3995_v56  ;;  %4824 = vrot.lane.b32.xlu0 %v4779_v48, %s6721_s26  ;;  %4556 = vrot.lane.b32.xlu1 %v4508_v0, %s6719_s24  ;;  %v4781_v48 = vld [vmem:[#allocation2 + $0x40] sm:$0x3] }
 0x7fc   :  { %4034 = vst [vmem:[#allocation3 + $0xa8] sm:$0x3] %v3996_v9  ;;  %v3789_v0 = vld [vmem:[#allocation2 + $0x60] sm:$0x3] }
 0x7fd   :  { %v4098_v40 = vpop.permute.xlu0 %4097  ;;  %v8668_v34 = vpop.permute.xlu1 %3825 }
 0x7fe   :  { %v3860_v4 = vsel %vm1521_vm10, %v3824_v38, %v8668_v34  ;;  %v4931_v23 = vld [vmem:[#allocation3 + $0x98] sm:$0xff] }
 0x7ff   :  { %3898 = vst [vmem:[#allocation3 + $0x18] sm:$0x3] %v3860_v4  ;;  %3839 = vrot.lane.b32.xlu0 %v3788_v17, %s6714_s3  ;;  %4693 = vrot.lane.b32.xlu1 %v4645_v53, %s6720_s25  ;;  %v6519_v3 = vpack.c.bf16 %v4931_v23, %v4912_v11  ;;  %v4062_v53 = vld [vmem:[#allocation2 + $0x58] sm:$0x3] }
 0x801   :  { %v4235_v43 = vpop.permute.xlu0 %4234  ;;  %v8674_v14 = vpop.permute.xlu1 %3962 }
 0x802   :  { %v3997_v42 = vsel %vm1659_vm11, %v3961_v31, %v8674_v14  ;;  %v4932_v20 = vld [vmem:[#allocation3 + $0xa0] sm:$0xff]  ;;  %v3924_v31 = vld [vmem:[#allocation2 + $0x50] sm:$0x3] }
 0x803   :  { %4035 = vst [vmem:[#allocation3 + $0xb0] sm:$0x3] %v3997_v42  ;;  %3976 = vrot.lane.b32.xlu0 %v3925_v62, %s6716_s21  ;;  %3837 = vrot.lane.b32.xlu1 %v3787_v52, %s6714_s3  ;;  %v6517_v51 = vpack.c.bf16 %v4932_v20, %v4913_v44  ;;  %v4933_v30 = vld [vmem:[#allocation3 + $0xa8] sm:$0xff]  ;;  %v3926_v42 = vld [vmem:[#allocation2 + $0x60] sm:$0x3]  ;;  %v4950_v20 = vld [vmem:[#allocation3 + $0x130] sm:$0xff] }
 0x804   :  { %v6535_v39 = vpack.c.bf16 %v4933_v30, %v4914_v37  ;;  %v4969_v62 = vld [vmem:[#allocation3 + $0x1c8] sm:$0xff] }
 0x805   :  { %v4406_v38 = vpop.permute.xlu0 %4405  ;;  %6518 = vmatprep.subr.bf16.mxu0 %v6517_v51  ;;  %v4096_v24 = vpop.permute.xlu1 %4095  ;;  %v6523_v51 = vpack.c.bf16 %v4969_v62, %v4950_v20  ;;  %v4198_v30 = vld [vmem:[#allocation2 + $0x50] sm:$0x3]  ;;  %v4988_v62 = vld [vmem:[#allocation3 + $0x260] sm:$0xff]  ;;  %v4991_v20 = vld [vmem:[#allocation3 + $0x278] sm:$0xff] }
 0x806   :  { %v4132_v19 = vsel %vm1797_vm14, %v4094_v18, %v4096_v24  ;;  %v4133_v50 = vsel %vm1797_vm14, %v4096_v24, %v4098_v40  ;;  %6520 = vmatpush1.bf16.msra.mxu0 %v6519_v3  ;;  %v4915_v6 = vld [vmem:[#allocation3 + $0x18] sm:$0xff] }
 0x807   :  { %4170 = vst [vmem:[#allocation3 + $0x138] sm:$0x3] %v4132_v19  ;;  %4171 = vst [vmem:[#allocation3 + $0x140] sm:$0x3] %v4133_v50  ;;  %4109 = vrot.lane.b32.xlu0 %v4060_v32, %s6717_s22  ;;  %3974 = vrot.lane.b32.xlu1 %v3924_v31, %s6716_s21  ;;  %v4199_v19 = vld [vmem:[#allocation2 + $0x58] sm:$0x3] }
 0x808   :  { %v4372_v31 = vld [vmem:[#allocation2 + $0x50] sm:$0x3] }
 0x809   :  { %v4404_v57 = vpop.permute.xlu0 %4403  ;;  %v4233_v2 = vpop.permute.xlu1 %4232 }
 0x80a   :  { %v4443_v33 = vsel %vm2111_vm12, %v4404_v57, %v4406_v38  ;;  %v4269_v55 = vsel %vm1935_vm15, %v4231_v27, %v4233_v2  ;;  %v4270_v18 = vsel %vm1935_vm15, %v4233_v2, %v4235_v43  ;;  %v4934_v13 = vld [vmem:[#allocation3 + $0xb0] sm:$0xff] }
 0x80b   :  { %4481 = vst [vmem:[#allocation3 + $0x2f8] sm:$0x3] %v4443_v33  ;;  %4307 = vst [vmem:[#allocation3 + $0x1d0] sm:$0x3] %v4269_v55  ;;  %4246 = vrot.lane.b32.xlu0 %v4197_v54, %s6712_s20  ;;  %4826 = vrot.lane.b32.xlu1 %v4780_v16, %s6721_s26  ;;  %v6533_v41 = vpack.c.bf16 %v4934_v13, %v4915_v6 }
 0x80c   :  { %4308 = vst [vmem:[#allocation3 + $0x1d8] sm:$0x3] %v4270_v18 }
 0x80d   :  { %v8689_v56 = vpop.permute.xlu0 %4411  ;;  %6534 = vmatprep.subr.bf16.mxu1 %v6533_v41  ;;  %v8691_v9 = vpop.permute.xlu1 %4099  ;;  %v4782_v41 = vld [vmem:[#allocation2 + $0x48] sm:$0x3] }
 0x80e   :  { %v4134_v27 = vsel %vm1797_vm14, %v4098_v40, %v8691_v9  ;;  %6536 = vmatpush1.bf16.msra.mxu1 %v6535_v39  ;;  %v4951_v52 = vld [vmem:[#allocation3 + $0x138] sm:$0xff]  ;;  %v4952_v18 = vld [vmem:[#allocation3 + $0x140] sm:$0xff] }
 0x80f   :  { %4172 = vst [vmem:[#allocation3 + $0x148] sm:$0x3] %v4134_v27  ;;  %4828 = vrot.lane.b32.xlu0 %v4781_v48, %s6721_s26  ;;  %3841 = vrot.lane.b32.xlu1 %v3789_v0, %s6714_s3  ;;  %v4374_v27 = vld [vmem:[#allocation2 + $0x60] sm:$0x3]  ;;  %v4989_v48 = vld [vmem:[#allocation3 + $0x268] sm:$0xff] }
 0x811   :  { %v8697_v4 = vpop.permute.xlu0 %4544  ;;  %v8699_v17 = vpop.permute.xlu1 %4236 }
 0x812   :  { %v4271_v23 = vsel %vm1935_vm15, %v4235_v43, %v8699_v17  ;;  %v4970_v40 = vld [vmem:[#allocation3 + $0x1d0] sm:$0xff]  ;;  %v4061_v43 = vld [vmem:[#allocation2 + $0x50] sm:$0x3]  ;;  %v5007_v37 = vld [vmem:[#allocation3 + $0x2f8] sm:$0xff] }
 0x813   :  { %4309 = vst [vmem:[#allocation3 + $0x1e0] sm:$0x3] %v4271_v23  ;;  %4113 = vrot.lane.b32.xlu0 %v4062_v53, %s6717_s22  ;;  %3978 = vrot.lane.b32.xlu1 %v3926_v42, %s6716_s21  ;;  %v6521_v44 = vpack.c.bf16 %v4970_v40, %v4951_v52  ;;  %v4971_v57 = vld [vmem:[#allocation3 + $0x1d8] sm:$0xff]  ;;  %v6527_v23 = vpack.c.bf16 %v5007_v37, %v4988_v62  ;;  %v4509_v40 = vld [vmem:[#allocation2 + $0x50] sm:$0x3] }
 0x814   :  { %v6539_v16 = vpack.c.bf16 %v4971_v57, %v4952_v18  ;;  %v4375_v62 = vld [vmem:[#allocation2 + $0x68] sm:$0x3] }
 0x815   :  { %v8705_v11 = vpop.permute.xlu0 %4681  ;;  %6522 = vmatprep.subr.bf16.mxu0 %v6521_v44  ;;  %v4408_v3 = vpop.permute.xlu1 %4407  ;;  %v4063_v44 = vld [vmem:[#allocation2 + $0x60] sm:$0x3] }
 0x816   :  { %v4444_v24 = vsel %vm2111_vm12, %v4406_v38, %v4408_v3  ;;  %6524 = vmatpush1.bf16.msra.mxu0 %v6523_v51  ;;  %v4953_v33 = vld [vmem:[#allocation3 + $0x148] sm:$0xff] }
 0x817   :  { %4482 = vst [vmem:[#allocation3 + $0x300] sm:$0x3] %v4444_v24  ;;  %4250 = vrot.lane.b32.xlu0 %v4199_v19, %s6712_s20  ;;  %4111 = vrot.lane.b32.xlu1 %v4061_v43, %s6717_s22  ;;  %v4990_v19 = vld [vmem:[#allocation3 + $0x270] sm:$0xff] }
 0x819   :  { %v4678_v50 = vpop.permute.xlu0 %4677  ;;  %v4410_v32 = vpop.permute.xlu1 %4409 }
 0x81a   :  { %v4445_v2 = vsel %vm2111_vm12, %v4408_v3, %v4410_v32  ;;  %v4446_v54 = vsel %vm2111_vm12, %v4410_v32, %v8689_v56  ;;  %v4972_v38 = vld [vmem:[#allocation3 + $0x1e0] sm:$0xff] }
 0x81b   :  { %4483 = vst [vmem:[#allocation3 + $0x308] sm:$0x3] %v4445_v2  ;;  %4484 = vst [vmem:[#allocation3 + $0x310] sm:$0x3] %v4446_v54  ;;  %4421 = vrot.lane.b32.xlu0 %v4372_v31, %s6718_s23  ;;  %4248 = vrot.lane.b32.xlu1 %v4198_v30, %s6712_s20  ;;  %v6537_v55 = vpack.c.bf16 %v4972_v38, %v4953_v33  ;;  %v4646_v54 = vld [vmem:[#allocation2 + $0x50] sm:$0x3] }
 0x81c   :  { %v4200_v30 = vld [vmem:[#allocation2 + $0x60] sm:$0x3] }
 0x81d   :  { %v8715_v6 = vpop.permute.xlu0 %4548  ;;  %6538 = vmatprep.subr.bf16.mxu1 %v6537_v55  ;;  %v4543_v13 = vpop.permute.xlu1 %4542  ;;  %v4373_v55 = vld [vmem:[#allocation2 + $0x58] sm:$0x3] }
 0x81e   :  { %v4581_v39 = vsel %vm2249_vm13, %v4543_v13, %v8697_v4  ;;  %6540 = vmatpush1.bf16.msra.mxu1 %v6539_v16  ;;  %v5008_v0 = vld [vmem:[#allocation3 + $0x300] sm:$0xff] }
 0x81f   :  { %4619 = vst [vmem:[#allocation3 + $0x398] sm:$0x3] %v4581_v39  ;;  %4425 = vrot.lane.b32.xlu0 %v4374_v27, %s6718_s23  ;;  %4830 = vrot.lane.b32.xlu1 %v4782_v41, %s6721_s26  ;;  %v6525_v53 = vpack.c.bf16 %v5008_v0, %v4989_v48  ;;  %v4511_v41 = vld [vmem:[#allocation2 + $0x60] sm:$0x3] }
 0x820   :  { %v4648_v0 = vld [vmem:[#allocation2 + $0x60] sm:$0x3] }
 0x821   :  { %v8721_v42 = vpop.permute.xlu0 %4685  ;;  %6526 = vmatprep.subr.bf16.mxu0 %v6525_v53  ;;  %v4680_v52 = vpop.permute.xlu1 %4679 }
 0x822   :  { %v4717_v51 = vsel %vm2387_vm1, %v4678_v50, %v4680_v52  ;;  %v4718_v3 = vsel %vm2387_vm1, %v4680_v52, %v8705_v11  ;;  %6528 = vmatpush1.bf16.msra.mxu0 %v6527_v23  ;;  %v5010_v24 = vld [vmem:[#allocation3 + $0x310] sm:$0xff]  ;;  %v5009_v43 = vld [vmem:[#allocation3 + $0x308] sm:$0xff] }
 0x823   :  { %4755 = vst [vmem:[#allocation3 + $0x428] sm:$0x3] %v4717_v51  ;;  %4756 = vst [vmem:[#allocation3 + $0x430] sm:$0x3] %v4718_v3  ;;  %4558 = vrot.lane.b32.xlu0 %v4509_v40, %s6719_s24  ;;  %4115 = vrot.lane.b32.xlu1 %v4063_v44, %s6717_s22  ;;  %v6541_v32 = vpack.c.bf16 %v5010_v24, %v4991_v20  ;;  %v6543_v31 = vpack.c.bf16 %v5009_v43, %v4990_v19  ;;  %v3790_v24 = vld [vmem:[#allocation2 + $0x68] sm:$0x3] }
 0x824   :  { %v4510_v19 = vld [vmem:[#allocation2 + $0x58] sm:$0x3] }
 0x825   :  { %v3830_v57 = vpop.permute.xlu0 %3829  ;;  %6542 = vmatprep.subr.bf16.mxu1 %v6541_v32  ;;  %v4541_v2 = vpop.permute.xlu1 %4540 }
 0x826   :  { %v4580_v50 = vsel %vm2249_vm13, %v4541_v2, %v4543_v13  ;;  %6544 = vmatpush1.bf16.msra.mxu1 %v6543_v31  ;;  %v5027_v37 = vld [vmem:[#allocation3 + $0x398] sm:$0xff]  ;;  %v3927_v31 = vld [vmem:[#allocation2 + $0x68] sm:$0x3]  ;;  %v4647_v2 = vld [vmem:[#allocation2 + $0x58] sm:$0x3] }
 0x827   :  { %4618 = vst [vmem:[#allocation3 + $0x390] sm:$0x3] %v4580_v50  ;;  %4695 = vrot.lane.b32.xlu0 %v4646_v54, %s6720_s25  ;;  %4252 = vrot.lane.b32.xlu1 %v4200_v30, %s6712_s20 }
 0x829   :  { %v3967_v33 = vpop.permute.xlu0 %3966  ;;  %v4547_v38 = vpop.permute.xlu1 %4546 }
 0x82a   :  { %v4582_v18 = vsel %vm2249_vm13, %v8697_v4, %v4547_v38  ;;  %v4583_v16 = vsel %vm2249_vm13, %v4547_v38, %v8715_v6  ;;  %v5046_v13 = vld [vmem:[#allocation3 + $0x430] sm:$0xff]  ;;  %v5045_v52 = vld [vmem:[#allocation3 + $0x428] sm:$0xff] }
 0x82b   :  { %4620 = vst [vmem:[#allocation3 + $0x3a0] sm:$0x3] %v4582_v18  ;;  %4621 = vst [vmem:[#allocation3 + $0x3a8] sm:$0x3] %v4583_v16  ;;  %4562 = vrot.lane.b32.xlu0 %v4511_v41, %s6719_s24  ;;  %4423 = vrot.lane.b32.xlu1 %v4373_v55, %s6718_s23  ;;  %v6529_v39 = vpack.c.bf16 %v5046_v13, %v5027_v37  ;;  %v4783_v13 = vld [vmem:[#allocation2 + $0x50] sm:$0x3] }
 0x82d   :  { %v8737_v27 = vpop.permute.xlu0 %4818  ;;  %6530 = vmatprep.subr.bf16.mxu0 %v6529_v39  ;;  %v4684_v48 = vpop.permute.xlu1 %4683  ;;  %v4512_v39 = vld [vmem:[#allocation2 + $0x68] sm:$0x3] }
 0x82e   :  { %v4719_v4 = vsel %vm2387_vm1, %v8705_v11, %v4684_v48  ;;  %v4720_v53 = vsel %vm2387_vm1, %v4684_v48, %v8721_v42  ;;  %v5026_v23 = vld [vmem:[#allocation3 + $0x390] sm:$0xff] }
 0x82f   :  { %4757 = vst [vmem:[#allocation3 + $0x438] sm:$0x3] %v4719_v4  ;;  %4758 = vst [vmem:[#allocation3 + $0x440] sm:$0x3] %v4720_v53  ;;  %4699 = vrot.lane.b32.xlu0 %v4648_v0, %s6720_s25  ;;  %4427 = vrot.lane.b32.xlu1 %v4375_v62, %s6718_s23  ;;  %v6531_v40 = vpack.c.bf16 %v5045_v52, %v5026_v23  ;;  %v4649_v62 = vld [vmem:[#allocation2 + $0x68] sm:$0x3] }
 0x831   :  { %v3832_v44 = vpop.permute.xlu0 %3831  ;;  %6532 = vmatpush1.bf16.msra.mxu0 %v6531_v40  ;;  %v3828_v20 = vpop.permute.xlu1 %3827 }
 0x832   :  { %v3863_v51 = vsel %vm1521_vm10, %v3830_v57, %v3832_v44  ;;  %v3861_v11 = vsel %vm1521_vm10, %v8668_v34, %v3828_v20  ;;  %v3862_v3 = vsel %vm1521_vm10, %v3828_v20, %v3830_v57  ;;  %v5029_v50 = vld [vmem:[#allocation3 + $0x3a8] sm:$0xff]  ;;  %v5028_v38 = vld [vmem:[#allocation3 + $0x3a0] sm:$0xff] }
 0x833   :  { %3901 = vst [vmem:[#allocation3 + $0x30] sm:$0x3] %v3863_v51  ;;  %3899 = vst [vmem:[#allocation3 + $0x20] sm:$0x3] %v3861_v11  ;;  %3843 = vrot.lane.b32.xlu0 %v3790_v24, %s6714_s3  ;;  %4560 = vrot.lane.b32.xlu1 %v4510_v19, %s6719_s24  ;;  %v3791_v51 = vld [vmem:[#allocation2 + $0x70] sm:$0x3] }
 0x834   :  { %3900 = vst [vmem:[#allocation3 + $0x28] sm:$0x3] %v3862_v3 }
 0x835   :  { %v3969_v43 = vpop.permute.xlu0 %3968  ;;  %v3965_v32 = vpop.permute.xlu1 %3964 }
 0x836   :  { %v4000_v54 = vsel %vm1659_vm11, %v3967_v33, %v3969_v43  ;;  %v3998_v34 = vsel %vm1659_vm11, %v8674_v14, %v3965_v32  ;;  %v3999_v57 = vsel %vm1659_vm11, %v3965_v32, %v3967_v33  ;;  %v5048_v30 = vld [vmem:[#allocation3 + $0x440] sm:$0xff]  ;;  %v5047_v55 = vld [vmem:[#allocation3 + $0x438] sm:$0xff] }
 0x837   :  { %4038 = vst [vmem:[#allocation3 + $0xc8] sm:$0x3] %v4000_v54  ;;  %4036 = vst [vmem:[#allocation3 + $0xb8] sm:$0x3] %v3998_v34  ;;  %3980 = vrot.lane.b32.xlu0 %v3927_v31, %s6716_s21  ;;  %4697 = vrot.lane.b32.xlu1 %v4647_v2, %s6720_s25  ;;  %v6545_v18 = vpack.c.bf16 %v5048_v30, %v5029_v50  ;;  %v6547_v16 = vpack.c.bf16 %v5047_v55, %v5028_v38  ;;  %v4064_v32 = vld [vmem:[#allocation2 + $0x68] sm:$0x3] }
 0x838   :  { %4037 = vst [vmem:[#allocation3 + $0xc0] sm:$0x3] %v3999_v57  ;;  %v3928_v31 = vld [vmem:[#allocation2 + $0x70] sm:$0x3]  ;;  %v8783_v54 = vld [vmem:[%s9448_s6] sm:$0x3] }
 0x839   :  { %v4102_v41 = vpop.permute.xlu0 %4101  ;;  %6546 = vmatprep.subr.bf16.mxu1 %v6545_v18  ;;  %v4817_v37 = vpop.permute.xlu1 %4816 }
 0x83a   :  { %v4135_v14 = vsel %vm1797_vm14, %v8691_v9, %v4102_v41  ;;  %v4855_v33 = vsel %vm2525_vm0, %v4817_v37, %v8737_v27  ;;  %6548 = vmatpush1.bf16.msra.mxu1 %v6547_v16  ;;  %v3792_v9 = vld [vmem:[#allocation2 + $0x78] sm:$0x3]  ;;  %v4916_v57 = vld [vmem:[#allocation3 + $0x20] sm:$0xff] }
 0x83b   :  { %4173 = vst [vmem:[#allocation3 + $0x150] sm:$0x3] %v4135_v14  ;;  %4893 = vst [vmem:[#allocation3 + $0x4c8] sm:$0x3] %v4855_v33  ;;  %4832 = vrot.lane.b32.xlu0 %v4783_v13, %s6721_s26  ;;  %4564 = vrot.lane.b32.xlu1 %v4512_v39, %s6719_s24  ;;  %v4917_v50 = vld [vmem:[#allocation3 + $0x28] sm:$0xff] }
 0x83c   :  { %v4201_v16 = vld [vmem:[#allocation2 + $0x68] sm:$0x3] }
 0x83d   :  { %v4239_v48 = vpop.permute.xlu0 %4238  ;;  %v4815_v0 = vpop.permute.xlu1 %4814 }
 0x83e   :  { %v4272_v4 = vsel %vm1935_vm15, %v8699_v17, %v4239_v48  ;;  %v4854_v53 = vsel %vm2525_vm0, %v4815_v0, %v4817_v37  ;;  %v3929_v17 = vld [vmem:[#allocation2 + $0x78] sm:$0x3]  ;;  %v4785_v0 = vld [vmem:[#allocation2 + $0x60] sm:$0x3] }
 0x83f   :  { %4310 = vst [vmem:[#allocation3 + $0x1e8] sm:$0x3] %v4272_v4  ;;  %4892 = vst [vmem:[#allocation3 + $0x4c0] sm:$0x3] %v4854_v53  ;;  %3847 = vrot.lane.b32.xlu0 %v3792_v9, %s6714_s3  ;;  %4701 = vrot.lane.b32.xlu1 %v4649_v62, %s6720_s25  ;;  %v4936_v3 = vld [vmem:[#allocation3 + $0xc0] sm:$0xff] }
 0x840   :  { %v6549_v34 = vpack.c.bf16 %v4936_v3, %v4917_v50  ;;  %v4784_v37 = vld [vmem:[#allocation2 + $0x58] sm:$0x3]  ;;  %v3793_v4 = vld [vmem:[#allocation2 + $0x80] sm:$0x3]  ;;  %v4065_v3 = vld [vmem:[#allocation2 + $0x70] sm:$0x3] }
 0x841   :  { %v4821_v23 = vpop.permute.xlu0 %4820  ;;  %v8768_v52 = vpop.permute.xlu1 %3833  ;;  %v4066_v62 = vld [vmem:[#allocation2 + $0x78] sm:$0x3] }
 0x842   :  { %v4856_v40 = vsel %vm2525_vm0, %v8737_v27, %v4821_v23  ;;  %v3864_v20 = vsel %vm1521_vm10, %v3832_v44, %v8768_v52  ;;  %v5065_v11 = vld [vmem:[#allocation3 + $0x4c8] sm:$0xff]  ;;  %v4935_v27 = vld [vmem:[#allocation3 + $0xb8] sm:$0xff] }
 0x843   :  { %4894 = vst [vmem:[#allocation3 + $0x4d0] sm:$0x3] %v4856_v40  ;;  %3902 = vst [vmem:[#allocation3 + $0x38] sm:$0x3] %v3864_v20  ;;  %3984 = vrot.lane.b32.xlu0 %v3929_v17, %s6716_s21  ;;  %3845 = vrot.lane.b32.xlu1 %v3791_v51, %s6714_s3  ;;  %v6551_v30 = vpack.c.bf16 %v4935_v27, %v4916_v57  ;;  %v4203_v17 = vld [vmem:[#allocation2 + $0x78] sm:$0x3] }
 0x844   :  { %5102 = vmatprep.subr.mxu0 %v5065_v11 }
 0x845   :  { %v4106_v24 = vpop.permute.xlu0 %4105  ;;  %v8776_v19 = vpop.permute.xlu1 %3970 }
 0x846   :  { %v4001_v44 = vsel %vm1659_vm11, %v3969_v43, %v8776_v19  ;;  %v5064_v2 = vld [vmem:[#allocation3 + $0x4c0] sm:$0xff]  ;;  %v4973_v51 = vld [vmem:[#allocation3 + $0x1e8] sm:$0xff] }
 0x847   :  { %4039 = vst [vmem:[#allocation3 + $0xd0] sm:$0x3] %v4001_v44  ;;  %4117 = vrot.lane.b32.xlu0 %v4064_v32, %s6717_s22  ;;  %3982 = vrot.lane.b32.xlu1 %v3928_v31, %s6716_s21  ;;  %v4954_v44 = vld [vmem:[#allocation3 + $0x150] sm:$0xff] }
 0x848   :  { %5103 = vmatpush1.msra.mxu0 %v5064_v2  ;;  %v6555_v2 = vpack.c.bf16 %v4973_v51, %v4954_v44  ;;  %v4513_v51 = vld [vmem:[#allocation2 + $0x70] sm:$0x3] }
 0x849   :  { %6550 = vmatprep.subr.bf16.mxu0 %v6549_v34  ;;  %v4243_v38 = vpop.permute.xlu0 %4242  ;;  %6221 = vmatmul.mubr.msk.f32.vlgmr.msra.gmra.mrb[20].mxu0 %vm2755_vm2, %v8783_v54  ;;  %v4104_v43 = vpop.permute.xlu1 %4103 }
 0x84a   :  { %6552 = vmatpush1.bf16.msra.mxu0 %v6551_v30  ;;  %v4136_v55 = vsel %vm1797_vm14, %v4102_v41, %v4104_v43  ;;  %v4137_v18 = vsel %vm1797_vm14, %v4104_v43, %v4106_v24  ;;  %5292 = vmatprep.mubr.f32.mxu0 %v8209_v49  ;;  %v4202_v43 = vld [vmem:[#allocation2 + $0x70] sm:$0x3] }
 0x84b   :  { %4174 = vst [vmem:[#allocation3 + $0x158] sm:$0x3] %v4136_v55  ;;  %4175 = vst [vmem:[#allocation3 + $0x160] sm:$0x3] %v4137_v18  ;;  %4254 = vrot.lane.b32.xlu0 %v4201_v16, %s6712_s20  ;;  %4834 = vrot.lane.b32.xlu1 %v4784_v37, %s6721_s26  ;;  %v4937_v18 = vld [vmem:[#allocation3 + $0xc8] sm:$0xff]  ;;  %v4919_v16 = vld [vmem:[#allocation3 + $0x38] sm:$0xff] }
 0x84c   :  { %v5066_v37 = vld [vmem:[#allocation3 + $0x4d0] sm:$0xff] }
 0x84d   :  { %v4414_v14 = vpop.permute.xlu0 %4413  ;;  %v4241_v33 = vpop.permute.xlu1 %4240 }
 0x84e   :  { %v4447_v13 = vsel %vm2111_vm12, %v8689_v56, %v4414_v14  ;;  %v4273_v39 = vsel %vm1935_vm15, %v4239_v48, %v4241_v33  ;;  %v4274_v41 = vsel %vm1935_vm15, %v4241_v33, %v4243_v38  ;;  %v3930_v48 = vld [vmem:[#allocation2 + $0x80] sm:$0x3]  ;;  %v4938_v57 = vld [vmem:[#allocation3 + $0xd0] sm:$0xff] }
 0x84f   :  { %4485 = vst [vmem:[#allocation3 + $0x318] sm:$0x3] %v4447_v13  ;;  %4311 = vst [vmem:[#allocation3 + $0x1f0] sm:$0x3] %v4273_v39  ;;  %4836 = vrot.lane.b32.xlu0 %v4785_v0, %s6721_s26  ;;  %3849 = vrot.lane.b32.xlu1 %v3793_v4, %s6714_s3  ;;  %v6565_v33 = vpack.c.bf16 %v4938_v57, %v4919_v16  ;;  %v4918_v13 = vld [vmem:[#allocation3 + $0x30] sm:$0xff] }
 0x850   :  { %4312 = vst [vmem:[#allocation3 + $0x1f8] sm:$0x3] %v4274_v41  ;;  %v4378_v4 = vld [vmem:[#allocation2 + $0x80] sm:$0x3] }
 0x851   :  { %v8800_v53 = vpop.permute.xlu0 %4417  ;;  %v8802_v9 = vpop.permute.xlu1 %4822 }
 0x852   :  { %v4857_v56 = vsel %vm2525_vm0, %v4821_v23, %v8802_v9  ;;  %v4955_v32 = vld [vmem:[#allocation3 + $0x158] sm:$0xff] }
 0x853   :  { %4895 = vst [vmem:[#allocation3 + $0x4d8] sm:$0x3] %v4857_v56  ;;  %4121 = vrot.lane.b32.xlu0 %v4066_v62, %s6717_s22  ;;  %3986 = vrot.lane.b32.xlu1 %v3930_v48, %s6716_s21  ;;  %v4786_v56 = vld [vmem:[#allocation2 + $0x68] sm:$0x3] }
 0x855   :  { %v8808_v40 = vpop.permute.xlu0 %4550  ;;  %v8810_v20 = vpop.permute.xlu1 %4107 }
 0x856   :  { %v4584_v11 = vsel %vm2249_vm13, %v8715_v6, %v8808_v40  ;;  %v4138_v23 = vsel %vm1797_vm14, %v4106_v24, %v8810_v20  ;;  %v4974_v31 = vld [vmem:[#allocation3 + $0x1f0] sm:$0xff]  ;;  %v4376_v6 = vld [vmem:[#allocation2 + $0x70] sm:$0x3] }
 0x857   :  { %4622 = vst [vmem:[#allocation3 + $0x3b0] sm:$0x3] %v4584_v11  ;;  %4176 = vst [vmem:[#allocation3 + $0x168] sm:$0x3] %v4138_v23  ;;  %4258 = vrot.lane.b32.xlu0 %v4203_v17, %s6712_s20  ;;  %4119 = vrot.lane.b32.xlu1 %v4065_v3, %s6717_s22  ;;  %v6553_v27 = vpack.c.bf16 %v4974_v31, %v4955_v32  ;;  %v4975_v48 = vld [vmem:[#allocation3 + $0x1f8] sm:$0xff]  ;;  %v4956_v31 = vld [vmem:[#allocation3 + $0x160] sm:$0xff] }
 0x858   :  { %v4067_v3 = vld [vmem:[#allocation2 + $0x80] sm:$0x3] }
 0x859   :  { %v8819_v50 = vpop.permute.xlu0 %4687  ;;  %6554 = vmatprep.subr.bf16.mxu0 %v6553_v27  ;;  %v8821_v34 = vpop.permute.xlu1 %4244  ;;  %v6571_v27 = vpack.c.bf16 %v4975_v48, %v4956_v31  ;;  %v4377_v48 = vld [vmem:[#allocation2 + $0x78] sm:$0x3]  ;;  %v4379_v31 = vld [vmem:[#allocation2 + $0x88] sm:$0x3] }
 0x85a   :  { %v4721_v24 = vsel %vm2387_vm1, %v8721_v42, %v8819_v50  ;;  %v4275_v30 = vsel %vm1935_vm15, %v4243_v38, %v8821_v34  ;;  %6556 = vmatpush1.bf16.msra.mxu0 %v6555_v2  ;;  %v5067_v55 = vld [vmem:[#allocation3 + $0x4d8] sm:$0xff]  ;;  %v6567_v38 = vpack.c.bf16 %v4937_v18, %v4918_v13 }
 0x85b   :  { %4759 = vst [vmem:[#allocation3 + $0x448] sm:$0x3] %v4721_v24  ;;  %4313 = vst [vmem:[#allocation3 + $0x200] sm:$0x3] %v4275_v30  ;;  %4429 = vrot.lane.b32.xlu0 %v4376_v6, %s6718_s23  ;;  %4256 = vrot.lane.b32.xlu1 %v4202_v43, %s6712_s20  ;;  %v5011_v6 = vld [vmem:[#allocation3 + $0x318] sm:$0xff]  ;;  %v4993_v43 = vld [vmem:[#allocation3 + $0x288] sm:$0xff] }
 0x85c   :  { %5173 = vmatprep.subr.mxu1 %v5067_v55  ;;  %v4650_v30 = vld [vmem:[#allocation2 + $0x70] sm:$0x3]  ;;  %v4204_v18 = vld [vmem:[#allocation2 + $0x80] sm:$0x3] }
 0x85d   :  { %5174 = vmatpush1.msra.mxu1 %v5066_v37  ;;  %v8830_v42 = vpop.permute.xlu0 %4554  ;;  %v4416_v39 = vpop.permute.xlu1 %4415  ;;  %v4992_v37 = vld [vmem:[#allocation3 + $0x280] sm:$0xff] }
 0x85e   :  { %6566 = vmatprep.subr.bf16.mxu1 %v6565_v33  ;;  %v4448_v41 = vsel %vm2111_vm12, %v4414_v14, %v4416_v39  ;;  %v4449_v0 = vsel %vm2111_vm12, %v4416_v39, %v8800_v53  ;;  %6222 = vmatmul.mubr.msk.f32.vlgmr.msra.gmra.mrb[20].mxu1 %vm2755_vm2, %v8783_v54  ;;  %v4957_v11 = vld [vmem:[#allocation3 + $0x168] sm:$0xff] }
 0x85f   :  { %4486 = vst [vmem:[#allocation3 + $0x320] sm:$0x3] %v4448_v41  ;;  %4487 = vst [vmem:[#allocation3 + $0x328] sm:$0x3] %v4449_v0  ;;  %6568 = vmatpush1.bf16.msra.mxu1 %v6567_v38  ;;  %4433 = vrot.lane.b32.xlu0 %v4378_v4, %s6718_s23  ;;  %v4515_v0 = vld [vmem:[#allocation2 + $0x80] sm:$0x3] }
 0x860   :  { %4838 = vrot.lane.b32.xlu1 %v4786_v56, %s6721_s26  ;;  %5363 = vmatprep.mubr.f32.mxu1 %v8209_v49  ;;  %v4995_v4 = vld [vmem:[#allocation3 + $0x298] sm:$0xff] }
 0x861   :  { %v8840_v62 = vpop.permute.xlu0 %4691  ;;  %v8842_v14 = vpop.permute.xlu1 %4419 }
 0x862   :  { %v4450_v17 = vsel %vm2111_vm12, %v8800_v53, %v8842_v14  ;;  %v4976_v23 = vld [vmem:[#allocation3 + $0x200] sm:$0xff] }
 0x863   :  { %4488 = vst [vmem:[#allocation3 + $0x330] sm:$0x3] %v4450_v17  ;;  %4566 = vrot.lane.b32.xlu0 %v4513_v51, %s6719_s24  ;;  %v6569_v32 = vpack.c.bf16 %v4976_v23, %v4957_v11  ;;  %v4994_v51 = vld [vmem:[#allocation3 + $0x290] sm:$0xff] }
 0x864   :  { %4123 = vrot.lane.b32.xlu1 %v4067_v3, %s6717_s22 }
 0x865   :  { %v8849_v44 = vpop.permute.xlu0 %3835  ;;  %6570 = vmatprep.subr.bf16.mxu1 %v6569_v32  ;;  %v4553_v2 = vpop.permute.xlu1 %4552  ;;  %v4652_v32 = vld [vmem:[#allocation2 + $0x80] sm:$0x3] }
 0x866   :  { %v3865_v53 = vsel %vm1521_vm10, %v8768_v52, %v8849_v44  ;;  %v4585_v57 = vsel %vm2249_vm13, %v8808_v40, %v4553_v2  ;;  %v4586_v24 = vsel %vm2249_vm13, %v4553_v2, %v8830_v42  ;;  %6572 = vmatpush1.bf16.msra.mxu1 %v6571_v27  ;;  %v5012_v55 = vld [vmem:[#allocation3 + $0x320] sm:$0xff]  ;;  %v6559_v52 = vpack.c.bf16 %v5011_v6, %v4992_v37  ;;  %v5013_v13 = vld [vmem:[#allocation3 + $0x328] sm:$0xff] }
 0x867   :  { %3903 = vst [vmem:[#allocation3 + $0x40] sm:$0x3] %v3865_v53  ;;  %4623 = vst [vmem:[#allocation3 + $0x3b8] sm:$0x3] %v4585_v57  ;;  %4703 = vrot.lane.b32.xlu0 %v4650_v30, %s6720_s25  ;;  %v6557_v16 = vpack.c.bf16 %v5012_v55, %v4993_v43  ;;  %v5049_v6 = vld [vmem:[#allocation3 + $0x448] sm:$0xff]  ;;  %v5030_v43 = vld [vmem:[#allocation3 + $0x3b0] sm:$0xff] }
 0x868   :  { %4624 = vst [vmem:[#allocation3 + $0x3c0] sm:$0x3] %v4586_v24  ;;  %4260 = vrot.lane.b32.xlu1 %v4204_v18, %s6712_s20  ;;  %v3794_v53 = vld [vmem:[#allocation2 + $0x88] sm:$0x3]  ;;  %v4514_v24 = vld [vmem:[#allocation2 + $0x78] sm:$0x3]  ;;  %v6563_v55 = vpack.c.bf16 %v5049_v6, %v5030_v43 }
 0x869   :  { %v8860_v33 = vpop.permute.xlu0 %3972  ;;  %6558 = vmatprep.subr.bf16.mxu0 %v6557_v16  ;;  %v4690_v40 = vpop.permute.xlu1 %4689  ;;  %v4653_v6 = vld [vmem:[#allocation2 + $0x88] sm:$0x3] }
 0x86a   :  { %v4002_v39 = vsel %vm1659_vm11, %v8776_v19, %v8860_v33  ;;  %v4722_v38 = vsel %vm2387_vm1, %v8819_v50, %v4690_v40  ;;  %v4723_v41 = vsel %vm2387_vm1, %v4690_v40, %v8840_v62  ;;  %6560 = vmatpush1.bf16.msra.mxu0 %v6559_v52  ;;  %v5014_v56 = vld [vmem:[#allocation3 + $0x330] sm:$0xff]  ;;  %v6575_v19 = vpack.c.bf16 %v5013_v13, %v4994_v51  ;;  %v3931_v52 = vld [vmem:[#allocation2 + $0x88] sm:$0x3] }
 0x86b   :  { %4040 = vst [vmem:[#allocation3 + $0xd8] sm:$0x3] %v4002_v39  ;;  %4760 = vst [vmem:[#allocation3 + $0x450] sm:$0x3] %v4722_v38  ;;  %4570 = vrot.lane.b32.xlu0 %v4515_v0, %s6719_s24  ;;  %v6573_v17 = vpack.c.bf16 %v5014_v56, %v4995_v4  ;;  %v4651_v40 = vld [vmem:[#allocation2 + $0x78] sm:$0x3] }
 0x86c   :  { %4761 = vst [vmem:[#allocation3 + $0x458] sm:$0x3] %v4723_v41  ;;  %4431 = vrot.lane.b32.xlu1 %v4377_v48, %s6718_s23  ;;  %v4787_v4 = vld [vmem:[#allocation2 + $0x70] sm:$0x3] }
 0x86d   :  { %v4825_v11 = vpop.permute.xlu0 %4824  ;;  %6574 = vmatprep.subr.bf16.mxu1 %v6573_v17  ;;  %v8871_v50 = vpop.permute.xlu1 %4556  ;;  %v4516_v17 = vld [vmem:[#allocation2 + $0x88] sm:$0x3] }
 0x86e   :  { %v4858_v23 = vsel %vm2525_vm0, %v8802_v9, %v4825_v11  ;;  %v4587_v3 = vsel %vm2249_vm13, %v8830_v42, %v8871_v50  ;;  %6576 = vmatpush1.bf16.msra.mxu1 %v6575_v19  ;;  %v5031_v57 = vld [vmem:[#allocation3 + $0x3b8] sm:$0xff] }
 0x86f   :  { %4896 = vst [vmem:[#allocation3 + $0x4e0] sm:$0x3] %v4858_v23  ;;  %4625 = vst [vmem:[#allocation3 + $0x3c8] sm:$0x3] %v4587_v3  ;;  %4707 = vrot.lane.b32.xlu0 %v4652_v32, %s6720_s25  ;;  %v5032_v19 = vld [vmem:[#allocation3 + $0x3c0] sm:$0xff] }
 0x870   :  { %4435 = vrot.lane.b32.xlu1 %v4379_v31, %s6718_s23  ;;  %v4068_v31 = vld [vmem:[#allocation2 + $0x88] sm:$0x3] }
 0x871   :  { %v3840_v27 = vpop.permute.xlu0 %3839  ;;  %v8880_v2 = vpop.permute.xlu1 %4693 }
 0x872   :  { %v4724_v9 = vsel %vm2387_vm1, %v8840_v62, %v8880_v2  ;;  %v5050_v42 = vld [vmem:[#allocation3 + $0x450] sm:$0xff] }
 0x873   :  { %4762 = vst [vmem:[#allocation3 + $0x460] sm:$0x3] %v4724_v9  ;;  %3851 = vrot.lane.b32.xlu0 %v3794_v53, %s6714_s3  ;;  %v6561_v30 = vpack.c.bf16 %v5050_v42, %v5031_v57  ;;  %v5051_v38 = vld [vmem:[#allocation3 + $0x458] sm:$0xff] }
 0x874   :  { %4568 = vrot.lane.b32.xlu1 %v4514_v24, %s6719_s24  ;;  %v6579_v23 = vpack.c.bf16 %v5051_v38, %v5032_v19  ;;  %v4920_v38 = vld [vmem:[#allocation3 + $0x40] sm:$0xff] }
 0x875   :  { %v3977_v18 = vpop.permute.xlu0 %3976  ;;  %6562 = vmatprep.subr.bf16.mxu0 %v6561_v30  ;;  %v3838_v16 = vpop.permute.xlu1 %3837 }
 0x876   :  { %v3866_v37 = vsel %vm1521_vm10, %v8849_v44, %v3838_v16  ;;  %v3867_v62 = vsel %vm1521_vm10, %v3838_v16, %v3840_v27  ;;  %6564 = vmatpush1.bf16.msra.mxu0 %v6563_v55  ;;  %v5033_v56 = vld [vmem:[#allocation3 + $0x3c8] sm:$0xff]  ;;  %v4939_v55 = vld [vmem:[#allocation3 + $0xd8] sm:$0xff] }
 0x877   :  { %3904 = vst [vmem:[#allocation3 + $0x48] sm:$0x3] %v3866_v37  ;;  %3905 = vst [vmem:[#allocation3 + $0x50] sm:$0x3] %v3867_v62  ;;  %3988 = vrot.lane.b32.xlu0 %v3931_v52, %s6716_s21  ;;  %v4789_v37 = vld [vmem:[#allocation2 + $0x80] sm:$0x3] }
 0x878   :  { %4705 = vrot.lane.b32.xlu1 %v4651_v40, %s6720_s25  ;;  %v5068_v40 = vld [vmem:[#allocation3 + $0x4e0] sm:$0xff] }
 0x879   :  { %v8892_v13 = vpop.permute.xlu0 %4109  ;;  %v3975_v39 = vpop.permute.xlu1 %3974 }
 0x87a   :  { %v4139_v41 = vsel %vm1797_vm14, %v8810_v20, %v8892_v13  ;;  %v4003_v44 = vsel %vm1659_vm11, %v8860_v33, %v3975_v39  ;;  %v4004_v0 = vsel %vm1659_vm11, %v3975_v39, %v3977_v18  ;;  %v5052_v48 = vld [vmem:[#allocation3 + $0x460] sm:$0xff] }
 0x87b   :  { %4177 = vst [vmem:[#allocation3 + $0x170] sm:$0x3] %v4139_v41  ;;  %4041 = vst [vmem:[#allocation3 + $0xe0] sm:$0x3] %v4003_v44  ;;  %4840 = vrot.lane.b32.xlu0 %v4787_v4, %s6721_s26  ;;  %v6577_v51 = vpack.c.bf16 %v5052_v48, %v5033_v56  ;;  %v6583_v41 = vpack.c.bf16 %v4939_v55, %v4920_v38  ;;  %v3796_v56 = vld [vmem:[#allocation2 + $0x98] sm:$0x3] }
 0x87c   :  { %4042 = vst [vmem:[#allocation3 + $0xe8] sm:$0x3] %v4004_v0  ;;  %4572 = vrot.lane.b32.xlu1 %v4516_v17, %s6719_s24  ;;  %v4788_v48 = vld [vmem:[#allocation2 + $0x78] sm:$0x3] }
 0x87d   :  { %v4247_v20 = vpop.permute.xlu0 %4246  ;;  %6578 = vmatprep.subr.bf16.mxu1 %v6577_v51  ;;  %v4827_v3 = vpop.permute.xlu1 %4826 }
 0x87e   :  { %v4276_v33 = vsel %vm1935_vm15, %v8821_v34, %v4247_v20  ;;  %v4859_v32 = vsel %vm2525_vm0, %v4825_v11, %v4827_v3  ;;  %6580 = vmatpush1.bf16.msra.mxu1 %v6579_v23  ;;  %v4205_v34 = vld [vmem:[#allocation2 + $0x88] sm:$0x3]  ;;  %v3795_v11 = vld [vmem:[#allocation2 + $0x90] sm:$0x3] }
 0x87f   :  { %4314 = vst [vmem:[#allocation3 + $0x208] sm:$0x3] %v4276_v33  ;;  %4897 = vst [vmem:[#allocation3 + $0x4e8] sm:$0x3] %v4859_v32  ;;  %4125 = vrot.lane.b32.xlu0 %v4068_v31, %s6717_s22  ;;  %v4921_v52 = vld [vmem:[#allocation3 + $0x48] sm:$0xff] }
 0x880   :  { %4709 = vrot.lane.b32.xlu1 %v4653_v6, %s6720_s25  ;;  %v4069_v33 = vld [vmem:[#allocation2 + $0x90] sm:$0x3]  ;;  %v4070_v6 = vld [vmem:[#allocation2 + $0x98] sm:$0x3] }
 0x881   :  { %v4829_v9 = vpop.permute.xlu0 %4828  ;;  %v8907_v53 = vpop.permute.xlu1 %3841 }
 0x882   :  { %v4860_v57 = vsel %vm2525_vm0, %v4827_v3, %v4829_v9  ;;  %v3868_v42 = vsel %vm1521_vm10, %v3840_v27, %v8907_v53  ;;  %v4940_v24 = vld [vmem:[#allocation3 + $0xe0] sm:$0xff]  ;;  %v3932_v27 = vld [vmem:[#allocation2 + $0x90] sm:$0x3] }
 0x883   :  { %4898 = vst [vmem:[#allocation3 + $0x4f0] sm:$0x3] %v4860_v57  ;;  %3906 = vst [vmem:[#allocation3 + $0x58] sm:$0x3] %v3868_v42  ;;  %4262 = vrot.lane.b32.xlu0 %v4205_v34, %s6712_s20  ;;  %v6581_v39 = vpack.c.bf16 %v4940_v24, %v4921_v52  ;;  %v4380_v3 = vld [vmem:[#allocation2 + $0x90] sm:$0x3] }
 0x884   :  { %3853 = vrot.lane.b32.xlu1 %v3795_v11, %s6714_s3  ;;  %v4958_v52 = vld [vmem:[#allocation3 + $0x170] sm:$0xff] }
 0x885   :  { %v4114_v30 = vpop.permute.xlu0 %4113  ;;  %v8914_v43 = vpop.permute.xlu1 %3978 }
 0x886   :  { %v4005_v16 = vsel %vm1659_vm11, %v3977_v18, %v8914_v43  ;;  %v5069_v62 = vld [vmem:[#allocation3 + $0x4e8] sm:$0xff] }
 0x887   :  { %4043 = vst [vmem:[#allocation3 + $0xf0] sm:$0x3] %v4005_v16  ;;  %4844 = vrot.lane.b32.xlu0 %v4789_v37, %s6721_s26  ;;  %5244 = vmatprep.subr.mxu0 %v5069_v62  ;;  %v4977_v34 = vld [vmem:[#allocation3 + $0x208] sm:$0xff]  ;;  %v4790_v37 = vld [vmem:[#allocation2 + $0x88] sm:$0x3] }
 0x888   :  { %3990 = vrot.lane.b32.xlu1 %v3932_v27, %s6716_s21  ;;  %5245 = vmatpush1.msra.mxu0 %v5068_v40  ;;  %v6587_v27 = vpack.c.bf16 %v4977_v34, %v4958_v52 }
 0x889   :  { %v4251_v44 = vpop.permute.xlu0 %4250  ;;  %6582 = vmatprep.subr.bf16.mxu0 %v6581_v39  ;;  %v4112_v0 = vpop.permute.xlu1 %4111  ;;  %6223 = vmatmul.mubr.msk.f32.vlgmr.msra.gmra.mrb[22].mxu0 %vm2755_vm2, %v8783_v54 }
 0x88a   :  { %v4140_v18 = vsel %vm1797_vm14, %v8892_v13, %v4112_v0  ;;  %v4141_v4 = vsel %vm1797_vm14, %v4112_v0, %v4114_v30  ;;  %6584 = vmatpush1.bf16.msra.mxu0 %v6583_v41  ;;  %5434 = vmatprep.mubr.f32.mxu0 %v8209_v49  ;;  %v4654_v0 = vld [vmem:[#allocation2 + $0x90] sm:$0x3] }
 0x88b   :  { %4178 = vst [vmem:[#allocation3 + $0x178] sm:$0x3] %v4140_v18  ;;  %4179 = vst [vmem:[#allocation3 + $0x180] sm:$0x3] %v4141_v4  ;;  %3855 = vrot.lane.b32.xlu0 %v3796_v56, %s6714_s3  ;;  %v4923_v4 = vld [vmem:[#allocation3 + $0x58] sm:$0xff] }
 0x88c   :  { %4842 = vrot.lane.b32.xlu1 %v4788_v48, %s6721_s26  ;;  %v3933_v56 = vld [vmem:[#allocation2 + $0x98] sm:$0x3] }
 0x88d   :  { %v8928_v17 = vpop.permute.xlu0 %4421  ;;  %v4249_v51 = vpop.permute.xlu1 %4248  ;;  %v5070_v48 = vld [vmem:[#allocation3 + $0x4f0] sm:$0xff] }
 0x88e   :  { %v4451_v13 = vsel %vm2111_vm12, %v8842_v14, %v8928_v17  ;;  %v4277_v19 = vsel %vm1935_vm15, %v4247_v20, %v4249_v51  ;;  %v4278_v23 = vsel %vm1935_vm15, %v4249_v51, %v4251_v44  ;;  %v4206_v20 = vld [vmem:[#allocation2 + $0x90] sm:$0x3]  ;;  %v4942_v40 = vld [vmem:[#allocation3 + $0xf0] sm:$0xff] }
 0x88f   :  { %4489 = vst [vmem:[#allocation3 + $0x338] sm:$0x3] %v4451_v13  ;;  %4315 = vst [vmem:[#allocation3 + $0x210] sm:$0x3] %v4277_v19  ;;  %4437 = vrot.lane.b32.xlu0 %v4380_v3, %s6718_s23  ;;  %v6597_v51 = vpack.c.bf16 %v4942_v40, %v4923_v4  ;;  %v4922_v13 = vld [vmem:[#allocation3 + $0x50] sm:$0xff] }
 0x890   :  { %4316 = vst [vmem:[#allocation3 + $0x218] sm:$0x3] %v4278_v23  ;;  %4127 = vrot.lane.b32.xlu1 %v4069_v33, %s6717_s22  ;;  %v4656_v19 = vld [vmem:[#allocation2 + $0xa0] sm:$0x3] }
 0x891   :  { %v8937_v32 = vpop.permute.xlu0 %4425  ;;  %v8939_v31 = vpop.permute.xlu1 %4830 }
 0x892   :  { %v4861_v14 = vsel %vm2525_vm0, %v4829_v9, %v8939_v31  ;;  %v4517_v9 = vld [vmem:[#allocation2 + $0x90] sm:$0x3]  ;;  %v4959_v55 = vld [vmem:[#allocation3 + $0x178] sm:$0xff] }
 0x893   :  { %4899 = vst [vmem:[#allocation3 + $0x4f8] sm:$0x3] %v4861_v14  ;;  %4129 = vrot.lane.b32.xlu0 %v4070_v6, %s6717_s22  ;;  %v4381_v14 = vld [vmem:[#allocation2 + $0x98] sm:$0x3] }
 0x894   :  { %4264 = vrot.lane.b32.xlu1 %v4206_v20, %s6712_s20 }
 0x895   :  { %v8945_v57 = vpop.permute.xlu0 %4558  ;;  %v8947_v42 = vpop.permute.xlu1 %4115 }
 0x896   :  { %v4588_v11 = vsel %vm2249_vm13, %v8871_v50, %v8945_v57  ;;  %v4142_v24 = vsel %vm1797_vm14, %v4114_v30, %v8947_v42  ;;  %v4978_v16 = vld [vmem:[#allocation3 + $0x210] sm:$0xff]  ;;  %v4941_v30 = vld [vmem:[#allocation3 + $0xe8] sm:$0xff]  ;;  %v5015_v40 = vld [vmem:[#allocation3 + $0x338] sm:$0xff] }
 0x897   :  { %4626 = vst [vmem:[#allocation3 + $0x3d0] sm:$0x3] %v4588_v11  ;;  %4180 = vst [vmem:[#allocation3 + $0x188] sm:$0x3] %v4142_v24  ;;  %4574 = vrot.lane.b32.xlu0 %v4517_v9, %s6719_s24  ;;  %v6585_v62 = vpack.c.bf16 %v4978_v16, %v4959_v55  ;;  %v4979_v34 = vld [vmem:[#allocation3 + $0x218] sm:$0xff] }
 0x898   :  { %4846 = vrot.lane.b32.xlu1 %v4790_v37, %s6721_s26  ;;  %v4792_v11 = vld [vmem:[#allocation2 + $0x98] sm:$0x3]  ;;  %v4960_v37 = vld [vmem:[#allocation3 + $0x180] sm:$0xff] }
 0x899   :  { %v8956_v39 = vpop.permute.xlu0 %4695  ;;  %6586 = vmatprep.subr.bf16.mxu0 %v6585_v62  ;;  %v8958_v50 = vpop.permute.xlu1 %4252  ;;  %v4207_v55 = vld [vmem:[#allocation2 + $0x98] sm:$0x3]  ;;  %v6603_v62 = vpack.c.bf16 %v4979_v34, %v4960_v37 }
 0x89a   :  { %v4725_v38 = vsel %vm2387_vm1, %v8880_v2, %v8956_v39  ;;  %v4279_v41 = vsel %vm1935_vm15, %v4251_v44, %v8958_v50  ;;  %6588 = vmatpush1.bf16.msra.mxu0 %v6587_v27  ;;  %v5071_v18 = vld [vmem:[#allocation3 + $0x4f8] sm:$0xff]  ;;  %v6599_v2 = vpack.c.bf16 %v4941_v30, %v4922_v13  ;;  %v4998_v34 = vld [vmem:[#allocation3 + $0x2b0] sm:$0xff] }
 0x89b   :  { %4763 = vst [vmem:[#allocation3 + $0x468] sm:$0x3] %v4725_v38  ;;  %4317 = vst [vmem:[#allocation3 + $0x220] sm:$0x3] %v4279_v41  ;;  %4711 = vrot.lane.b32.xlu0 %v4654_v0, %s6720_s25  ;;  %5315 = vmatprep.subr.mxu1 %v5071_v18  ;;  %v4997_v41 = vld [vmem:[#allocation3 + $0x2a8] sm:$0xff] }
 0x89c   :  { %3992 = vrot.lane.b32.xlu1 %v3933_v56, %s6716_s21  ;;  %5316 = vmatpush1.msra.mxu1 %v5070_v48  ;;  %v4518_v18 = vld [vmem:[#allocation2 + $0x98] sm:$0x3]  ;;  %v4996_v56 = vld [vmem:[#allocation3 + $0x2a0] sm:$0xff] }
 0x89d   :  { %v8967_v23 = vpop.permute.xlu0 %4562  ;;  %6598 = vmatprep.subr.bf16.mxu1 %v6597_v51  ;;  %v4424_v44 = vpop.permute.xlu1 %4423  ;;  %6224 = vmatmul.mubr.msk.f32.vlgmr.msra.gmra.mrb[22].mxu1 %vm2755_vm2, %v8783_v54  ;;  %v6591_v48 = vpack.c.bf16 %v5015_v40, %v4996_v56 }
 0x89e   :  { %v4452_v3 = vsel %vm2111_vm12, %v8928_v17, %v4424_v44  ;;  %v4453_v33 = vsel %vm2111_vm12, %v4424_v44, %v8937_v32  ;;  %6600 = vmatpush1.bf16.msra.mxu1 %v6599_v2  ;;  %5505 = vmatprep.mubr.f32.mxu1 %v8209_v49  ;;  %v4961_v24 = vld [vmem:[#allocation3 + $0x188] sm:$0xff]  ;;  %v4999_v44 = vld [vmem:[#allocation3 + $0x2b8] sm:$0xff] }
 0x89f   :  { %4490 = vst [vmem:[#allocation3 + $0x340] sm:$0x3] %v4452_v3  ;;  %4491 = vst [vmem:[#allocation3 + $0x348] sm:$0x3] %v4453_v33  ;;  %4715 = vrot.lane.b32.xlu0 %v4656_v19, %s6720_s25  ;;  %v4655_v33 = vld [vmem:[#allocation2 + $0x98] sm:$0x3] }
 0x8a0   :  { %4439 = vrot.lane.b32.xlu1 %v4381_v14, %s6718_s23 }
 0x8a1   :  { %v8978_v6 = vpop.permute.xlu0 %4699  ;;  %v8980_v20 = vpop.permute.xlu1 %4427 }
 0x8a2   :  { %v4454_v17 = vsel %vm2111_vm12, %v8937_v32, %v8980_v20  ;;  %v4980_v9 = vld [vmem:[#allocation3 + $0x220] sm:$0xff]  ;;  %v5053_v37 = vld [vmem:[#allocation3 + $0x468] sm:$0xff] }
 0x8a3   :  { %4492 = vst [vmem:[#allocation3 + $0x350] sm:$0x3] %v4454_v17  ;;  %4850 = vrot.lane.b32.xlu0 %v4792_v11, %s6721_s26  ;;  %v6601_v16 = vpack.c.bf16 %v4980_v9, %v4961_v24 }
 0x8a4   :  { %4266 = vrot.lane.b32.xlu1 %v4207_v55, %s6712_s20 }
 0x8a5   :  { %v8987_v52 = vpop.permute.xlu0 %3843  ;;  %6602 = vmatprep.subr.bf16.mxu1 %v6601_v16  ;;  %v4561_v27 = vpop.permute.xlu1 %4560 }
 0x8a6   :  { %v3869_v32 = vsel %vm1521_vm10, %v8907_v53, %v8987_v52  ;;  %v4589_v30 = vsel %vm2249_vm13, %v8945_v57, %v4561_v27  ;;  %v4590_v38 = vsel %vm2249_vm13, %v4561_v27, %v8967_v23  ;;  %6604 = vmatpush1.bf16.msra.mxu1 %v6603_v62  ;;  %v5016_v0 = vld [vmem:[#allocation3 + $0x340] sm:$0xff]  ;;  %v5017_v13 = vld [vmem:[#allocation3 + $0x348] sm:$0xff] }
 0x8a7   :  { %3907 = vst [vmem:[#allocation3 + $0x60] sm:$0x3] %v3869_v32  ;;  %4627 = vst [vmem:[#allocation3 + $0x3d8] sm:$0x3] %v4589_v30  ;;  %v6589_v4 = vpack.c.bf16 %v5016_v0, %v4997_v41  ;;  %v6607_v17 = vpack.c.bf16 %v5017_v13, %v4998_v34  ;;  %v5034_v30 = vld [vmem:[#allocation3 + $0x3d0] sm:$0xff] }
 0x8a8   :  { %4628 = vst [vmem:[#allocation3 + $0x3e0] sm:$0x3] %v4590_v38  ;;  %4576 = vrot.lane.b32.xlu1 %v4518_v18, %s6719_s24  ;;  %v4793_v0 = vld [vmem:[#allocation2 + $0xa0] sm:$0x3] }
 0x8a9   :  { %v3981_v51 = vpop.permute.xlu0 %3980  ;;  %6590 = vmatprep.subr.bf16.mxu0 %v6589_v4  ;;  %v4698_v53 = vpop.permute.xlu1 %4697 }
 0x8aa   :  { %v4006_v57 = vsel %vm1659_vm11, %v8914_v43, %v3981_v51  ;;  %v4726_v2 = vsel %vm2387_vm1, %v8956_v39, %v4698_v53  ;;  %v4727_v19 = vsel %vm2387_vm1, %v4698_v53, %v8978_v6  ;;  %6592 = vmatpush1.bf16.msra.mxu0 %v6591_v48  ;;  %v5018_v3 = vld [vmem:[#allocation3 + $0x350] sm:$0xff]  ;;  %v4519_v39 = vld [vmem:[#allocation2 + $0xa0] sm:$0x3] }
 0x8ab   :  { %4044 = vst [vmem:[#allocation3 + $0xf8] sm:$0x3] %v4006_v57  ;;  %4764 = vst [vmem:[#allocation3 + $0x470] sm:$0x3] %v4726_v2  ;;  %v6605_v14 = vpack.c.bf16 %v5018_v3, %v4999_v44 }
 0x8ac   :  { %4765 = vst [vmem:[#allocation3 + $0x478] sm:$0x3] %v4727_v19  ;;  %4713 = vrot.lane.b32.xlu1 %v4655_v33, %s6720_s25 }
 0x8ad   :  { %v4833_v11 = vpop.permute.xlu0 %4832  ;;  %6606 = vmatprep.subr.bf16.mxu1 %v6605_v14  ;;  %v9004_v43 = vpop.permute.xlu1 %4564 }
 0x8ae   :  { %v4862_v24 = vsel %vm2525_vm0, %v8939_v31, %v4833_v11  ;;  %v4591_v9 = vsel %vm2249_vm13, %v8967_v23, %v9004_v43  ;;  %6608 = vmatpush1.bf16.msra.mxu1 %v6607_v17  ;;  %v5035_v27 = vld [vmem:[#allocation3 + $0x3d8] sm:$0xff]  ;;  %v4791_v31 = vld [vmem:[#allocation2 + $0x90] sm:$0x3]  ;;  %v6595_v23 = vpack.c.bf16 %v5053_v37, %v5034_v30  ;;  %v4924_v30 = vld [vmem:[#allocation3 + $0x60] sm:$0xff] }
 0x8af   :  { %4900 = vst [vmem:[#allocation3 + $0x500] sm:$0x3] %v4862_v24  ;;  %4629 = vst [vmem:[#allocation3 + $0x3e8] sm:$0x3] %v4591_v9  ;;  %v5036_v44 = vld [vmem:[#allocation3 + $0x3e0] sm:$0xff] }
 0x8b0   :  { %4578 = vrot.lane.b32.xlu1 %v4519_v39, %s6719_s24 }
 0x8b1   :  { %v3848_v55 = vpop.permute.xlu0 %3847  ;;  %v9012_v16 = vpop.permute.xlu1 %4701 }
 0x8b2   :  { %v4728_v62 = vsel %vm2387_vm1, %v8978_v6, %v9012_v16  ;;  %v5054_v40 = vld [vmem:[#allocation3 + $0x470] sm:$0xff] }
 0x8b3   :  { %4766 = vst [vmem:[#allocation3 + $0x480] sm:$0x3] %v4728_v62  ;;  %v6593_v32 = vpack.c.bf16 %v5054_v40, %v5035_v27  ;;  %v5055_v48 = vld [vmem:[#allocation3 + $0x478] sm:$0xff] }
 0x8b4   :  { %4848 = vrot.lane.b32.xlu1 %v4791_v31, %s6721_s26  ;;  %v6611_v3 = vpack.c.bf16 %v5055_v48, %v5036_v44 }
 0x8b5   :  { %v3985_v38 = vpop.permute.xlu0 %3984  ;;  %6594 = vmatprep.subr.bf16.mxu0 %v6593_v32  ;;  %v3846_v41 = vpop.permute.xlu1 %3845 }
 0x8b6   :  { %v3870_v18 = vsel %vm1521_vm10, %v8987_v52, %v3846_v41  ;;  %v3871_v4 = vsel %vm1521_vm10, %v3846_v41, %v3848_v55  ;;  %6596 = vmatpush1.bf16.msra.mxu0 %v6595_v23  ;;  %v5037_v2 = vld [vmem:[#allocation3 + $0x3e8] sm:$0xff]  ;;  %v5072_v31 = vld [vmem:[#allocation3 + $0x500] sm:$0xff] }
 0x8b7   :  { %3908 = vst [vmem:[#allocation3 + $0x68] sm:$0x3] %v3870_v18  ;;  %3909 = vst [vmem:[#allocation3 + $0x70] sm:$0x3] %v3871_v4 }
 0x8b8   :  { %4852 = vrot.lane.b32.xlu1 %v4793_v0, %s6721_s26 }
 0x8b9   :  { %v4118_v6 = vpop.permute.xlu0 %4117  ;;  %v3983_v56 = vpop.permute.xlu1 %3982 }
 0x8ba   :  { %v4143_v53 = vsel %vm1797_vm14, %v8947_v42, %v4118_v6  ;;  %v4007_v13 = vsel %vm1659_vm11, %v3981_v51, %v3983_v56  ;;  %v4008_v57 = vsel %vm1659_vm11, %v3983_v56, %v3985_v38  ;;  %v5056_v19 = vld [vmem:[#allocation3 + $0x480] sm:$0xff] }
 0x8bb   :  { %4181 = vst [vmem:[#allocation3 + $0x190] sm:$0x3] %v4143_v53  ;;  %4045 = vst [vmem:[#allocation3 + $0x100] sm:$0x3] %v4007_v13  ;;  %v6609_v52 = vpack.c.bf16 %v5056_v19, %v5037_v2 }
 0x8bc   :  { %4046 = vst [vmem:[#allocation3 + $0x108] sm:$0x3] %v4008_v57 }
 0x8bd   :  { %v4255_v33 = vpop.permute.xlu0 %4254  ;;  %6610 = vmatprep.subr.bf16.mxu1 %v6609_v52  ;;  %v4835_v14 = vpop.permute.xlu1 %4834 }
 0x8be   :  { %v4280_v34 = vsel %vm1935_vm15, %v8958_v50, %v4255_v33  ;;  %v4863_v42 = vsel %vm2525_vm0, %v4833_v11, %v4835_v14  ;;  %6612 = vmatpush1.bf16.msra.mxu1 %v6611_v3  ;;  %v4943_v50 = vld [vmem:[#allocation3 + $0xf8] sm:$0xff]  ;;  %v4925_v40 = vld [vmem:[#allocation3 + $0x68] sm:$0xff] }
 0x8bf   :  { %4318 = vst [vmem:[#allocation3 + $0x228] sm:$0x3] %v4280_v34  ;;  %4901 = vst [vmem:[#allocation3 + $0x508] sm:$0x3] %v4863_v42  ;;  %v6615_v23 = vpack.c.bf16 %v4943_v50, %v4924_v30 }
 0x8c1   :  { %v4837_v51 = vpop.permute.xlu0 %4836  ;;  %v9029_v17 = vpop.permute.xlu1 %3849 }
 0x8c2   :  { %v4864_v39 = vsel %vm2525_vm0, %v4835_v14, %v4837_v51  ;;  %v3872_v24 = vsel %vm1521_vm10, %v3848_v55, %v9029_v17  ;;  %v4944_v9 = vld [vmem:[#allocation3 + $0x100] sm:$0xff]  ;;  %v4962_v34 = vld [vmem:[#allocation3 + $0x190] sm:$0xff] }
 0x8c3   :  { %4902 = vst [vmem:[#allocation3 + $0x510] sm:$0x3] %v4864_v39  ;;  %3910 = vst [vmem:[#allocation3 + $0x78] sm:$0x3] %v3872_v24  ;;  %v6613_v32 = vpack.c.bf16 %v4944_v9, %v4925_v40 }
 0x8c5   :  { %v4122_v37 = vpop.permute.xlu0 %4121  ;;  %v9034_v62 = vpop.permute.xlu1 %3986 }
 0x8c6   :  { %v4009_v11 = vsel %vm1659_vm11, %v3985_v38, %v9034_v62  ;;  %v5073_v27 = vld [vmem:[#allocation3 + $0x508] sm:$0xff] }
 0x8c7   :  { %4047 = vst [vmem:[#allocation3 + $0x110] sm:$0x3] %v4009_v11  ;;  %5386 = vmatprep.subr.mxu0 %v5073_v27  ;;  %v4981_v19 = vld [vmem:[#allocation3 + $0x228] sm:$0xff] }
 0x8c8   :  { %5387 = vmatpush1.msra.mxu0 %v5072_v31  ;;  %v6619_v42 = vpack.c.bf16 %v4981_v19, %v4962_v34  ;;  %v4926_v31 = vld [vmem:[#allocation3 + $0x70] sm:$0xff] }
 0x8c9   :  { %v4259_v55 = vpop.permute.xlu0 %4258  ;;  %6614 = vmatprep.subr.bf16.mxu0 %v6613_v32  ;;  %v4120_v41 = vpop.permute.xlu1 %4119  ;;  %6225 = vmatmul.mubr.msk.f32.vlgmr.msra.gmra.mrb[24].mxu0 %vm2755_vm2, %v8783_v54 }
 0x8ca   :  { %v4144_v0 = vsel %vm1797_vm14, %v4118_v6, %v4120_v41  ;;  %v4145_v18 = vsel %vm1797_vm14, %v4120_v41, %v4122_v37  ;;  %6616 = vmatpush1.bf16.msra.mxu0 %v6615_v23  ;;  %5576 = vmatprep.mubr.f32.mxu0 %v8209_v49  ;;  %v5074_v27 = vld [vmem:[#allocation3 + $0x510] sm:$0xff] }
 0x8cb   :  { %4182 = vst [vmem:[#allocation3 + $0x198] sm:$0x3] %v4144_v0  ;;  %4183 = vst [vmem:[#allocation3 + $0x1a0] sm:$0x3] %v4145_v18 }
 0x8cd   :  { %v4430_v38 = vpop.permute.xlu0 %4429  ;;  %v4257_v4 = vpop.permute.xlu1 %4256 }
 0x8ce   :  { %v4455_v56 = vsel %vm2111_vm12, %v8980_v20, %v4430_v38  ;;  %v4281_v48 = vsel %vm1935_vm15, %v4255_v33, %v4257_v4  ;;  %v4282_v53 = vsel %vm1935_vm15, %v4257_v4, %v4259_v55 }
 0x8cf   :  { %4493 = vst [vmem:[#allocation3 + $0x358] sm:$0x3] %v4455_v56  ;;  %4319 = vst [vmem:[#allocation3 + $0x230] sm:$0x3] %v4281_v48 }
 0x8d0   :  { %4320 = vst [vmem:[#allocation3 + $0x238] sm:$0x3] %v4282_v53 }
 0x8d1   :  { %v4434_v6 = vpop.permute.xlu0 %4433 }
 0x8d2   :  { %v9047_v13 = vpop.permute.xlu1 %4838  ;;  %v4963_v44 = vld [vmem:[#allocation3 + $0x198] sm:$0xff]  ;;  %v4964_v53 = vld [vmem:[#allocation3 + $0x1a0] sm:$0xff] }
 0x8d3   :  { %v4865_v57 = vsel %vm2525_vm0, %v4837_v51, %v9047_v13  ;;  %v4946_v51 = vld [vmem:[#allocation3 + $0x110] sm:$0xff] }
 0x8d4   :  { %4903 = vst [vmem:[#allocation3 + $0x518] sm:$0x3] %v4865_v57 }
 0x8d5   :  { %v4567_v2 = vpop.permute.xlu0 %4566 }
 0x8d6   :  { %v4592_v52 = vsel %vm2249_vm13, %v9004_v43, %v4567_v2  ;;  %v9053_v20 = vpop.permute.xlu1 %4123  ;;  %v4982_v3 = vld [vmem:[#allocation3 + $0x230] sm:$0xff]  ;;  %v4945_v43 = vld [vmem:[#allocation3 + $0x108] sm:$0xff] }
 0x8d7   :  { %4630 = vst [vmem:[#allocation3 + $0x3f0] sm:$0x3] %v4592_v52  ;;  %v4146_v33 = vsel %vm1797_vm14, %v4122_v37, %v9053_v20  ;;  %v6617_v14 = vpack.c.bf16 %v4982_v3, %v4963_v44  ;;  %v4927_v37 = vld [vmem:[#allocation3 + $0x78] sm:$0xff]  ;;  %v6631_v30 = vpack.c.bf16 %v4945_v43, %v4926_v31  ;;  %v5002_v31 = vld [vmem:[#allocation3 + $0x2d0] sm:$0xff] }
 0x8d8   :  { %4184 = vst [vmem:[#allocation3 + $0x1a8] sm:$0x3] %v4146_v33  ;;  %v6629_v40 = vpack.c.bf16 %v4946_v51, %v4927_v37  ;;  %v4983_v18 = vld [vmem:[#allocation3 + $0x238] sm:$0xff] }
 0x8d9   :  { %v4704_v39 = vpop.permute.xlu0 %4703  ;;  %6618 = vmatprep.subr.bf16.mxu0 %v6617_v14  ;;  %v6635_v57 = vpack.c.bf16 %v4983_v18, %v4964_v53  ;;  %v5019_v44 = vld [vmem:[#allocation3 + $0x358] sm:$0xff] }
 0x8da   :  { %v4729_v24 = vsel %vm2387_vm1, %v9012_v16, %v4704_v39  ;;  %v9059_v9 = vpop.permute.xlu1 %4260  ;;  %6620 = vmatpush1.bf16.msra.mxu0 %v6619_v42  ;;  %v5000_v42 = vld [vmem:[#allocation3 + $0x2c0] sm:$0xff]  ;;  %v5003_v37 = vld [vmem:[#allocation3 + $0x2d8] sm:$0xff] }
 0x8db   :  { %4767 = vst [vmem:[#allocation3 + $0x488] sm:$0x3] %v4729_v24  ;;  %v4283_v50 = vsel %vm1935_vm15, %v4259_v55, %v9059_v9  ;;  %v5075_v11 = vld [vmem:[#allocation3 + $0x518] sm:$0xff]  ;;  %v6623_v24 = vpack.c.bf16 %v5019_v44, %v5000_v42 }
 0x8dc   :  { %4321 = vst [vmem:[#allocation3 + $0x240] sm:$0x3] %v4283_v50  ;;  %5457 = vmatprep.subr.mxu1 %v5075_v11 }
 0x8dd   :  { %5458 = vmatpush1.msra.mxu1 %v5074_v27  ;;  %v4571_v32 = vpop.permute.xlu0 %4570 }
 0x8de   :  { %6630 = vmatprep.subr.bf16.mxu1 %v6629_v40  ;;  %v4432_v16 = vpop.permute.xlu1 %4431  ;;  %6226 = vmatmul.mubr.msk.f32.vlgmr.msra.gmra.mrb[24].mxu1 %vm2755_vm2, %v8783_v54 }
 0x8df   :  { %v4456_v23 = vsel %vm2111_vm12, %v4430_v38, %v4432_v16  ;;  %v4457_v41 = vsel %vm2111_vm12, %v4432_v16, %v4434_v6  ;;  %6632 = vmatpush1.bf16.msra.mxu1 %v6631_v30  ;;  %5647 = vmatprep.mubr.f32.mxu1 %v8209_v49  ;;  %v4965_v56 = vld [vmem:[#allocation3 + $0x1a8] sm:$0xff] }
 0x8e0   :  { %4494 = vst [vmem:[#allocation3 + $0x360] sm:$0x3] %v4456_v23  ;;  %4495 = vst [vmem:[#allocation3 + $0x368] sm:$0x3] %v4457_v41 }
 0x8e1   :  { %v4708_v55 = vpop.permute.xlu0 %4707 }
 0x8e2   :  { %v9068_v0 = vpop.permute.xlu1 %4435 }
 0x8e3   :  { %v4458_v4 = vsel %vm2111_vm12, %v4434_v6, %v9068_v0  ;;  %v4984_v48 = vld [vmem:[#allocation3 + $0x240] sm:$0xff]  ;;  %v5001_v6 = vld [vmem:[#allocation3 + $0x2c8] sm:$0xff] }
 0x8e4   :  { %4496 = vst [vmem:[#allocation3 + $0x370] sm:$0x3] %v4458_v4  ;;  %v6633_v54 = vpack.c.bf16 %v4984_v48, %v4965_v56  ;;  %v5057_v56 = vld [vmem:[#allocation3 + $0x488] sm:$0xff] }
 0x8e5   :  { %v3852_v38 = vpop.permute.xlu0 %3851 }
 0x8e6   :  { %v3873_v19 = vsel %vm1521_vm10, %v9029_v17, %v3852_v38  ;;  %6634 = vmatprep.subr.bf16.mxu1 %v6633_v54  ;;  %v4569_v52 = vpop.permute.xlu1 %4568 }
 0x8e7   :  { %3911 = vst [vmem:[#allocation3 + $0x80] sm:$0x3] %v3873_v19  ;;  %v4593_v3 = vsel %vm2249_vm13, %v4567_v2, %v4569_v52  ;;  %v4594_v33 = vsel %vm2249_vm13, %v4569_v52, %v4571_v32  ;;  %6636 = vmatpush1.bf16.msra.mxu1 %v6635_v57  ;;  %v5020_v14 = vld [vmem:[#allocation3 + $0x360] sm:$0xff]  ;;  %v5021_v50 = vld [vmem:[#allocation3 + $0x368] sm:$0xff]  ;;  %v5038_v57 = vld [vmem:[#allocation3 + $0x3f0] sm:$0xff] }
 0x8e8   :  { %4631 = vst [vmem:[#allocation3 + $0x3f8] sm:$0x3] %v4593_v3  ;;  %4632 = vst [vmem:[#allocation3 + $0x400] sm:$0x3] %v4594_v33  ;;  %v6621_v34 = vpack.c.bf16 %v5020_v14, %v5001_v6  ;;  %v6639_v16 = vpack.c.bf16 %v5021_v50, %v5002_v31 }
 0x8e9   :  { %v3989_v51 = vpop.permute.xlu0 %3988 }
 0x8ea   :  { %v4010_v17 = vsel %vm1659_vm11, %v9034_v62, %v3989_v51  ;;  %6622 = vmatprep.subr.bf16.mxu0 %v6621_v34  ;;  %v4706_v43 = vpop.permute.xlu1 %4705 }
 0x8eb   :  { %4048 = vst [vmem:[#allocation3 + $0x118] sm:$0x3] %v4010_v17  ;;  %v4730_v2 = vsel %vm2387_vm1, %v4704_v39, %v4706_v43  ;;  %v4731_v11 = vsel %vm2387_vm1, %v4706_v43, %v4708_v55  ;;  %6624 = vmatpush1.bf16.msra.mxu0 %v6623_v24  ;;  %v5022_v27 = vld [vmem:[#allocation3 + $0x370] sm:$0xff] }
 0x8ec   :  { %4768 = vst [vmem:[#allocation3 + $0x490] sm:$0x3] %v4730_v2  ;;  %4769 = vst [vmem:[#allocation3 + $0x498] sm:$0x3] %v4731_v11  ;;  %v6637_v40 = vpack.c.bf16 %v5022_v27, %v5003_v37 }
 0x8ed   :  { %v4841_v30 = vpop.permute.xlu0 %4840 }
 0x8ee   :  { %v4866_v62 = vsel %vm2525_vm0, %v9047_v13, %v4841_v30  ;;  %6638 = vmatprep.subr.bf16.mxu1 %v6637_v40  ;;  %v9082_v23 = vpop.permute.xlu1 %4572 }
 0x8ef   :  { %4904 = vst [vmem:[#allocation3 + $0x520] sm:$0x3] %v4866_v62  ;;  %v4595_v39 = vsel %vm2249_vm13, %v4571_v32, %v9082_v23  ;;  %6640 = vmatpush1.bf16.msra.mxu1 %v6639_v16  ;;  %v5039_v48 = vld [vmem:[#allocation3 + $0x3f8] sm:$0xff]  ;;  %v6627_v32 = vpack.c.bf16 %v5057_v56, %v5038_v57  ;;  %v5040_v24 = vld [vmem:[#allocation3 + $0x400] sm:$0xff] }
 0x8f0   :  { %4633 = vst [vmem:[#allocation3 + $0x408] sm:$0x3] %v4595_v39  ;;  %v9109_v57 = vld [vmem:[%s9448_s6] sm:$0x3] }
 0x8f1   :  { %v4126_v41 = vpop.permute.xlu0 %4125 }
 0x8f2   :  { %v4147_v18 = vsel %vm1797_vm14, %v9053_v20, %v4126_v41  ;;  %v9088_v4 = vpop.permute.xlu1 %4709 }
 0x8f3   :  { %4185 = vst [vmem:[#allocation3 + $0x1b0] sm:$0x3] %v4147_v18  ;;  %v4732_v13 = vsel %vm2387_vm1, %v4708_v55, %v9088_v4  ;;  %v5058_v54 = vld [vmem:[#allocation3 + $0x490] sm:$0xff]  ;;  %v5059_v55 = vld [vmem:[#allocation3 + $0x498] sm:$0xff] }
 0x8f4   :  { %4770 = vst [vmem:[#allocation3 + $0x4a0] sm:$0x3] %v4732_v13  ;;  %v6625_v53 = vpack.c.bf16 %v5058_v54, %v5039_v48  ;;  %v6643_v43 = vpack.c.bf16 %v5059_v55, %v5040_v24  ;;  %v4928_v48 = vld [vmem:[#allocation3 + $0x80] sm:$0xff] }
 0x8f5   :  { %v4263_v19 = vpop.permute.xlu0 %4262 }
 0x8f6   :  { %v4284_v52 = vsel %vm1935_vm15, %v9059_v9, %v4263_v19  ;;  %6626 = vmatprep.subr.bf16.mxu0 %v6625_v53  ;;  %v3854_v44 = vpop.permute.xlu1 %3853  ;;  %v5076_v13 = vld [vmem:[#allocation3 + $0x520] sm:$0xff] }
 0x8f7   :  { %4322 = vst [vmem:[#allocation3 + $0x248] sm:$0x3] %v4284_v52  ;;  %v3874_v20 = vsel %vm1521_vm10, %v3852_v38, %v3854_v44  ;;  %6628 = vmatpush1.bf16.msra.mxu0 %v6627_v32  ;;  %v5041_v14 = vld [vmem:[#allocation3 + $0x408] sm:$0xff] }
 0x8f8   :  { %3912 = vst [vmem:[#allocation3 + $0x88] sm:$0x3] %v3874_v20 }
 0x8f9   :  { %v4845_v3 = vpop.permute.xlu0 %4844 }
 0x8fa   :  { %v3991_v33 = vpop.permute.xlu1 %3990 }
 0x8fb   :  { %v4011_v6 = vsel %vm1659_vm11, %v3989_v51, %v3991_v33  ;;  %v5060_v34 = vld [vmem:[#allocation3 + $0x4a0] sm:$0xff] }
 0x8fc   :  { %4049 = vst [vmem:[#allocation3 + $0x120] sm:$0x3] %v4011_v6  ;;  %v6641_v42 = vpack.c.bf16 %v5060_v34, %v5041_v14 }
 0x8fd   :  { %v3856_v17 = vpop.permute.xlu0 %3855 }
 0x8fe   :  { %v3875_v9 = vsel %vm1521_vm10, %v3854_v44, %v3856_v17  ;;  %6642 = vmatprep.subr.bf16.mxu1 %v6641_v42  ;;  %v4843_v50 = vpop.permute.xlu1 %4842  ;;  %v4985_v20 = vld [vmem:[#allocation3 + $0x248] sm:$0xff]  ;;  %v4966_v42 = vld [vmem:[#allocation3 + $0x1b0] sm:$0xff] }
 0x8ff   :  { %3913 = vst [vmem:[#allocation3 + $0x90] sm:$0x3] %v3875_v9  ;;  %v4867_v38 = vsel %vm2525_vm0, %v4841_v30, %v4843_v50  ;;  %v4868_v2 = vsel %vm2525_vm0, %v4843_v50, %v4845_v3  ;;  %6644 = vmatpush1.bf16.msra.mxu1 %v6643_v43  ;;  %v4947_v30 = vld [vmem:[#allocation3 + $0x118] sm:$0xff]  ;;  %v4929_v56 = vld [vmem:[#allocation3 + $0x88] sm:$0xff]  ;;  %v6651_v24 = vpack.c.bf16 %v4985_v20, %v4966_v42 }
 0x900   :  { %4905 = vst [vmem:[#allocation3 + $0x528] sm:$0x3] %v4867_v38  ;;  %4906 = vst [vmem:[#allocation3 + $0x530] sm:$0x3] %v4868_v2 }
 0x901   :  { %v4438_v51 = vpop.permute.xlu0 %4437 }
 0x902   :  { %v4459_v11 = vsel %vm2111_vm12, %v9068_v0, %v4438_v51  ;;  %v4128_v37 = vpop.permute.xlu1 %4127 }
 0x903   :  { %4497 = vst [vmem:[#allocation3 + $0x378] sm:$0x3] %v4459_v11  ;;  %v4148_v27 = vsel %vm1797_vm14, %v4126_v41, %v4128_v37  ;;  %v4948_v31 = vld [vmem:[#allocation3 + $0x120] sm:$0xff]  ;;  %v6647_v41 = vpack.c.bf16 %v4947_v30, %v4928_v48 }
 0x904   :  { %4186 = vst [vmem:[#allocation3 + $0x1b8] sm:$0x3] %v4148_v27  ;;  %v6645_v0 = vpack.c.bf16 %v4948_v31, %v4929_v56  ;;  %v5005_v27 = vld [vmem:[#allocation3 + $0x2e8] sm:$0xff] }
 0x905   :  { %v4130_v40 = vpop.permute.xlu0 %4129 }
 0x906   :  { %v4149_v16 = vsel %vm1797_vm14, %v4128_v37, %v4130_v40  ;;  %v4265_v62 = vpop.permute.xlu1 %4264  ;;  %v4930_v38 = vld [vmem:[#allocation3 + $0x90] sm:$0xff] }
 0x907   :  { %4187 = vst [vmem:[#allocation3 + $0x1c0] sm:$0x3] %v4149_v16  ;;  %v4285_v39 = vsel %vm1935_vm15, %v4263_v19, %v4265_v62  ;;  %v5077_v18 = vld [vmem:[#allocation3 + $0x528] sm:$0xff]  ;;  %v5078_v9 = vld [vmem:[#allocation3 + $0x530] sm:$0xff]  ;;  %v5004_v16 = vld [vmem:[#allocation3 + $0x2e0] sm:$0xff] }
 0x908   :  { %4323 = vst [vmem:[#allocation3 + $0x250] sm:$0x3] %v4285_v39  ;;  %5528 = vmatprep.subr.mxu0 %v5077_v18 }
 0x909   :  { %5529 = vmatpush1.msra.mxu0 %v5076_v13  ;;  %v4575_v54 = vpop.permute.xlu0 %4574 }
 0x90a   :  { %v4596_v53 = vsel %vm2249_vm13, %v9082_v23, %v4575_v54  ;;  %6227 = vmatmul.mubr.msk.f32.vlgmr.msra.gmra.mrb[26].mxu0 %vm2755_vm2, %v9109_v57  ;;  %6646 = vmatprep.subr.bf16.mxu0 %v6645_v0  ;;  %v9113_v19 = vpop.permute.xlu1 %4846  ;;  %v5023_v11 = vld [vmem:[#allocation3 + $0x378] sm:$0xff] }
 0x90b   :  { %4634 = vst [vmem:[#allocation3 + $0x410] sm:$0x3] %v4596_v53  ;;  %v4869_v32 = vsel %vm2525_vm0, %v4845_v3, %v9113_v19  ;;  %6648 = vmatpush1.bf16.msra.mxu0 %v6647_v41  ;;  %5718 = vmatprep.mubr.f32.mxu0 %v8209_v49  ;;  %v4967_v6 = vld [vmem:[#allocation3 + $0x1b8] sm:$0xff]  ;;  %v6655_v30 = vpack.c.bf16 %v5023_v11, %v5004_v16 }
 0x90c   :  { %4907 = vst [vmem:[#allocation3 + $0x538] sm:$0x3] %v4869_v32 }
 0x90d   :  { %v4712_v23 = vpop.permute.xlu0 %4711 }
 0x90e   :  { %v4733_v52 = vsel %vm2387_vm1, %v9088_v4, %v4712_v23  ;;  %v3993_v44 = vpop.permute.xlu1 %3992  ;;  %v4968_v41 = vld [vmem:[#allocation3 + $0x1c0] sm:$0xff] }
 0x90f   :  { %4771 = vst [vmem:[#allocation3 + $0x4a8] sm:$0x3] %v4733_v52  ;;  %v4012_v55 = vsel %vm1659_vm11, %v3991_v33, %v3993_v44  ;;  %v4986_v14 = vld [vmem:[#allocation3 + $0x250] sm:$0xff] }
 0x910   :  { %4050 = vst [vmem:[#allocation3 + $0x128] sm:$0x3] %v4012_v55  ;;  %v6649_v34 = vpack.c.bf16 %v4986_v14, %v4967_v6 }
 0x911   :  { %v4716_v56 = vpop.permute.xlu0 %4715 }
 0x912   :  { %6650 = vmatprep.subr.bf16.mxu0 %v6649_v34  ;;  %v4440_v3 = vpop.permute.xlu1 %4439 }
 0x913   :  { %v4460_v17 = vsel %vm2111_vm12, %v4438_v51, %v4440_v3  ;;  %v4461_v43 = vsel %vm2111_vm12, %v4440_v3, %v8487_v22  ;;  %6652 = vmatpush1.bf16.msra.mxu0 %v6651_v24  ;;  %v5079_v4 = vld [vmem:[#allocation3 + $0x538] sm:$0xff] }
 0x914   :  { %4498 = vst [vmem:[#allocation3 + $0x380] sm:$0x3] %v4460_v17  ;;  %4499 = vst [vmem:[#allocation3 + $0x388] sm:$0x3] %v4461_v43  ;;  %5599 = vmatprep.subr.mxu1 %v5079_v4 }
 0x915   :  { %5600 = vmatpush1.msra.mxu1 %v5078_v9  ;;  %v4851_v42 = vpop.permute.xlu0 %4850 }
 0x916   :  { %6228 = vmatmul.mubr.msk.f32.vlgmr.msra.gmra.mrb[26].mxu1 %vm2755_vm2, %v9109_v57  ;;  %v4267_v33 = vpop.permute.xlu1 %4266  ;;  %6661 = vmatprep.subr.bf16.mxu1 %v6709_v60  ;;  %v5061_v3 = vld [vmem:[#allocation3 + $0x4a8] sm:$0xff] }
 0x917   :  { %v4286_v50 = vsel %vm1935_vm15, %v4265_v62, %v4267_v33  ;;  %v4949_v2 = vld [vmem:[#allocation3 + $0x128] sm:$0xff]  ;;  %6300 = vmatprep.mubr.msk.f32.mxu1 %vm6710_vm4, %v8209_v49  ;;  %vm9454_vm4 = vcmask 1041408  }
 0x918   :  { %4324 = vst [vmem:[#allocation3 + $0x258] sm:$0x3] %v4286_v50  ;;  %v6662_v22 = vpack.c.bf16 %v4949_v2, %v4930_v38  ;;  %vm9455_vm10 = vmmov %vm9454_vm4  ;;  %v5042_v50 = vld [vmem:[#allocation3 + $0x410] sm:$0xff] }
 0x919   :  { %v6659_v38 = vpack.c.bf16 %v5061_v3, %v5042_v50  ;;  %vm9456_vm11 = vmmov %vm9454_vm4 }
 0x91a   :  { %6663 = vmatpush3.bf16.msra.mxu1 %v6662_v22  ;;  %v4577_v51 = vpop.permute.xlu1 %4576  ;;  %vm9457_vm12 = vmmov %vm9454_vm4 }
 0x91b   :  { %v4597_v37 = vsel %vm2249_vm13, %v4575_v54, %v4577_v51  ;;  %v5024_v40 = vld [vmem:[#allocation3 + $0x380] sm:$0xff]  ;;  %6664 = vmatprep.subr.bf16.mxu1 %v6709_v60  ;;  %v5025_v20 = vld [vmem:[#allocation3 + $0x388] sm:$0xff]  ;;  %vm9459_vm14 = vmmov %vm9454_vm4 }
 0x91c   :  { %4635 = vst [vmem:[#allocation3 + $0x418] sm:$0x3] %v4597_v37  ;;  %v6653_v31 = vpack.c.bf16 %v5024_v40, %v5005_v27  ;;  %v9132_v62 = vpop.f32.mrb[20].mxu0  ;;  %vm9460_vm15 = vmmov %vm9454_vm4 }
 0x91d   :  { %v5796_v39 = vmul.f32 %v9132_v62, %v7178_v5  ;;  %v9136_v18 = vpop.f32.mrb[21].mxu0 }
 0x91e   :  { %6654 = vmatprep.subr.bf16.mxu0 %v6653_v31  ;;  %v4714_v13 = vpop.permute.xlu1 %4713  ;;  %v5797_v0 = vmul.f32 %v9136_v18, %v7182_v7 }
 0x91f   :  { %v4734_v48 = vsel %vm2387_vm1, %v4712_v23, %v4714_v13  ;;  %v4735_v54 = vsel %vm2387_vm1, %v4714_v13, %v4716_v56  ;;  %6656 = vmatpush1.bf16.msra.mxu0 %v6655_v30  ;;  %v4987_v53 = vld [vmem:[#allocation3 + $0x258] sm:$0xff]  ;;  %v5815_v32 = vsel %vm9454_vm4, %v5796_v39, 0.0  ;;  %v5006_v23 = vld [vmem:[#allocation3 + $0x2f0] sm:$0xff] }
 0x920   :  { %4772 = vst [vmem:[#allocation3 + $0x4b0] sm:$0x3] %v4734_v48  ;;  %4773 = vst [vmem:[#allocation3 + $0x4b8] sm:$0x3] %v4735_v54  ;;  %v6665_v52 = vpack.c.bf16 %v4987_v53, %v4968_v41  ;;  %v5816_v44 = vsel %vm9455_vm10, %v5797_v0, 0.0  ;;  %v6668_v34 = vpack.c.bf16 %v5025_v20, %v5006_v23 }
 0x921   :  { %v5817_v55 = vadd.f32 %v5816_v44, %v5815_v32 }
 0x922   :  { %6666 = vmatpush3.bf16.msra.mxu1 %v6665_v52  ;;  %v4579_v6 = vpop.permute.xlu1 %4578 }
 0x923   :  { %v4598_v14 = vsel %vm2249_vm13, %v4577_v51, %v4579_v6  ;;  %6667 = vmatprep.subr.bf16.mxu1 %v6709_v60  ;;  %v5043_v4 = vld [vmem:[#allocation3 + $0x418] sm:$0xff]  ;;  %vm9458_vm13 = vmmov %vm9454_vm4 }
 0x924   :  { %4636 = vst [vmem:[#allocation3 + $0x420] sm:$0x3] %v4598_v14 }
 0x926   :  { %6669 = vmatpush3.bf16.msra.mxu1 %v6668_v34  ;;  %v4849_v24 = vpop.permute.xlu1 %4848 }
 0x927   :  { %v4870_v17 = vsel %vm2525_vm0, %v9113_v19, %v4849_v24  ;;  %v4871_v43 = vsel %vm2525_vm0, %v4849_v24, %v4851_v42  ;;  %v5062_v9 = vld [vmem:[#allocation3 + $0x4b0] sm:$0xff]  ;;  %6670 = vmatprep.subr.bf16.mxu1 %v6709_v60  ;;  %v5063_v11 = vld [vmem:[#allocation3 + $0x4b8] sm:$0xff] }
 0x928   :  { %4908 = vst [vmem:[#allocation3 + $0x540] sm:$0x3] %v4870_v17  ;;  %4909 = vst [vmem:[#allocation3 + $0x548] sm:$0x3] %v4871_v43  ;;  %v6657_v33 = vpack.c.bf16 %v5062_v9, %v5043_v4 }
 0x92a   :  { %6658 = vmatprep.subr.bf16.mxu0 %v6657_v33  ;;  %v4853_v2 = vpop.permute.xlu1 %4852 }
 0x92b   :  { %v4872_v22 = vsel %vm2525_vm0, %v4851_v42, %v4853_v2  ;;  %6660 = vmatpush1.bf16.msra.mxu0 %v6659_v38  ;;  %v5044_v51 = vld [vmem:[#allocation3 + $0x420] sm:$0xff]  ;;  %vm9461_vm0 = vmmov %vm9454_vm4 }
 0x92c   :  { %4910 = vst [vmem:[#allocation3 + $0x550] sm:$0x3] %v4872_v22  ;;  %v6671_v19 = vpack.c.bf16 %v5063_v11, %v5044_v51  ;;  %vm9462_vm1 = vmmov %vm9461_vm0 }
 0x92d   :  { %vm9464_vm6 = vmmov %vm9461_vm0 }
 0x92e   :  { %6672 = vmatpush3.bf16.msra.mxu1 %v6671_v19  ;;  %vm9465_vm3 = vmmov %vm9461_vm0 }
 0x92f   :  { %v5081_v37 = vld [vmem:[#allocation3 + $0x548] sm:$0xff]  ;;  %v5080_v27 = vld [vmem:[#allocation3 + $0x540] sm:$0xff]  ;;  %6298 = vmatprep.subr.mxu1 %v8209_v49  ;;  %vm9466_vm7 = vmmov %vm9461_vm0 }
 0x930   :  { %5670 = vmatprep.subr.mxu0 %v5081_v37  ;;  %vm9467_vm8 = vmmov %vm9461_vm0 }
 0x931   :  { %5671 = vmatpush1.msra.mxu0 %v5080_v27  ;;  %v9152_v60 = vpop.f32.mrb[20].mxu1  ;;  %vm9468_vm9 = vmmov %vm9461_vm0 }
 0x932   :  { %6229 = vmatmul.mubr.msk.f32.vlgmr.msra.gmra.mrb[28].mxu0 %vm2755_vm2, %v9109_v57  ;;  %v5798_v40 = vmul.f32 %v9152_v60, %v7185_v8  ;;  %v9158_v31 = vpop.f32.mrb[21].mxu1  ;;  %vm9469_vm5 = vmmov %vm9461_vm0 }
 0x933   :  { %v5082_v16 = vld [vmem:[#allocation3 + $0x550] sm:$0xff]  ;;  %v5799_v30 = vmul.f32 %v9158_v31, %v7189_v10  ;;  %vm9470_vm4 = vmmov %vm9461_vm0 }
 0x934   :  { %6299 = vmatpush3.msra.mxu1 %v5082_v16  ;;  %v5818_v39 = vsel %vm9456_vm11, %v5798_v40, 0.0  ;;  %vm9471_vm10 = vmmov %vm9461_vm0 }
 0x935   :  { %6301 = vmatmul.mubr.msk.f32.vlgmr.msra.gmra.mrb[28].mxu1 %vm2755_vm2, %v9109_v57  ;;  %v5819_v49 = vadd.f32 %v5818_v39, %v5817_v55  ;;  %v5820_v56 = vsel %vm9457_vm12, %v5799_v30, 0.0  ;;  %vm9463_vm2 = vmmov %vm9461_vm0 }
 0x936   :  { %vm9472_vm11 = vmmov %vm9461_vm0 }
 0x937   :  { %v5821_v13 = vadd.f32 %v5820_v56, %v5819_v49  ;;  %vm9473_vm12 = vmmov %vm9461_vm0 }
 0x95c   :  { %v9166_v0 = vpop.f32.mrb[22].mxu0 }
 0x95d   :  { %v5800_v48 = vmul.f32 %v9166_v0, %v7197_v15  ;;  %v9170_v54 = vpop.f32.mrb[23].mxu0 }
 0x95e   :  { %v5801_v41 = vmul.f32 %v9170_v54, %v7214_v25 }
 0x95f   :  { %v5822_v53 = vsel %vm9458_vm13, %v5800_v48, 0.0  ;;  %vm9474_vm13 = vmmov %vm9461_vm0 }
 0x960   :  { %v5823_v32 = vadd.f32 %v5822_v53, %v5821_v13  ;;  %v5824_v52 = vsel %vm9459_vm14, %v5801_v41, 0.0  ;;  %vm9475_vm14 = vmmov %vm9461_vm0 }
 0x962   :  { %v5825_v57 = vadd.f32 %v5824_v52, %v5823_v32 }
 0x970   :  { %v9176_v44 = vpop.f32.mrb[22].mxu1 }
 0x971   :  { %v5802_v20 = vmul.f32 %v9176_v44, %v7216_v26  ;;  %v9180_v55 = vpop.f32.mrb[23].mxu1 }
 0x972   :  { %v5803_v6 = vmul.f32 %v9180_v55, %v7230_v35 }
 0x973   :  { %v5826_v14 = vsel %vm9460_vm15, %v5802_v20, 0.0  ;;  %vm9476_vm15 = vmmov %vm9461_vm0 }
 0x974   :  { %v5827_v23 = vadd.f32 %v5826_v14, %v5825_v57  ;;  %v5828_v34 = vsel %vm9461_vm0, %v5803_v6, 0.0 }
 0x976   :  { %v5829_v42 = vadd.f32 %v5828_v34, %v5827_v23 }
 0x99c   :  { %v9186_v24 = vpop.f32.mrb[24].mxu0 }
 0x99d   :  { %v5804_v3 = vmul.f32 %v9186_v24, %v7233_v36  ;;  %v9190_v17 = vpop.f32.mrb[25].mxu0 }
 0x99e   :  { %v5805_v43 = vmul.f32 %v9190_v17, %v7248_v46 }
 0x99f   :  { %v5830_v4 = vsel %vm9462_vm1, %v5804_v3, 0.0  ;;  %vm9477_vm1 = vmmov %vm9461_vm0 }
 0x9a0   :  { %v5831_v9 = vadd.f32 %v5830_v4, %v5829_v42  ;;  %v5832_v33 = vsel %vm9463_vm2, %v5805_v43, 0.0  ;;  %vm9478_vm2 = vmmov %vm9461_vm0 }
 0x9a2   :  { %v5833_v50 = vadd.f32 %v5832_v33, %v5831_v9 }
 0x9b1   :  { %v9196_v38 = vpop.f32.mrb[24].mxu1 }
 0x9b2   :  { %v5806_v2 = vmul.f32 %v9196_v38, %v7251_v47  ;;  %v9200_v22 = vpop.f32.mrb[25].mxu1 }
 0x9b3   :  { %v5807_v51 = vmul.f32 %v9200_v22, %v7267_v58 }
 0x9b4   :  { %v5834_v11 = vsel %vm9464_vm6, %v5806_v2, 0.0  ;;  %vm9479_vm6 = vmmov %vm9461_vm0 }
 0x9b5   :  { %v5835_v19 = vadd.f32 %v5834_v11, %v5833_v50  ;;  %v5836_v37 = vsel %vm9465_vm3, %v5807_v51, 0.0  ;;  %vm9480_vm3 = vmmov %vm9461_vm0 }
 0x9b7   :  { %v5837_v27 = vadd.f32 %v5836_v37, %v5835_v19 }
 0x9dd   :  { %v9206_v40 = vpop.f32.mrb[26].mxu0 }
 0x9de   :  { %v5808_v16 = vmul.f32 %v9206_v40, %v7269_v59  ;;  %v9210_v30 = vpop.f32.mrb[27].mxu0 }
 0x9df   :  { %v5809_v39 = vmul.f32 %v9210_v30, %v7285_v28 }
 0x9e0   :  { %v5838_v49 = vsel %vm9466_vm7, %v5808_v16, 0.0  ;;  %vm9481_vm7 = vmmov %vm9461_vm0 }
 0x9e1   :  { %v5839_v56 = vadd.f32 %v5838_v49, %v5837_v27  ;;  %v5840_v13 = vsel %vm9467_vm8, %v5809_v39, 0.0  ;;  %vm9482_vm8 = vmmov %vm9461_vm0 }
 0x9e3   :  { %v5841_v48 = vadd.f32 %v5840_v13, %v5839_v56 }
 0x9e9   :  { %v9216_v41 = vpop.f32.mrb[26].mxu1 }
 0x9ea   :  { %v5810_v53 = vmul.f32 %v9216_v41, %v7287_v29  ;;  %v9220_v32 = vpop.f32.mrb[27].mxu1 }
 0x9eb   :  { %v5811_v52 = vmul.f32 %v9220_v32, %v7298_v45 }
 0x9ec   :  { %v5842_v57 = vsel %vm9468_vm9, %v5810_v53, 0.0  ;;  %vm9483_vm9 = vmmov %vm9461_vm0 }
 0x9ed   :  { %v5843_v20 = vadd.f32 %v5842_v57, %v5841_v48  ;;  %v5844_v6 = vsel %vm9469_vm5, %v5811_v52, 0.0  ;;  %vm9484_vm5 = vmmov %vm9461_vm0 }
 0x9ef   :  { %v5845_v14 = vadd.f32 %v5844_v6, %v5843_v20 }
 0xa05   :  { %v9226_v23 = vpop.f32.mrb[28].mxu0 }
 0xa06   :  { %v5812_v34 = vmul.f32 %v9226_v23, %v7301_v12  ;;  %v9230_v42 = vpop.f32.mrb[29].mxu0 }
 0xa07   :  { %v5813_v3 = vmul.f32 %v9230_v42, %v7310_v1 }
 0xa08   :  { %v5846_v43 = vsel %vm9470_vm4, %v5812_v34, 0.0  ;;  %v9235_v4 = vpop.f32.mrb[28].mxu1  ;;  %vm9485_vm4 = vmmov %vm9461_vm0 }
 0xa09   :  { %v5847_v9 = vadd.f32 %v5846_v43, %v5845_v14  ;;  %v5848_v33 = vsel %vm9471_vm10, %v5813_v3, 0.0  ;;  %v5814_v50 = vmul.f32 %v9235_v4, %v7313_v21  ;;  %v6302_v2 = vpop.f32.mrb[29].mxu1  ;;  %vm9486_vm10 = vmmov %vm9461_vm0 }
 0xa0b   :  { %v5849_v51 = vadd.f32 %v5848_v33, %v5847_v9  ;;  %v5850_v11 = vsel %vm9472_vm11, %v5814_v50, 0.0  ;;  %vm9487_vm11 = vmmov %vm9461_vm0 }
 0xa0d   :  { %v5851_v19 = vadd.f32 %v5850_v11, %v5849_v51 }
 0xa0f   :  { %5852 = vadd.xlane.f32.xlu0 %v5851_v19 }
 0xa9c   :  { %v5853_v37 = vpop.xlane.xlu0 %5852 }
 0xa9d   :  { %v9241_v27 = vmul.f32 0.00048828125, %v5853_v37 }
 0xa9f   :  { %v9245_v16 = vsub.f32 %v9132_v62, %v9241_v27  ;;  %v9249_v39 = vsub.f32 %v9136_v18, %v9241_v27  ;;  %v9253_v49 = vsub.f32 %v9152_v60, %v9241_v27  ;;  %v9257_v56 = vsub.f32 %v9158_v31, %v9241_v27 }
 0xaa0   :  { %v9265_v62 = vsub.f32 %v9166_v0, %v9241_v27  ;;  %v9271_v60 = vsub.f32 %v9170_v54, %v9241_v27 }
 0xaa1   :  { %v5874_v13 = vmul.f32 %v9245_v16, %v7178_v5  ;;  %v5875_v48 = vmul.f32 %v9249_v39, %v7182_v7  ;;  %v5876_v18 = vmul.f32 %v9253_v49, %v7185_v8  ;;  %v5877_v31 = vmul.f32 %v9257_v56, %v7189_v10 }
 0xaa2   :  { %v9277_v5 = vsub.f32 %v9176_v44, %v9241_v27  ;;  %v5878_v7 = vmul.f32 %v9265_v62, %v7197_v15  ;;  %v9283_v8 = vsub.f32 %v9180_v55, %v9241_v27  ;;  %v5879_v54 = vmul.f32 %v9271_v60, %v7214_v25 }
 0xaa3   :  { %v5893_v53 = vmul.f32 %v5874_v13, %v5874_v13  ;;  %v5894_v52 = vmul.f32 %v5875_v48, %v5875_v48  ;;  %v5895_v0 = vmul.f32 %v5876_v18, %v5876_v18  ;;  %v5896_v57 = vmul.f32 %v5877_v31, %v5877_v31 }
 0xaa4   :  { %v9291_v44 = vsub.f32 %v9186_v24, %v9241_v27  ;;  %v5880_v15 = vmul.f32 %v9277_v5, %v7216_v26  ;;  %v5897_v14 = vmul.f32 %v5878_v7, %v5878_v7  ;;  %v9298_v25 = vsub.f32 %v9190_v17, %v9241_v27 }
 0xaa5   :  { %v5912_v10 = vsel %vm9473_vm12, %v5893_v53, 0.0  ;;  %v5913_v20 = vsel %vm9474_vm13, %v5894_v52, 0.0  ;;  %v5915_v55 = vsel %vm9475_vm14, %v5895_v0, 0.0  ;;  %v5881_v3 = vmul.f32 %v9283_v8, %v7230_v35  ;;  %vm9488_vm12 = vmmov %vm9461_vm0 }
 0xaa6   :  { %v5914_v6 = vadd.f32 %v5913_v20, %v5912_v10  ;;  %v5898_v43 = vmul.f32 %v5879_v54, %v5879_v54  ;;  %v5917_v9 = vsel %vm9476_vm15, %v5896_v57, 0.0  ;;  %v9305_v24 = vsub.f32 %v9196_v38, %v9241_v27  ;;  %vm9489_vm13 = vmmov %vm9461_vm0 }
 0xaa7   :  { %v5882_v26 = vmul.f32 %v9291_v44, %v7233_v36  ;;  %v5899_v50 = vmul.f32 %v5880_v15, %v5880_v15  ;;  %v5919_v2 = vsel %vm9461_vm0, %v5897_v14, 0.0  ;;  %v9312_v17 = vsub.f32 %v9200_v22, %v9241_v27  ;;  %vm9490_vm14 = vmmov %vm9461_vm0 }
 0xaa8   :  { %v5916_v34 = vadd.f32 %v5915_v55, %v5914_v6  ;;  %v5883_v35 = vmul.f32 %v9298_v25, %v7248_v46  ;;  %v5900_v11 = vmul.f32 %v5881_v3, %v5881_v3  ;;  %v5921_v19 = vsel %vm9477_vm1, %v5898_v43, 0.0 }
 0xaa9   :  { %v9319_v38 = vsub.f32 %v9206_v40, %v9241_v27  ;;  %v5884_v36 = vmul.f32 %v9305_v24, %v7251_v47  ;;  %v5901_v13 = vmul.f32 %v5882_v26, %v5882_v26  ;;  %v5923_v48 = vsel %vm9478_vm2, %v5899_v50, 0.0 }
 0xaaa   :  { %v5918_v33 = vadd.f32 %v5917_v9, %v5916_v34  ;;  %v9326_v22 = vsub.f32 %v9210_v30, %v9241_v27  ;;  %v5885_v46 = vmul.f32 %v9312_v17, %v7267_v58  ;;  %v5902_v31 = vmul.f32 %v5883_v35, %v5883_v35 }
 0xaab   :  { %v5925_v53 = vsel %vm9479_vm6, %v5900_v11, 0.0  ;;  %v9333_v40 = vsub.f32 %v9216_v41, %v9241_v27  ;;  %v5886_v47 = vmul.f32 %v9319_v38, %v7269_v59  ;;  %v5903_v7 = vmul.f32 %v5884_v36, %v5884_v36 }
 0xaac   :  { %v5920_v51 = vadd.f32 %v5919_v2, %v5918_v33  ;;  %v5927_v0 = vsel %vm9480_vm3, %v5901_v13, 0.0  ;;  %v9340_v30 = vsub.f32 %v9220_v32, %v9241_v27  ;;  %v5887_v58 = vmul.f32 %v9326_v22, %v7285_v28 }
 0xaad   :  { %v5904_v57 = vmul.f32 %v5885_v46, %v5885_v46  ;;  %v5929_v10 = vsel %vm9481_vm7, %v5902_v31, 0.0  ;;  %v9347_v41 = vsub.f32 %v9226_v23, %v9241_v27  ;;  %v5888_v59 = vmul.f32 %v9333_v40, %v7287_v29 }
 0xaae   :  { %v5922_v37 = vadd.f32 %v5921_v19, %v5920_v51  ;;  %v5905_v6 = vmul.f32 %v5886_v47, %v5886_v47  ;;  %v5931_v15 = vsel %vm9482_vm8, %v5903_v7, 0.0  ;;  %v9354_v32 = vsub.f32 %v9230_v42, %v9241_v27 }
 0xaaf   :  { %v5889_v28 = vmul.f32 %v9340_v30, %v7298_v45  ;;  %v5906_v55 = vmul.f32 %v5887_v58, %v5887_v58  ;;  %v5933_v34 = vsel %vm9483_vm9, %v5904_v57, 0.0  ;;  %v5873_v23 = vsub.f32 %v9235_v4, %v9241_v27 }
 0xab0   :  { %v5924_v18 = vadd.f32 %v5923_v48, %v5922_v37  ;;  %v5890_v29 = vmul.f32 %v9347_v41, %v7301_v12  ;;  %v5907_v43 = vmul.f32 %v5888_v59, %v5888_v59  ;;  %v5935_v9 = vsel %vm9484_vm5, %v5905_v6, 0.0 }
 0xab1   :  { %v5891_v42 = vmul.f32 %v9354_v32, %v7310_v1  ;;  %v5908_v26 = vmul.f32 %v5889_v28, %v5889_v28  ;;  %v5937_v45 = vsel %vm9485_vm4, %v5906_v55, 0.0  ;;  %v5892_v2 = vmul.f32 %v5873_v23, %v7313_v21  ;;  %v5795_v21 = vld [vmem:[%s9449_s7] sm:$0x3] }
 0xab2   :  { %v5926_v52 = vadd.f32 %v5925_v53, %v5924_v18  ;;  %v5909_v51 = vmul.f32 %v5890_v29, %v5890_v29  ;;  %v5939_v35 = vsel %vm9486_vm10, %v5907_v43, 0.0 }
 0xab3   :  { %v5910_v27 = vmul.f32 %v5891_v42, %v5891_v42  ;;  %v5941_v12 = vsel %vm9487_vm11, %v5908_v26, 0.0  ;;  %v5911_v19 = vmul.f32 %v5892_v2, %v5892_v2 }
 0xab4   :  { %v5928_v54 = vadd.f32 %v5927_v0, %v5926_v52  ;;  %v5943_v37 = vsel %vm9488_vm12, %v5909_v51, 0.0  ;;  %v6722_v0 = vmov 1983009808  }
 0xab5   :  { %v5945_v1 = vsel %vm9489_vm13, %v5910_v27, 0.0  ;;  %v5947_v48 = vsel %vm9490_vm14, %v5911_v19, 0.0 }
 0xab6   :  { %v5930_v20 = vadd.f32 %v5929_v10, %v5928_v54  ;;  %v6087_v54 = vunpack.c.l.s4 %v6722_v0 }
 0xab8   :  { %v5932_v14 = vadd.f32 %v5931_v15, %v5930_v20  ;;  %v6088_v58 = vunpack.c.0.s8 %v6087_v54 }
 0xaba   :  { %v5934_v3 = vadd.f32 %v5933_v34, %v5932_v14  ;;  %v9378_v10 = vsub.s32 %v6088_v58, %v7162_v63 }
 0xabc   :  { %v5936_v33 = vadd.f32 %v5935_v9, %v5934_v3 }
 0xabe   :  { %v5938_v50 = vadd.f32 %v5937_v45, %v5936_v33 }
 0xac0   :  { %v5940_v4 = vadd.f32 %v5939_v35, %v5938_v50 }
 0xac2   :  { %v5942_v11 = vadd.f32 %v5941_v12, %v5940_v4 }
 0xac4   :  { %v5944_v36 = vadd.f32 %v5943_v37, %v5942_v11 }
 0xac6   :  { %v5946_v13 = vadd.f32 %v5945_v1, %v5944_v36 }
 0xac8   :  { %v5948_v18 = vadd.f32 %v5947_v48, %v5946_v13 }
 0xaca   :  { %5949 = vadd.xlane.f32.xlu1 %v5948_v18 }
 0xadb   :  { %5982 = vperm.xlu1 %6695, %v5795_v21  }
 0xb57   :  { %v5950_v46 = vpop.xlane.xlu1 %5949 }
 0xb58   :  { %v5951_v31 = vmul.f32 0.00048828125, %v5950_v46 }
 0xb5a   :  { %v5952_v53 = vmax.f32 %v5951_v31, 0.0 }
 0xb5b   :  { %v5983_v3 = vpop.permute.xlu1 %5982 }
 0xb5c   :  { %v5953_v52 = vadd.f32 1e-05, %v5952_v53 }
 0xb5e   :  { %6701 = vrsqrt.f32 %v5953_v52 }
 0xb68   :  { %v6702_v47 = vpop.eup %6701 }
 0xb69   :  { %v5955_v7 = vmul.f32 %v6702_v47, %v5795_v21 }
 0xb6b   :  { %5958 = vperm.xlu0 %6694, %v5955_v7  }
 0xb6f   :  { %6696 = vset.pattern.permute.xlu0 %v6711_v61 }
 0xb70   :  { %6024 = vperm.xlu0 %6696, %v5795_v21  }
 0xbea   :  { %v5959_v57 = vpop.permute.xlu0 %5958 }
 0xbeb   :  { %v5961_v20 = vmul.f32 %v5959_v57, %v9245_v16  ;;  %v5962_v59 = vmul.f32 %v5959_v57, %v9249_v39  ;;  %v5963_v6 = vmul.f32 %v5959_v57, %v9253_v49  ;;  %v5964_v15 = vmul.f32 %v5959_v57, %v9257_v56 }
 0xbec   :  { %v5965_v14 = vmul.f32 %v5959_v57, %v9265_v62  ;;  %v5966_v61 = vmul.f32 %v5959_v57, %v9271_v60  ;;  %v5967_v28 = vmul.f32 %v5959_v57, %v9277_v5  ;;  %v5968_v55 = vmul.f32 %v5959_v57, %v9283_v8 }
 0xbed   :  { %v5969_v34 = vmul.f32 %v5959_v57, %v9291_v44  ;;  %v5970_v63 = vmul.f32 %v5959_v57, %v9298_v25  ;;  %v5971_v16 = vmul.f32 %v5959_v57, %v9305_v24  ;;  %v5972_v39 = vmul.f32 %v5959_v57, %v9312_v17 }
 0xbee   :  { %v5973_v49 = vmul.f32 %v5959_v57, %v9319_v38  ;;  %v5974_v56 = vmul.f32 %v5959_v57, %v9326_v22  ;;  %v5975_v62 = vmul.f32 %v5959_v57, %v9333_v40  ;;  %v5976_v60 = vmul.f32 %v5959_v57, %v9340_v30 }
 0xbef   :  { %v5977_v5 = vmul.f32 %v5959_v57, %v9347_v41  ;;  %v5978_v8 = vmul.f32 %v5959_v57, %v9354_v32  ;;  %v5979_v44 = vmul.f32 %v5959_v57, %v5873_v23  ;;  %v5985_v29 = vadd.f32 %v5983_v3, %v5961_v20  ;;  %v6025_v23 = vpop.permute.xlu0 %6024 }
 0xbf0   :  { %v5986_v25 = vadd.f32 %v5983_v3, %v5962_v59  ;;  %v5987_v43 = vadd.f32 %v5983_v3, %v5963_v6  ;;  %v5988_v9 = vadd.f32 %v5983_v3, %v5964_v15  ;;  %v5989_v24 = vadd.f32 %v5983_v3, %v5965_v14 }
 0xbf1   :  { %v5990_v33 = vadd.f32 %v5983_v3, %v5966_v61  ;;  %v5991_v17 = vadd.f32 %v5983_v3, %v5967_v28  ;;  %v5992_v42 = vadd.f32 %v5983_v3, %v5968_v55  ;;  %v5993_v38 = vadd.f32 %v5983_v3, %v5969_v34 }
 0xbf2   :  { %v5994_v26 = vadd.f32 %v5983_v3, %v5970_v63  ;;  %v5995_v22 = vadd.f32 %v5983_v3, %v5971_v16  ;;  %v5996_v45 = vadd.f32 %v5983_v3, %v5972_v39  ;;  %v5997_v40 = vadd.f32 %v5983_v3, %v5973_v49 }
 0xbf3   :  { %v5998_v50 = vadd.f32 %v5983_v3, %v5974_v56  ;;  %v5999_v30 = vadd.f32 %v5983_v3, %v5975_v62  ;;  %v6000_v2 = vadd.f32 %v5983_v3, %v5976_v60  ;;  %v6001_v41 = vadd.f32 %v5983_v3, %v5977_v5 }
 0xbf4   :  { %v6002_v51 = vadd.f32 %v5983_v3, %v5978_v8  ;;  %v6003_v32 = vadd.f32 %v5983_v3, %v5979_v44  ;;  %vm6007_vm2 = vcmp.ge.f32.partialorder %v5988_v9, 0.0  ;;  %vm6008_vm6 = vcmp.ge.f32.partialorder %v5989_v24, 0.0 }
 0xbf5   :  { %vm6009_vm3 = vcmp.ge.f32.partialorder %v5990_v33, 0.0  ;;  %vm6010_vm7 = vcmp.ge.f32.partialorder %v5991_v17, 0.0  ;;  %vm6011_vm8 = vcmp.ge.f32.partialorder %v5992_v42, 0.0  ;;  %vm6012_vm9 = vcmp.ge.f32.partialorder %v5993_v38, 0.0 }
 0xbf6   :  { %vm6013_vm5 = vcmp.ge.f32.partialorder %v5994_v26, 0.0  ;;  %vm6014_vm4 = vcmp.ge.f32.partialorder %v5995_v22, 0.0  ;;  %vm6015_vm10 = vcmp.ge.f32.partialorder %v5996_v45, 0.0  ;;  %vm6016_vm11 = vcmp.ge.f32.partialorder %v5997_v40, 0.0 }
 0xbf7   :  { %vm6017_vm12 = vcmp.ge.f32.partialorder %v5998_v50, 0.0  ;;  %vm6018_vm13 = vcmp.ge.f32.partialorder %v5999_v30, 0.0  ;;  %vm6019_vm14 = vcmp.ge.f32.partialorder %v6000_v2, 0.0  ;;  %v6027_v35 = vmul.f32 %v6025_v23, %v5985_v29 }
 0xbf8   :  { %v6028_v4 = vmul.f32 %v6025_v23, %v5986_v25  ;;  %v6029_v27 = vmul.f32 %v6025_v23, %v5987_v43  ;;  %v6030_v12 = vmul.f32 %v6025_v23, %v5988_v9  ;;  %v6031_v11 = vmul.f32 %v6025_v23, %v5989_v24 }
 0xbf9   :  { %v6032_v19 = vmul.f32 %v6025_v23, %v5990_v33  ;;  %v6033_v37 = vmul.f32 %v6025_v23, %v5991_v17  ;;  %v6034_v36 = vmul.f32 %v6025_v23, %v5992_v42  ;;  %v6035_v1 = vmul.f32 %v6025_v23, %v5993_v38 }
 0xbfa   :  { %v6036_v13 = vmul.f32 %v6025_v23, %v5994_v26  ;;  %v6037_v48 = vmul.f32 %v6025_v23, %v5995_v22  ;;  %v6038_v18 = vmul.f32 %v6025_v23, %v5996_v45  ;;  %v6039_v21 = vmul.f32 %v6025_v23, %v5997_v40 }
 0xbfb   :  { %v6040_v46 = vmul.f32 %v6025_v23, %v5998_v50  ;;  %v6041_v31 = vmul.f32 %v6025_v23, %v5999_v30  ;;  %v6042_v53 = vmul.f32 %v6025_v23, %v6000_v2  ;;  %v6043_v52 = vmul.f32 %v6025_v23, %v6001_v41 }
 0xbfc   :  { %v6044_v47 = vmul.f32 %v6025_v23, %v6002_v51  ;;  %v6045_v7 = vmul.f32 %v6025_v23, %v6003_v32  ;;  %vm9491_vm1 = vcmp.ge.f32.partialorder %v5985_v29, 0.0  ;;  %vm9492_vm0 = vcmp.ge.f32.partialorder %v5986_v25, 0.0 }
 0xbfd   :  { %v6046_v0 = vsel %vm9491_vm1, %v5985_v29, %v6027_v35  ;;  %v6047_v54 = vsel %vm9492_vm0, %v5986_v25, %v6028_v4  ;;  %vm9493_vm15 = vcmp.ge.f32.partialorder %v5987_v43, 0.0  ;;  %v6049_v57 = vsel %vm6007_vm2, %v5988_v9, %v6030_v12 }
 0xbfe   :  { %v6048_v58 = vsel %vm9493_vm15, %v5987_v43, %v6029_v27  ;;  %v6050_v20 = vsel %vm6008_vm6, %v5989_v24, %v6031_v11  ;;  %v6051_v59 = vsel %vm6009_vm3, %v5990_v33, %v6032_v19  ;;  %v6052_v6 = vsel %vm6010_vm7, %v5991_v17, %v6033_v37 }
 0xbff   :  { %v6053_v15 = vsel %vm6011_vm8, %v5992_v42, %v6034_v36  ;;  %v6054_v14 = vsel %vm6012_vm9, %v5993_v38, %v6035_v1  ;;  %v6055_v61 = vsel %vm6013_vm5, %v5994_v26, %v6036_v13  ;;  %v6056_v28 = vsel %vm6014_vm4, %v5995_v22, %v6037_v48 }
 0xc00   :  { %v6057_v55 = vsel %vm6015_vm10, %v5996_v45, %v6038_v18  ;;  %v6058_v34 = vsel %vm6016_vm11, %v5997_v40, %v6039_v21  ;;  %v6059_v63 = vsel %vm6017_vm12, %v5998_v50, %v6040_v46  ;;  %v6060_v3 = vsel %vm6018_vm13, %v5999_v30, %v6041_v31 }
 0xc01   :  { %v6061_v16 = vsel %vm6019_vm14, %v6000_v2, %v6042_v53  ;;  %vm9494_vm15 = vcmp.ge.f32.partialorder %v6001_v41, 0.0  ;;  %vm9495_vm0 = vcmp.ge.f32.partialorder %v6002_v51, 0.0  ;;  %vm9496_vm1 = vcmp.ge.f32.partialorder %v6003_v32, 0.0 }
 0xc02   :  { %v6062_v39 = vsel %vm9494_vm15, %v6001_v41, %v6043_v52  ;;  %v6063_v49 = vsel %vm9495_vm0, %v6002_v51, %v6044_v47  ;;  %v6064_v56 = vsel %vm9496_vm1, %v6003_v32, %v6045_v7  ;;  %v6084_v62 = vcombine.low %v6046_v0, %v6047_v54 }
 0xc03   :  { %v6085_v60 = vcombine.low %v6048_v58, %v6049_v57  ;;  %v6101_v5 = vcombine.low %v6050_v20, %v6051_v59  ;;  %v6102_v8 = vcombine.low %v6052_v6, %v6053_v15  ;;  %v6118_v44 = vcombine.low %v6054_v14, %v6055_v61 }
 0xc04   :  { %v6092_v29 = vrot.slane %v6084_v62, %v9378_v10  ;;  %v6119_v25 = vcombine.low %v6056_v28, %v6057_v55  ;;  %v6135_v43 = vcombine.low %v6058_v34, %v6059_v63  ;;  %v6136_v9 = vcombine.low %v6060_v3, %v6061_v16 }
 0xc05   :  { %v6099_v24 = vrot.slane %v6085_v60, %v9378_v10  ;;  %v6109_v33 = vrot.slane %v6101_v5, %v9378_v10  ;;  %v6116_v17 = vrot.slane %v6102_v8, %v9378_v10  ;;  %v6126_v42 = vrot.slane %v6118_v44, %v9378_v10 }
 0xc06   :  { %v6133_v38 = vrot.slane %v6119_v25, %v9378_v10  ;;  %v6143_v26 = vrot.slane %v6135_v43, %v9378_v10  ;;  %v6150_v22 = vrot.slane %v6136_v9, %v9378_v10  ;;  %v6152_v45 = vcombine.low %v6062_v39, %v6063_v49 }
 0xc07   :  { %v6100_v40 = vcombine.low %v6092_v29, %v6099_v24  ;;  %v6117_v50 = vcombine.low %v6109_v33, %v6116_v17  ;;  %v6166_v51 = vrot.slane %v6064_v56, %v9378_v10 }
 0xc08   :  { %v6134_v30 = vcombine.low %v6126_v42, %v6133_v38  ;;  %v6151_v2 = vcombine.low %v6143_v26, %v6150_v22  ;;  %v6159_v41 = vrot.slane %v6152_v45, %v9378_v10 }
 0xc09   :  { %6173 = vst [vmem:[%s9450_s8] sm:$0xff] %v6100_v40  ;;  %6174 = vst [vmem:[%s9450_s8 + $0x8] sm:$0xff] %v6117_v50 }
 0xc0a   :  { %v6167_v32 = vcombine.low %v6159_v41, %v6166_v51  ;;  %6175 = vst [vmem:[%s9450_s8 + $0x10] sm:$0xff] %v6134_v30  ;;  %6176 = vst [vmem:[%s9450_s8 + $0x18] sm:$0xff] %v6151_v2 }
 0xc0c   :  { %6177 = vst [vmem:[%s9450_s8 + $0x20] sm:$0x3f] %v6167_v32 }

</bundles_post_ra>
